<compile_context>
chip_gen: v7x
topology: tpu7x:2x2x1
jax: 0.10.0
libtpu: 0.0.40
codegen_flags: <defaults>
</compile_context>

<pallas_src>
import functools

import jax
import jax.numpy as jnp
from jax.experimental import pallas as pl
from jax.experimental.pallas import tpu as pltpu

LANE = 128      # channel / fc lane padding
TAP_PAD = 16    # 9 conv taps zero-padded to 16 along K
VMEM_LIMIT = 32 * 1024 * 1024


def _pick_bblk(batch, cap=4):
    """Largest divisor of `batch` <= cap that still leaves >= 2 grid steps."""
    target = min(cap, max(1, batch // 2))
    for d in range(target, 0, -1):
        if batch % d == 0:
            return d
    return 1


# --------------------------------------------------------------------------- #
# conv1 (Cin=1): K-packed taps, fused bias + ReLU + 2x2 max-pool
# --------------------------------------------------------------------------- #
def _conv1_kernel(x_ref, w_ref, b_ref, o_ref, *, bblk):
    """x_ref: (bblk, 4, HoWo, 16)  per-quadrant tap matrices (taps K-packed)
    w_ref: (16, 128)  tap-major weights (rows 9..15 and cols 32..127 are zero)
    b_ref: (1, 128)   bias (zero-padded)
    o_ref: (bblk, HoWo, 128)  pooled+relu output (lane-dense slab)."""
    w = w_ref[...]
    bias = b_ref[...]
    for bb in range(bblk):
        pooled = None
        for q in range(4):                      # 4 pool quadrants
            r = jnp.dot(x_ref[bb, q], w, preferred_element_type=jnp.float32)
            pooled = r if pooled is None else jnp.maximum(pooled, r)
        # per-channel bias + ReLU commute with the max (monotone / constant).
        o_ref[bb] = jnp.maximum(pooled + bias, 0.0)


def conv1_relu_pool(x_nhwc, w16, bias_row):
    B, H, W, cin = x_nhwc.shape
    assert cin == 1 and H % 2 == 0 and W % 2 == 0
    Ho, Wo = H // 2, W // 2
    HoWo = Ho * Wo

    # Wrapper-side tap gather (tiny: ~50 KB/image).  For quadrant (pr,pc) and
    # tap (dh,dw): t1[b, pr*2+pc, i*Wo+j, dh*3+dw] = P[b, 2i+pr+dh, 2j+pc+dw].
    xp = jnp.pad(x_nhwc[..., 0], ((0, 0), (1, 1), (1, 1)))   # (B, H+2, W+2)
    quads = []
    for pr in range(2):
        for pc in range(2):
            taps = [xp[:, pr + dh:pr + dh + 2 * Ho:2, pc + dw:pc + dw + 2 * Wo:2]
                    for dh in range(3) for dw in range(3)]
            quads.append(jnp.stack(taps, axis=-1))            # (B, Ho, Wo, 9)
    t1 = jnp.stack(quads, axis=1).reshape(B, 4, HoWo, 9)
    t1 = jnp.pad(t1, ((0, 0), (0, 0), (0, 0), (0, TAP_PAD - 9)))

    bblk = _pick_bblk(B)
    return pl.pallas_call(
        functools.partial(_conv1_kernel, bblk=bblk),
        out_shape=jax.ShapeDtypeStruct((B, HoWo, LANE), jnp.float32),
        grid_spec=pltpu.PrefetchScalarGridSpec(
            num_scalar_prefetch=0,
            grid=(B // bblk,),
            in_specs=[pl.BlockSpec((bblk, 4, HoWo, TAP_PAD),
                                   lambda b: (b, 0, 0, 0)),
                      pl.BlockSpec((TAP_PAD, LANE), lambda b: (0, 0)),
                      pl.BlockSpec((1, LANE), lambda b: (0, 0))],
            out_specs=pl.BlockSpec((bblk, HoWo, LANE), lambda b: (b, 0, 0))),
        compiler_params=pltpu.CompilerParams(
            dimension_semantics=("parallel",),
            vmem_limit_bytes=VMEM_LIMIT),
    )(t1, w16, bias_row)


# --------------------------------------------------------------------------- #
# conv2 (Cin=128 padded): dense K=128 tap matmuls, register accumulators,
# fused bias + ReLU + 2x2 max-pool
# --------------------------------------------------------------------------- #
def _conv2_kernel(x_ref, w_ref, b_ref, o_ref, *, bblk):
    """x_ref: (bblk, 16, HoWo, 128)  tap blocks indexed by rs*4+cs, where
              block[rs*4+cs][i*Wo+j, :] = P[rs+2i, cs+2j, :]
    w_ref: (9, 128, 128)  K2[dh*3+dw][ci, co] (zero-padded Cin/Cout)
    b_ref: (1, 128); o_ref: (bblk, HoWo, 128)."""
    bias = b_ref[...]
    for bb in range(bblk):
        accs = [None, None, None, None]          # one per pool quadrant
        for dh in range(3):
            for dw in range(3):
                w = w_ref[dh * 3 + dw]           # (128, 128), loaded once/image
                for pr in range(2):
                    for pc in range(2):
                        q = pr * 2 + pc
                        t = x_ref[bb, (pr + dh) * 4 + (pc + dw)]   # (HoWo, 128)
                        r = jnp.dot(t, w, preferred_element_type=jnp.float32)
                        accs[q] = r if accs[q] is None else accs[q] + r
        pooled = jnp.maximum(jnp.maximum(accs[0], accs[1]),
                             jnp.maximum(accs[2], accs[3]))
        o_ref[bb] = jnp.maximum(pooled + bias, 0.0)


def conv2_relu_pool(y_nhwc, w9, bias_row):
    B, H, W, C = y_nhwc.shape
    assert C == LANE and H % 2 == 0 and W % 2 == 0
    Ho, Wo = H // 2, W // 2
    HoWo = Ho * Wo

    # Pre-gather the 16 strided tap blocks (one per (row-offset, col-offset) in
    # {0..3}^2) so every in-kernel matmul operand is a dense (HoWo, 128) slab.
    yp = jnp.pad(y_nhwc, ((0, 0), (1, 1), (1, 1), (0, 0)))   # (B, H+2, W+2, 128)
    blocks = []
    for rs in range(4):
        for cs in range(4):
            sl = yp[:, rs:rs + 2 * Ho:2, cs:cs + 2 * Wo:2, :]  # (B, Ho, Wo, 128)
            blocks.append(sl.reshape(B, HoWo, C))
    t2 = jnp.stack(blocks, axis=1)                             # (B, 16, HoWo, 128)

    bblk = _pick_bblk(B)
    return pl.pallas_call(
        functools.partial(_conv2_kernel, bblk=bblk),
        out_shape=jax.ShapeDtypeStruct((B, HoWo, LANE), jnp.float32),
        grid_spec=pltpu.PrefetchScalarGridSpec(
            num_scalar_prefetch=0,
            grid=(B // bblk,),
            in_specs=[pl.BlockSpec((bblk, 16, HoWo, LANE),
                                   lambda b: (b, 0, 0, 0)),
                      pl.BlockSpec((9, LANE, LANE), lambda b: (0, 0, 0)),
                      pl.BlockSpec((1, LANE), lambda b: (0, 0))],
            out_specs=pl.BlockSpec((bblk, HoWo, LANE), lambda b: (b, 0, 0))),
        compiler_params=pltpu.CompilerParams(
            dimension_semantics=("parallel",),
            vmem_limit_bytes=VMEM_LIMIT),
    )(t2, w9, bias_row)


# --------------------------------------------------------------------------- #
# Fused fc1 (+ReLU) + fc2 head — one kernel, lane-dense (outputs padded to 128)
# --------------------------------------------------------------------------- #
def _mlp_kernel(x_ref, w1_ref, b1_ref, w2_ref, b2_ref, o_ref):
    h = jnp.dot(x_ref[...], w1_ref[...], preferred_element_type=jnp.float32)
    h = jnp.maximum(h + b1_ref[...], 0.0)
    o_ref[...] = (jnp.dot(h, w2_ref[...], preferred_element_type=jnp.float32)
                  + b2_ref[...])


def mlp_pallas(x, w1, b1, w2, b2):
    M, K = x.shape
    N1 = w1.shape[1]
    N2 = w2.shape[1]

    def full(shape):
        return pl.BlockSpec(shape, lambda i: (0,) * len(shape))

    return pl.pallas_call(
        _mlp_kernel,
        out_shape=jax.ShapeDtypeStruct((M, N2), jnp.float32),
        grid_spec=pltpu.PrefetchScalarGridSpec(
            num_scalar_prefetch=0,
            grid=(1,),
            in_specs=[full((M, K)), full((K, N1)), full((1, N1)),
                      full((N1, N2)), full((1, N2))],
            out_specs=full((M, N2))),
        compiler_params=pltpu.CompilerParams(
            dimension_semantics=("arbitrary",),
            vmem_limit_bytes=VMEM_LIMIT),
    )(x, w1, b1, w2, b2)


# ------------------------------- parameters -------------------------------- #
def init_params(key):
    """Deterministic synthetic params with the exact PyTorch parameter shapes."""
    ks = jax.random.split(key, 8)
    s = 0.05
    return {
        "conv1_w": s * jax.random.normal(ks[0], (32, 1, 3, 3), jnp.float32),
        "conv1_b": s * jax.random.normal(ks[1], (32,), jnp.float32),
        "conv2_w": s * jax.random.normal(ks[2], (64, 32, 3, 3), jnp.float32),
        "conv2_b": s * jax.random.normal(ks[3], (64,), jnp.float32),
        "fc1_w": s * jax.random.normal(ks[4], (128, 64 * 7 * 7), jnp.float32),
        "fc1_b": s * jax.random.normal(ks[5], (128,), jnp.float32),
        "fc2_w": s * jax.random.normal(ks[6], (26, 128), jnp.float32),
        "fc2_b": s * jax.random.normal(ks[7], (26,), jnp.float32),
    }


def prepare_params(p):
    """One-time re-layout of PyTorch-shaped params (hoisted out of forward).

    * conv1: (32,1,3,3) -> (16,128) tap-major matrix (rows 9..15 zero,
      cols 32..127 zero); bias -> (1,128).
    * conv2: (64,32,3,3) -> (9,128,128) tap matrices with Cin zero-padded to
      128 (so the 128-lane conv1 activation feeds it directly) and Cout
      zero-padded to 128; bias -> (1,128).
    * fc1: (128, 64*7*7) NCHW-flatten -> (6272,128) rows laid out for our
      (h, w, c128) flatten, with zero rows for the 64 padded channels.
    * fc2: (26,128) -> (128,128) with the 26 real output columns zero-padded.
    """
    c1 = jnp.transpose(p["conv1_w"][:, 0], (1, 2, 0)).reshape(9, 32)
    c1 = jnp.pad(c1, ((0, TAP_PAD - 9), (0, LANE - 32)))
    c1b = jnp.pad(p["conv1_b"], (0, LANE - 32)).reshape(1, LANE)

    c2 = jnp.transpose(p["conv2_w"], (2, 3, 1, 0)).reshape(9, 32, 64)
    c2 = jnp.pad(c2, ((0, 0), (0, LANE - 32), (0, LANE - 64)))
    c2b = jnp.pad(p["conv2_b"], (0, LANE - 64)).reshape(1, LANE)

    fc1 = p["fc1_w"].reshape(128, 64, 7, 7)
    fc1 = jnp.transpose(fc1, (2, 3, 1, 0))                     # (7,7,64,128)
    fc1 = jnp.pad(fc1, ((0, 0), (0, 0), (0, LANE - 64), (0, 0)))
    fc1 = fc1.reshape(7 * 7 * LANE, 128)                       # (6272, 128)
    fc1b = p["fc1_b"].reshape(1, 128)

    fc2 = jnp.pad(p["fc2_w"].T, ((0, 0), (0, LANE - 26)))      # (128, 128)
    fc2b = jnp.pad(p["fc2_b"], (0, LANE - 26)).reshape(1, LANE)

    return {"conv1_w": c1, "conv1_b": c1b,
            "conv2_w": c2, "conv2_b": c2b,
            "fc1_w": fc1, "fc1_b": fc1b,
            "fc2_w": fc2, "fc2_b": fc2b}


# --------------------------------- forward --------------------------------- #
@jax.jit
def cnn_forward(prep, x_nchw):
    B, _, H, W = x_nchw.shape
    x = jnp.transpose(x_nchw, (0, 2, 3, 1))                       # NCHW -> NHWC
    x = conv1_relu_pool(x, prep["conv1_w"], prep["conv1_b"])      # (B, 196, 128)
    x = x.reshape(B, H // 2, W // 2, LANE)                        # pure view
    x = conv2_relu_pool(x, prep["conv2_w"], prep["conv2_b"])      # (B, 49, 128)
    x = x.reshape(B, (H // 4) * (W // 4) * LANE)                  # pure view
    x = mlp_pallas(x, prep["fc1_w"], prep["fc1_b"],
                   prep["fc2_w"], prep["fc2_b"])                  # (B, 128)
    return x[:, :26]                                              # drop zero pad


if __name__ == "__main__":
    key = jax.random.PRNGKey(0)
    pkey, xkey = jax.random.split(key)
    params = prepare_params(init_params(pkey))
    # Shapes implied by the module: single-channel 28x28 input (64*7*7 after 2 pools).
    x = jax.random.normal(xkey, (2, 1, 28, 28), jnp.float32)
    out = jax.block_until_ready(cnn_forward(params, x))
    assert out.shape == (2, 26), out.shape
    assert bool(jnp.all(jnp.isfinite(out)))
    print("KERNEL_OK")
</pallas_src>

<mosaic_0001>
module attributes {stable_mosaic.version = 11 : i64} {
  func.func @_conv1_kernel(%arg0: i32, %arg1: memref<1x4x196x16xf32, #tpu.memory_space<vmem>>, %arg2: memref<16x128xf32, #tpu.memory_space<vmem>>, %arg3: memref<1x128xf32, #tpu.memory_space<vmem>>, %arg4: memref<1x196x128xf32, #tpu.memory_space<vmem>>) attributes {dimension_semantics = [#tpu.dimension_semantics<parallel>], iteration_bounds = array<i64: 2>, scalar_prefetch = 0 : i64, scratch_operands = 0 : i64, tpu.core_type = #tpu.core_type<tc>, window_params = [{transform_indices = @transform_0, window_bounds = array<i64: 1, 4, 196, 16>}, {pipeline_mode = #tpu.pipeline_mode<synchronous>, transform_indices = @transform_1, window_bounds = array<i64: 16, 128>}, {pipeline_mode = #tpu.pipeline_mode<synchronous>, transform_indices = @transform_2, window_bounds = array<i64: 1, 128>}, {transform_indices = @transform_3, window_bounds = array<i64: 1, 196, 128>}]} {
    %c0 = arith.constant 0 : index
    %c0_0 = arith.constant 0 : index
    %0 = vector.load %arg2[%c0, %c0_0] : memref<16x128xf32, #tpu.memory_space<vmem>>, vector<16x128xf32>
    %c0_1 = arith.constant 0 : index
    %c0_2 = arith.constant 0 : index
    %1 = vector.load %arg3[%c0_1, %c0_2] : memref<1x128xf32, #tpu.memory_space<vmem>>, vector<1x128xf32>
    %c0_3 = arith.constant 0 : index
    %c0_4 = arith.constant 0 : index
    %c0_5 = arith.constant 0 : index
    %c0_6 = arith.constant 0 : index
    %2 = vector.load %arg1[%c0_3, %c0_4, %c0_5, %c0_6] : memref<1x4x196x16xf32, #tpu.memory_space<vmem>>, vector<1x1x196x16xf32>
    %3 = vector.shape_cast %2 : vector<1x1x196x16xf32> to vector<196x16xf32>
    %cst = arith.constant dense<0.000000e+00> : vector<196x128xf32>
    %4 = tpu.matmul %3, %0, %cst {dimension_numbers = #tpu.dot_dimension_numbers<[1], [0], [0], [1], [0, 0, 1, 1], [], []>} : vector<196x16xf32>, vector<16x128xf32>, vector<196x128xf32> -> vector<196x128xf32>
    %c0_7 = arith.constant 0 : index
    %c1 = arith.constant 1 : index
    %c0_8 = arith.constant 0 : index
    %c0_9 = arith.constant 0 : index
    %5 = vector.load %arg1[%c0_7, %c1, %c0_8, %c0_9] : memref<1x4x196x16xf32, #tpu.memory_space<vmem>>, vector<1x1x196x16xf32>
    %6 = vector.shape_cast %5 : vector<1x1x196x16xf32> to vector<196x16xf32>
    %cst_10 = arith.constant dense<0.000000e+00> : vector<196x128xf32>
    %7 = tpu.matmul %6, %0, %cst_10 {dimension_numbers = #tpu.dot_dimension_numbers<[1], [0], [0], [1], [0, 0, 1, 1], [], []>} : vector<196x16xf32>, vector<16x128xf32>, vector<196x128xf32> -> vector<196x128xf32>
    %8 = arith.maximumf %4, %7 : vector<196x128xf32>
    %c0_11 = arith.constant 0 : index
    %c2 = arith.constant 2 : index
    %c0_12 = arith.constant 0 : index
    %c0_13 = arith.constant 0 : index
    %9 = vector.load %arg1[%c0_11, %c2, %c0_12, %c0_13] : memref<1x4x196x16xf32, #tpu.memory_space<vmem>>, vector<1x1x196x16xf32>
    %10 = vector.shape_cast %9 : vector<1x1x196x16xf32> to vector<196x16xf32>
    %cst_14 = arith.constant dense<0.000000e+00> : vector<196x128xf32>
    %11 = tpu.matmul %10, %0, %cst_14 {dimension_numbers = #tpu.dot_dimension_numbers<[1], [0], [0], [1], [0, 0, 1, 1], [], []>} : vector<196x16xf32>, vector<16x128xf32>, vector<196x128xf32> -> vector<196x128xf32>
    %12 = arith.maximumf %8, %11 : vector<196x128xf32>
    %c0_15 = arith.constant 0 : index
    %c3 = arith.constant 3 : index
    %c0_16 = arith.constant 0 : index
    %c0_17 = arith.constant 0 : index
    %13 = vector.load %arg1[%c0_15, %c3, %c0_16, %c0_17] : memref<1x4x196x16xf32, #tpu.memory_space<vmem>>, vector<1x1x196x16xf32>
    %14 = vector.shape_cast %13 : vector<1x1x196x16xf32> to vector<196x16xf32>
    %cst_18 = arith.constant dense<0.000000e+00> : vector<196x128xf32>
    %15 = tpu.matmul %14, %0, %cst_18 {dimension_numbers = #tpu.dot_dimension_numbers<[1], [0], [0], [1], [0, 0, 1, 1], [], []>} : vector<196x16xf32>, vector<16x128xf32>, vector<196x128xf32> -> vector<196x128xf32>
    %16 = arith.maximumf %12, %15 : vector<196x128xf32>
    %17 = vector.broadcast %1 : vector<1x128xf32> to vector<196x128xf32>
    %18 = arith.addf %16, %17 : vector<196x128xf32>
    %cst_19 = arith.constant 0.000000e+00 : f32
    %19 = vector.broadcast %cst_19 : f32 to vector<196x128xf32>
    %20 = arith.maximumf %18, %19 : vector<196x128xf32>
    %c0_20 = arith.constant 0 : index
    %c0_21 = arith.constant 0 : index
    %c0_22 = arith.constant 0 : index
    %21 = vector.load %arg4[%c0_20, %c0_21, %c0_22] : memref<1x196x128xf32, #tpu.memory_space<vmem>>, vector<1x196x128xf32>
    %22 = vector.shape_cast %21 : vector<1x196x128xf32> to vector<196x128xf32>
    %23 = vector.shape_cast %20 : vector<196x128xf32> to vector<1x196x128xf32>
    tpu.vector_store %arg4[%c0_20, %c0_21, %c0_22], %23 {strides = array<i32>} : memref<1x196x128xf32, #tpu.memory_space<vmem>>, vector<1x196x128xf32>,
    return
  }
  func.func @transform_0(%arg0: i32) -> (i32, i32, i32, i32) {
    %c0_i32 = arith.constant 0 : i32
    %c0_i32_0 = arith.constant 0 : i32
    %c0_i32_1 = arith.constant 0 : i32
    %c0_i32_2 = arith.constant 0 : i32
    return %arg0, %c0_i32, %c0_i32_0, %c0_i32_1 : i32, i32, i32, i32
  }
  func.func @transform_1(%arg0: i32) -> (i32, i32) {
    %c0_i32 = arith.constant 0 : i32
    %c0_i32_0 = arith.constant 0 : i32
    %c0_i32_1 = arith.constant 0 : i32
    return %c0_i32, %c0_i32_0 : i32, i32
  }
  func.func @transform_2(%arg0: i32) -> (i32, i32) {
    %c0_i32 = arith.constant 0 : i32
    %c0_i32_0 = arith.constant 0 : i32
    %c0_i32_1 = arith.constant 0 : i32
    return %c0_i32, %c0_i32_0 : i32, i32
  }
  func.func @transform_3(%arg0: i32) -> (i32, i32, i32) {
    %c0_i32 = arith.constant 0 : i32
    %c0_i32_0 = arith.constant 0 : i32
    %c0_i32_1 = arith.constant 0 : i32
    return %arg0, %c0_i32, %c0_i32_0 : i32, i32, i32
  }
}

module attributes {stable_mosaic.version = 11 : i64} {
  func.func @_mlp_kernel(%arg0: i32, %arg1: memref<2x6272xf32, #tpu.memory_space<vmem>>, %arg2: memref<6272x128xf32, #tpu.memory_space<vmem>>, %arg3: memref<1x128xf32, #tpu.memory_space<vmem>>, %arg4: memref<128x128xf32, #tpu.memory_space<vmem>>, %arg5: memref<1x128xf32, #tpu.memory_space<vmem>>, %arg6: memref<2x128xf32, #tpu.memory_space<vmem>>) attributes {dimension_semantics = [#tpu.dimension_semantics<arbitrary>], iteration_bounds = array<i64: 1>, scalar_prefetch = 0 : i64, scratch_operands = 0 : i64, tpu.core_type = #tpu.core_type<tc>, window_params = [{pipeline_mode = #tpu.pipeline_mode<synchronous>, transform_indices = @transform_0, window_bounds = array<i64: 2, 6272>}, {pipeline_mode = #tpu.pipeline_mode<synchronous>, transform_indices = @transform_1, window_bounds = array<i64: 6272, 128>}, {pipeline_mode = #tpu.pipeline_mode<synchronous>, transform_indices = @transform_2, window_bounds = array<i64: 1, 128>}, {pipeline_mode = #tpu.pipeline_mode<synchronous>, transform_indices = @transform_3, window_bounds = array<i64: 128, 128>}, {pipeline_mode = #tpu.pipeline_mode<synchronous>, transform_indices = @transform_4, window_bounds = array<i64: 1, 128>}, {pipeline_mode = #tpu.pipeline_mode<synchronous>, transform_indices = @transform_5, window_bounds = array<i64: 2, 128>}]} {
    %c0 = arith.constant 0 : index
    %c0_0 = arith.constant 0 : index
    %0 = vector.load %arg1[%c0, %c0_0] : memref<2x6272xf32, #tpu.memory_space<vmem>>, vector<2x6272xf32>
    %c0_1 = arith.constant 0 : index
    %c0_2 = arith.constant 0 : index
    %1 = vector.load %arg2[%c0_1, %c0_2] : memref<6272x128xf32, #tpu.memory_space<vmem>>, vector<6272x128xf32>
    %cst = arith.constant dense<0.000000e+00> : vector<2x128xf32>
    %2 = tpu.matmul %0, %1, %cst {dimension_numbers = #tpu.dot_dimension_numbers<[1], [0], [0], [1], [0, 0, 1, 1], [], []>} : vector<2x6272xf32>, vector<6272x128xf32>, vector<2x128xf32> -> vector<2x128xf32>
    %c0_3 = arith.constant 0 : index
    %c0_4 = arith.constant 0 : index
    %3 = vector.load %arg3[%c0_3, %c0_4] : memref<1x128xf32, #tpu.memory_space<vmem>>, vector<1x128xf32>
    %4 = vector.broadcast %3 : vector<1x128xf32> to vector<2x128xf32>
    %5 = arith.addf %2, %4 : vector<2x128xf32>
    %cst_5 = arith.constant 0.000000e+00 : f32
    %6 = vector.broadcast %cst_5 : f32 to vector<2x128xf32>
    %7 = arith.maximumf %5, %6 : vector<2x128xf32>
    %c0_6 = arith.constant 0 : index
    %c0_7 = arith.constant 0 : index
    %8 = vector.load %arg4[%c0_6, %c0_7] : memref<128x128xf32, #tpu.memory_space<vmem>>, vector<128x128xf32>
    %cst_8 = arith.constant dense<0.000000e+00> : vector<2x128xf32>
    %9 = tpu.matmul %7, %8, %cst_8 {dimension_numbers = #tpu.dot_dimension_numbers<[1], [0], [0], [1], [0, 0, 1, 1], [], []>} : vector<2x128xf32>, vector<128x128xf32>, vector<2x128xf32> -> vector<2x128xf32>
    %c0_9 = arith.constant 0 : index
    %c0_10 = arith.constant 0 : index
    %10 = vector.load %arg5[%c0_9, %c0_10] : memref<1x128xf32, #tpu.memory_space<vmem>>, vector<1x128xf32>
    %11 = vector.broadcast %10 : vector<1x128xf32> to vector<2x128xf32>
    %12 = arith.addf %9, %11 : vector<2x128xf32>
    %c0_11 = arith.constant 0 : index
    %c0_12 = arith.constant 0 : index
    %13 = vector.load %arg6[%c0_11, %c0_12] : memref<2x128xf32, #tpu.memory_space<vmem>>, vector<2x128xf32>
    tpu.vector_store %arg6[%c0_11, %c0_12], %12 {strides = array<i32>} : memref<2x128xf32, #tpu.memory_space<vmem>>, vector<2x128xf32>,
    return
  }
  func.func @transform_0(%arg0: i32) -> (i32, i32) {
    %c0_i32 = arith.constant 0 : i32
    %c0_i32_0 = arith.constant 0 : i32
    %c0_i32_1 = arith.constant 0 : i32
    return %c0_i32, %c0_i32_0 : i32, i32
  }
  func.func @transform_1(%arg0: i32) -> (i32, i32) {
    %c0_i32 = arith.constant 0 : i32
    %c0_i32_0 = arith.constant 0 : i32
    %c0_i32_1 = arith.constant 0 : i32
    return %c0_i32, %c0_i32_0 : i32, i32
  }
  func.func @transform_2(%arg0: i32) -> (i32, i32) {
    %c0_i32 = arith.constant 0 : i32
    %c0_i32_0 = arith.constant 0 : i32
    %c0_i32_1 = arith.constant 0 : i32
    return %c0_i32, %c0_i32_0 : i32, i32
  }
  func.func @transform_3(%arg0: i32) -> (i32, i32) {
    %c0_i32 = arith.constant 0 : i32
    %c0_i32_0 = arith.constant 0 : i32
    %c0_i32_1 = arith.constant 0 : i32
    return %c0_i32, %c0_i32_0 : i32, i32
  }
  func.func @transform_4(%arg0: i32) -> (i32, i32) {
    %c0_i32 = arith.constant 0 : i32
    %c0_i32_0 = arith.constant 0 : i32
    %c0_i32_1 = arith.constant 0 : i32
    return %c0_i32, %c0_i32_0 : i32, i32
  }
  func.func @transform_5(%arg0: i32) -> (i32, i32) {
    %c0_i32 = arith.constant 0 : i32
    %c0_i32_0 = arith.constant 0 : i32
    %c0_i32_1 = arith.constant 0 : i32
    return %c0_i32, %c0_i32_0 : i32, i32
  }
}

module attributes {stable_mosaic.version = 11 : i64} {
  func.func @_conv2_kernel(%arg0: i32, %arg1: memref<1x16x49x128xf32, #tpu.memory_space<vmem>>, %arg2: memref<9x128x128xf32, #tpu.memory_space<vmem>>, %arg3: memref<1x128xf32, #tpu.memory_space<vmem>>, %arg4: memref<1x49x128xf32, #tpu.memory_space<vmem>>) attributes {dimension_semantics = [#tpu.dimension_semantics<parallel>], iteration_bounds = array<i64: 2>, scalar_prefetch = 0 : i64, scratch_operands = 0 : i64, tpu.core_type = #tpu.core_type<tc>, window_params = [{transform_indices = @transform_0, window_bounds = array<i64: 1, 16, 49, 128>}, {pipeline_mode = #tpu.pipeline_mode<synchronous>, transform_indices = @transform_1, window_bounds = array<i64: 9, 128, 128>}, {pipeline_mode = #tpu.pipeline_mode<synchronous>, transform_indices = @transform_2, window_bounds = array<i64: 1, 128>}, {transform_indices = @transform_3, window_bounds = array<i64: 1, 49, 128>}]} {
    %c0 = arith.constant 0 : index
    %c0_0 = arith.constant 0 : index
    %0 = vector.load %arg3[%c0, %c0_0] : memref<1x128xf32, #tpu.memory_space<vmem>>, vector<1x128xf32>
    %c0_1 = arith.constant 0 : index
    %c0_2 = arith.constant 0 : index
    %c0_3 = arith.constant 0 : index
    %1 = vector.load %arg2[%c0_1, %c0_2, %c0_3] : memref<9x128x128xf32, #tpu.memory_space<vmem>>, vector<1x128x128xf32>
    %2 = vector.shape_cast %1 : vector<1x128x128xf32> to vector<128x128xf32>
    %c0_4 = arith.constant 0 : index
    %c0_5 = arith.constant 0 : index
    %c0_6 = arith.constant 0 : index
    %c0_7 = arith.constant 0 : index
    %3 = vector.load %arg1[%c0_4, %c0_5, %c0_6, %c0_7] : memref<1x16x49x128xf32, #tpu.memory_space<vmem>>, vector<1x1x49x128xf32>
    %4 = vector.shape_cast %3 : vector<1x1x49x128xf32> to vector<49x128xf32>
    %cst = arith.constant dense<0.000000e+00> : vector<49x128xf32>
    %5 = tpu.matmul %4, %2, %cst {dimension_numbers = #tpu.dot_dimension_numbers<[1], [0], [0], [1], [0, 0, 1, 1], [], []>} : vector<49x128xf32>, vector<128x128xf32>, vector<49x128xf32> -> vector<49x128xf32>
    %c0_8 = arith.constant 0 : index
    %c1 = arith.constant 1 : index
    %c0_9 = arith.constant 0 : index
    %c0_10 = arith.constant 0 : index
    %6 = vector.load %arg1[%c0_8, %c1, %c0_9, %c0_10] : memref<1x16x49x128xf32, #tpu.memory_space<vmem>>, vector<1x1x49x128xf32>
    %7 = vector.shape_cast %6 : vector<1x1x49x128xf32> to vector<49x128xf32>
    %cst_11 = arith.constant dense<0.000000e+00> : vector<49x128xf32>
    %8 = tpu.matmul %7, %2, %cst_11 {dimension_numbers = #tpu.dot_dimension_numbers<[1], [0], [0], [1], [0, 0, 1, 1], [], []>} : vector<49x128xf32>, vector<128x128xf32>, vector<49x128xf32> -> vector<49x128xf32>
    %c0_12 = arith.constant 0 : index
    %c4 = arith.constant 4 : index
    %c0_13 = arith.constant 0 : index
    %c0_14 = arith.constant 0 : index
    %9 = vector.load %arg1[%c0_12, %c4, %c0_13, %c0_14] : memref<1x16x49x128xf32, #tpu.memory_space<vmem>>, vector<1x1x49x128xf32>
    %10 = vector.shape_cast %9 : vector<1x1x49x128xf32> to vector<49x128xf32>
    %cst_15 = arith.constant dense<0.000000e+00> : vector<49x128xf32>
    %11 = tpu.matmul %10, %2, %cst_15 {dimension_numbers = #tpu.dot_dimension_numbers<[1], [0], [0], [1], [0, 0, 1, 1], [], []>} : vector<49x128xf32>, vector<128x128xf32>, vector<49x128xf32> -> vector<49x128xf32>
    %c0_16 = arith.constant 0 : index
    %c5 = arith.constant 5 : index
    %c0_17 = arith.constant 0 : index
    %c0_18 = arith.constant 0 : index
    %12 = vector.load %arg1[%c0_16, %c5, %c0_17, %c0_18] : memref<1x16x49x128xf32, #tpu.memory_space<vmem>>, vector<1x1x49x128xf32>
    %13 = vector.shape_cast %12 : vector<1x1x49x128xf32> to vector<49x128xf32>
    %cst_19 = arith.constant dense<0.000000e+00> : vector<49x128xf32>
    %14 = tpu.matmul %13, %2, %cst_19 {dimension_numbers = #tpu.dot_dimension_numbers<[1], [0], [0], [1], [0, 0, 1, 1], [], []>} : vector<49x128xf32>, vector<128x128xf32>, vector<49x128xf32> -> vector<49x128xf32>
    %c1_20 = arith.constant 1 : index
    %c0_21 = arith.constant 0 : index
    %c0_22 = arith.constant 0 : index
    %15 = vector.load %arg2[%c1_20, %c0_21, %c0_22] : memref<9x128x128xf32, #tpu.memory_space<vmem>>, vector<1x128x128xf32>
    %16 = vector.shape_cast %15 : vector<1x128x128xf32> to vector<128x128xf32>
    %c0_23 = arith.constant 0 : index
    %c1_24 = arith.constant 1 : index
    %c0_25 = arith.constant 0 : index
    %c0_26 = arith.constant 0 : index
    %17 = vector.load %arg1[%c0_23, %c1_24, %c0_25, %c0_26] : memref<1x16x49x128xf32, #tpu.memory_space<vmem>>, vector<1x1x49x128xf32>
    %18 = vector.shape_cast %17 : vector<1x1x49x128xf32> to vector<49x128xf32>
    %cst_27 = arith.constant dense<0.000000e+00> : vector<49x128xf32>
    %19 = tpu.matmul %18, %16, %cst_27 {dimension_numbers = #tpu.dot_dimension_numbers<[1], [0], [0], [1], [0, 0, 1, 1], [], []>} : vector<49x128xf32>, vector<128x128xf32>, vector<49x128xf32> -> vector<49x128xf32>
    %20 = arith.addf %5, %19 : vector<49x128xf32>
    %c0_28 = arith.constant 0 : index
    %c2 = arith.constant 2 : index
    %c0_29 = arith.constant 0 : index
    %c0_30 = arith.constant 0 : index
    %21 = vector.load %arg1[%c0_28, %c2, %c0_29, %c0_30] : memref<1x16x49x128xf32, #tpu.memory_space<vmem>>, vector<1x1x49x128xf32>
    %22 = vector.shape_cast %21 : vector<1x1x49x128xf32> to vector<49x128xf32>
    %cst_31 = arith.constant dense<0.000000e+00> : vector<49x128xf32>
    %23 = tpu.matmul %22, %16, %cst_31 {dimension_numbers = #tpu.dot_dimension_numbers<[1], [0], [0], [1], [0, 0, 1, 1], [], []>} : vector<49x128xf32>, vector<128x128xf32>, vector<49x128xf32> -> vector<49x128xf32>
    %24 = arith.addf %8, %23 : vector<49x128xf32>
    %c0_32 = arith.constant 0 : index
    %c5_33 = arith.constant 5 : index
    %c0_34 = arith.constant 0 : index
    %c0_35 = arith.constant 0 : index
    %25 = vector.load %arg1[%c0_32, %c5_33, %c0_34, %c0_35] : memref<1x16x49x128xf32, #tpu.memory_space<vmem>>, vector<1x1x49x128xf32>
    %26 = vector.shape_cast %25 : vector<1x1x49x128xf32> to vector<49x128xf32>
    %cst_36 = arith.constant dense<0.000000e+00> : vector<49x128xf32>
    %27 = tpu.matmul %26, %16, %cst_36 {dimension_numbers = #tpu.dot_dimension_numbers<[1], [0], [0], [1], [0, 0, 1, 1], [], []>} : vector<49x128xf32>, vector<128x128xf32>, vector<49x128xf32> -> vector<49x128xf32>
    %28 = arith.addf %11, %27 : vector<49x128xf32>
    %c0_37 = arith.constant 0 : index
    %c6 = arith.constant 6 : index
    %c0_38 = arith.constant 0 : index
    %c0_39 = arith.constant 0 : index
    %29 = vector.load %arg1[%c0_37, %c6, %c0_38, %c0_39] : memref<1x16x49x128xf32, #tpu.memory_space<vmem>>, vector<1x1x49x128xf32>
    %30 = vector.shape_cast %29 : vector<1x1x49x128xf32> to vector<49x128xf32>
    %cst_40 = arith.constant dense<0.000000e+00> : vector<49x128xf32>
    %31 = tpu.matmul %30, %16, %cst_40 {dimension_numbers = #tpu.dot_dimension_numbers<[1], [0], [0], [1], [0, 0, 1, 1], [], []>} : vector<49x128xf32>, vector<128x128xf32>, vector<49x128xf32> -> vector<49x128xf32>
    %32 = arith.addf %14, %31 : vector<49x128xf32>
    %c2_41 = arith.constant 2 : index
    %c0_42 = arith.constant 0 : index
    %c0_43 = arith.constant 0 : index
    %33 = vector.load %arg2[%c2_41, %c0_42, %c0_43] : memref<9x128x128xf32, #tpu.memory_space<vmem>>, vector<1x128x128xf32>
    %34 = vector.shape_cast %33 : vector<1x128x128xf32> to vector<128x128xf32>
    %c0_44 = arith.constant 0 : index
    %c2_45 = arith.constant 2 : index
    %c0_46 = arith.constant 0 : index
    %c0_47 = arith.constant 0 : index
    %35 = vector.load %arg1[%c0_44, %c2_45, %c0_46, %c0_47] : memref<1x16x49x128xf32, #tpu.memory_space<vmem>>, vector<1x1x49x128xf32>
    %36 = vector.shape_cast %35 : vector<1x1x49x128xf32> to vector<49x128xf32>
    %cst_48 = arith.constant dense<0.000000e+00> : vector<49x128xf32>
    %37 = tpu.matmul %36, %34, %cst_48 {dimension_numbers = #tpu.dot_dimension_numbers<[1], [0], [0], [1], [0, 0, 1, 1], [], []>} : vector<49x128xf32>, vector<128x128xf32>, vector<49x128xf32> -> vector<49x128xf32>
    %38 = arith.addf %20, %37 : vector<49x128xf32>
    %c0_49 = arith.constant 0 : index
    %c3 = arith.constant 3 : index
    %c0_50 = arith.constant 0 : index
    %c0_51 = arith.constant 0 : index
    %39 = vector.load %arg1[%c0_49, %c3, %c0_50, %c0_51] : memref<1x16x49x128xf32, #tpu.memory_space<vmem>>, vector<1x1x49x128xf32>
    %40 = vector.shape_cast %39 : vector<1x1x49x128xf32> to vector<49x128xf32>
    %cst_52 = arith.constant dense<0.000000e+00> : vector<49x128xf32>
    %41 = tpu.matmul %40, %34, %cst_52 {dimension_numbers = #tpu.dot_dimension_numbers<[1], [0], [0], [1], [0, 0, 1, 1], [], []>} : vector<49x128xf32>, vector<128x128xf32>, vector<49x128xf32> -> vector<49x128xf32>
    %42 = arith.addf %24, %41 : vector<49x128xf32>
    %c0_53 = arith.constant 0 : index
    %c6_54 = arith.constant 6 : index
    %c0_55 = arith.constant 0 : index
    %c0_56 = arith.constant 0 : index
    %43 = vector.load %arg1[%c0_53, %c6_54, %c0_55, %c0_56] : memref<1x16x49x128xf32, #tpu.memory_space<vmem>>, vector<1x1x49x128xf32>
    %44 = vector.shape_cast %43 : vector<1x1x49x128xf32> to vector<49x128xf32>
    %cst_57 = arith.constant dense<0.000000e+00> : vector<49x128xf32>
    %45 = tpu.matmul %44, %34, %cst_57 {dimension_numbers = #tpu.dot_dimension_numbers<[1], [0], [0], [1], [0, 0, 1, 1], [], []>} : vector<49x128xf32>, vector<128x128xf32>, vector<49x128xf32> -> vector<49x128xf32>
    %46 = arith.addf %28, %45 : vector<49x128xf32>
    %c0_58 = arith.constant 0 : index
    %c7 = arith.constant 7 : index
    %c0_59 = arith.constant 0 : index
    %c0_60 = arith.constant 0 : index
    %47 = vector.load %arg1[%c0_58, %c7, %c0_59, %c0_60] : memref<1x16x49x128xf32, #tpu.memory_space<vmem>>, vector<1x1x49x128xf32>
    %48 = vector.shape_cast %47 : vector<1x1x49x128xf32> to vector<49x128xf32>
    %cst_61 = arith.constant dense<0.000000e+00> : vector<49x128xf32>
    %49 = tpu.matmul %48, %34, %cst_61 {dimension_numbers = #tpu.dot_dimension_numbers<[1], [0], [0], [1], [0, 0, 1, 1], [], []>} : vector<49x128xf32>, vector<128x128xf32>, vector<49x128xf32> -> vector<49x128xf32>
    %50 = arith.addf %32, %49 : vector<49x128xf32>
    %c3_62 = arith.constant 3 : index
    %c0_63 = arith.constant 0 : index
    %c0_64 = arith.constant 0 : index
    %51 = vector.load %arg2[%c3_62, %c0_63, %c0_64] : memref<9x128x128xf32, #tpu.memory_space<vmem>>, vector<1x128x128xf32>
    %52 = vector.shape_cast %51 : vector<1x128x128xf32> to vector<128x128xf32>
    %c0_65 = arith.constant 0 : index
    %c4_66 = arith.constant 4 : index
    %c0_67 = arith.constant 0 : index
    %c0_68 = arith.constant 0 : index
    %53 = vector.load %arg1[%c0_65, %c4_66, %c0_67, %c0_68] : memref<1x16x49x128xf32, #tpu.memory_space<vmem>>, vector<1x1x49x128xf32>
    %54 = vector.shape_cast %53 : vector<1x1x49x128xf32> to vector<49x128xf32>
    %cst_69 = arith.constant dense<0.000000e+00> : vector<49x128xf32>
    %55 = tpu.matmul %54, %52, %cst_69 {dimension_numbers = #tpu.dot_dimension_numbers<[1], [0], [0], [1], [0, 0, 1, 1], [], []>} : vector<49x128xf32>, vector<128x128xf32>, vector<49x128xf32> -> vector<49x128xf32>
    %56 = arith.addf %38, %55 : vector<49x128xf32>
    %c0_70 = arith.constant 0 : index
    %c5_71 = arith.constant 5 : index
    %c0_72 = arith.constant 0 : index
    %c0_73 = arith.constant 0 : index
    %57 = vector.load %arg1[%c0_70, %c5_71, %c0_72, %c0_73] : memref<1x16x49x128xf32, #tpu.memory_space<vmem>>, vector<1x1x49x128xf32>
    %58 = vector.shape_cast %57 : vector<1x1x49x128xf32> to vector<49x128xf32>
    %cst_74 = arith.constant dense<0.000000e+00> : vector<49x128xf32>
    %59 = tpu.matmul %58, %52, %cst_74 {dimension_numbers = #tpu.dot_dimension_numbers<[1], [0], [0], [1], [0, 0, 1, 1], [], []>} : vector<49x128xf32>, vector<128x128xf32>, vector<49x128xf32> -> vector<49x128xf32>
    %60 = arith.addf %42, %59 : vector<49x128xf32>
    %c0_75 = arith.constant 0 : index
    %c8 = arith.constant 8 : index
    %c0_76 = arith.constant 0 : index
    %c0_77 = arith.constant 0 : index
    %61 = vector.load %arg1[%c0_75, %c8, %c0_76, %c0_77] : memref<1x16x49x128xf32, #tpu.memory_space<vmem>>, vector<1x1x49x128xf32>
    %62 = vector.shape_cast %61 : vector<1x1x49x128xf32> to vector<49x128xf32>
    %cst_78 = arith.constant dense<0.000000e+00> : vector<49x128xf32>
    %63 = tpu.matmul %62, %52, %cst_78 {dimension_numbers = #tpu.dot_dimension_numbers<[1], [0], [0], [1], [0, 0, 1, 1], [], []>} : vector<49x128xf32>, vector<128x128xf32>, vector<49x128xf32> -> vector<49x128xf32>
    %64 = arith.addf %46, %63 : vector<49x128xf32>
    %c0_79 = arith.constant 0 : index
    %c9 = arith.constant 9 : index
    %c0_80 = arith.constant 0 : index
    %c0_81 = arith.constant 0 : index
    %65 = vector.load %arg1[%c0_79, %c9, %c0_80, %c0_81] : memref<1x16x49x128xf32, #tpu.memory_space<vmem>>, vector<1x1x49x128xf32>
    %66 = vector.shape_cast %65 : vector<1x1x49x128xf32> to vector<49x128xf32>
    %cst_82 = arith.constant dense<0.000000e+00> : vector<49x128xf32>
    %67 = tpu.matmul %66, %52, %cst_82 {dimension_numbers = #tpu.dot_dimension_numbers<[1], [0], [0], [1], [0, 0, 1, 1], [], []>} : vector<49x128xf32>, vector<128x128xf32>, vector<49x128xf32> -> vector<49x128xf32>
    %68 = arith.addf %50, %67 : vector<49x128xf32>
    %c4_83 = arith.constant 4 : index
    %c0_84 = arith.constant 0 : index
    %c0_85 = arith.constant 0 : index
    %69 = vector.load %arg2[%c4_83, %c0_84, %c0_85] : memref<9x128x128xf32, #tpu.memory_space<vmem>>, vector<1x128x128xf32>
    %70 = vector.shape_cast %69 : vector<1x128x128xf32> to vector<128x128xf32>
    %c0_86 = arith.constant 0 : index
    %c5_87 = arith.constant 5 : index
    %c0_88 = arith.constant 0 : index
    %c0_89 = arith.constant 0 : index
    %71 = vector.load %arg1[%c0_86, %c5_87, %c0_88, %c0_89] : memref<1x16x49x128xf32, #tpu.memory_space<vmem>>, vector<1x1x49x128xf32>
    %72 = vector.shape_cast %71 : vector<1x1x49x128xf32> to vector<49x128xf32>
    %cst_90 = arith.constant dense<0.000000e+00> : vector<49x128xf32>
    %73 = tpu.matmul %72, %70, %cst_90 {dimension_numbers = #tpu.dot_dimension_numbers<[1], [0], [0], [1], [0, 0, 1, 1], [], []>} : vector<49x128xf32>, vector<128x128xf32>, vector<49x128xf32> -> vector<49x128xf32>
    %74 = arith.addf %56, %73 : vector<49x128xf32>
    %c0_91 = arith.constant 0 : index
    %c6_92 = arith.constant 6 : index
    %c0_93 = arith.constant 0 : index
    %c0_94 = arith.constant 0 : index
    %75 = vector.load %arg1[%c0_91, %c6_92, %c0_93, %c0_94] : memref<1x16x49x128xf32, #tpu.memory_space<vmem>>, vector<1x1x49x128xf32>
    %76 = vector.shape_cast %75 : vector<1x1x49x128xf32> to vector<49x128xf32>
    %cst_95 = arith.constant dense<0.000000e+00> : vector<49x128xf32>
    %77 = tpu.matmul %76, %70, %cst_95 {dimension_numbers = #tpu.dot_dimension_numbers<[1], [0], [0], [1], [0, 0, 1, 1], [], []>} : vector<49x128xf32>, vector<128x128xf32>, vector<49x128xf32> -> vector<49x128xf32>
    %78 = arith.addf %60, %77 : vector<49x128xf32>
    %c0_96 = arith.constant 0 : index
    %c9_97 = arith.constant 9 : index
    %c0_98 = arith.constant 0 : index
    %c0_99 = arith.constant 0 : index
    %79 = vector.load %arg1[%c0_96, %c9_97, %c0_98, %c0_99] : memref<1x16x49x128xf32, #tpu.memory_space<vmem>>, vector<1x1x49x128xf32>
    %80 = vector.shape_cast %79 : vector<1x1x49x128xf32> to vector<49x128xf32>
    %cst_100 = arith.constant dense<0.000000e+00> : vector<49x128xf32>
    %81 = tpu.matmul %80, %70, %cst_100 {dimension_numbers = #tpu.dot_dimension_numbers<[1], [0], [0], [1], [0, 0, 1, 1], [], []>} : vector<49x128xf32>, vector<128x128xf32>, vector<49x128xf32> -> vector<49x128xf32>
    %82 = arith.addf %64, %81 : vector<49x128xf32>
    %c0_101 = arith.constant 0 : index
    %c10 = arith.constant 10 : index
    %c0_102 = arith.constant 0 : index
    %c0_103 = arith.constant 0 : index
    %83 = vector.load %arg1[%c0_101, %c10, %c0_102, %c0_103] : memref<1x16x49x128xf32, #tpu.memory_space<vmem>>, vector<1x1x49x128xf32>
    %84 = vector.shape_cast %83 : vector<1x1x49x128xf32> to vector<49x128xf32>
    %cst_104 = arith.constant dense<0.000000e+00> : vector<49x128xf32>
    %85 = tpu.matmul %84, %70, %cst_104 {dimension_numbers = #tpu.dot_dimension_numbers<[1], [0], [0], [1], [0, 0, 1, 1], [], []>} : vector<49x128xf32>, vector<128x128xf32>, vector<49x128xf32> -> vector<49x128xf32>
    %86 = arith.addf %68, %85 : vector<49x128xf32>
    %c5_105 = arith.constant 5 : index
    %c0_106 = arith.constant 0 : index
    %c0_107 = arith.constant 0 : index
    %87 = vector.load %arg2[%c5_105, %c0_106, %c0_107] : memref<9x128x128xf32, #tpu.memory_space<vmem>>, vector<1x128x128xf32>
    %88 = vector.shape_cast %87 : vector<1x128x128xf32> to vector<128x128xf32>
    %c0_108 = arith.constant 0 : index
    %c6_109 = arith.constant 6 : index
    %c0_110 = arith.constant 0 : index
    %c0_111 = arith.constant 0 : index
    %89 = vector.load %arg1[%c0_108, %c6_109, %c0_110, %c0_111] : memref<1x16x49x128xf32, #tpu.memory_space<vmem>>, vector<1x1x49x128xf32>
    %90 = vector.shape_cast %89 : vector<1x1x49x128xf32> to vector<49x128xf32>
    %cst_112 = arith.constant dense<0.000000e+00> : vector<49x128xf32>
    %91 = tpu.matmul %90, %88, %cst_112 {dimension_numbers = #tpu.dot_dimension_numbers<[1], [0], [0], [1], [0, 0, 1, 1], [], []>} : vector<49x128xf32>, vector<128x128xf32>, vector<49x128xf32> -> vector<49x128xf32>
    %92 = arith.addf %74, %91 : vector<49x128xf32>
    %c0_113 = arith.constant 0 : index
    %c7_114 = arith.constant 7 : index
    %c0_115 = arith.constant 0 : index
    %c0_116 = arith.constant 0 : index
    %93 = vector.load %arg1[%c0_113, %c7_114, %c0_115, %c0_116] : memref<1x16x49x128xf32, #tpu.memory_space<vmem>>, vector<1x1x49x128xf32>
    %94 = vector.shape_cast %93 : vector<1x1x49x128xf32> to vector<49x128xf32>
    %cst_117 = arith.constant dense<0.000000e+00> : vector<49x128xf32>
    %95 = tpu.matmul %94, %88, %cst_117 {dimension_numbers = #tpu.dot_dimension_numbers<[1], [0], [0], [1], [0, 0, 1, 1], [], []>} : vector<49x128xf32>, vector<128x128xf32>, vector<49x128xf32> -> vector<49x128xf32>
    %96 = arith.addf %78, %95 : vector<49x128xf32>
    %c0_118 = arith.constant 0 : index
    %c10_119 = arith.constant 10 : index
    %c0_120 = arith.constant 0 : index
    %c0_121 = arith.constant 0 : index
    %97 = vector.load %arg1[%c0_118, %c10_119, %c0_120, %c0_121] : memref<1x16x49x128xf32, #tpu.memory_space<vmem>>, vector<1x1x49x128xf32>
    %98 = vector.shape_cast %97 : vector<1x1x49x128xf32> to vector<49x128xf32>
    %cst_122 = arith.constant dense<0.000000e+00> : vector<49x128xf32>
    %99 = tpu.matmul %98, %88, %cst_122 {dimension_numbers = #tpu.dot_dimension_numbers<[1], [0], [0], [1], [0, 0, 1, 1], [], []>} : vector<49x128xf32>, vector<128x128xf32>, vector<49x128xf32> -> vector<49x128xf32>
    %100 = arith.addf %82, %99 : vector<49x128xf32>
    %c0_123 = arith.constant 0 : index
    %c11 = arith.constant 11 : index
    %c0_124 = arith.constant 0 : index
    %c0_125 = arith.constant 0 : index
    %101 = vector.load %arg1[%c0_123, %c11, %c0_124, %c0_125] : memref<1x16x49x128xf32, #tpu.memory_space<vmem>>, vector<1x1x49x128xf32>
    %102 = vector.shape_cast %101 : vector<1x1x49x128xf32> to vector<49x128xf32>
    %cst_126 = arith.constant dense<0.000000e+00> : vector<49x128xf32>
    %103 = tpu.matmul %102, %88, %cst_126 {dimension_numbers = #tpu.dot_dimension_numbers<[1], [0], [0], [1], [0, 0, 1, 1], [], []>} : vector<49x128xf32>, vector<128x128xf32>, vector<49x128xf32> -> vector<49x128xf32>
    %104 = arith.addf %86, %103 : vector<49x128xf32>
    %c6_127 = arith.constant 6 : index
    %c0_128 = arith.constant 0 : index
    %c0_129 = arith.constant 0 : index
    %105 = vector.load %arg2[%c6_127, %c0_128, %c0_129] : memref<9x128x128xf32, #tpu.memory_space<vmem>>, vector<1x128x128xf32>
    %106 = vector.shape_cast %105 : vector<1x128x128xf32> to vector<128x128xf32>
    %c0_130 = arith.constant 0 : index
    %c8_131 = arith.constant 8 : index
    %c0_132 = arith.constant 0 : index
    %c0_133 = arith.constant 0 : index
    %107 = vector.load %arg1[%c0_130, %c8_131, %c0_132, %c0_133] : memref<1x16x49x128xf32, #tpu.memory_space<vmem>>, vector<1x1x49x128xf32>
    %108 = vector.shape_cast %107 : vector<1x1x49x128xf32> to vector<49x128xf32>
    %cst_134 = arith.constant dense<0.000000e+00> : vector<49x128xf32>
    %109 = tpu.matmul %108, %106, %cst_134 {dimension_numbers = #tpu.dot_dimension_numbers<[1], [0], [0], [1], [0, 0, 1, 1], [], []>} : vector<49x128xf32>, vector<128x128xf32>, vector<49x128xf32> -> vector<49x128xf32>
    %110 = arith.addf %92, %109 : vector<49x128xf32>
    %c0_135 = arith.constant 0 : index
    %c9_136 = arith.constant 9 : index
    %c0_137 = arith.constant 0 : index
    %c0_138 = arith.constant 0 : index
    %111 = vector.load %arg1[%c0_135, %c9_136, %c0_137, %c0_138] : memref<1x16x49x128xf32, #tpu.memory_space<vmem>>, vector<1x1x49x128xf32>
    %112 = vector.shape_cast %111 : vector<1x1x49x128xf32> to vector<49x128xf32>
    %cst_139 = arith.constant dense<0.000000e+00> : vector<49x128xf32>
    %113 = tpu.matmul %112, %106, %cst_139 {dimension_numbers = #tpu.dot_dimension_numbers<[1], [0], [0], [1], [0, 0, 1, 1], [], []>} : vector<49x128xf32>, vector<128x128xf32>, vector<49x128xf32> -> vector<49x128xf32>
    %114 = arith.addf %96, %113 : vector<49x128xf32>
    %c0_140 = arith.constant 0 : index
    %c12 = arith.constant 12 : index
    %c0_141 = arith.constant 0 : index
    %c0_142 = arith.constant 0 : index
    %115 = vector.load %arg1[%c0_140, %c12, %c0_141, %c0_142] : memref<1x16x49x128xf32, #tpu.memory_space<vmem>>, vector<1x1x49x128xf32>
    %116 = vector.shape_cast %115 : vector<1x1x49x128xf32> to vector<49x128xf32>
    %cst_143 = arith.constant dense<0.000000e+00> : vector<49x128xf32>
    %117 = tpu.matmul %116, %106, %cst_143 {dimension_numbers = #tpu.dot_dimension_numbers<[1], [0], [0], [1], [0, 0, 1, 1], [], []>} : vector<49x128xf32>, vector<128x128xf32>, vector<49x128xf32> -> vector<49x128xf32>
    %118 = arith.addf %100, %117 : vector<49x128xf32>
    %c0_144 = arith.constant 0 : index
    %c13 = arith.constant 13 : index
    %c0_145 = arith.constant 0 : index
    %c0_146 = arith.constant 0 : index
    %119 = vector.load %arg1[%c0_144, %c13, %c0_145, %c0_146] : memref<1x16x49x128xf32, #tpu.memory_space<vmem>>, vector<1x1x49x128xf32>
    %120 = vector.shape_cast %119 : vector<1x1x49x128xf32> to vector<49x128xf32>
    %cst_147 = arith.constant dense<0.000000e+00> : vector<49x128xf32>
    %121 = tpu.matmul %120, %106, %cst_147 {dimension_numbers = #tpu.dot_dimension_numbers<[1], [0], [0], [1], [0, 0, 1, 1], [], []>} : vector<49x128xf32>, vector<128x128xf32>, vector<49x128xf32> -> vector<49x128xf32>
    %122 = arith.addf %104, %121 : vector<49x128xf32>
    %c7_148 = arith.constant 7 : index
    %c0_149 = arith.constant 0 : index
    %c0_150 = arith.constant 0 : index
    %123 = vector.load %arg2[%c7_148, %c0_149, %c0_150] : memref<9x128x128xf32, #tpu.memory_space<vmem>>, vector<1x128x128xf32>
    %124 = vector.shape_cast %123 : vector<1x128x128xf32> to vector<128x128xf32>
    %c0_151 = arith.constant 0 : index
    %c9_152 = arith.constant 9 : index
    %c0_153 = arith.constant 0 : index
    %c0_154 = arith.constant 0 : index
    %125 = vector.load %arg1[%c0_151, %c9_152, %c0_153, %c0_154] : memref<1x16x49x128xf32, #tpu.memory_space<vmem>>, vector<1x1x49x128xf32>
    %126 = vector.shape_cast %125 : vector<1x1x49x128xf32> to vector<49x128xf32>
    %cst_155 = arith.constant dense<0.000000e+00> : vector<49x128xf32>
    %127 = tpu.matmul %126, %124, %cst_155 {dimension_numbers = #tpu.dot_dimension_numbers<[1], [0], [0], [1], [0, 0, 1, 1], [], []>} : vector<49x128xf32>, vector<128x128xf32>, vector<49x128xf32> -> vector<49x128xf32>
    %128 = arith.addf %110, %127 : vector<49x128xf32>
    %c0_156 = arith.constant 0 : index
    %c10_157 = arith.constant 10 : index
    %c0_158 = arith.constant 0 : index
    %c0_159 = arith.constant 0 : index
    %129 = vector.load %arg1[%c0_156, %c10_157, %c0_158, %c0_159] : memref<1x16x49x128xf32, #tpu.memory_space<vmem>>, vector<1x1x49x128xf32>
    %130 = vector.shape_cast %129 : vector<1x1x49x128xf32> to vector<49x128xf32>
    %cst_160 = arith.constant dense<0.000000e+00> : vector<49x128xf32>
    %131 = tpu.matmul %130, %124, %cst_160 {dimension_numbers = #tpu.dot_dimension_numbers<[1], [0], [0], [1], [0, 0, 1, 1], [], []>} : vector<49x128xf32>, vector<128x128xf32>, vector<49x128xf32> -> vector<49x128xf32>
    %132 = arith.addf %114, %131 : vector<49x128xf32>
    %c0_161 = arith.constant 0 : index
    %c13_162 = arith.constant 13 : index
    %c0_163 = arith.constant 0 : index
    %c0_164 = arith.constant 0 : index
    %133 = vector.load %arg1[%c0_161, %c13_162, %c0_163, %c0_164] : memref<1x16x49x128xf32, #tpu.memory_space<vmem>>, vector<1x1x49x128xf32>
    %134 = vector.shape_cast %133 : vector<1x1x49x128xf32> to vector<49x128xf32>
    %cst_165 = arith.constant dense<0.000000e+00> : vector<49x128xf32>
    %135 = tpu.matmul %134, %124, %cst_165 {dimension_numbers = #tpu.dot_dimension_numbers<[1], [0], [0], [1], [0, 0, 1, 1], [], []>} : vector<49x128xf32>, vector<128x128xf32>, vector<49x128xf32> -> vector<49x128xf32>
    %136 = arith.addf %118, %135 : vector<49x128xf32>
    %c0_166 = arith.constant 0 : index
    %c14 = arith.constant 14 : index
    %c0_167 = arith.constant 0 : index
    %c0_168 = arith.constant 0 : index
    %137 = vector.load %arg1[%c0_166, %c14, %c0_167, %c0_168] : memref<1x16x49x128xf32, #tpu.memory_space<vmem>>, vector<1x1x49x128xf32>
    %138 = vector.shape_cast %137 : vector<1x1x49x128xf32> to vector<49x128xf32>
    %cst_169 = arith.constant dense<0.000000e+00> : vector<49x128xf32>
    %139 = tpu.matmul %138, %124, %cst_169 {dimension_numbers = #tpu.dot_dimension_numbers<[1], [0], [0], [1], [0, 0, 1, 1], [], []>} : vector<49x128xf32>, vector<128x128xf32>, vector<49x128xf32> -> vector<49x128xf32>
    %140 = arith.addf %122, %139 : vector<49x128xf32>
    %c8_170 = arith.constant 8 : index
    %c0_171 = arith.constant 0 : index
    %c0_172 = arith.constant 0 : index
    %141 = vector.load %arg2[%c8_170, %c0_171, %c0_172] : memref<9x128x128xf32, #tpu.memory_space<vmem>>, vector<1x128x128xf32>
    %142 = vector.shape_cast %141 : vector<1x128x128xf32> to vector<128x128xf32>
    %c0_173 = arith.constant 0 : index
    %c10_174 = arith.constant 10 : index
    %c0_175 = arith.constant 0 : index
    %c0_176 = arith.constant 0 : index
    %143 = vector.load %arg1[%c0_173, %c10_174, %c0_175, %c0_176] : memref<1x16x49x128xf32, #tpu.memory_space<vmem>>, vector<1x1x49x128xf32>
    %144 = vector.shape_cast %143 : vector<1x1x49x128xf32> to vector<49x128xf32>
    %cst_177 = arith.constant dense<0.000000e+00> : vector<49x128xf32>
    %145 = tpu.matmul %144, %142, %cst_177 {dimension_numbers = #tpu.dot_dimension_numbers<[1], [0], [0], [1], [0, 0, 1, 1], [], []>} : vector<49x128xf32>, vector<128x128xf32>, vector<49x128xf32> -> vector<49x128xf32>
    %146 = arith.addf %128, %145 : vector<49x128xf32>
    %c0_178 = arith.constant 0 : index
    %c11_179 = arith.constant 11 : index
    %c0_180 = arith.constant 0 : index
    %c0_181 = arith.constant 0 : index
    %147 = vector.load %arg1[%c0_178, %c11_179, %c0_180, %c0_181] : memref<1x16x49x128xf32, #tpu.memory_space<vmem>>, vector<1x1x49x128xf32>
    %148 = vector.shape_cast %147 : vector<1x1x49x128xf32> to vector<49x128xf32>
    %cst_182 = arith.constant dense<0.000000e+00> : vector<49x128xf32>
    %149 = tpu.matmul %148, %142, %cst_182 {dimension_numbers = #tpu.dot_dimension_numbers<[1], [0], [0], [1], [0, 0, 1, 1], [], []>} : vector<49x128xf32>, vector<128x128xf32>, vector<49x128xf32> -> vector<49x128xf32>
    %150 = arith.addf %132, %149 : vector<49x128xf32>
    %c0_183 = arith.constant 0 : index
    %c14_184 = arith.constant 14 : index
    %c0_185 = arith.constant 0 : index
    %c0_186 = arith.constant 0 : index
    %151 = vector.load %arg1[%c0_183, %c14_184, %c0_185, %c0_186] : memref<1x16x49x128xf32, #tpu.memory_space<vmem>>, vector<1x1x49x128xf32>
    %152 = vector.shape_cast %151 : vector<1x1x49x128xf32> to vector<49x128xf32>
    %cst_187 = arith.constant dense<0.000000e+00> : vector<49x128xf32>
    %153 = tpu.matmul %152, %142, %cst_187 {dimension_numbers = #tpu.dot_dimension_numbers<[1], [0], [0], [1], [0, 0, 1, 1], [], []>} : vector<49x128xf32>, vector<128x128xf32>, vector<49x128xf32> -> vector<49x128xf32>
    %154 = arith.addf %136, %153 : vector<49x128xf32>
    %c0_188 = arith.constant 0 : index
    %c15 = arith.constant 15 : index
    %c0_189 = arith.constant 0 : index
    %c0_190 = arith.constant 0 : index
    %155 = vector.load %arg1[%c0_188, %c15, %c0_189, %c0_190] : memref<1x16x49x128xf32, #tpu.memory_space<vmem>>, vector<1x1x49x128xf32>
    %156 = vector.shape_cast %155 : vector<1x1x49x128xf32> to vector<49x128xf32>
    %cst_191 = arith.constant dense<0.000000e+00> : vector<49x128xf32>
    %157 = tpu.matmul %156, %142, %cst_191 {dimension_numbers = #tpu.dot_dimension_numbers<[1], [0], [0], [1], [0, 0, 1, 1], [], []>} : vector<49x128xf32>, vector<128x128xf32>, vector<49x128xf32> -> vector<49x128xf32>
    %158 = arith.addf %140, %157 : vector<49x128xf32>
    %159 = arith.maximumf %146, %150 : vector<49x128xf32>
    %160 = arith.maximumf %154, %158 : vector<49x128xf32>
    %161 = arith.maximumf %159, %160 : vector<49x128xf32>
    %162 = vector.broadcast %0 : vector<1x128xf32> to vector<49x128xf32>
    %163 = arith.addf %161, %162 : vector<49x128xf32>
    %cst_192 = arith.constant 0.000000e+00 : f32
    %164 = vector.broadcast %cst_192 : f32 to vector<49x128xf32>
    %165 = arith.maximumf %163, %164 : vector<49x128xf32>
    %c0_193 = arith.constant 0 : index
    %c0_194 = arith.constant 0 : index
    %c0_195 = arith.constant 0 : index
    %166 = vector.load %arg4[%c0_193, %c0_194, %c0_195] : memref<1x49x128xf32, #tpu.memory_space<vmem>>, vector<1x49x128xf32>
    %167 = vector.shape_cast %166 : vector<1x49x128xf32> to vector<49x128xf32>
    %168 = vector.shape_cast %165 : vector<49x128xf32> to vector<1x49x128xf32>
    tpu.vector_store %arg4[%c0_193, %c0_194, %c0_195], %168 {strides = array<i32>} : memref<1x49x128xf32, #tpu.memory_space<vmem>>, vector<1x49x128xf32>,
    return
  }
  func.func @transform_0(%arg0: i32) -> (i32, i32, i32, i32) {
    %c0_i32 = arith.constant 0 : i32
    %c0_i32_0 = arith.constant 0 : i32
    %c0_i32_1 = arith.constant 0 : i32
    %c0_i32_2 = arith.constant 0 : i32
    return %arg0, %c0_i32, %c0_i32_0, %c0_i32_1 : i32, i32, i32, i32
  }
  func.func @transform_1(%arg0: i32) -> (i32, i32, i32) {
    %c0_i32 = arith.constant 0 : i32
    %c0_i32_0 = arith.constant 0 : i32
    %c0_i32_1 = arith.constant 0 : i32
    %c0_i32_2 = arith.constant 0 : i32
    return %c0_i32, %c0_i32_0, %c0_i32_1 : i32, i32, i32
  }
  func.func @transform_2(%arg0: i32) -> (i32, i32) {
    %c0_i32 = arith.constant 0 : i32
    %c0_i32_0 = arith.constant 0 : i32
    %c0_i32_1 = arith.constant 0 : i32
    return %c0_i32, %c0_i32_0 : i32, i32
  }
  func.func @transform_3(%arg0: i32) -> (i32, i32, i32) {
    %c0_i32 = arith.constant 0 : i32
    %c0_i32_0 = arith.constant 0 : i32
    %c0_i32_1 = arith.constant 0 : i32
    return %arg0, %c0_i32, %c0_i32_0 : i32, i32, i32
  }
}

</mosaic_0001>

<bundles_post_ra>
// kernel: cnn_forward.3
= control target key start
LH: loop header
LB: loop body
LE: loop exit
PB: predicated region body
PF: predicated region fallthrough
CT: control target
= control target key end

     0   :  { %s2214_s12 = smov 0   ;;  %s2925_s0 = inlined_call_operand.vmem [shape: f32[2,4,196,16], index: 0, kind: input, shape index: {}]   ;;  %s2926_s1 = inlined_call_operand.vmem [shape: f32[16,128], index: 1, kind: input, shape index: {}]   ;;  %s2927_s2 = inlined_call_operand.vmem [shape: f32[1,128], index: 2, kind: input, shape index: {}]   ;;  %s2928_s3 = inlined_call_operand.vmem [shape: f32[2,196,128], index: 3, kind: output, shape index: {}]  }
   0x1 LB: > { %s1549_s13 = sadd.s32 4294967295, %s2189_s12   ;;  %p1553_p0 = scmp.ge.s32.totalorder %s2189_s12, 1  ;;  %s2189_s12 = sphi %s2214_s12, %s13_s12  }
   0x2   : > { %p137_p1 = scmp.lt.s32.totalorder %s2189_s12, 3 }
   0x4   : > { %p138_p2 = pnand %p1553_p0, %p137_p1 }
   0x5   : > { %v171_v0 = vld [vmem:[%s2926_s1] sm:$0xff] (!%p138_p2)  ;;  %v172_v1 = vld [vmem:[%s2926_s1 + $0x8] sm:$0xff] (!%p138_p2)  ;;  %p161_p3 = scmp.lt.s32.totalorder (!%p138_p2), %s1549_s13, 1  ;;  %v2191_v2 = vmov (!%p138_p2), 0.0|0.0   ;;  %vm2192_vm0 = vmmov (!%p138_p2), 0   ;;  %v2193_v4 = vmov (!%p138_p2), 0.0  }
   0x6   : > { %141 = sbr.rel (%p138_p2) target bundleno = 435 (0x1b3), region = 32  ;;  %2158 = vmatprep.subr.bf16.mxu0 (!%p138_p2), %v2191_v2  ;;  %v2159_v3 = vpack.c.bf16 (!%p138_p2), %v172_v1, %v171_v0  ;;  %2161 = vmatprep.subr.bf16.mxu1 (!%p138_p2), %v2191_v2  ;;  %vm199_vm1 = vcmask (!%p138_p2), 130048  }
   0x7   : > { %1846 = vmatprep.mubr.msk.f32.mxu0 (!%p138_p2), %vm2192_vm0, %v2193_v4  ;;  %1925 = vmatprep.mubr.msk.f32.mxu1 (!%p138_p2), %vm2192_vm0, %v2193_v4 }
   0x8   : > { %2160 = vmatpush3.bf16.msra.mxu0 (!%p138_p2), %v2159_v3  ;;  %2163 = vmatpush3.bf16.msra.mxu1 (!%p138_p2), %v2159_v3 }
   0x9   : > { %2164 = vmatprep.subr.bf16.mxu0 (!%p138_p2), %v2191_v2  ;;  %2167 = vmatprep.subr.bf16.mxu1 (!%p138_p2), %v2191_v2 }
   0xd   : > { %s2953_s13 = smov (!%p161_p3, %s1549_s13), 1 }
   0xe   : > { %s2170_s18 = smul.u32 800, %s2953_s13 }
   0xf   : > { %s2171_s22 = smul.u32 200, %s2953_s13 }
  0x10   : > { %s2238_s21 = scalar_lea.vmem %s2925_s0, %s2170_s18 }
  0x11   : > { %v174_v5 = vld [vmem:[%s2238_s21] sm:$0xff]  ;;  %v1581_v6 = vld [vmem:[%s2238_s21 + $0xc8] sm:$0xff]  ;;  %v1582_v8 = vld [vmem:[%s2238_s21 + $0xd0] sm:$0xff]  ;;  %s2802_s27 = scalar_lea.vmem %s2928_s3, %s2171_s22 }
  0x12   : > { %1847 = vmatmul.mubr.msk.f32.vlgmr.msra.gmra.mrb[0].mxu0 %vm199_vm1, %v174_v5  ;;  %1926 = vmatmul.mubr.msk.f32.vlgmr.msra.gmra.mrb[0].mxu1 %vm199_vm1, %v1581_v6  ;;  %v175_v7 = vld [vmem:[%s2238_s21 + $0x8] sm:$0xff]  ;;  %v176_v9 = vld [vmem:[%s2238_s21 + $0x10] sm:$0xff]  ;;  %v1583_v10 = vld [vmem:[%s2238_s21 + $0xd8] sm:$0xff] }
  0x13   : > { %2166 = vmatpush3.bf16.msra.mxu0 %v2159_v3  ;;  %2169 = vmatpush3.bf16.msra.mxu1 %v2159_v3  ;;  %v177_v11 = vld [vmem:[%s2238_s21 + $0x18] sm:$0xff]  ;;  %v1584_v12 = vld [vmem:[%s2238_s21 + $0xe0] sm:$0xff]  ;;  %v1585_v14 = vld [vmem:[%s2238_s21 + $0xe8] sm:$0xff] }
  0x14   : > { %1849 = vmatprep.mubr.msk.f32.mxu0 %vm2192_vm0, %v2193_v4  ;;  %1928 = vmatprep.mubr.msk.f32.mxu1 %vm2192_vm0, %v2193_v4  ;;  %v178_v13 = vld [vmem:[%s2238_s21 + $0x20] sm:$0xff]  ;;  %v179_v15 = vld [vmem:[%s2238_s21 + $0x28] sm:$0xff]  ;;  %v1586_v16 = vld [vmem:[%s2238_s21 + $0xf0] sm:$0xff] }
  0x15   : > { %v180_v17 = vld [vmem:[%s2238_s21 + $0x30] sm:$0xff]  ;;  %v1587_v18 = vld [vmem:[%s2238_s21 + $0xf8] sm:$0xff]  ;;  %v1588_v20 = vld [vmem:[%s2238_s21 + $0x100] sm:$0xff] }
  0x16   : > { %1850 = vmatmul.mubr.msk.f32.gmra.mrb[2].mxu0 %vm199_vm1, %v175_v7  ;;  %1929 = vmatmul.mubr.msk.f32.gmra.mrb[2].mxu1 %vm199_vm1, %v1582_v8  ;;  %v181_v19 = vld [vmem:[%s2238_s21 + $0x38] sm:$0xff]  ;;  %v182_v21 = vld [vmem:[%s2238_s21 + $0x40] sm:$0xff]  ;;  %v1589_v22 = vld [vmem:[%s2238_s21 + $0x108] sm:$0xff] }
  0x17   : > { %1852 = vmatprep.mubr.msk.f32.mxu0 %vm2192_vm0, %v2193_v4  ;;  %1931 = vmatprep.mubr.msk.f32.mxu1 %vm2192_vm0, %v2193_v4  ;;  %v183_v23 = vld [vmem:[%s2238_s21 + $0x48] sm:$0xff]  ;;  %v1590_v24 = vld [vmem:[%s2238_s21 + $0x110] sm:$0xff]  ;;  %v1591_v26 = vld [vmem:[%s2238_s21 + $0x118] sm:$0xff] }
  0x18   : > { %v184_v25 = vld [vmem:[%s2238_s21 + $0x50] sm:$0xff]  ;;  %v185_v27 = vld [vmem:[%s2238_s21 + $0x58] sm:$0xff]  ;;  %v1592_v28 = vld [vmem:[%s2238_s21 + $0x120] sm:$0xff] }
  0x19   : > { %v186_v29 = vld [vmem:[%s2238_s21 + $0x60] sm:$0xff]  ;;  %v1593_v30 = vld [vmem:[%s2238_s21 + $0x128] sm:$0xff]  ;;  %v1594_v32 = vld [vmem:[%s2238_s21 + $0x130] sm:$0xff] }
  0x1a   : > { %1853 = vmatmul.mubr.msk.f32.gmra.mrb[4].mxu0 %vm199_vm1, %v176_v9  ;;  %1932 = vmatmul.mubr.msk.f32.gmra.mrb[4].mxu1 %vm199_vm1, %v1583_v10  ;;  %v187_v31 = vld [vmem:[%s2238_s21 + $0x68] sm:$0xff]  ;;  %v188_v33 = vld [vmem:[%s2238_s21 + $0x70] sm:$0xff]  ;;  %v1595_v34 = vld [vmem:[%s2238_s21 + $0x138] sm:$0xff] }
  0x1b   : > { %1855 = vmatprep.mubr.msk.f32.mxu0 %vm2192_vm0, %v2193_v4  ;;  %1934 = vmatprep.mubr.msk.f32.mxu1 %vm2192_vm0, %v2193_v4  ;;  %v189_v35 = vld [vmem:[%s2238_s21 + $0x78] sm:$0xff]  ;;  %v1596_v36 = vld [vmem:[%s2238_s21 + $0x140] sm:$0xff]  ;;  %v1597_v38 = vld [vmem:[%s2238_s21 + $0x148] sm:$0xff] }
  0x1c   : > { %v190_v37 = vld [vmem:[%s2238_s21 + $0x80] sm:$0xff]  ;;  %v191_v39 = vld [vmem:[%s2238_s21 + $0x88] sm:$0xff]  ;;  %v1598_v40 = vld [vmem:[%s2238_s21 + $0x150] sm:$0xff] }
  0x1d   : > { %v192_v41 = vld [vmem:[%s2238_s21 + $0x90] sm:$0xff]  ;;  %v1599_v42 = vld [vmem:[%s2238_s21 + $0x158] sm:$0xff]  ;;  %v1600_v44 = vld [vmem:[%s2238_s21 + $0x160] sm:$0xff] }
  0x1e   : > { %1856 = vmatmul.mubr.msk.f32.gmra.mrb[6].mxu0 %vm199_vm1, %v177_v11  ;;  %1935 = vmatmul.mubr.msk.f32.gmra.mrb[6].mxu1 %vm199_vm1, %v1584_v12  ;;  %v193_v43 = vld [vmem:[%s2238_s21 + $0x98] sm:$0xff]  ;;  %v194_v45 = vld [vmem:[%s2238_s21 + $0xa0] sm:$0xff]  ;;  %v1601_v46 = vld [vmem:[%s2238_s21 + $0x168] sm:$0xff] }
  0x1f   : > { %1858 = vmatprep.mubr.msk.f32.mxu0 %vm2192_vm0, %v2193_v4  ;;  %1937 = vmatprep.mubr.msk.f32.mxu1 %vm2192_vm0, %v2193_v4  ;;  %v195_v47 = vld [vmem:[%s2238_s21 + $0xa8] sm:$0xff]  ;;  %v1602_v48 = vld [vmem:[%s2238_s21 + $0x170] sm:$0xff]  ;;  %v1603_v50 = vld [vmem:[%s2238_s21 + $0x178] sm:$0xff] }
  0x20   : > { %v196_v49 = vld [vmem:[%s2238_s21 + $0xb0] sm:$0xff]  ;;  %v197_v51 = vld [vmem:[%s2238_s21 + $0xb8] sm:$0xff]  ;;  %v1604_v52 = vld [vmem:[%s2238_s21 + $0x180] sm:$0xff] }
  0x21   : > { %v198_v53 = vld [vmem:[%s2238_s21 + $0xc0] sm:$0xf]  ;;  %v1605_v54 = vld [vmem:[%s2238_s21 + $0x188] sm:$0xf]  ;;  %v1631_v55 = vld [vmem:[%s2238_s21 + $0x190] sm:$0xff] }
  0x22   : > { %1859 = vmatmul.mubr.msk.f32.gmra.mrb[8].mxu0 %vm199_vm1, %v178_v13  ;;  %1938 = vmatmul.mubr.msk.f32.gmra.mrb[8].mxu1 %vm199_vm1, %v1585_v14  ;;  %v1681_v56 = vld [vmem:[%s2238_s21 + $0x258] sm:$0xff]  ;;  %v1682_v58 = vld [vmem:[%s2238_s21 + $0x260] sm:$0xff]  ;;  %v1683_v60 = vld [vmem:[%s2238_s21 + $0x268] sm:$0xff] }
  0x23   : > { %1861 = vmatprep.mubr.msk.f32.mxu0 %vm2192_vm0, %v2193_v4  ;;  %1940 = vmatprep.mubr.msk.f32.mxu1 %vm2192_vm0, %v2193_v4  ;;  %v1632_v57 = vld [vmem:[%s2238_s21 + $0x198] sm:$0xff]  ;;  %v1633_v59 = vld [vmem:[%s2238_s21 + $0x1a0] sm:$0xff]  ;;  %v1634_v61 = vld [vmem:[%s2238_s21 + $0x1a8] sm:$0xff] }
  0x24   : > { %v1684_v62 = vld [vmem:[%s2238_s21 + $0x270] sm:$0xff]  ;;  %v1685_v0 = vld [vmem:[%s2238_s21 + $0x278] sm:$0xff]  ;;  %v1686_v2 = vld [vmem:[%s2238_s21 + $0x280] sm:$0xff] }
  0x25   : > { %v1635_v63 = vld [vmem:[%s2238_s21 + $0x1b0] sm:$0xff]  ;;  %v1636_v1 = vld [vmem:[%s2238_s21 + $0x1b8] sm:$0xff]  ;;  %v1637_v3 = vld [vmem:[%s2238_s21 + $0x1c0] sm:$0xff] }
  0x26   : > { %1862 = vmatmul.mubr.msk.f32.gmra.mrb[10].mxu0 %vm199_vm1, %v179_v15  ;;  %1941 = vmatmul.mubr.msk.f32.gmra.mrb[10].mxu1 %vm199_vm1, %v1586_v16  ;;  %v1687_v5 = vld [vmem:[%s2238_s21 + $0x288] sm:$0xff]  ;;  %v1688_v7 = vld [vmem:[%s2238_s21 + $0x290] sm:$0xff]  ;;  %v1689_v9 = vld [vmem:[%s2238_s21 + $0x298] sm:$0xff] }
  0x27   : > { %1864 = vmatprep.mubr.msk.f32.mxu0 %vm2192_vm0, %v2193_v4  ;;  %1943 = vmatprep.mubr.msk.f32.mxu1 %vm2192_vm0, %v2193_v4  ;;  %v1638_v6 = vld [vmem:[%s2238_s21 + $0x1c8] sm:$0xff]  ;;  %v1639_v8 = vld [vmem:[%s2238_s21 + $0x1d0] sm:$0xff]  ;;  %v1640_v10 = vld [vmem:[%s2238_s21 + $0x1d8] sm:$0xff] }
  0x28   : > { %v1690_v11 = vld [vmem:[%s2238_s21 + $0x2a0] sm:$0xff]  ;;  %v1691_v13 = vld [vmem:[%s2238_s21 + $0x2a8] sm:$0xff]  ;;  %v1692_v15 = vld [vmem:[%s2238_s21 + $0x2b0] sm:$0xff] }
  0x29   : > { %v1641_v12 = vld [vmem:[%s2238_s21 + $0x1e0] sm:$0xff]  ;;  %v1642_v14 = vld [vmem:[%s2238_s21 + $0x1e8] sm:$0xff]  ;;  %v1643_v16 = vld [vmem:[%s2238_s21 + $0x1f0] sm:$0xff] }
  0x2a   : > { %1865 = vmatmul.mubr.msk.f32.gmra.mrb[12].mxu0 %vm199_vm1, %v180_v17  ;;  %1944 = vmatmul.mubr.msk.f32.gmra.mrb[12].mxu1 %vm199_vm1, %v1587_v18  ;;  %v1693_v17 = vld [vmem:[%s2238_s21 + $0x2b8] sm:$0xff] }
  0x2b   : > { %1867 = vmatprep.mubr.msk.f32.mxu0 %vm2192_vm0, %v2193_v4  ;;  %1946 = vmatprep.mubr.msk.f32.mxu1 %vm2192_vm0, %v2193_v4  ;;  %v1644_v18 = vld [vmem:[%s2238_s21 + $0x1f8] sm:$0xff] }
  0x2e   : > { %1868 = vmatmul.mubr.msk.f32.gmra.mrb[14].mxu0 %vm199_vm1, %v181_v19  ;;  %1947 = vmatmul.mubr.msk.f32.gmra.mrb[14].mxu1 %vm199_vm1, %v1588_v20  ;;  %v1694_v19 = vld [vmem:[%s2238_s21 + $0x2c0] sm:$0xff] }
  0x2f   : > { %1870 = vmatprep.mubr.msk.f32.mxu0 %vm2192_vm0, %v2193_v4  ;;  %1949 = vmatprep.mubr.msk.f32.mxu1 %vm2192_vm0, %v2193_v4  ;;  %v1645_v20 = vld [vmem:[%s2238_s21 + $0x200] sm:$0xff] }
  0x32   : > { %1871 = vmatmul.mubr.msk.f32.gmra.mrb[16].mxu0 %vm199_vm1, %v182_v21  ;;  %1950 = vmatmul.mubr.msk.f32.gmra.mrb[16].mxu1 %vm199_vm1, %v1589_v22  ;;  %v1695_v21 = vld [vmem:[%s2238_s21 + $0x2c8] sm:$0xff] }
  0x33   : > { %1873 = vmatprep.mubr.msk.f32.mxu0 %vm2192_vm0, %v2193_v4  ;;  %1952 = vmatprep.mubr.msk.f32.mxu1 %vm2192_vm0, %v2193_v4  ;;  %v1646_v22 = vld [vmem:[%s2238_s21 + $0x208] sm:$0xff] }
  0x36   : > { %1874 = vmatmul.mubr.msk.f32.gmra.mrb[18].mxu0 %vm199_vm1, %v183_v23  ;;  %1953 = vmatmul.mubr.msk.f32.gmra.mrb[18].mxu1 %vm199_vm1, %v1590_v24  ;;  %v1696_v23 = vld [vmem:[%s2238_s21 + $0x2d0] sm:$0xff] }
  0x37   : > { %1876 = vmatprep.mubr.msk.f32.mxu0 %vm2192_vm0, %v2193_v4  ;;  %1955 = vmatprep.mubr.msk.f32.mxu1 %vm2192_vm0, %v2193_v4  ;;  %v1647_v24 = vld [vmem:[%s2238_s21 + $0x210] sm:$0xff] }
  0x3a   : > { %1877 = vmatmul.mubr.msk.f32.gmra.mrb[20].mxu0 %vm199_vm1, %v184_v25  ;;  %1956 = vmatmul.mubr.msk.f32.gmra.mrb[20].mxu1 %vm199_vm1, %v1591_v26  ;;  %v1697_v25 = vld [vmem:[%s2238_s21 + $0x2d8] sm:$0xff] }
  0x3b   : > { %1879 = vmatprep.mubr.msk.f32.mxu0 %vm2192_vm0, %v2193_v4  ;;  %1958 = vmatprep.mubr.msk.f32.mxu1 %vm2192_vm0, %v2193_v4  ;;  %v1648_v26 = vld [vmem:[%s2238_s21 + $0x218] sm:$0xff] }
  0x3e   : > { %1880 = vmatmul.mubr.msk.f32.gmra.mrb[22].mxu0 %vm199_vm1, %v185_v27  ;;  %1959 = vmatmul.mubr.msk.f32.gmra.mrb[22].mxu1 %vm199_vm1, %v1592_v28  ;;  %v1698_v27 = vld [vmem:[%s2238_s21 + $0x2e0] sm:$0xff] }
  0x3f   : > { %1882 = vmatprep.mubr.msk.f32.mxu0 %vm2192_vm0, %v2193_v4  ;;  %1961 = vmatprep.mubr.msk.f32.mxu1 %vm2192_vm0, %v2193_v4  ;;  %v1649_v28 = vld [vmem:[%s2238_s21 + $0x220] sm:$0xff] }
  0x42   : > { %1883 = vmatmul.mubr.msk.f32.gmra.mrb[24].mxu0 %vm199_vm1, %v186_v29  ;;  %1962 = vmatmul.mubr.msk.f32.gmra.mrb[24].mxu1 %vm199_vm1, %v1593_v30  ;;  %v1699_v29 = vld [vmem:[%s2238_s21 + $0x2e8] sm:$0xff] }
  0x43   : > { %1885 = vmatprep.mubr.msk.f32.mxu0 %vm2192_vm0, %v2193_v4  ;;  %1964 = vmatprep.mubr.msk.f32.mxu1 %vm2192_vm0, %v2193_v4  ;;  %v1650_v30 = vld [vmem:[%s2238_s21 + $0x228] sm:$0xff] }
  0x46   : > { %1886 = vmatmul.mubr.msk.f32.gmra.mrb[26].mxu0 %vm199_vm1, %v187_v31  ;;  %1965 = vmatmul.mubr.msk.f32.gmra.mrb[26].mxu1 %vm199_vm1, %v1594_v32  ;;  %v1700_v31 = vld [vmem:[%s2238_s21 + $0x2f0] sm:$0xff] }
  0x47   : > { %1888 = vmatprep.mubr.msk.f32.mxu0 %vm2192_vm0, %v2193_v4  ;;  %1967 = vmatprep.mubr.msk.f32.mxu1 %vm2192_vm0, %v2193_v4  ;;  %v1651_v32 = vld [vmem:[%s2238_s21 + $0x230] sm:$0xff] }
  0x4a   : > { %1889 = vmatmul.mubr.msk.f32.gmra.mrb[28].mxu0 %vm199_vm1, %v188_v33  ;;  %1968 = vmatmul.mubr.msk.f32.gmra.mrb[28].mxu1 %vm199_vm1, %v1595_v34  ;;  %v1701_v33 = vld [vmem:[%s2238_s21 + $0x2f8] sm:$0xff] }
  0x4b   : > { %1891 = vmatprep.mubr.msk.f32.mxu0 %vm2192_vm0, %v2193_v4  ;;  %1970 = vmatprep.mubr.msk.f32.mxu1 %vm2192_vm0, %v2193_v4  ;;  %v1652_v34 = vld [vmem:[%s2238_s21 + $0x238] sm:$0xff] }
  0x4e   : > { %1892 = vmatmul.mubr.msk.f32.gmra.mrb[30].mxu0 %vm199_vm1, %v189_v35  ;;  %1971 = vmatmul.mubr.msk.f32.gmra.mrb[30].mxu1 %vm199_vm1, %v1596_v36  ;;  %v1702_v35 = vld [vmem:[%s2238_s21 + $0x300] sm:$0xff] }
  0x4f   : > { %1894 = vmatprep.mubr.msk.f32.mxu0 %vm2192_vm0, %v2193_v4  ;;  %1973 = vmatprep.mubr.msk.f32.mxu1 %vm2192_vm0, %v2193_v4  ;;  %v1653_v36 = vld [vmem:[%s2238_s21 + $0x240] sm:$0xff] }
  0x52   : > { %1895 = vmatmul.mubr.msk.f32.gmra.mrb[32].mxu0 %vm199_vm1, %v190_v37  ;;  %1974 = vmatmul.mubr.msk.f32.gmra.mrb[32].mxu1 %vm199_vm1, %v1597_v38  ;;  %v1703_v37 = vld [vmem:[%s2238_s21 + $0x308] sm:$0xff] }
  0x53   : > { %1897 = vmatprep.mubr.msk.f32.mxu0 %vm2192_vm0, %v2193_v4  ;;  %1976 = vmatprep.mubr.msk.f32.mxu1 %vm2192_vm0, %v2193_v4  ;;  %v1654_v38 = vld [vmem:[%s2238_s21 + $0x248] sm:$0xff] }
  0x56   : > { %1898 = vmatmul.mubr.msk.f32.gmra.mrb[34].mxu0 %vm199_vm1, %v191_v39  ;;  %1977 = vmatmul.mubr.msk.f32.gmra.mrb[34].mxu1 %vm199_vm1, %v1598_v40  ;;  %v1704_v39 = vld [vmem:[%s2238_s21 + $0x310] sm:$0xff] }
  0x57   : > { %1900 = vmatprep.mubr.msk.f32.mxu0 %vm2192_vm0, %v2193_v4  ;;  %1979 = vmatprep.mubr.msk.f32.mxu1 %vm2192_vm0, %v2193_v4  ;;  %v1655_v40 = vld [vmem:[%s2238_s21 + $0x250] sm:$0xf] }
  0x5a   : > { %1901 = vmatmul.mubr.msk.f32.gmra.mrb[36].mxu0 %vm199_vm1, %v192_v41  ;;  %1980 = vmatmul.mubr.msk.f32.gmra.mrb[36].mxu1 %vm199_vm1, %v1599_v42  ;;  %v1705_v41 = vld [vmem:[%s2238_s21 + $0x318] sm:$0xf] }
  0x5b   : > { %1903 = vmatprep.mubr.msk.f32.mxu0 %vm2192_vm0, %v2193_v4  ;;  %1982 = vmatprep.mubr.msk.f32.mxu1 %vm2192_vm0, %v2193_v4 }
  0x5e   : > { %1904 = vmatmul.mubr.msk.f32.gmra.mrb[38].mxu0 %vm199_vm1, %v193_v43  ;;  %1983 = vmatmul.mubr.msk.f32.gmra.mrb[38].mxu1 %vm199_vm1, %v1600_v44 }
  0x5f   : > { %1906 = vmatprep.mubr.msk.f32.mxu0 %vm2192_vm0, %v2193_v4  ;;  %1985 = vmatprep.mubr.msk.f32.mxu1 %vm2192_vm0, %v2193_v4 }
  0x62   : > { %1907 = vmatmul.mubr.msk.f32.gmra.mrb[40].mxu0 %vm199_vm1, %v194_v45  ;;  %1986 = vmatmul.mubr.msk.f32.gmra.mrb[40].mxu1 %vm199_vm1, %v1601_v46 }
  0x63   : > { %1909 = vmatprep.mubr.msk.f32.mxu0 %vm2192_vm0, %v2193_v4  ;;  %1988 = vmatprep.mubr.msk.f32.mxu1 %vm2192_vm0, %v2193_v4 }
  0x66   : > { %1910 = vmatmul.mubr.msk.f32.gmra.mrb[42].mxu0 %vm199_vm1, %v195_v47  ;;  %1989 = vmatmul.mubr.msk.f32.gmra.mrb[42].mxu1 %vm199_vm1, %v1602_v48 }
  0x67   : > { %1912 = vmatprep.mubr.msk.f32.mxu0 %vm2192_vm0, %v2193_v4  ;;  %1991 = vmatprep.mubr.msk.f32.mxu1 %vm2192_vm0, %v2193_v4 }
  0x6a   : > { %1913 = vmatmul.mubr.msk.f32.gmra.mrb[44].mxu0 %vm199_vm1, %v196_v49  ;;  %1992 = vmatmul.mubr.msk.f32.gmra.mrb[44].mxu1 %vm199_vm1, %v1603_v50 }
  0x6b   : > { %1915 = vmatprep.mubr.msk.f32.mxu0 %vm2192_vm0, %v2193_v4  ;;  %1994 = vmatprep.mubr.msk.f32.mxu1 %vm2192_vm0, %v2193_v4 }
  0x6e   : > { %1916 = vmatmul.mubr.msk.f32.gmra.mrb[46].mxu0 %vm199_vm1, %v197_v51  ;;  %1995 = vmatmul.mubr.msk.f32.gmra.mrb[46].mxu1 %vm199_vm1, %v1604_v52 }
  0x6f   : > { %1918 = vmatprep.mubr.msk.f32.mxu0 %vm2192_vm0, %v2193_v4  ;;  %1997 = vmatprep.mubr.msk.f32.mxu1 %vm2192_vm0, %v2193_v4 }
  0x72   : > { %1919 = vmatmul.mubr.msk.f32.gmra.mrb[48].mxu0 %vm199_vm1, %v198_v53  ;;  %1998 = vmatmul.mubr.msk.f32.gmra.mrb[48].mxu1 %vm199_vm1, %v1605_v54 }
  0x73   : > { %2004 = vmatprep.mubr.msk.f32.mxu0 %vm2192_vm0, %v2193_v4  ;;  %2083 = vmatprep.mubr.msk.f32.mxu1 %vm2192_vm0, %v2193_v4 }
  0x76   : > { %2005 = vmatmul.mubr.msk.f32.vlgmr.msra.gmra.mrb[50].mxu0 %vm199_vm1, %v1631_v55  ;;  %2084 = vmatmul.mubr.msk.f32.vlgmr.msra.gmra.mrb[50].mxu1 %vm199_vm1, %v1681_v56 }
  0x77   : > { %2007 = vmatprep.mubr.msk.f32.mxu0 %vm2192_vm0, %v2193_v4  ;;  %2086 = vmatprep.mubr.msk.f32.mxu1 %vm2192_vm0, %v2193_v4 }
  0x7a   : > { %2008 = vmatmul.mubr.msk.f32.gmra.mrb[52].mxu0 %vm199_vm1, %v1632_v57  ;;  %2087 = vmatmul.mubr.msk.f32.gmra.mrb[52].mxu1 %vm199_vm1, %v1682_v58 }
  0x7b   : > { %2010 = vmatprep.mubr.msk.f32.mxu0 %vm2192_vm0, %v2193_v4  ;;  %2089 = vmatprep.mubr.msk.f32.mxu1 %vm2192_vm0, %v2193_v4 }
  0x7e   : > { %2011 = vmatmul.mubr.msk.f32.gmra.mrb[54].mxu0 %vm199_vm1, %v1633_v59  ;;  %2090 = vmatmul.mubr.msk.f32.gmra.mrb[54].mxu1 %vm199_vm1, %v1683_v60 }
  0x7f   : > { %2013 = vmatprep.mubr.msk.f32.mxu0 %vm2192_vm0, %v2193_v4  ;;  %2092 = vmatprep.mubr.msk.f32.mxu1 %vm2192_vm0, %v2193_v4 }
  0x82   : > { %2014 = vmatmul.mubr.msk.f32.gmra.mrb[56].mxu0 %vm199_vm1, %v1634_v61  ;;  %2093 = vmatmul.mubr.msk.f32.gmra.mrb[56].mxu1 %vm199_vm1, %v1684_v62 }
  0x83   : > { %2016 = vmatprep.mubr.msk.f32.mxu0 %vm2192_vm0, %v2193_v4  ;;  %2095 = vmatprep.mubr.msk.f32.mxu1 %vm2192_vm0, %v2193_v4 }
  0x86   : > { %2017 = vmatmul.mubr.msk.f32.gmra.mrb[58].mxu0 %vm199_vm1, %v1635_v63  ;;  %2096 = vmatmul.mubr.msk.f32.gmra.mrb[58].mxu1 %vm199_vm1, %v1685_v0 }
  0x87   : > { %2019 = vmatprep.mubr.msk.f32.mxu0 %vm2192_vm0, %v2193_v4  ;;  %2098 = vmatprep.mubr.msk.f32.mxu1 %vm2192_vm0, %v2193_v4 }
  0x8a   : > { %2020 = vmatmul.mubr.msk.f32.gmra.mrb[60].mxu0 %vm199_vm1, %v1636_v1  ;;  %2099 = vmatmul.mubr.msk.f32.gmra.mrb[60].mxu1 %vm199_vm1, %v1686_v2 }
  0x8b   : > { %2022 = vmatprep.mubr.msk.f32.mxu0 %vm2192_vm0, %v2193_v4  ;;  %2101 = vmatprep.mubr.msk.f32.mxu1 %vm2192_vm0, %v2193_v4 }
  0x8e   : > { %2023 = vmatmul.mubr.msk.f32.gmra.mrb[62].mxu0 %vm199_vm1, %v1637_v3  ;;  %2102 = vmatmul.mubr.msk.f32.gmra.mrb[62].mxu1 %vm199_vm1, %v1687_v5 }
  0x8f   : > { %2025 = vmatprep.mubr.msk.f32.mxu0 %vm2192_vm0, %v2193_v4  ;;  %2104 = vmatprep.mubr.msk.f32.mxu1 %vm2192_vm0, %v2193_v4 }
  0x92   : > { %2026 = vmatmul.mubr.msk.f32.gmra.mrb[64].mxu0 %vm199_vm1, %v1638_v6  ;;  %2105 = vmatmul.mubr.msk.f32.gmra.mrb[64].mxu1 %vm199_vm1, %v1688_v7 }
  0x93   : > { %2028 = vmatprep.mubr.msk.f32.mxu0 %vm2192_vm0, %v2193_v4  ;;  %2107 = vmatprep.mubr.msk.f32.mxu1 %vm2192_vm0, %v2193_v4 }
  0x96   : > { %2029 = vmatmul.mubr.msk.f32.gmra.mrb[66].mxu0 %vm199_vm1, %v1639_v8  ;;  %2108 = vmatmul.mubr.msk.f32.gmra.mrb[66].mxu1 %vm199_vm1, %v1689_v9 }
  0x97   : > { %2031 = vmatprep.mubr.msk.f32.mxu0 %vm2192_vm0, %v2193_v4  ;;  %2110 = vmatprep.mubr.msk.f32.mxu1 %vm2192_vm0, %v2193_v4 }
  0x9a   : > { %2032 = vmatmul.mubr.msk.f32.gmra.mrb[68].mxu0 %vm199_vm1, %v1640_v10  ;;  %2111 = vmatmul.mubr.msk.f32.gmra.mrb[68].mxu1 %vm199_vm1, %v1690_v11 }
  0x9b   : > { %2034 = vmatprep.mubr.msk.f32.mxu0 %vm2192_vm0, %v2193_v4  ;;  %2113 = vmatprep.mubr.msk.f32.mxu1 %vm2192_vm0, %v2193_v4 }
  0x9e   : > { %2035 = vmatmul.mubr.msk.f32.gmra.mrb[70].mxu0 %vm199_vm1, %v1641_v12  ;;  %2114 = vmatmul.mubr.msk.f32.gmra.mrb[70].mxu1 %vm199_vm1, %v1691_v13 }
  0x9f   : > { %2037 = vmatprep.mubr.msk.f32.mxu0 %vm2192_vm0, %v2193_v4  ;;  %2116 = vmatprep.mubr.msk.f32.mxu1 %vm2192_vm0, %v2193_v4 }
  0xa2   : > { %2038 = vmatmul.mubr.msk.f32.gmra.mrb[72].mxu0 %vm199_vm1, %v1642_v14  ;;  %2117 = vmatmul.mubr.msk.f32.gmra.mrb[72].mxu1 %vm199_vm1, %v1692_v15 }
  0xa3   : > { %2040 = vmatprep.mubr.msk.f32.mxu0 %vm2192_vm0, %v2193_v4  ;;  %2119 = vmatprep.mubr.msk.f32.mxu1 %vm2192_vm0, %v2193_v4 }
  0xa6   : > { %2041 = vmatmul.mubr.msk.f32.gmra.mrb[74].mxu0 %vm199_vm1, %v1643_v16  ;;  %2120 = vmatmul.mubr.msk.f32.gmra.mrb[74].mxu1 %vm199_vm1, %v1693_v17 }
  0xa7   : > { %2043 = vmatprep.mubr.msk.f32.mxu0 %vm2192_vm0, %v2193_v4  ;;  %2122 = vmatprep.mubr.msk.f32.mxu1 %vm2192_vm0, %v2193_v4 }
  0xaa   : > { %2044 = vmatmul.mubr.msk.f32.gmra.mrb[76].mxu0 %vm199_vm1, %v1644_v18  ;;  %2123 = vmatmul.mubr.msk.f32.gmra.mrb[76].mxu1 %vm199_vm1, %v1694_v19 }
  0xab   : > { %2046 = vmatprep.mubr.msk.f32.mxu0 %vm2192_vm0, %v2193_v4  ;;  %2125 = vmatprep.mubr.msk.f32.mxu1 %vm2192_vm0, %v2193_v4 }
  0xae   : > { %2047 = vmatmul.mubr.msk.f32.gmra.mrb[78].mxu0 %vm199_vm1, %v1645_v20  ;;  %2126 = vmatmul.mubr.msk.f32.gmra.mrb[78].mxu1 %vm199_vm1, %v1695_v21 }
  0xaf   : > { %2049 = vmatprep.mubr.msk.f32.mxu0 %vm2192_vm0, %v2193_v4  ;;  %2128 = vmatprep.mubr.msk.f32.mxu1 %vm2192_vm0, %v2193_v4 }
  0xb2   : > { %2050 = vmatmul.mubr.msk.f32.gmra.mrb[80].mxu0 %vm199_vm1, %v1646_v22  ;;  %2129 = vmatmul.mubr.msk.f32.gmra.mrb[80].mxu1 %vm199_vm1, %v1696_v23 }
  0xb3   : > { %2052 = vmatprep.mubr.msk.f32.mxu0 %vm2192_vm0, %v2193_v4  ;;  %2131 = vmatprep.mubr.msk.f32.mxu1 %vm2192_vm0, %v2193_v4 }
  0xb6   : > { %2053 = vmatmul.mubr.msk.f32.gmra.mrb[82].mxu0 %vm199_vm1, %v1647_v24  ;;  %2132 = vmatmul.mubr.msk.f32.gmra.mrb[82].mxu1 %vm199_vm1, %v1697_v25 }
  0xb7   : > { %2055 = vmatprep.mubr.msk.f32.mxu0 %vm2192_vm0, %v2193_v4  ;;  %2134 = vmatprep.mubr.msk.f32.mxu1 %vm2192_vm0, %v2193_v4 }
  0xba   : > { %2056 = vmatmul.mubr.msk.f32.gmra.mrb[84].mxu0 %vm199_vm1, %v1648_v26  ;;  %2135 = vmatmul.mubr.msk.f32.gmra.mrb[84].mxu1 %vm199_vm1, %v1698_v27 }
  0xbb   : > { %2058 = vmatprep.mubr.msk.f32.mxu0 %vm2192_vm0, %v2193_v4  ;;  %2137 = vmatprep.mubr.msk.f32.mxu1 %vm2192_vm0, %v2193_v4 }
  0xbe   : > { %2059 = vmatmul.mubr.msk.f32.gmra.mrb[86].mxu0 %vm199_vm1, %v1649_v28  ;;  %2138 = vmatmul.mubr.msk.f32.gmra.mrb[86].mxu1 %vm199_vm1, %v1699_v29 }
  0xbf   : > { %2061 = vmatprep.mubr.msk.f32.mxu0 %vm2192_vm0, %v2193_v4  ;;  %2140 = vmatprep.mubr.msk.f32.mxu1 %vm2192_vm0, %v2193_v4 }
  0xc2   : > { %2062 = vmatmul.mubr.msk.f32.gmra.mrb[88].mxu0 %vm199_vm1, %v1650_v30  ;;  %2141 = vmatmul.mubr.msk.f32.gmra.mrb[88].mxu1 %vm199_vm1, %v1700_v31 }
  0xc3   : > { %2064 = vmatprep.mubr.msk.f32.mxu0 %vm2192_vm0, %v2193_v4  ;;  %2143 = vmatprep.mubr.msk.f32.mxu1 %vm2192_vm0, %v2193_v4 }
  0xc6   : > { %2065 = vmatmul.mubr.msk.f32.gmra.mrb[90].mxu0 %vm199_vm1, %v1651_v32  ;;  %2144 = vmatmul.mubr.msk.f32.gmra.mrb[90].mxu1 %vm199_vm1, %v1701_v33 }
  0xc7   : > { %2067 = vmatprep.mubr.msk.f32.mxu0 %vm2192_vm0, %v2193_v4  ;;  %2146 = vmatprep.mubr.msk.f32.mxu1 %vm2192_vm0, %v2193_v4 }
  0xca   : > { %2068 = vmatmul.mubr.msk.f32.gmra.mrb[92].mxu0 %vm199_vm1, %v1652_v34  ;;  %2147 = vmatmul.mubr.msk.f32.gmra.mrb[92].mxu1 %vm199_vm1, %v1702_v35 }
  0xcb   : > { %2070 = vmatprep.mubr.msk.f32.mxu0 %vm2192_vm0, %v2193_v4  ;;  %2149 = vmatprep.mubr.msk.f32.mxu1 %vm2192_vm0, %v2193_v4 }
  0xce   : > { %2071 = vmatmul.mubr.msk.f32.gmra.mrb[94].mxu0 %vm199_vm1, %v1653_v36  ;;  %2150 = vmatmul.mubr.msk.f32.gmra.mrb[94].mxu1 %vm199_vm1, %v1703_v37 }
  0xcf   : > { %2073 = vmatprep.mubr.msk.f32.mxu0 %vm2192_vm0, %v2193_v4  ;;  %2152 = vmatprep.mubr.msk.f32.mxu1 %vm2192_vm0, %v2193_v4 }
  0xd2   : > { %2074 = vmatmul.mubr.msk.f32.gmra.mrb[96].mxu0 %vm199_vm1, %v1654_v38  ;;  %2153 = vmatmul.mubr.msk.f32.gmra.mrb[96].mxu1 %vm199_vm1, %v1704_v39 }
  0xd3   : > { %2076 = vmatprep.mubr.msk.f32.mxu0 %vm2192_vm0, %v2193_v4  ;;  %2155 = vmatprep.mubr.msk.f32.mxu1 %vm2192_vm0, %v2193_v4 }
  0xd6   : > { %2077 = vmatmul.mubr.msk.f32.gmra.mrb[98].mxu0 %vm199_vm1, %v1655_v40  ;;  %2156 = vmatmul.mubr.msk.f32.gmra.mrb[98].mxu1 %vm199_vm1, %v1705_v41 }
  0xe5   : > { %v2636_v42 = vpop.f32.mrb[0].mxu0  ;;  %v2638_v43 = vpop.f32.mrb[0].mxu1 }
  0xe6   : > { %v756_v44 = vmax.f32 %v2636_v42, %v2638_v43  ;;  %v1848_v45 = vpop.f32.mrb[1].mxu0  ;;  %v1927_v46 = vpop.f32.mrb[1].mxu1 }
  0xe9   : > { %v2642_v47 = vpop.f32.mrb[2].mxu0  ;;  %v2644_v48 = vpop.f32.mrb[2].mxu1 }
  0xea   : > { %v757_v4 = vmax.f32 %v2642_v47, %v2644_v48  ;;  %v1851_v49 = vpop.f32.mrb[3].mxu0  ;;  %v1930_v50 = vpop.f32.mrb[3].mxu1 }
  0xed   : > { %v2648_v51 = vpop.f32.mrb[4].mxu0  ;;  %v2650_v52 = vpop.f32.mrb[4].mxu1 }
  0xee   : > { %v1854_v54 = vpop.f32.mrb[5].mxu0  ;;  %v1933_v55 = vpop.f32.mrb[5].mxu1  ;;  %v2929_v47 = vmax.f32 %v2648_v51, %v2650_v52 }
  0xf1   : > { %v2654_v56 = vpop.f32.mrb[6].mxu0  ;;  %v2656_v57 = vpop.f32.mrb[6].mxu1 }
  0xf2   : > { %v1857_v59 = vpop.f32.mrb[7].mxu0  ;;  %v1936_v60 = vpop.f32.mrb[7].mxu1 }
  0xf5   : > { %v2660_v61 = vpop.f32.mrb[8].mxu0  ;;  %v2662_v62 = vpop.f32.mrb[8].mxu1 }
  0xf6   : > { %v1860_v0 = vpop.f32.mrb[9].mxu0  ;;  %v1939_v1 = vpop.f32.mrb[9].mxu1 }
  0xf9   : > { %v2666_v2 = vpop.f32.mrb[10].mxu0  ;;  %v2668_v3 = vpop.f32.mrb[10].mxu1 }
  0xfa   : > { %v1863_v6 = vpop.f32.mrb[11].mxu0  ;;  %v1942_v7 = vpop.f32.mrb[11].mxu1 }
  0xfd   : > { %v2672_v8 = vpop.f32.mrb[12].mxu0  ;;  %v2674_v9 = vpop.f32.mrb[12].mxu1 }
  0xfe   : > { %v1866_v11 = vpop.f32.mrb[13].mxu0  ;;  %v1945_v12 = vpop.f32.mrb[13].mxu1 }
 0x101   : > { %v2678_v13 = vpop.f32.mrb[14].mxu0  ;;  %v2680_v14 = vpop.f32.mrb[14].mxu1 }
 0x102   : > { %v1869_v16 = vpop.f32.mrb[15].mxu0  ;;  %v1948_v17 = vpop.f32.mrb[15].mxu1 }
 0x105   : > { %v2684_v18 = vpop.f32.mrb[16].mxu0  ;;  %v2686_v19 = vpop.f32.mrb[16].mxu1 }
 0x106   : > { %v1872_v21 = vpop.f32.mrb[17].mxu0  ;;  %v1951_v22 = vpop.f32.mrb[17].mxu1 }
 0x109   : > { %v2690_v23 = vpop.f32.mrb[18].mxu0  ;;  %v2692_v24 = vpop.f32.mrb[18].mxu1 }
 0x10a   : > { %v1875_v26 = vpop.f32.mrb[19].mxu0  ;;  %v1954_v27 = vpop.f32.mrb[19].mxu1 }
 0x10d   : > { %v2696_v28 = vpop.f32.mrb[20].mxu0  ;;  %v2698_v29 = vpop.f32.mrb[20].mxu1 }
 0x10e   : > { %v1878_v31 = vpop.f32.mrb[21].mxu0  ;;  %v1957_v32 = vpop.f32.mrb[21].mxu1 }
 0x111   : > { %v2702_v33 = vpop.f32.mrb[22].mxu0  ;;  %v2704_v34 = vpop.f32.mrb[22].mxu1 }
 0x112   : > { %v1881_v36 = vpop.f32.mrb[23].mxu0  ;;  %v1960_v37 = vpop.f32.mrb[23].mxu1 }
 0x115   : > { %v2708_v38 = vpop.f32.mrb[24].mxu0  ;;  %v2710_v39 = vpop.f32.mrb[24].mxu1 }
 0x116   : > { %v1884_v41 = vpop.f32.mrb[25].mxu0  ;;  %v1963_v45 = vpop.f32.mrb[25].mxu1 }
 0x119   : > { %v2714_v46 = vpop.f32.mrb[26].mxu0  ;;  %v2716_v49 = vpop.f32.mrb[26].mxu1 }
 0x11a   : > { %v1887_v54 = vpop.f32.mrb[27].mxu0  ;;  %v1966_v55 = vpop.f32.mrb[27].mxu1 }
 0x11d   : > { %v2720_v59 = vpop.f32.mrb[28].mxu0  ;;  %v2722_v60 = vpop.f32.mrb[28].mxu1 }
 0x11e   : > { %v1890_v1 = vpop.f32.mrb[29].mxu0  ;;  %v1969_v6 = vpop.f32.mrb[29].mxu1 }
 0x121   : > { %v2726_v7 = vpop.f32.mrb[30].mxu0  ;;  %v2728_v11 = vpop.f32.mrb[30].mxu1 }
 0x122   : > { %v1893_v16 = vpop.f32.mrb[31].mxu0  ;;  %v1972_v17 = vpop.f32.mrb[31].mxu1 }
 0x125   : > { %v2732_v21 = vpop.f32.mrb[32].mxu0  ;;  %v2734_v22 = vpop.f32.mrb[32].mxu1 }
 0x126   : > { %v1896_v27 = vpop.f32.mrb[33].mxu0  ;;  %v1975_v31 = vpop.f32.mrb[33].mxu1 }
 0x129   : > { %v2738_v32 = vpop.f32.mrb[34].mxu0  ;;  %v2740_v36 = vpop.f32.mrb[34].mxu1 }
 0x12a   : > { %v1899_v41 = vpop.f32.mrb[35].mxu0  ;;  %v1978_v45 = vpop.f32.mrb[35].mxu1 }
 0x12d   : > { %v2744_v54 = vpop.f32.mrb[36].mxu0  ;;  %v2746_v55 = vpop.f32.mrb[36].mxu1 }
 0x12e   : > { %v1902_v6 = vpop.f32.mrb[37].mxu0  ;;  %v1981_v16 = vpop.f32.mrb[37].mxu1 }
 0x131   : > { %v2750_v17 = vpop.f32.mrb[38].mxu0  ;;  %v2752_v27 = vpop.f32.mrb[38].mxu1 }
 0x132   : > { %v1905_v26 = vpop.f32.mrb[39].mxu0  ;;  %v1984_v37 = vpop.f32.mrb[39].mxu1 }
 0x135   : > { %v2756_v41 = vpop.f32.mrb[40].mxu0  ;;  %v2758_v45 = vpop.f32.mrb[40].mxu1 }
 0x136   : > { %v1908_v0 = vpop.f32.mrb[41].mxu0  ;;  %v1987_v1 = vpop.f32.mrb[41].mxu1 }
 0x139   : > { %v2762_v6 = vpop.f32.mrb[42].mxu0  ;;  %v2764_v16 = vpop.f32.mrb[42].mxu1 }
 0x13a   : > { %v1911_v40 = vpop.f32.mrb[43].mxu0  ;;  %v1990_v31 = vpop.f32.mrb[43].mxu1 }
 0x13d   : > { %v2768_v26 = vpop.f32.mrb[44].mxu0  ;;  %v2770_v37 = vpop.f32.mrb[44].mxu1 }
 0x13e   : > { %v1914_v30 = vpop.f32.mrb[45].mxu0  ;;  %v1993_v12 = vpop.f32.mrb[45].mxu1 }
 0x141   : > { %v2774_v0 = vpop.f32.mrb[46].mxu0  ;;  %v2776_v1 = vpop.f32.mrb[46].mxu1 }
 0x142   : > { %v1917_v50 = vpop.f32.mrb[47].mxu0  ;;  %v1996_v40 = vpop.f32.mrb[47].mxu1 }
 0x143   : > { %v2793_v50 = vld [vmem:[%s2927_s2] ss:$0 sm:$0xff] }
 0x145   : > { %v2780_v31 = vpop.f32.mrb[48].mxu0  ;;  %v2782_v20 = vpop.f32.mrb[48].mxu1 }
 0x146   : > { %v1920_v35 = vpop.f32.mrb[49].mxu0  ;;  %v1999_v30 = vpop.f32.mrb[49].mxu1 }
 0x149   : > { %v948_v12 = vpop.f32.mrb[50].mxu0  ;;  %v1264_v10 = vpop.f32.mrb[50].mxu1 }
 0x14a   : > { %v1072_v5 = vmax.f32 %v756_v44, %v948_v12  ;;  %v2006_v63 = vpop.f32.mrb[51].mxu0  ;;  %v2085_v58 = vpop.f32.mrb[51].mxu1 }
 0x14c   : > { %v1388_v40 = vmax.f32 %v1072_v5, %v1264_v10 }
 0x14d   : > { %v953_v25 = vpop.f32.mrb[52].mxu0  ;;  %v1269_v53 = vpop.f32.mrb[52].mxu1 }
 0x14e   : > { %v1419_v35 = vadd.f32 %v2793_v50, %v1388_v40  ;;  %v1073_v30 = vmax.f32 %v757_v4, %v953_v25  ;;  %v2009_v15 = vpop.f32.mrb[53].mxu0  ;;  %v2088_v42 = vpop.f32.mrb[53].mxu1 }
 0x150   : > { %v1444_v43 = vmax.f32 %v1419_v35, 0.0  ;;  %v1389_v44 = vmax.f32 %v1073_v30, %v1269_v53  ;;  %v2930_v53 = vmax.f32 %v2654_v56, %v2656_v57 }
 0x151   : > { %v958_v58 = vpop.f32.mrb[54].mxu0  ;;  %v1274_v63 = vpop.f32.mrb[54].mxu1 }
 0x152   : > { %1469 = vst [vmem:[%s2802_s27] sm:$0xff] %v1444_v43  ;;  %v1420_v5 = vadd.f32 %v2793_v50, %v1389_v44  ;;  %v1074_v48 = vmax.f32 %v2929_v47, %v958_v58  ;;  %v2012_v4 = vpop.f32.mrb[55].mxu0  ;;  %v2091_v10 = vpop.f32.mrb[55].mxu1 }
 0x154   : > { %v1445_v15 = vmax.f32 %v1420_v5, 0.0  ;;  %v1390_v25 = vmax.f32 %v1074_v48, %v1274_v63  ;;  %v2931_v63 = vmax.f32 %v2660_v61, %v2662_v62 }
 0x155   : > { %v963_v12 = vpop.f32.mrb[56].mxu0  ;;  %v1279_v40 = vpop.f32.mrb[56].mxu1 }
 0x156   : > { %1470 = vst [vmem:[%s2802_s27 + $0x8] sm:$0xff] %v1445_v15  ;;  %v1421_v35 = vadd.f32 %v2793_v50, %v1390_v25  ;;  %v1075_v30 = vmax.f32 %v2930_v53, %v963_v12  ;;  %v2015_v42 = vpop.f32.mrb[57].mxu0  ;;  %v2094_v43 = vpop.f32.mrb[57].mxu1  ;;  %v2932_v12 = vmax.f32 %v2666_v2, %v2668_v3 }
 0x158   : > { %v1446_v44 = vmax.f32 %v1421_v35, 0.0  ;;  %v1391_v51 = vmax.f32 %v1075_v30, %v1279_v40 }
 0x159   : > { %v968_v52 = vpop.f32.mrb[58].mxu0  ;;  %v1284_v58 = vpop.f32.mrb[58].mxu1 }
 0x15a   : > { %1471 = vst [vmem:[%s2802_s27 + $0x10] sm:$0xff] %v1446_v44  ;;  %v1422_v5 = vadd.f32 %v2793_v50, %v1391_v51  ;;  %v1076_v47 = vmax.f32 %v2931_v63, %v968_v52  ;;  %v2018_v48 = vpop.f32.mrb[59].mxu0  ;;  %v2097_v4 = vpop.f32.mrb[59].mxu1  ;;  %v2933_v44 = vmax.f32 %v2672_v8, %v2674_v9 }
 0x15b   : > { %v2934_v48 = vmax.f32 %v2678_v13, %v2680_v14 }
 0x15c   : > { %v1447_v10 = vmax.f32 %v1422_v5, 0.0  ;;  %v1392_v56 = vmax.f32 %v1076_v47, %v1284_v58 }
 0x15d   : > { %v973_v57 = vpop.f32.mrb[60].mxu0  ;;  %v1289_v15 = vpop.f32.mrb[60].mxu1 }
 0x15e   : > { %1472 = vst [vmem:[%s2802_s27 + $0x18] sm:$0xff] %v1447_v10  ;;  %v1423_v25 = vadd.f32 %v2793_v50, %v1392_v56  ;;  %v1077_v40 = vmax.f32 %v2932_v12, %v973_v57  ;;  %v2021_v35 = vpop.f32.mrb[61].mxu0  ;;  %v2100_v53 = vpop.f32.mrb[61].mxu1  ;;  %v2935_v12 = vmax.f32 %v2684_v18, %v2686_v19 }
 0x160   : > { %v1448_v30 = vmax.f32 %v1423_v25, 0.0  ;;  %v1393_v61 = vmax.f32 %v1077_v40, %v1289_v15 }
 0x161   : > { %v978_v62 = vpop.f32.mrb[62].mxu0  ;;  %v1294_v42 = vpop.f32.mrb[62].mxu1 }
 0x162   : > { %1473 = vst [vmem:[%s2802_s27 + $0x20] sm:$0xff] %v1448_v30  ;;  %v1424_v43 = vadd.f32 %v2793_v50, %v1393_v61  ;;  %v1078_v51 = vmax.f32 %v2933_v44, %v978_v62  ;;  %v2024_v52 = vpop.f32.mrb[63].mxu0  ;;  %v2103_v58 = vpop.f32.mrb[63].mxu1 }
 0x164   : > { %v1449_v5 = vmax.f32 %v1424_v43, 0.0  ;;  %v1394_v2 = vmax.f32 %v1078_v51, %v1294_v42  ;;  %v2936_v42 = vmax.f32 %v2690_v23, %v2692_v24 }
 0x165   : > { %v983_v3 = vpop.f32.mrb[64].mxu0  ;;  %v1299_v63 = vpop.f32.mrb[64].mxu1 }
 0x166   : > { %1474 = vst [vmem:[%s2802_s27 + $0x28] sm:$0xff] %v1449_v5  ;;  %v1425_v47 = vadd.f32 %v2793_v50, %v1394_v2  ;;  %v1079_v4 = vmax.f32 %v2934_v48, %v983_v3  ;;  %v2027_v10 = vpop.f32.mrb[65].mxu0  ;;  %v2106_v56 = vpop.f32.mrb[65].mxu1  ;;  %v2937_v2 = vmax.f32 %v2696_v28, %v2698_v29 }
 0x167   : > { %v2938_v56 = vmax.f32 %v2702_v33, %v2704_v34 }
 0x168   : > { %v1450_v57 = vmax.f32 %v1425_v47, 0.0  ;;  %v1395_v8 = vmax.f32 %v1079_v4, %v1299_v63 }
 0x169   : > { %v988_v9 = vpop.f32.mrb[66].mxu0  ;;  %v1304_v15 = vpop.f32.mrb[66].mxu1 }
 0x16a   : > { %1475 = vst [vmem:[%s2802_s27 + $0x30] sm:$0xff] %v1450_v57  ;;  %v1426_v25 = vadd.f32 %v2793_v50, %v1395_v8  ;;  %v1080_v40 = vmax.f32 %v2935_v12, %v988_v9  ;;  %v2030_v35 = vpop.f32.mrb[67].mxu0  ;;  %v2109_v53 = vpop.f32.mrb[67].mxu1 }
 0x16c   : > { %v1451_v30 = vmax.f32 %v1426_v25, 0.0  ;;  %v1396_v13 = vmax.f32 %v1080_v40, %v1304_v15  ;;  %v2939_v40 = vmax.f32 %v2708_v38, %v2710_v39 }
 0x16d   : > { %v993_v14 = vpop.f32.mrb[68].mxu0  ;;  %v1309_v61 = vpop.f32.mrb[68].mxu1 }
 0x16e   : > { %1476 = vst [vmem:[%s2802_s27 + $0x38] sm:$0xff] %v1451_v30  ;;  %v1427_v62 = vadd.f32 %v2793_v50, %v1396_v13  ;;  %v1081_v43 = vmax.f32 %v2936_v42, %v993_v14  ;;  %v2033_v44 = vpop.f32.mrb[69].mxu0  ;;  %v2112_v51 = vpop.f32.mrb[69].mxu1 }
 0x170   : > { %v1452_v52 = vmax.f32 %v1427_v62, 0.0  ;;  %v1397_v18 = vmax.f32 %v1081_v43, %v1309_v61  ;;  %v2940_v62 = vmax.f32 %v2714_v46, %v2716_v49 }
 0x171   : > { %v998_v19 = vpop.f32.mrb[70].mxu0  ;;  %v1314_v58 = vpop.f32.mrb[70].mxu1 }
 0x172   : > { %1477 = vst [vmem:[%s2802_s27 + $0x40] sm:$0xff] %v1452_v52  ;;  %v1428_v5 = vadd.f32 %v2793_v50, %v1397_v18  ;;  %v1082_v3 = vmax.f32 %v2937_v2, %v998_v19  ;;  %v2036_v63 = vpop.f32.mrb[71].mxu0  ;;  %v2115_v47 = vpop.f32.mrb[71].mxu1  ;;  %v2941_v19 = vmax.f32 %v2720_v59, %v2722_v60 }
 0x174   : > { %v1453_v48 = vmax.f32 %v1428_v5, 0.0  ;;  %v1398_v23 = vmax.f32 %v1082_v3, %v1314_v58 }
 0x175   : > { %v1003_v24 = vpop.f32.mrb[72].mxu0  ;;  %v1319_v4 = vpop.f32.mrb[72].mxu1 }
 0x176   : > { %1478 = vst [vmem:[%s2802_s27 + $0x48] sm:$0xff] %v1453_v48  ;;  %v1429_v10 = vadd.f32 %v2793_v50, %v1398_v23  ;;  %v1083_v57 = vmax.f32 %v2938_v56, %v1003_v24  ;;  %v2039_v8 = vpop.f32.mrb[73].mxu0  ;;  %v2118_v9 = vpop.f32.mrb[73].mxu1  ;;  %v2942_v48 = vmax.f32 %v2726_v7, %v2728_v11 }
 0x177   : > { %v2943_v8 = vmax.f32 %v2732_v21, %v2734_v22 }
 0x178   : > { %v1454_v15 = vmax.f32 %v1429_v10, 0.0  ;;  %v1399_v28 = vmax.f32 %v1083_v57, %v1319_v4 }
 0x179   : > { %v1008_v29 = vpop.f32.mrb[74].mxu0  ;;  %v1324_v25 = vpop.f32.mrb[74].mxu1 }
 0x17a   : > { %1479 = vst [vmem:[%s2802_s27 + $0x50] sm:$0xff] %v1454_v15  ;;  %v1430_v12 = vadd.f32 %v2793_v50, %v1399_v28  ;;  %v1084_v35 = vmax.f32 %v2939_v40, %v1008_v29  ;;  %v2042_v53 = vpop.f32.mrb[75].mxu0  ;;  %v2121_v30 = vpop.f32.mrb[75].mxu1  ;;  %v2944_v40 = vmax.f32 %v2738_v32, %v2740_v36 }
 0x17c   : > { %v1455_v13 = vmax.f32 %v1430_v12, 0.0  ;;  %v1400_v33 = vmax.f32 %v1084_v35, %v1324_v25 }
 0x17d   : > { %v1013_v34 = vpop.f32.mrb[76].mxu0  ;;  %v1329_v14 = vpop.f32.mrb[76].mxu1 }
 0x17e   : > { %1480 = vst [vmem:[%s2802_s27 + $0x58] sm:$0xff] %v1455_v13  ;;  %v1431_v61 = vadd.f32 %v2793_v50, %v1400_v33  ;;  %v1085_v42 = vmax.f32 %v2940_v62, %v1013_v34  ;;  %v2045_v43 = vpop.f32.mrb[77].mxu0  ;;  %v2124_v44 = vpop.f32.mrb[77].mxu1 }
 0x180   : > { %v1456_v51 = vmax.f32 %v1431_v61, 0.0  ;;  %v1401_v38 = vmax.f32 %v1085_v42, %v1329_v14  ;;  %v2945_v14 = vmax.f32 %v2744_v54, %v2746_v55 }
 0x181   : > { %v1018_v39 = vpop.f32.mrb[78].mxu0  ;;  %v1334_v52 = vpop.f32.mrb[78].mxu1 }
 0x182   : > { %1481 = vst [vmem:[%s2802_s27 + $0x60] sm:$0xff] %v1456_v51  ;;  %v1432_v18 = vadd.f32 %v2793_v50, %v1401_v38  ;;  %v1086_v58 = vmax.f32 %v2941_v19, %v1018_v39  ;;  %v2048_v5 = vpop.f32.mrb[79].mxu0  ;;  %v2127_v2 = vpop.f32.mrb[79].mxu1  ;;  %v2946_v38 = vmax.f32 %v2750_v17, %v2752_v27 }
 0x183   : > { %v2947_v2 = vmax.f32 %v2756_v41, %v2758_v45 }
 0x184   : > { %v1457_v3 = vmax.f32 %v1432_v18, 0.0  ;;  %v1402_v46 = vmax.f32 %v1086_v58, %v1334_v52 }
 0x185   : > { %v1023_v49 = vpop.f32.mrb[80].mxu0  ;;  %v1339_v63 = vpop.f32.mrb[80].mxu1 }
 0x186   : > { %1482 = vst [vmem:[%s2802_s27 + $0x68] sm:$0xff] %v1457_v3  ;;  %v1433_v47 = vadd.f32 %v2793_v50, %v1402_v46  ;;  %v1087_v23 = vmax.f32 %v2942_v48, %v1023_v49  ;;  %v2051_v24 = vpop.f32.mrb[81].mxu0  ;;  %v2130_v4 = vpop.f32.mrb[81].mxu1 }
 0x188   : > { %v1458_v10 = vmax.f32 %v1433_v47, 0.0  ;;  %v1403_v59 = vmax.f32 %v1087_v23, %v1339_v63  ;;  %v2948_v23 = vmax.f32 %v2762_v6, %v2764_v16 }
 0x189   : > { %v1028_v60 = vpop.f32.mrb[82].mxu0  ;;  %v1344_v56 = vpop.f32.mrb[82].mxu1 }
 0x18a   : > { %1483 = vst [vmem:[%s2802_s27 + $0x70] sm:$0xff] %v1458_v10  ;;  %v1434_v57 = vadd.f32 %v2793_v50, %v1403_v59  ;;  %v1088_v9 = vmax.f32 %v2943_v8, %v1028_v60  ;;  %v2054_v15 = vpop.f32.mrb[83].mxu0  ;;  %v2133_v28 = vpop.f32.mrb[83].mxu1 }
 0x18c   : > { %v1459_v29 = vmax.f32 %v1434_v57, 0.0  ;;  %v1404_v7 = vmax.f32 %v1088_v9, %v1344_v56  ;;  %v2949_v57 = vmax.f32 %v2768_v26, %v2770_v37 }
 0x18d   : > { %v1033_v11 = vpop.f32.mrb[84].mxu0  ;;  %v1349_v25 = vpop.f32.mrb[84].mxu1 }
 0x18e   : > { %1484 = vst [vmem:[%s2802_s27 + $0x78] sm:$0xff] %v1459_v29  ;;  %v1435_v12 = vadd.f32 %v2793_v50, %v1404_v7  ;;  %v1089_v35 = vmax.f32 %v2944_v40, %v1033_v11  ;;  %v2057_v53 = vpop.f32.mrb[85].mxu0  ;;  %v2136_v30 = vpop.f32.mrb[85].mxu1  ;;  %v2950_v11 = vmax.f32 %v2774_v0, %v2776_v1 }
 0x190   : > { %v1460_v13 = vmax.f32 %v1435_v12, 0.0  ;;  %v1405_v21 = vmax.f32 %v1089_v35, %v1349_v25 }
 0x191   : > { %v1038_v22 = vpop.f32.mrb[86].mxu0  ;;  %v1354_v33 = vpop.f32.mrb[86].mxu1 }
 0x192   : > { %1485 = vst [vmem:[%s2802_s27 + $0x80] sm:$0xff] %v1460_v13  ;;  %v1436_v34 = vadd.f32 %v2793_v50, %v1405_v21  ;;  %v1090_v61 = vmax.f32 %v2945_v14, %v1038_v22  ;;  %v2060_v62 = vpop.f32.mrb[87].mxu0  ;;  %v2139_v42 = vpop.f32.mrb[87].mxu1  ;;  %v2951_v13 = vmax.f32 %v2780_v31, %v2782_v20 }
 0x194   : > { %v1461_v43 = vmax.f32 %v1436_v34, 0.0  ;;  %v1406_v32 = vmax.f32 %v1090_v61, %v1354_v33 }
 0x195   : > { %v1043_v36 = vpop.f32.mrb[88].mxu0  ;;  %v1359_v44 = vpop.f32.mrb[88].mxu1 }
 0x196   : > { %1486 = vst [vmem:[%s2802_s27 + $0x88] sm:$0xff] %v1461_v43  ;;  %v1437_v51 = vadd.f32 %v2793_v50, %v1406_v32  ;;  %v1091_v39 = vmax.f32 %v2946_v38, %v1043_v36  ;;  %v2063_v52 = vpop.f32.mrb[89].mxu0  ;;  %v2142_v18 = vpop.f32.mrb[89].mxu1 }
 0x198   : > { %v1462_v19 = vmax.f32 %v1437_v51, 0.0  ;;  %v1407_v54 = vmax.f32 %v1091_v39, %v1359_v44 }
 0x199   : > { %v1048_v55 = vpop.f32.mrb[90].mxu0  ;;  %v1364_v58 = vpop.f32.mrb[90].mxu1 }
 0x19a   : > { %1487 = vst [vmem:[%s2802_s27 + $0x90] sm:$0xff] %v1462_v19  ;;  %v1438_v5 = vadd.f32 %v2793_v50, %v1407_v54  ;;  %v1092_v3 = vmax.f32 %v2947_v2, %v1048_v55  ;;  %v2066_v46 = vpop.f32.mrb[91].mxu0  ;;  %v2145_v49 = vpop.f32.mrb[91].mxu1 }
 0x19c   : > { %v1463_v63 = vmax.f32 %v1438_v5, 0.0  ;;  %v1408_v17 = vmax.f32 %v1092_v3, %v1364_v58 }
 0x19d   : > { %v1053_v27 = vpop.f32.mrb[92].mxu0  ;;  %v1369_v47 = vpop.f32.mrb[92].mxu1 }
 0x19e   : > { %1488 = vst [vmem:[%s2802_s27 + $0x98] sm:$0xff] %v1463_v63  ;;  %v1439_v48 = vadd.f32 %v2793_v50, %v1408_v17  ;;  %v1093_v24 = vmax.f32 %v2948_v23, %v1053_v27  ;;  %v2069_v4 = vpop.f32.mrb[93].mxu0  ;;  %v2148_v10 = vpop.f32.mrb[93].mxu1 }
 0x1a0   : > { %v1464_v59 = vmax.f32 %v1439_v48, 0.0  ;;  %v1409_v41 = vmax.f32 %v1093_v24, %v1369_v47 }
 0x1a1   : > { %v1058_v45 = vpop.f32.mrb[94].mxu0  ;;  %v1374_v60 = vpop.f32.mrb[94].mxu1 }
 0x1a2   : > { %1489 = vst [vmem:[%s2802_s27 + $0xa0] sm:$0xff] %v1464_v59  ;;  %v1440_v56 = vadd.f32 %v2793_v50, %v1409_v41  ;;  %v1094_v8 = vmax.f32 %v2949_v57, %v1058_v45  ;;  %v2072_v9 = vpop.f32.mrb[95].mxu0  ;;  %v2151_v15 = vpop.f32.mrb[95].mxu1 }
 0x1a4   : > { %v1465_v28 = vmax.f32 %v1440_v56, 0.0  ;;  %v1410_v6 = vmax.f32 %v1094_v8, %v1374_v60 }
 0x1a5   : > { %v1063_v16 = vpop.f32.mrb[96].mxu0  ;;  %v1379_v29 = vpop.f32.mrb[96].mxu1 }
 0x1a6   : > { %1490 = vst [vmem:[%s2802_s27 + $0xa8] sm:$0xff] %v1465_v28  ;;  %v1441_v7 = vadd.f32 %v2793_v50, %v1410_v6  ;;  %v1095_v25 = vmax.f32 %v2950_v11, %v1063_v16  ;;  %v2075_v12 = vpop.f32.mrb[97].mxu0  ;;  %v2154_v40 = vpop.f32.mrb[97].mxu1 }
 0x1a8   : > { %v1466_v26 = vmax.f32 %v1441_v7, 0.0  ;;  %v1411_v37 = vmax.f32 %v1095_v25, %v1379_v29 }
 0x1a9   : > { %v1068_v35 = vpop.f32.mrb[98].mxu0  ;;  %v1384_v53 = vpop.f32.mrb[98].mxu1 }
 0x1aa   : > { %1491 = vst [vmem:[%s2802_s27 + $0xb0] sm:$0xff] %v1466_v26  ;;  %v1442_v30 = vadd.f32 %v2793_v50, %v1411_v37  ;;  %v1096_v21 = vmax.f32 %v2951_v13, %v1068_v35  ;;  %v2078_v22 = vpop.f32.mrb[99].mxu0  ;;  %v2157_v33 = vpop.f32.mrb[99].mxu1 }
 0x1ac   : > { %v1467_v34 = vmax.f32 %v1442_v30, 0.0  ;;  %v1412_v14 = vmax.f32 %v1096_v21, %v1384_v53 }
 0x1ae   : > { %1492 = vst [vmem:[%s2802_s27 + $0xb8] sm:$0xff] %v1467_v34  ;;  %v1443_v0 = vadd.f32 %v2793_v50, %v1412_v14 }
 0x1b0   : > { %v1468_v1 = vmax.f32 %v1443_v0, 0.0 }
 0x1b2   : > { %1493 = vst [vmem:[%s2802_s27 + $0xc0] sm:$0xf] %v1468_v1 }
 0x1b3 PF: > { %s13_s12 = sadd.s32 1, %s2189_s12  }
 0x1b4   : > { %p10_p4 = scmp.ge.s32.totalorder %s13_s12, 4  }
 0x1b6   :  { %12 = sbr.rel (!%p10_p4) target bundleno = 1 (0x1), region = 65 }

// kernel: cnn_forward.4
= control target key start
LH: loop header
LB: loop body
LE: loop exit
PB: predicated region body
PF: predicated region fallthrough
CT: control target
= control target key end

     0   :  { %s8706_s12 = smov 0   ;;  %s10917_s0 = inlined_call_operand.vmem [shape: f32[2,16,49,128], index: 0, kind: input, shape index: {}]   ;;  %s10918_s1 = inlined_call_operand.vmem [shape: f32[9,128,128], index: 1, kind: input, shape index: {}]   ;;  %s10919_s2 = inlined_call_operand.vmem [shape: f32[1,128], index: 2, kind: input, shape index: {}]   ;;  %s10920_s3 = inlined_call_operand.vmem [shape: f32[2,49,128], index: 3, kind: output, shape index: {}]  }
   0x1 LB: > { %s4350_s13 = sadd.s32 4294967295, %s8681_s12   ;;  %p4354_p0 = scmp.ge.s32.totalorder %s8681_s12, 1  ;;  %s8681_s12 = sphi %s8706_s12, %s13_s12  }
   0x2   : > { %p137_p1 = scmp.lt.s32.totalorder %s8681_s12, 3 }
   0x4   : > { %p138_p2 = pnand %p4354_p0, %p137_p1 }
   0x5   : > { %v4378_v0 = vld [vmem:[%s10918_s1 + $0x80] sm:$0xff] (!%p138_p2)  ;;  %v4379_v1 = vld [vmem:[%s10918_s1 + $0x88] sm:$0xff] (!%p138_p2)  ;;  %v4380_v2 = vld [vmem:[%s10918_s1 + $0x90] sm:$0xff] (!%p138_p2)  ;;  %v8683_v3 = vmov (!%p138_p2), 0.0|0.0   ;;  %vm8684_vm0 = vmmov (!%p138_p2), 0   ;;  %v8685_v6 = vmov (!%p138_p2), 0.0  }
   0x6   : > { %141 = sbr.rel (%p138_p2) target bundleno = 828 (0x33c), region = 32  ;;  %7329 = vmatprep.subr.bf16.mxu0 (!%p138_p2), %v8683_v3  ;;  %7377 = vmatprep.subr.bf16.mxu1 (!%p138_p2), %v8683_v3  ;;  %v8725_v4 = vpack.c.bf16 (!%p138_p2), %v4379_v1, %v4378_v0  ;;  %v4381_v5 = vld [vmem:[%s10918_s1 + $0x98] sm:$0xff] (!%p138_p2)  ;;  %v4382_v8 = vld [vmem:[%s10918_s1 + $0xa0] sm:$0xff] (!%p138_p2)  ;;  %v4383_v9 = vld [vmem:[%s10918_s1 + $0xa8] sm:$0xff] (!%p138_p2)  ;;  %p161_p3 = scmp.lt.s32.totalorder (!%p138_p2), %s4350_s13, 1 }
   0x7   : > { %5453 = vmatprep.mubr.msk.f32.mxu0 (!%p138_p2), %vm8684_vm0, %v8685_v6  ;;  %5559 = vmatprep.mubr.msk.f32.mxu1 (!%p138_p2), %vm8684_vm0, %v8685_v6  ;;  %v8736_v7 = vpack.c.bf16 (!%p138_p2), %v4381_v5, %v4380_v2  ;;  %v8748_v10 = vpack.c.bf16 (!%p138_p2), %v4383_v9, %v4382_v8  ;;  %v4384_v11 = vld [vmem:[%s10918_s1 + $0xb0] sm:$0xff] (!%p138_p2)  ;;  %v4385_v12 = vld [vmem:[%s10918_s1 + $0xb8] sm:$0xff] (!%p138_p2)  ;;  %v4386_v14 = vld [vmem:[%s10918_s1 + $0xc0] sm:$0xff] (!%p138_p2) }
   0x8   : > { %7331 = vmatpush3.bf16.msra.mxu0 (!%p138_p2), %v8725_v4  ;;  %7379 = vmatpush3.bf16.msra.mxu1 (!%p138_p2), %v8725_v4  ;;  %v8760_v13 = vpack.c.bf16 (!%p138_p2), %v4385_v12, %v4384_v11  ;;  %v4387_v15 = vld [vmem:[%s10918_s1 + $0xc8] sm:$0xff] (!%p138_p2)  ;;  %v4388_v17 = vld [vmem:[%s10918_s1 + $0xd0] sm:$0xff] (!%p138_p2)  ;;  %v4389_v18 = vld [vmem:[%s10918_s1 + $0xd8] sm:$0xff] (!%p138_p2) }
   0x9   : > { %7332 = vmatprep.subr.bf16.mxu0 (!%p138_p2), %v8683_v3  ;;  %7380 = vmatprep.subr.bf16.mxu1 (!%p138_p2), %v8683_v3  ;;  %v8772_v16 = vpack.c.bf16 (!%p138_p2), %v4387_v15, %v4386_v14  ;;  %v8786_v19 = vpack.c.bf16 (!%p138_p2), %v4389_v18, %v4388_v17  ;;  %v4390_v20 = vld [vmem:[%s10918_s1 + $0xe0] sm:$0xff] (!%p138_p2)  ;;  %v4391_v21 = vld [vmem:[%s10918_s1 + $0xe8] sm:$0xff] (!%p138_p2)  ;;  %v4392_v23 = vld [vmem:[%s10918_s1 + $0xf0] sm:$0xff] (!%p138_p2) }
   0xa   : > { %v8802_v22 = vpack.c.bf16 (!%p138_p2), %v4391_v21, %v4390_v20  ;;  %v4393_v24 = vld [vmem:[%s10918_s1 + $0xf8] sm:$0xff] (!%p138_p2)  ;;  %v172_v26 = vld [vmem:[%s10918_s1] sm:$0xff] (!%p138_p2)  ;;  %v173_v27 = vld [vmem:[%s10918_s1 + $0x8] sm:$0xff] (!%p138_p2) }
   0xb   : > { %v8815_v25 = vpack.c.bf16 (!%p138_p2), %v4393_v24, %v4392_v23  ;;  %v8835_v29 = vpack.c.bf16 (!%p138_p2), %v173_v27, %v172_v26  ;;  %v174_v31 = vld [vmem:[%s10918_s1 + $0x10] sm:$0xff] (!%p138_p2)  ;;  %v175_v32 = vld [vmem:[%s10918_s1 + $0x18] sm:$0xff] (!%p138_p2)  ;;  %v176_v36 = vld [vmem:[%s10918_s1 + $0x20] sm:$0xff] (!%p138_p2) }
   0xc   : > { %7334 = vmatpush3.bf16.msra.mxu0 (!%p138_p2), %v8736_v7  ;;  %7382 = vmatpush3.bf16.msra.mxu1 (!%p138_p2), %v8736_v7  ;;  %v8852_v33 = vpack.c.bf16 (!%p138_p2), %v175_v32, %v174_v31  ;;  %v177_v37 = vld [vmem:[%s10918_s1 + $0x28] sm:$0xff] (!%p138_p2)  ;;  %v178_v41 = vld [vmem:[%s10918_s1 + $0x30] sm:$0xff] (!%p138_p2)  ;;  %v179_v42 = vld [vmem:[%s10918_s1 + $0x38] sm:$0xff] (!%p138_p2) }
   0xd   : > { %7335 = vmatprep.subr.bf16.mxu0 %v8683_v3  ;;  %7383 = vmatprep.subr.bf16.mxu1 %v8683_v3  ;;  %s10922_s13 = smov (!%p161_p3, %s4350_s13), 1  ;;  %v8876_v38 = vpack.c.bf16 %v177_v37, %v176_v36  ;;  %v8900_v43 = vpack.c.bf16 %v179_v42, %v178_v41  ;;  %v180_v46 = vld [vmem:[%s10918_s1 + $0x40] sm:$0xff]  ;;  %v181_v47 = vld [vmem:[%s10918_s1 + $0x48] sm:$0xff]  ;;  %v182_v51 = vld [vmem:[%s10918_s1 + $0x50] sm:$0xff] }
   0xe   : > { %s8641_s21 = smul.u32 896, %s10922_s13  ;;  %v8924_v48 = vpack.c.bf16 %v181_v47, %v180_v46  ;;  %v183_v52 = vld [vmem:[%s10918_s1 + $0x58] sm:$0xff]  ;;  %v184_v56 = vld [vmem:[%s10918_s1 + $0x60] sm:$0xff]  ;;  %v185_v57 = vld [vmem:[%s10918_s1 + $0x68] sm:$0xff] }
   0xf   : > { %v8948_v53 = vpack.c.bf16 %v183_v52, %v182_v51  ;;  %v8972_v58 = vpack.c.bf16 %v185_v57, %v184_v56  ;;  %v186_v61 = vld [vmem:[%s10918_s1 + $0x70] sm:$0xff]  ;;  %v187_v62 = vld [vmem:[%s10918_s1 + $0x78] sm:$0xff]  ;;  %v4408_v23 = vld [vmem:[%s10918_s1 + $0x100] sm:$0xff] }
  0x10   : > { %7337 = vmatpush3.bf16.msra.mxu0 %v8748_v10  ;;  %7385 = vmatpush3.bf16.msra.mxu1 %v8748_v10  ;;  %s8822_s24 = scalar_lea.vmem %s10917_s0, %s8641_s21  ;;  %v8996_v63 = vpack.c.bf16 %v187_v62, %v186_v61  ;;  %v4409_v24 = vld [vmem:[%s10918_s1 + $0x108] sm:$0xff]  ;;  %v4410_v27 = vld [vmem:[%s10918_s1 + $0x110] sm:$0xff]  ;;  %v4412_v32 = vld [vmem:[%s10918_s1 + $0x120] sm:$0xff] }
  0x11   : > { %7338 = vmatprep.subr.bf16.mxu0 %v8683_v3  ;;  %7386 = vmatprep.subr.bf16.mxu1 %v8683_v3  ;;  %v8833_v28 = vld [vmem:[%s8822_s24 + $0x38] sm:$0xff]  ;;  %v8838_v30 = vld [vmem:[%s8822_s24 + $0x70] sm:$0xff]  ;;  %v8855_v34 = vld [vmem:[%s8822_s24 + $0x40] sm:$0xff]  ;;  %v9205_v26 = vpack.c.bf16 %v4409_v24, %v4408_v23 }
  0x12   : > { %v8858_v35 = vld [vmem:[%s8822_s24 + $0x78] sm:$0xff]  ;;  %v8879_v39 = vld [vmem:[%s8822_s24 + $0x48] sm:$0xff]  ;;  %v8882_v40 = vld [vmem:[%s8822_s24 + $0x80] sm:$0xff] }
  0x13   : > { %v8903_v44 = vld [vmem:[%s8822_s24 + $0x50] sm:$0xff]  ;;  %v8906_v45 = vld [vmem:[%s8822_s24 + $0x88] sm:$0xff]  ;;  %v8927_v49 = vld [vmem:[%s8822_s24 + $0x58] sm:$0xff] }
  0x14   : > { %7340 = vmatpush3.bf16.msra.mxu0 %v8760_v13  ;;  %7388 = vmatpush3.bf16.msra.mxu1 %v8760_v13  ;;  %v8930_v50 = vld [vmem:[%s8822_s24 + $0x90] sm:$0xff]  ;;  %v8951_v54 = vld [vmem:[%s8822_s24 + $0x60] sm:$0xff]  ;;  %v8954_v55 = vld [vmem:[%s8822_s24 + $0x98] sm:$0xff] }
  0x15   : > { %7341 = vmatprep.subr.bf16.mxu0 %v8683_v3  ;;  %7389 = vmatprep.subr.bf16.mxu1 %v8683_v3  ;;  %v8975_v59 = vld [vmem:[%s8822_s24 + $0x68] sm:$0x1]  ;;  %v8978_v60 = vld [vmem:[%s8822_s24 + $0xa0] sm:$0x1]  ;;  %v190_v2 = vld [vmem:[%s8822_s24 + $0x10] sm:$0xff] }
  0x16   : > { %v188_v0 = vld [vmem:[%s8822_s24] sm:$0xff]  ;;  %v189_v1 = vld [vmem:[%s8822_s24 + $0x8] sm:$0xff]  ;;  %v194_v8 = vld [vmem:[%s8822_s24 + $0x30] sm:$0x1] }
  0x17   : > { %v192_v5 = vld [vmem:[%s8822_s24 + $0x20] sm:$0xff]  ;;  %v9081_v9 = vld [vmem:[%s8822_s24 + $0x118] sm:$0xff]  ;;  %v9125_v15 = vld [vmem:[%s8822_s24 + $0x130] sm:$0xff] }
  0x18   : > { %7343 = vmatpush3.bf16.msra.mxu0 %v8772_v16  ;;  %7391 = vmatpush3.bf16.msra.mxu1 %v8772_v16  ;;  %v9093_v11 = vld [vmem:[%s8822_s24 + $0x120] sm:$0xff]  ;;  %v9096_v12 = vld [vmem:[%s8822_s24 + $0x158] sm:$0xff]  ;;  %v9144_v18 = vld [vmem:[%s8822_s24 + $0x170] sm:$0xff] }
  0x19   : > { %7344 = vmatprep.subr.bf16.mxu0 %v8683_v3  ;;  %7392 = vmatprep.subr.bf16.mxu1 %v8683_v3  ;;  %v9112_v14 = vld [vmem:[%s8822_s24 + $0x160] sm:$0xff]  ;;  %v9141_v17 = vld [vmem:[%s8822_s24 + $0x138] sm:$0xff]  ;;  %v9173_v21 = vld [vmem:[%s8822_s24 + $0x148] sm:$0x1] }
  0x1a   : > { %v9160_v20 = vld [vmem:[%s8822_s24 + $0x178] sm:$0xff]  ;;  %v9222_v31 = vld [vmem:[%s8822_s24 + $0xe8] sm:$0xff]  ;;  %v9243_v36 = vld [vmem:[%s8822_s24 + $0xf0] sm:$0xff] }
  0x1b   : > { %v4414_v37 = vld [vmem:[%s10918_s1 + $0x130] sm:$0xff]  ;;  %v9264_v41 = vld [vmem:[%s8822_s24 + $0xf8] sm:$0xff]  ;;  %v4416_v42 = vld [vmem:[%s10918_s1 + $0x140] sm:$0xff] }
  0x1c   : > { %7346 = vmatpush3.bf16.msra.mxu0 %v8786_v19  ;;  %7394 = vmatpush3.bf16.msra.mxu1 %v8786_v19  ;;  %v9285_v46 = vld [vmem:[%s8822_s24 + $0x100] sm:$0xff]  ;;  %v4418_v47 = vld [vmem:[%s10918_s1 + $0x150] sm:$0xff]  ;;  %v9306_v51 = vld [vmem:[%s8822_s24 + $0x108] sm:$0xff] }
  0x1d   : > { %7347 = vmatprep.subr.bf16.mxu0 %v8683_v3  ;;  %7395 = vmatprep.subr.bf16.mxu1 %v8683_v3  ;;  %v4420_v52 = vld [vmem:[%s10918_s1 + $0x160] sm:$0xff]  ;;  %v9327_v56 = vld [vmem:[%s8822_s24 + $0x110] sm:$0x1]  ;;  %v4424_v61 = vld [vmem:[%s8822_s24 + $0xa8] sm:$0xff] }
  0x1e   : > { %v4422_v57 = vld [vmem:[%s10918_s1 + $0x170] sm:$0xff]  ;;  %v9476_v24 = vld [vmem:[%s8822_s24 + $0x198] sm:$0xff] }
  0x1f   : > { %v4425_v62 = vld [vmem:[%s8822_s24 + $0xb0] sm:$0xff] }
  0x20   : > { %7349 = vmatpush3.bf16.msra.mxu0 %v8802_v22  ;;  %7397 = vmatpush3.bf16.msra.mxu1 %v8802_v22 }
  0x21   : > { %7350 = vmatprep.subr.bf16.mxu0 %v8683_v3  ;;  %7398 = vmatprep.subr.bf16.mxu1 %v8683_v3 }
  0x24   : > { %7352 = vmatpush3.bf16.msra.mxu0 %v8815_v25  ;;  %7400 = vmatpush3.bf16.msra.mxu1 %v8815_v25 }
  0x25   : > { %7353 = vmatprep.subr.bf16.mxu0 %v8683_v3  ;;  %7401 = vmatprep.subr.bf16.mxu1 %v8683_v3 }
  0x27   : > { %5454 = vmatmul.mubr.f32.vlgmr.msra.gmra.mrb[0].mxu0 %v8833_v28  ;;  %5560 = vmatmul.mubr.f32.vlgmr.msra.gmra.mrb[0].mxu1 %v8838_v30 }
  0x28   : > { %7355 = vmatpush3.bf16.msra.mxu0 %v8835_v29  ;;  %7403 = vmatpush3.bf16.msra.mxu1 %v8835_v29 }
  0x29   : > { %7356 = vmatprep.subr.bf16.mxu0 %v8683_v3  ;;  %7404 = vmatprep.subr.bf16.mxu1 %v8683_v3 }
  0x2a   : > { %5456 = vmatprep.mubr.msk.f32.mxu0 %vm8684_vm0, %v8685_v6  ;;  %5562 = vmatprep.mubr.msk.f32.mxu1 %vm8684_vm0, %v8685_v6 }
  0x2b   : > { %5457 = vmatmul.mubr.f32.gmra.mrb[2].mxu0 %v8855_v34  ;;  %5563 = vmatmul.mubr.f32.gmra.mrb[2].mxu1 %v8858_v35 }
  0x2c   : > { %7358 = vmatpush3.bf16.msra.mxu0 %v8852_v33  ;;  %7406 = vmatpush3.bf16.msra.mxu1 %v8852_v33 }
  0x2d   : > { %7359 = vmatprep.subr.bf16.mxu0 %v8683_v3  ;;  %7407 = vmatprep.subr.bf16.mxu1 %v8683_v3 }
  0x2e   : > { %5459 = vmatprep.mubr.msk.f32.mxu0 %vm8684_vm0, %v8685_v6  ;;  %5565 = vmatprep.mubr.msk.f32.mxu1 %vm8684_vm0, %v8685_v6 }
  0x2f   : > { %5460 = vmatmul.mubr.f32.gmra.mrb[4].mxu0 %v8879_v39  ;;  %5566 = vmatmul.mubr.f32.gmra.mrb[4].mxu1 %v8882_v40 }
  0x30   : > { %7361 = vmatpush3.bf16.msra.mxu0 %v8876_v38  ;;  %7409 = vmatpush3.bf16.msra.mxu1 %v8876_v38 }
  0x31   : > { %7362 = vmatprep.subr.bf16.mxu0 %v8683_v3  ;;  %7410 = vmatprep.subr.bf16.mxu1 %v8683_v3 }
  0x32   : > { %5462 = vmatprep.mubr.msk.f32.mxu0 %vm8684_vm0, %v8685_v6  ;;  %5568 = vmatprep.mubr.msk.f32.mxu1 %vm8684_vm0, %v8685_v6 }
  0x33   : > { %5463 = vmatmul.mubr.f32.gmra.mrb[6].mxu0 %v8903_v44  ;;  %5569 = vmatmul.mubr.f32.gmra.mrb[6].mxu1 %v8906_v45 }
  0x34   : > { %7364 = vmatpush3.bf16.msra.mxu0 %v8900_v43  ;;  %7412 = vmatpush3.bf16.msra.mxu1 %v8900_v43 }
  0x35   : > { %7365 = vmatprep.subr.bf16.mxu0 %v8683_v3  ;;  %7413 = vmatprep.subr.bf16.mxu1 %v8683_v3 }
  0x36   : > { %5465 = vmatprep.mubr.msk.f32.mxu0 %vm8684_vm0, %v8685_v6  ;;  %5571 = vmatprep.mubr.msk.f32.mxu1 %vm8684_vm0, %v8685_v6 }
  0x37   : > { %5466 = vmatmul.mubr.f32.gmra.mrb[8].mxu0 %v8927_v49  ;;  %5572 = vmatmul.mubr.f32.gmra.mrb[8].mxu1 %v8930_v50 }
  0x38   : > { %7367 = vmatpush3.bf16.msra.mxu0 %v8924_v48  ;;  %7415 = vmatpush3.bf16.msra.mxu1 %v8924_v48 }
  0x39   : > { %7368 = vmatprep.subr.bf16.mxu0 %v8683_v3  ;;  %7416 = vmatprep.subr.bf16.mxu1 %v8683_v3 }
  0x3a   : > { %5468 = vmatprep.mubr.msk.f32.mxu0 %vm8684_vm0, %v8685_v6  ;;  %5574 = vmatprep.mubr.msk.f32.mxu1 %vm8684_vm0, %v8685_v6 }
  0x3b   : > { %5469 = vmatmul.mubr.f32.gmra.mrb[10].mxu0 %v8951_v54  ;;  %5575 = vmatmul.mubr.f32.gmra.mrb[10].mxu1 %v8954_v55 }
  0x3c   : > { %7370 = vmatpush3.bf16.msra.mxu0 %v8948_v53  ;;  %7418 = vmatpush3.bf16.msra.mxu1 %v8948_v53 }
  0x3d   : > { %7371 = vmatprep.subr.bf16.mxu0 %v8683_v3  ;;  %7419 = vmatprep.subr.bf16.mxu1 %v8683_v3 }
  0x3e   : > { %5471 = vmatprep.mubr.msk.f32.mxu0 %vm8684_vm0, %v8685_v6  ;;  %5577 = vmatprep.mubr.msk.f32.mxu1 %vm8684_vm0, %v8685_v6 }
  0x3f   : > { %5472 = vmatmul.mubr.f32.gmra.mrb[12].mxu0 %v8975_v59  ;;  %5578 = vmatmul.mubr.f32.gmra.mrb[12].mxu1 %v8978_v60 }
  0x40   : > { %7373 = vmatpush3.bf16.msra.mxu0 %v8972_v58  ;;  %7421 = vmatpush3.bf16.msra.mxu1 %v8972_v58 }
  0x41   : > { %7374 = vmatprep.subr.bf16.mxu0 %v8683_v3  ;;  %7422 = vmatprep.subr.bf16.mxu1 %v8683_v3 }
  0x42   : > { %5506 = vmatprep.mubr.msk.f32.mxu0 %vm8684_vm0, %v8685_v6  ;;  %5612 = vmatprep.mubr.msk.f32.mxu1 %vm8684_vm0, %v8685_v6 }
  0x44   : > { %7376 = vmatpush3.bf16.msra.mxu0 %v8996_v63  ;;  %7424 = vmatpush3.bf16.msra.mxu1 %v8996_v63 }
  0x45   : > { %7425 = vmatprep.subr.bf16.mxu0 %v8683_v3  ;;  %7473 = vmatprep.subr.bf16.mxu1 %v8683_v3 }
  0x47   : > { %5507 = vmatmul.mubr.f32.vlgmr.msra.gmra.mrb[0].mxu0 %v188_v0  ;;  %5613 = vmatmul.mubr.f32.vlgmr.msra.gmra.mrb[0].mxu1 %v8833_v28  ;;  %v4411_v28 = vld [vmem:[%s10918_s1 + $0x118] sm:$0xff] }
  0x48   : > { %7427 = vmatpush3.bf16.msra.mxu0 %v8725_v4  ;;  %7475 = vmatpush3.bf16.msra.mxu1 %v8725_v4  ;;  %v191_v4 = vld [vmem:[%s8822_s24 + $0x18] sm:$0xff] }
  0x49   : > { %7428 = vmatprep.subr.bf16.mxu0 %v8683_v3  ;;  %7476 = vmatprep.subr.bf16.mxu1 %v8683_v3 }
  0x4a   : > { %5509 = vmatprep.mubr.msk.f32.mxu0 %vm8684_vm0, %v8685_v6  ;;  %5615 = vmatprep.mubr.msk.f32.mxu1 %vm8684_vm0, %v8685_v6 }
  0x4b   : > { %5510 = vmatmul.mubr.f32.gmra.mrb[2].mxu0 %v189_v1  ;;  %5616 = vmatmul.mubr.f32.gmra.mrb[2].mxu1 %v8855_v34  ;;  %v4440_v1 = vld [vmem:[%s10918_s1 + $0x190] sm:$0xff] }
  0x4c   : > { %7430 = vmatpush3.bf16.msra.mxu0 %v8736_v7  ;;  %7478 = vmatpush3.bf16.msra.mxu1 %v8736_v7  ;;  %v193_v7 = vld [vmem:[%s8822_s24 + $0x28] sm:$0xff] }
  0x4d   : > { %7431 = vmatprep.subr.bf16.mxu0 %v8683_v3  ;;  %7479 = vmatprep.subr.bf16.mxu1 %v8683_v3 }
  0x4e   : > { %5512 = vmatprep.mubr.msk.f32.mxu0 %vm8684_vm0, %v8685_v6  ;;  %5618 = vmatprep.mubr.msk.f32.mxu1 %vm8684_vm0, %v8685_v6 }
  0x4f   : > { %5513 = vmatmul.mubr.f32.gmra.mrb[4].mxu0 %v190_v2  ;;  %5619 = vmatmul.mubr.f32.gmra.mrb[4].mxu1 %v8879_v39  ;;  %v4441_v2 = vld [vmem:[%s10918_s1 + $0x198] sm:$0xff] }
  0x50   : > { %7433 = vmatpush3.bf16.msra.mxu0 %v8748_v10  ;;  %7481 = vmatpush3.bf16.msra.mxu1 %v8748_v10  ;;  %v9084_v10 = vld [vmem:[%s8822_s24 + $0x150] sm:$0xff] }
  0x51   : > { %7434 = vmatprep.subr.bf16.mxu0 %v8683_v3  ;;  %7482 = vmatprep.subr.bf16.mxu1 %v8683_v3 }
  0x52   : > { %5515 = vmatprep.mubr.msk.f32.mxu0 %vm8684_vm0, %v8685_v6  ;;  %5621 = vmatprep.mubr.msk.f32.mxu1 %vm8684_vm0, %v8685_v6 }
  0x53   : > { %5516 = vmatmul.mubr.f32.gmra.mrb[6].mxu0 %v191_v4  ;;  %5622 = vmatmul.mubr.f32.gmra.mrb[6].mxu1 %v8903_v44  ;;  %v9452_v4 = vpack.c.bf16 %v4441_v2, %v4440_v1  ;;  %v4476_v1 = vld [vmem:[%s10918_s1 + $0x240] sm:$0xff]  ;;  %v4477_v2 = vld [vmem:[%s10918_s1 + $0x248] sm:$0xff] }
  0x54   : > { %7436 = vmatpush3.bf16.msra.mxu0 %v8760_v13  ;;  %7484 = vmatpush3.bf16.msra.mxu1 %v8760_v13  ;;  %v9109_v13 = vld [vmem:[%s8822_s24 + $0x128] sm:$0xff] }
  0x55   : > { %7437 = vmatprep.subr.bf16.mxu0 %v8683_v3  ;;  %7485 = vmatprep.subr.bf16.mxu1 %v8683_v3 }
  0x56   : > { %5518 = vmatprep.mubr.msk.f32.mxu0 %vm8684_vm0, %v8685_v6  ;;  %5624 = vmatprep.mubr.msk.f32.mxu1 %vm8684_vm0, %v8685_v6 }
  0x57   : > { %5519 = vmatmul.mubr.f32.gmra.mrb[8].mxu0 %v192_v5  ;;  %5625 = vmatmul.mubr.f32.gmra.mrb[8].mxu1 %v8927_v49  ;;  %v9455_v5 = vld [vmem:[%s8822_s24 + $0x190] sm:$0xff] }
  0x58   : > { %7439 = vmatpush3.bf16.msra.mxu0 %v8772_v16  ;;  %7487 = vmatpush3.bf16.msra.mxu1 %v8772_v16  ;;  %v9128_v16 = vld [vmem:[%s8822_s24 + $0x168] sm:$0xff] }
  0x59   : > { %7440 = vmatprep.subr.bf16.mxu0 %v8683_v3  ;;  %7488 = vmatprep.subr.bf16.mxu1 %v8683_v3 }
  0x5a   : > { %5521 = vmatprep.mubr.msk.f32.mxu0 %vm8684_vm0, %v8685_v6  ;;  %5627 = vmatprep.mubr.msk.f32.mxu1 %vm8684_vm0, %v8685_v6 }
  0x5b   : > { %5522 = vmatmul.mubr.f32.gmra.mrb[10].mxu0 %v193_v7  ;;  %5628 = vmatmul.mubr.f32.gmra.mrb[10].mxu1 %v8951_v54  ;;  %v4442_v7 = vld [vmem:[%s10918_s1 + $0x1a0] sm:$0xff] }
  0x5c   : > { %7442 = vmatpush3.bf16.msra.mxu0 %v8786_v19  ;;  %7490 = vmatpush3.bf16.msra.mxu1 %v8786_v19  ;;  %v9157_v19 = vld [vmem:[%s8822_s24 + $0x140] sm:$0xff] }
  0x5d   : > { %7443 = vmatprep.subr.bf16.mxu0 %v8683_v3  ;;  %7491 = vmatprep.subr.bf16.mxu1 %v8683_v3 }
  0x5e   : > { %5524 = vmatprep.mubr.msk.f32.mxu0 %vm8684_vm0, %v8685_v6  ;;  %5630 = vmatprep.mubr.msk.f32.mxu1 %vm8684_vm0, %v8685_v6 }
  0x5f   : > { %5525 = vmatmul.mubr.f32.gmra.mrb[12].mxu0 %v194_v8  ;;  %5631 = vmatmul.mubr.f32.gmra.mrb[12].mxu1 %v8975_v59  ;;  %v4443_v8 = vld [vmem:[%s10918_s1 + $0x1a8] sm:$0xff] }
  0x60   : > { %7445 = vmatpush3.bf16.msra.mxu0 %v8802_v22  ;;  %7493 = vmatpush3.bf16.msra.mxu1 %v8802_v22  ;;  %v9176_v22 = vld [vmem:[%s8822_s24 + $0x180] sm:$0x1]  ;;  %v9473_v23 = vpack.c.bf16 %v4443_v8, %v4442_v7  ;;  %v9766_v8 = vld [vmem:[%s8822_s24 + $0x218] sm:$0xff] }
  0x61   : > { %7446 = vmatprep.subr.bf16.mxu0 %v8683_v3  ;;  %7494 = vmatprep.subr.bf16.mxu1 %v8683_v3  ;;  %v9763_v7 = vld [vmem:[%s8822_s24 + $0x1e0] sm:$0xff] }
  0x62   : > { %5665 = vmatprep.mubr.msk.f32.mxu0 %vm8684_vm0, %v8685_v6  ;;  %5771 = vmatprep.mubr.msk.f32.mxu1 %vm8684_vm0, %v8685_v6 }
  0x64   : > { %7448 = vmatpush3.bf16.msra.mxu0 %v8815_v25  ;;  %7496 = vmatpush3.bf16.msra.mxu1 %v8815_v25  ;;  %v9203_v25 = vld [vmem:[%s8822_s24 + $0xe0] sm:$0xff] }
  0x65   : > { %7449 = vmatprep.subr.bf16.mxu0 %v8683_v3  ;;  %7497 = vmatprep.subr.bf16.mxu1 %v8683_v3 }
  0x67   : > { %5666 = vmatmul.mubr.f32.vlgmr.msra.gmra.mrb[14].mxu0 %v9081_v9  ;;  %5772 = vmatmul.mubr.f32.vlgmr.msra.gmra.mrb[14].mxu1 %v9084_v10 }
  0x68   : > { %7451 = vmatpush3.bf16.msra.mxu0 %v8835_v29  ;;  %7499 = vmatpush3.bf16.msra.mxu1 %v8835_v29  ;;  %v9219_v29 = vpack.c.bf16 %v4411_v28, %v4410_v27  ;;  %v4445_v27 = vld [vmem:[%s10918_s1 + $0x1b8] sm:$0xff] }
  0x69   : > { %7452 = vmatprep.subr.bf16.mxu0 %v8683_v3  ;;  %7500 = vmatprep.subr.bf16.mxu1 %v8683_v3 }
  0x6a   : > { %5668 = vmatprep.mubr.msk.f32.mxu0 %vm8684_vm0, %v8685_v6  ;;  %5774 = vmatprep.mubr.msk.f32.mxu1 %vm8684_vm0, %v8685_v6 }
  0x6b   : > { %5669 = vmatmul.mubr.f32.gmra.mrb[16].mxu0 %v9093_v11  ;;  %5775 = vmatmul.mubr.f32.gmra.mrb[16].mxu1 %v9096_v12 }
  0x6c   : > { %7454 = vmatpush3.bf16.msra.mxu0 %v8852_v33  ;;  %7502 = vmatpush3.bf16.msra.mxu1 %v8852_v33  ;;  %v4413_v33 = vld [vmem:[%s10918_s1 + $0x128] sm:$0xff] }
  0x6d   : > { %7455 = vmatprep.subr.bf16.mxu0 %v8683_v3  ;;  %7503 = vmatprep.subr.bf16.mxu1 %v8683_v3  ;;  %v9240_v34 = vpack.c.bf16 %v4413_v33, %v4412_v32  ;;  %v4446_v32 = vld [vmem:[%s10918_s1 + $0x1c0] sm:$0xff]  ;;  %v4447_v33 = vld [vmem:[%s10918_s1 + $0x1c8] sm:$0xff] }
  0x6e   : > { %5671 = vmatprep.mubr.msk.f32.mxu0 %vm8684_vm0, %v8685_v6  ;;  %5777 = vmatprep.mubr.msk.f32.mxu1 %vm8684_vm0, %v8685_v6 }
  0x6f   : > { %5672 = vmatmul.mubr.f32.gmra.mrb[18].mxu0 %v9109_v13  ;;  %5778 = vmatmul.mubr.f32.gmra.mrb[18].mxu1 %v9112_v14 }
  0x70   : > { %7457 = vmatpush3.bf16.msra.mxu0 %v8876_v38  ;;  %7505 = vmatpush3.bf16.msra.mxu1 %v8876_v38  ;;  %v4415_v38 = vld [vmem:[%s10918_s1 + $0x138] sm:$0xff] }
  0x71   : > { %7458 = vmatprep.subr.bf16.mxu0 %v8683_v3  ;;  %7506 = vmatprep.subr.bf16.mxu1 %v8683_v3  ;;  %v9261_v39 = vpack.c.bf16 %v4415_v38, %v4414_v37  ;;  %v9518_v37 = vld [vmem:[%s8822_s24 + $0x1a8] sm:$0xff]  ;;  %v4448_v38 = vld [vmem:[%s10918_s1 + $0x1d0] sm:$0xff] }
  0x72   : > { %5674 = vmatprep.mubr.msk.f32.mxu0 %vm8684_vm0, %v8685_v6  ;;  %5780 = vmatprep.mubr.msk.f32.mxu1 %vm8684_vm0, %v8685_v6 }
  0x73   : > { %5675 = vmatmul.mubr.f32.gmra.mrb[20].mxu0 %v9125_v15  ;;  %5781 = vmatmul.mubr.f32.gmra.mrb[20].mxu1 %v9128_v16 }
  0x74   : > { %7460 = vmatpush3.bf16.msra.mxu0 %v8900_v43  ;;  %7508 = vmatpush3.bf16.msra.mxu1 %v8900_v43  ;;  %v4417_v43 = vld [vmem:[%s10918_s1 + $0x148] sm:$0xff] }
  0x75   : > { %7461 = vmatprep.subr.bf16.mxu0 %v8683_v3  ;;  %7509 = vmatprep.subr.bf16.mxu1 %v8683_v3  ;;  %v9282_v44 = vpack.c.bf16 %v4417_v43, %v4416_v42  ;;  %v9539_v43 = vld [vmem:[%s8822_s24 + $0x1b0] sm:$0xff] }
  0x76   : > { %5677 = vmatprep.mubr.msk.f32.mxu0 %vm8684_vm0, %v8685_v6  ;;  %5783 = vmatprep.mubr.msk.f32.mxu1 %vm8684_vm0, %v8685_v6 }
  0x77   : > { %5678 = vmatmul.mubr.f32.gmra.mrb[22].mxu0 %v9141_v17  ;;  %5784 = vmatmul.mubr.f32.gmra.mrb[22].mxu1 %v9144_v18 }
  0x78   : > { %7463 = vmatpush3.bf16.msra.mxu0 %v8924_v48  ;;  %7511 = vmatpush3.bf16.msra.mxu1 %v8924_v48  ;;  %v4419_v48 = vld [vmem:[%s10918_s1 + $0x158] sm:$0xff] }
  0x79   : > { %7464 = vmatprep.subr.bf16.mxu0 %v8683_v3  ;;  %7512 = vmatprep.subr.bf16.mxu1 %v8683_v3  ;;  %v9303_v49 = vpack.c.bf16 %v4419_v48, %v4418_v47  ;;  %v4451_v47 = vld [vmem:[%s10918_s1 + $0x1e8] sm:$0xff] }
  0x7a   : > { %5680 = vmatprep.mubr.msk.f32.mxu0 %vm8684_vm0, %v8685_v6  ;;  %5786 = vmatprep.mubr.msk.f32.mxu1 %vm8684_vm0, %v8685_v6 }
  0x7b   : > { %5681 = vmatmul.mubr.f32.gmra.mrb[24].mxu0 %v9157_v19  ;;  %5787 = vmatmul.mubr.f32.gmra.mrb[24].mxu1 %v9160_v20 }
  0x7c   : > { %7466 = vmatpush3.bf16.msra.mxu0 %v8948_v53  ;;  %7514 = vmatpush3.bf16.msra.mxu1 %v8948_v53  ;;  %v4421_v53 = vld [vmem:[%s10918_s1 + $0x168] sm:$0xff] }
  0x7d   : > { %7467 = vmatprep.subr.bf16.mxu0 %v8683_v3  ;;  %7515 = vmatprep.subr.bf16.mxu1 %v8683_v3  ;;  %v9324_v54 = vpack.c.bf16 %v4421_v53, %v4420_v52  ;;  %v4452_v52 = vld [vmem:[%s10918_s1 + $0x1f0] sm:$0xff]  ;;  %v4453_v53 = vld [vmem:[%s10918_s1 + $0x1f8] sm:$0xff] }
  0x7e   : > { %5683 = vmatprep.mubr.msk.f32.mxu0 %vm8684_vm0, %v8685_v6  ;;  %5789 = vmatprep.mubr.msk.f32.mxu1 %vm8684_vm0, %v8685_v6 }
  0x7f   : > { %5684 = vmatmul.mubr.f32.gmra.mrb[26].mxu0 %v9173_v21  ;;  %5790 = vmatmul.mubr.f32.gmra.mrb[26].mxu1 %v9176_v22 }
  0x80   : > { %7469 = vmatpush3.bf16.msra.mxu0 %v8972_v58  ;;  %7517 = vmatpush3.bf16.msra.mxu1 %v8972_v58  ;;  %v4423_v58 = vld [vmem:[%s10918_s1 + $0x178] sm:$0xff] }
  0x81   : > { %7470 = vmatprep.subr.bf16.mxu0 %v8683_v3  ;;  %7518 = vmatprep.subr.bf16.mxu1 %v8683_v3  ;;  %v9345_v59 = vpack.c.bf16 %v4423_v58, %v4422_v57  ;;  %v9691_v58 = vld [vmem:[%s8822_s24 + $0x1c8] sm:$0xff] }
  0x82   : > { %5718 = vmatprep.mubr.msk.f32.mxu0 %vm8684_vm0, %v8685_v6  ;;  %5824 = vmatprep.mubr.msk.f32.mxu1 %vm8684_vm0, %v8685_v6 }
  0x84   : > { %7472 = vmatpush3.bf16.msra.mxu0 %v8996_v63  ;;  %7520 = vmatpush3.bf16.msra.mxu1 %v8996_v63  ;;  %v4439_v63 = vld [vmem:[%s10918_s1 + $0x188] sm:$0xff] }
  0x85   : > { %7521 = vmatprep.subr.bf16.mxu0 %v8683_v3  ;;  %7545 = vmatprep.subr.bf16.mxu1 %v8683_v3 }
  0x87   : > { %5719 = vmatmul.mubr.f32.vlgmr.msra.gmra.mrb[14].mxu0 %v9203_v25  ;;  %5825 = vmatmul.mubr.f32.vlgmr.msra.gmra.mrb[14].mxu1 %v9081_v9 }
  0x88   : > { %7523 = vmatpush3.bf16.msra.mxu0 %v9205_v26  ;;  %7547 = vmatpush3.bf16.msra.mxu1 %v9205_v26 }
  0x89   : > { %7524 = vmatprep.subr.bf16.mxu0 %v8683_v3  ;;  %7548 = vmatprep.subr.bf16.mxu1 %v8683_v3 }
  0x8a   : > { %5721 = vmatprep.mubr.msk.f32.mxu0 %vm8684_vm0, %v8685_v6  ;;  %5827 = vmatprep.mubr.msk.f32.mxu1 %vm8684_vm0, %v8685_v6 }
  0x8b   : > { %5722 = vmatmul.mubr.f32.gmra.mrb[16].mxu0 %v9222_v31  ;;  %5828 = vmatmul.mubr.f32.gmra.mrb[16].mxu1 %v9093_v11 }
  0x8c   : > { %7526 = vmatpush3.bf16.msra.mxu0 %v9219_v29  ;;  %7550 = vmatpush3.bf16.msra.mxu1 %v9219_v29 }
  0x8d   : > { %7527 = vmatprep.subr.bf16.mxu0 %v8683_v3  ;;  %7551 = vmatprep.subr.bf16.mxu1 %v8683_v3 }
  0x8e   : > { %5724 = vmatprep.mubr.msk.f32.mxu0 %vm8684_vm0, %v8685_v6  ;;  %5830 = vmatprep.mubr.msk.f32.mxu1 %vm8684_vm0, %v8685_v6 }
  0x8f   : > { %5725 = vmatmul.mubr.f32.gmra.mrb[18].mxu0 %v9243_v36  ;;  %5831 = vmatmul.mubr.f32.gmra.mrb[18].mxu1 %v9109_v13 }
  0x90   : > { %7529 = vmatpush3.bf16.msra.mxu0 %v9240_v34  ;;  %7553 = vmatpush3.bf16.msra.mxu1 %v9240_v34 }
  0x91   : > { %7530 = vmatprep.subr.bf16.mxu0 %v8683_v3  ;;  %7554 = vmatprep.subr.bf16.mxu1 %v8683_v3 }
  0x92   : > { %5727 = vmatprep.mubr.msk.f32.mxu0 %vm8684_vm0, %v8685_v6  ;;  %5833 = vmatprep.mubr.msk.f32.mxu1 %vm8684_vm0, %v8685_v6 }
  0x93   : > { %5728 = vmatmul.mubr.f32.gmra.mrb[20].mxu0 %v9264_v41  ;;  %5834 = vmatmul.mubr.f32.gmra.mrb[20].mxu1 %v9125_v15 }
  0x94   : > { %7532 = vmatpush3.bf16.msra.mxu0 %v9261_v39  ;;  %7556 = vmatpush3.bf16.msra.mxu1 %v9261_v39 }
  0x95   : > { %7533 = vmatprep.subr.bf16.mxu0 %v8683_v3  ;;  %7557 = vmatprep.subr.bf16.mxu1 %v8683_v3 }
  0x96   : > { %5730 = vmatprep.mubr.msk.f32.mxu0 %vm8684_vm0, %v8685_v6  ;;  %5836 = vmatprep.mubr.msk.f32.mxu1 %vm8684_vm0, %v8685_v6 }
  0x97   : > { %5731 = vmatmul.mubr.f32.gmra.mrb[22].mxu0 %v9285_v46  ;;  %5837 = vmatmul.mubr.f32.gmra.mrb[22].mxu1 %v9141_v17 }
  0x98   : > { %7535 = vmatpush3.bf16.msra.mxu0 %v9282_v44  ;;  %7559 = vmatpush3.bf16.msra.mxu1 %v9282_v44 }
  0x99   : > { %7536 = vmatprep.subr.bf16.mxu0 %v8683_v3  ;;  %7560 = vmatprep.subr.bf16.mxu1 %v8683_v3 }
  0x9a   : > { %5733 = vmatprep.mubr.msk.f32.mxu0 %vm8684_vm0, %v8685_v6  ;;  %5839 = vmatprep.mubr.msk.f32.mxu1 %vm8684_vm0, %v8685_v6 }
  0x9b   : > { %5734 = vmatmul.mubr.f32.gmra.mrb[24].mxu0 %v9306_v51  ;;  %5840 = vmatmul.mubr.f32.gmra.mrb[24].mxu1 %v9157_v19 }
  0x9c   : > { %7538 = vmatpush3.bf16.msra.mxu0 %v9303_v49  ;;  %7562 = vmatpush3.bf16.msra.mxu1 %v9303_v49 }
  0x9d   : > { %7539 = vmatprep.subr.bf16.mxu0 %v8683_v3  ;;  %7563 = vmatprep.subr.bf16.mxu1 %v8683_v3 }
  0x9e   : > { %5736 = vmatprep.mubr.msk.f32.mxu0 %vm8684_vm0, %v8685_v6  ;;  %5842 = vmatprep.mubr.msk.f32.mxu1 %vm8684_vm0, %v8685_v6 }
  0x9f   : > { %5737 = vmatmul.mubr.f32.gmra.mrb[26].mxu0 %v9327_v56  ;;  %5843 = vmatmul.mubr.f32.gmra.mrb[26].mxu1 %v9173_v21 }
  0xa0   : > { %7541 = vmatpush3.bf16.msra.mxu0 %v9324_v54  ;;  %7565 = vmatpush3.bf16.msra.mxu1 %v9324_v54 }
  0xa1   : > { %7542 = vmatprep.subr.bf16.mxu0 %v8683_v3  ;;  %7566 = vmatprep.subr.bf16.mxu1 %v8683_v3 }
  0xa2   : > { %5877 = vmatprep.mubr.msk.f32.mxu0 %vm8684_vm0, %v8685_v6  ;;  %5930 = vmatprep.mubr.msk.f32.mxu1 %vm8684_vm0, %v8685_v6 }
  0xa4   : > { %7544 = vmatpush3.bf16.msra.mxu0 %v9345_v59  ;;  %7568 = vmatpush3.bf16.msra.mxu1 %v9345_v59 }
  0xa5   : > { %7569 = vmatprep.subr.bf16.mxu0 %v8683_v3  ;;  %7593 = vmatprep.subr.bf16.mxu1 %v8683_v3 }
  0xa7   : > { %5878 = vmatmul.mubr.f32.vlgmr.msra.gmra.mrb[0].mxu0 %v8838_v30  ;;  %5931 = vmatmul.mubr.f32.vlgmr.msra.gmra.mrb[0].mxu1 %v4424_v61  ;;  %v4426_v30 = vld [vmem:[%s8822_s24 + $0xb8] sm:$0xff]  ;;  %v4472_v61 = vld [vmem:[%s10918_s1 + $0x220] sm:$0xff] }
  0xa8   : > { %7571 = vmatpush3.bf16.msra.mxu0 %v9205_v26  ;;  %7595 = vmatpush3.bf16.msra.mxu1 %v9205_v26  ;;  %v4444_v26 = vld [vmem:[%s10918_s1 + $0x1b0] sm:$0xff] }
  0xa9   : > { %7572 = vmatprep.subr.bf16.mxu0 %v8683_v3  ;;  %7596 = vmatprep.subr.bf16.mxu1 %v8683_v3  ;;  %v9494_v28 = vpack.c.bf16 %v4445_v27, %v4444_v26  ;;  %v4479_v26 = vld [vmem:[%s10918_s1 + $0x258] sm:$0xff] }
  0xaa   : > { %5880 = vmatprep.mubr.msk.f32.mxu0 %vm8684_vm0, %v8685_v6  ;;  %5933 = vmatprep.mubr.msk.f32.mxu1 %vm8684_vm0, %v8685_v6 }
  0xab   : > { %5881 = vmatmul.mubr.f32.gmra.mrb[2].mxu0 %v8858_v35  ;;  %5934 = vmatmul.mubr.f32.gmra.mrb[2].mxu1 %v4425_v62  ;;  %v4427_v35 = vld [vmem:[%s8822_s24 + $0xc0] sm:$0xff]  ;;  %v4473_v62 = vld [vmem:[%s10918_s1 + $0x228] sm:$0xff] }
  0xac   : > { %7574 = vmatpush3.bf16.msra.mxu0 %v9219_v29  ;;  %7598 = vmatpush3.bf16.msra.mxu1 %v9219_v29  ;;  %v9497_v29 = vld [vmem:[%s8822_s24 + $0x1a0] sm:$0xff] }
  0xad   : > { %7575 = vmatprep.subr.bf16.mxu0 %v8683_v3  ;;  %7599 = vmatprep.subr.bf16.mxu1 %v8683_v3 }
  0xae   : > { %5883 = vmatprep.mubr.msk.f32.mxu0 %vm8684_vm0, %v8685_v6  ;;  %5936 = vmatprep.mubr.msk.f32.mxu1 %vm8684_vm0, %v8685_v6 }
  0xaf   : > { %5884 = vmatmul.mubr.f32.gmra.mrb[4].mxu0 %v8882_v40  ;;  %5937 = vmatmul.mubr.f32.gmra.mrb[4].mxu1 %v4426_v30  ;;  %v4428_v40 = vld [vmem:[%s8822_s24 + $0xc8] sm:$0xff]  ;;  %v9712_v30 = vpack.c.bf16 %v4473_v62, %v4472_v61  ;;  %v10026_v61 = vld [vmem:[%s8822_s24 + $0x258] sm:$0xff]  ;;  %v4503_v62 = vld [vmem:[%s10918_s1 + $0x2e0] sm:$0xff] }
  0xb0   : > { %7577 = vmatpush3.bf16.msra.mxu0 %v9240_v34  ;;  %7601 = vmatpush3.bf16.msra.mxu1 %v9240_v34  ;;  %v9515_v34 = vpack.c.bf16 %v4447_v33, %v4446_v32  ;;  %v9790_v32 = vld [vmem:[%s8822_s24 + $0x220] sm:$0xff] }
  0xb1   : > { %7578 = vmatprep.subr.bf16.mxu0 %v8683_v3  ;;  %7602 = vmatprep.subr.bf16.mxu1 %v8683_v3  ;;  %v4480_v33 = vld [vmem:[%s10918_s1 + $0x260] sm:$0xff] }
  0xb2   : > { %5886 = vmatprep.mubr.msk.f32.mxu0 %vm8684_vm0, %v8685_v6  ;;  %5939 = vmatprep.mubr.msk.f32.mxu1 %vm8684_vm0, %v8685_v6 }
  0xb3   : > { %5887 = vmatmul.mubr.f32.gmra.mrb[6].mxu0 %v8906_v45  ;;  %5940 = vmatmul.mubr.f32.gmra.mrb[6].mxu1 %v4427_v35  ;;  %v4429_v45 = vld [vmem:[%s8822_s24 + $0xd0] sm:$0xff] }
  0xb4   : > { %7580 = vmatpush3.bf16.msra.mxu0 %v9261_v39  ;;  %7604 = vmatpush3.bf16.msra.mxu1 %v9261_v39  ;;  %v4449_v39 = vld [vmem:[%s10918_s1 + $0x1d8] sm:$0xff]  ;;  %v9715_v35 = vld [vmem:[%s8822_s24 + $0x1d0] sm:$0xff] }
  0xb5   : > { %7581 = vmatprep.subr.bf16.mxu0 %v8683_v3  ;;  %7605 = vmatprep.subr.bf16.mxu1 %v8683_v3  ;;  %v9536_v42 = vpack.c.bf16 %v4449_v39, %v4448_v38  ;;  %v9811_v39 = vld [vmem:[%s8822_s24 + $0x1f0] sm:$0x1] }
  0xb6   : > { %5889 = vmatprep.mubr.msk.f32.mxu0 %vm8684_vm0, %v8685_v6  ;;  %5942 = vmatprep.mubr.msk.f32.mxu1 %vm8684_vm0, %v8685_v6 }
  0xb7   : > { %5890 = vmatmul.mubr.f32.gmra.mrb[8].mxu0 %v8930_v50  ;;  %5943 = vmatmul.mubr.f32.gmra.mrb[8].mxu1 %v4428_v40  ;;  %v4430_v50 = vld [vmem:[%s8822_s24 + $0xd8] sm:$0x1]  ;;  %v9718_v40 = vld [vmem:[%s8822_s24 + $0x208] sm:$0xff] }
  0xb8   : > { %7583 = vmatpush3.bf16.msra.mxu0 %v9282_v44  ;;  %7607 = vmatpush3.bf16.msra.mxu1 %v9282_v44  ;;  %v4450_v44 = vld [vmem:[%s10918_s1 + $0x1e0] sm:$0xff] }
  0xb9   : > { %7584 = vmatprep.subr.bf16.mxu0 %v8683_v3  ;;  %7608 = vmatprep.subr.bf16.mxu1 %v8683_v3  ;;  %v9557_v48 = vpack.c.bf16 %v4451_v47, %v4450_v44  ;;  %v4482_v44 = vld [vmem:[%s10918_s1 + $0x270] sm:$0xff]  ;;  %v4483_v47 = vld [vmem:[%s10918_s1 + $0x278] sm:$0xff] }
  0xba   : > { %5892 = vmatprep.mubr.msk.f32.mxu0 %vm8684_vm0, %v8685_v6  ;;  %5945 = vmatprep.mubr.msk.f32.mxu1 %vm8684_vm0, %v8685_v6 }
  0xbb   : > { %5893 = vmatmul.mubr.f32.gmra.mrb[10].mxu0 %v8954_v55  ;;  %5946 = vmatmul.mubr.f32.gmra.mrb[10].mxu1 %v4429_v45  ;;  %v4438_v55 = vld [vmem:[%s10918_s1 + $0x180] sm:$0xff]  ;;  %v4474_v45 = vld [vmem:[%s10918_s1 + $0x230] sm:$0xff] }
  0xbc   : > { %7586 = vmatpush3.bf16.msra.mxu0 %v9303_v49  ;;  %7610 = vmatpush3.bf16.msra.mxu1 %v9303_v49  ;;  %v9438_v0 = vpack.c.bf16 %v4439_v63, %v4438_v55  ;;  %v9560_v49 = vld [vmem:[%s8822_s24 + $0x1b8] sm:$0x1] }
  0xbd   : > { %7587 = vmatprep.subr.bf16.mxu0 %v8683_v3  ;;  %7611 = vmatprep.subr.bf16.mxu1 %v8683_v3  ;;  %v9739_v63 = vld [vmem:[%s8822_s24 + $0x1d8] sm:$0xff] }
  0xbe   : > { %5895 = vmatprep.mubr.msk.f32.mxu0 %vm8684_vm0, %v8685_v6  ;;  %5948 = vmatprep.mubr.msk.f32.mxu1 %vm8684_vm0, %v8685_v6 }
  0xbf   : > { %5896 = vmatmul.mubr.f32.gmra.mrb[12].mxu0 %v8978_v60  ;;  %5949 = vmatmul.mubr.f32.gmra.mrb[12].mxu1 %v4430_v50  ;;  %v9436_v60 = vld [vmem:[%s8822_s24 + $0x188] sm:$0xff]  ;;  %v4475_v50 = vld [vmem:[%s10918_s1 + $0x238] sm:$0xff] }
  0xc0   : > { %7589 = vmatpush3.bf16.msra.mxu0 %v9324_v54  ;;  %7613 = vmatpush3.bf16.msra.mxu1 %v9324_v54  ;;  %v9578_v54 = vpack.c.bf16 %v4453_v53, %v4452_v52  ;;  %v9736_v55 = vpack.c.bf16 %v4475_v50, %v4474_v45  ;;  %v9984_v53 = vld [vmem:[%s8822_s24 + $0x248] sm:$0xff]  ;;  %v10047_v50 = vld [vmem:[%s8822_s24 + $0x260] sm:$0x1] }
  0xc1   : > { %7590 = vmatprep.subr.bf16.mxu0 %v8683_v3  ;;  %7614 = vmatprep.subr.bf16.mxu1 %v8683_v3 }
  0xc2   : > { %5983 = vmatprep.mubr.msk.f32.mxu0 %vm8684_vm0, %v8685_v6  ;;  %6036 = vmatprep.mubr.msk.f32.mxu1 %vm8684_vm0, %v8685_v6 }
  0xc4   : > { %7592 = vmatpush3.bf16.msra.mxu0 %v9345_v59  ;;  %7616 = vmatpush3.bf16.msra.mxu1 %v9345_v59  ;;  %v9694_v59 = vld [vmem:[%s8822_s24 + $0x200] sm:$0xff] }
  0xc5   : > { %7617 = vmatprep.subr.bf16.mxu0 %v8683_v3  ;;  %7641 = vmatprep.subr.bf16.mxu1 %v8683_v3 }
  0xc7   : > { %5984 = vmatmul.mubr.f32.vlgmr.msra.gmra.mrb[14].mxu0 %v9084_v10  ;;  %6037 = vmatmul.mubr.f32.vlgmr.msra.gmra.mrb[14].mxu1 %v9436_v60 }
  0xc8   : > { %7619 = vmatpush3.bf16.msra.mxu0 %v9438_v0  ;;  %7643 = vmatpush3.bf16.msra.mxu1 %v9438_v0 }
  0xc9   : > { %7620 = vmatprep.subr.bf16.mxu0 %v8683_v3  ;;  %7644 = vmatprep.subr.bf16.mxu1 %v8683_v3 }
  0xca   : > { %5986 = vmatprep.mubr.msk.f32.mxu0 %vm8684_vm0, %v8685_v6  ;;  %6039 = vmatprep.mubr.msk.f32.mxu1 %vm8684_vm0, %v8685_v6 }
  0xcb   : > { %5987 = vmatmul.mubr.f32.gmra.mrb[16].mxu0 %v9096_v12  ;;  %6040 = vmatmul.mubr.f32.gmra.mrb[16].mxu1 %v9455_v5 }
  0xcc   : > { %7622 = vmatpush3.bf16.msra.mxu0 %v9452_v4  ;;  %7646 = vmatpush3.bf16.msra.mxu1 %v9452_v4 }
  0xcd   : > { %7623 = vmatprep.subr.bf16.mxu0 %v8683_v3  ;;  %7647 = vmatprep.subr.bf16.mxu1 %v8683_v3 }
  0xce   : > { %5989 = vmatprep.mubr.msk.f32.mxu0 %vm8684_vm0, %v8685_v6  ;;  %6042 = vmatprep.mubr.msk.f32.mxu1 %vm8684_vm0, %v8685_v6 }
  0xcf   : > { %5990 = vmatmul.mubr.f32.gmra.mrb[18].mxu0 %v9112_v14  ;;  %6043 = vmatmul.mubr.f32.gmra.mrb[18].mxu1 %v9476_v24 }
  0xd0   : > { %7625 = vmatpush3.bf16.msra.mxu0 %v9473_v23  ;;  %7649 = vmatpush3.bf16.msra.mxu1 %v9473_v23 }
  0xd1   : > { %7626 = vmatprep.subr.bf16.mxu0 %v8683_v3  ;;  %7650 = vmatprep.subr.bf16.mxu1 %v8683_v3 }
  0xd2   : > { %5992 = vmatprep.mubr.msk.f32.mxu0 %vm8684_vm0, %v8685_v6  ;;  %6045 = vmatprep.mubr.msk.f32.mxu1 %vm8684_vm0, %v8685_v6 }
  0xd3   : > { %5993 = vmatmul.mubr.f32.gmra.mrb[20].mxu0 %v9128_v16  ;;  %6046 = vmatmul.mubr.f32.gmra.mrb[20].mxu1 %v9497_v29 }
  0xd4   : > { %7628 = vmatpush3.bf16.msra.mxu0 %v9494_v28  ;;  %7652 = vmatpush3.bf16.msra.mxu1 %v9494_v28 }
  0xd5   : > { %7629 = vmatprep.subr.bf16.mxu0 %v8683_v3  ;;  %7653 = vmatprep.subr.bf16.mxu1 %v8683_v3 }
  0xd6   : > { %5995 = vmatprep.mubr.msk.f32.mxu0 %vm8684_vm0, %v8685_v6  ;;  %6048 = vmatprep.mubr.msk.f32.mxu1 %vm8684_vm0, %v8685_v6 }
  0xd7   : > { %5996 = vmatmul.mubr.f32.gmra.mrb[22].mxu0 %v9144_v18  ;;  %6049 = vmatmul.mubr.f32.gmra.mrb[22].mxu1 %v9518_v37 }
  0xd8   : > { %7631 = vmatpush3.bf16.msra.mxu0 %v9515_v34  ;;  %7655 = vmatpush3.bf16.msra.mxu1 %v9515_v34 }
  0xd9   : > { %7632 = vmatprep.subr.bf16.mxu0 %v8683_v3  ;;  %7656 = vmatprep.subr.bf16.mxu1 %v8683_v3 }
  0xda   : > { %5998 = vmatprep.mubr.msk.f32.mxu0 %vm8684_vm0, %v8685_v6  ;;  %6051 = vmatprep.mubr.msk.f32.mxu1 %vm8684_vm0, %v8685_v6 }
  0xdb   : > { %5999 = vmatmul.mubr.f32.gmra.mrb[24].mxu0 %v9160_v20  ;;  %6052 = vmatmul.mubr.f32.gmra.mrb[24].mxu1 %v9539_v43 }
  0xdc   : > { %7634 = vmatpush3.bf16.msra.mxu0 %v9536_v42  ;;  %7658 = vmatpush3.bf16.msra.mxu1 %v9536_v42 }
  0xdd   : > { %7635 = vmatprep.subr.bf16.mxu0 %v8683_v3  ;;  %7659 = vmatprep.subr.bf16.mxu1 %v8683_v3 }
  0xde   : > { %6001 = vmatprep.mubr.msk.f32.mxu0 %vm8684_vm0, %v8685_v6  ;;  %6054 = vmatprep.mubr.msk.f32.mxu1 %vm8684_vm0, %v8685_v6 }
  0xdf   : > { %6002 = vmatmul.mubr.f32.gmra.mrb[26].mxu0 %v9176_v22  ;;  %6055 = vmatmul.mubr.f32.gmra.mrb[26].mxu1 %v9560_v49 }
  0xe0   : > { %7637 = vmatpush3.bf16.msra.mxu0 %v9557_v48  ;;  %7661 = vmatpush3.bf16.msra.mxu1 %v9557_v48 }
  0xe1   : > { %7638 = vmatprep.subr.bf16.mxu0 %v8683_v3  ;;  %7662 = vmatprep.subr.bf16.mxu1 %v8683_v3 }
  0xe2   : > { %6089 = vmatprep.mubr.msk.f32.mxu0 %vm8684_vm0, %v8685_v6  ;;  %6142 = vmatprep.mubr.msk.f32.mxu1 %vm8684_vm0, %v8685_v6 }
  0xe4   : > { %7640 = vmatpush3.bf16.msra.mxu0 %v9578_v54  ;;  %7664 = vmatpush3.bf16.msra.mxu1 %v9578_v54 }
  0xe5   : > { %7665 = vmatprep.subr.bf16.mxu0 %v8683_v3  ;;  %7689 = vmatprep.subr.bf16.mxu1 %v8683_v3 }
  0xe7   : > { %6090 = vmatmul.mubr.f32.vlgmr.msra.gmra.mrb[0].mxu0 %v9203_v25  ;;  %6143 = vmatmul.mubr.f32.vlgmr.msra.gmra.mrb[0].mxu1 %v9081_v9  ;;  %v4468_v25 = vld [vmem:[%s10918_s1 + $0x200] sm:$0xff] }
  0xe8   : > { %7667 = vmatpush3.bf16.msra.mxu0 %v9438_v0  ;;  %7691 = vmatpush3.bf16.msra.mxu1 %v9438_v0  ;;  %v9742_v0 = vld [vmem:[%s8822_s24 + $0x210] sm:$0xff] }
  0xe9   : > { %7668 = vmatprep.subr.bf16.mxu0 %v8683_v3  ;;  %7692 = vmatprep.subr.bf16.mxu1 %v8683_v3 }
  0xea   : > { %6092 = vmatprep.mubr.msk.f32.mxu0 %vm8684_vm0, %v8685_v6  ;;  %6145 = vmatprep.mubr.msk.f32.mxu1 %vm8684_vm0, %v8685_v6 }
  0xeb   : > { %6093 = vmatmul.mubr.f32.gmra.mrb[2].mxu0 %v9222_v31  ;;  %6146 = vmatmul.mubr.f32.gmra.mrb[2].mxu1 %v9093_v11  ;;  %v4469_v31 = vld [vmem:[%s10918_s1 + $0x208] sm:$0xff] }
  0xec   : > { %7670 = vmatpush3.bf16.msra.mxu0 %v9452_v4  ;;  %7694 = vmatpush3.bf16.msra.mxu1 %v9452_v4  ;;  %v9760_v4 = vpack.c.bf16 %v4477_v2, %v4476_v1  ;;  %v4506_v1 = vld [vmem:[%s10918_s1 + $0x2f8] sm:$0xff] }
  0xed   : > { %7671 = vmatprep.subr.bf16.mxu0 %v8683_v3  ;;  %7695 = vmatprep.subr.bf16.mxu1 %v8683_v3 }
  0xee   : > { %6095 = vmatprep.mubr.msk.f32.mxu0 %vm8684_vm0, %v8685_v6  ;;  %6148 = vmatprep.mubr.msk.f32.mxu1 %vm8684_vm0, %v8685_v6 }
  0xef   : > { %6096 = vmatmul.mubr.f32.gmra.mrb[4].mxu0 %v9243_v36  ;;  %6149 = vmatmul.mubr.f32.gmra.mrb[4].mxu1 %v9109_v13  ;;  %v9669_v36 = vld [vmem:[%s8822_s24 + $0x1c0] sm:$0xff] }
  0xf0   : > { %7673 = vmatpush3.bf16.msra.mxu0 %v9473_v23  ;;  %7697 = vmatpush3.bf16.msra.mxu1 %v9473_v23  ;;  %v4478_v23 = vld [vmem:[%s10918_s1 + $0x250] sm:$0xff] }
  0xf1   : > { %7674 = vmatprep.subr.bf16.mxu0 %v8683_v3  ;;  %7698 = vmatprep.subr.bf16.mxu1 %v8683_v3  ;;  %v9784_v27 = vpack.c.bf16 %v4479_v26, %v4478_v23  ;;  %v8655_v23 = vld [vmem:[%s8822_s24 + $0x158] sm:$0xff]  ;;  %v4515_v26 = vld [vmem:[%s10918_s1 + $0x308] sm:$0xff] }
  0xf2   : > { %6098 = vmatprep.mubr.msk.f32.mxu0 %vm8684_vm0, %v8685_v6  ;;  %6151 = vmatprep.mubr.msk.f32.mxu1 %vm8684_vm0, %v8685_v6 }
  0xf3   : > { %6099 = vmatmul.mubr.f32.gmra.mrb[6].mxu0 %v9264_v41  ;;  %6152 = vmatmul.mubr.f32.gmra.mrb[6].mxu1 %v9125_v15  ;;  %v9672_v41 = vld [vmem:[%s8822_s24 + $0x1f8] sm:$0xff] }
  0xf4   : > { %7676 = vmatpush3.bf16.msra.mxu0 %v9494_v28  ;;  %7700 = vmatpush3.bf16.msra.mxu1 %v9494_v28  ;;  %v9787_v28 = vld [vmem:[%s8822_s24 + $0x1e8] sm:$0xff] }
  0xf5   : > { %7677 = vmatprep.subr.bf16.mxu0 %v8683_v3  ;;  %7701 = vmatprep.subr.bf16.mxu1 %v8683_v3 }
  0xf6   : > { %6101 = vmatprep.mubr.msk.f32.mxu0 %vm8684_vm0, %v8685_v6  ;;  %6154 = vmatprep.mubr.msk.f32.mxu1 %vm8684_vm0, %v8685_v6 }
  0xf7   : > { %6102 = vmatmul.mubr.f32.gmra.mrb[8].mxu0 %v9285_v46  ;;  %6155 = vmatmul.mubr.f32.gmra.mrb[8].mxu1 %v9141_v17  ;;  %v9674_v46 = vpack.c.bf16 %v4469_v31, %v4468_v25  ;;  %v4500_v25 = vld [vmem:[%s10918_s1 + $0x2c8] sm:$0xff] }
  0xf8   : > { %7679 = vmatpush3.bf16.msra.mxu0 %v9515_v34  ;;  %7703 = vmatpush3.bf16.msra.mxu1 %v9515_v34  ;;  %v4481_v34 = vld [vmem:[%s10918_s1 + $0x268] sm:$0xff] }
  0xf9   : > { %7680 = vmatprep.subr.bf16.mxu0 %v8683_v3  ;;  %7704 = vmatprep.subr.bf16.mxu1 %v8683_v3  ;;  %v9808_v38 = vpack.c.bf16 %v4481_v34, %v4480_v33  ;;  %v4516_v33 = vld [vmem:[%s10918_s1 + $0x310] sm:$0xff]  ;;  %v4517_v34 = vld [vmem:[%s10918_s1 + $0x318] sm:$0xff] }
  0xfa   : > { %6104 = vmatprep.mubr.msk.f32.mxu0 %vm8684_vm0, %v8685_v6  ;;  %6157 = vmatprep.mubr.msk.f32.mxu1 %vm8684_vm0, %v8685_v6 }
  0xfb   : > { %6105 = vmatmul.mubr.f32.gmra.mrb[10].mxu0 %v9306_v51  ;;  %6158 = vmatmul.mubr.f32.gmra.mrb[10].mxu1 %v9157_v19  ;;  %v4470_v51 = vld [vmem:[%s10918_s1 + $0x210] sm:$0xff] }
  0xfc   : > { %7682 = vmatpush3.bf16.msra.mxu0 %v9536_v42  ;;  %7706 = vmatpush3.bf16.msra.mxu1 %v9536_v42  ;;  %v9814_v42 = vld [vmem:[%s8822_s24 + $0x228] sm:$0x1] }
  0xfd   : > { %7683 = vmatprep.subr.bf16.mxu0 %v8683_v3  ;;  %7707 = vmatprep.subr.bf16.mxu1 %v8683_v3 }
  0xfe   : > { %6107 = vmatprep.mubr.msk.f32.mxu0 %vm8684_vm0, %v8685_v6  ;;  %6160 = vmatprep.mubr.msk.f32.mxu1 %vm8684_vm0, %v8685_v6 }
  0xff   : > { %6108 = vmatmul.mubr.f32.gmra.mrb[12].mxu0 %v9327_v56  ;;  %6161 = vmatmul.mubr.f32.gmra.mrb[12].mxu1 %v9173_v21  ;;  %v4471_v56 = vld [vmem:[%s10918_s1 + $0x218] sm:$0xff] }
 0x100   : > { %7685 = vmatpush3.bf16.msra.mxu0 %v9557_v48  ;;  %7709 = vmatpush3.bf16.msra.mxu1 %v9557_v48  ;;  %v9688_v57 = vpack.c.bf16 %v4471_v56, %v4470_v51  ;;  %v9832_v48 = vpack.c.bf16 %v4483_v47, %v4482_v44  ;;  %v4501_v51 = vld [vmem:[%s10918_s1 + $0x2d0] sm:$0xff]  ;;  %v4502_v56 = vld [vmem:[%s10918_s1 + $0x2d8] sm:$0xff]  ;;  %v4518_v47 = vld [vmem:[%s10918_s1 + $0x320] sm:$0xff] }
 0x101   : > { %7686 = vmatprep.subr.bf16.mxu0 %v8683_v3  ;;  %7710 = vmatprep.subr.bf16.mxu1 %v8683_v3  ;;  %v10175_v44 = vld [vmem:[%s8822_s24 + $0x270] sm:$0xff] }
 0x102   : > { %6195 = vmatprep.mubr.msk.f32.mxu0 %vm8684_vm0, %v8685_v6  ;;  %6248 = vmatprep.mubr.msk.f32.mxu1 %vm8684_vm0, %v8685_v6 }
 0x104   : > { %7688 = vmatpush3.bf16.msra.mxu0 %v9578_v54  ;;  %7712 = vmatpush3.bf16.msra.mxu1 %v9578_v54  ;;  %v4499_v54 = vld [vmem:[%s10918_s1 + $0x2c0] sm:$0xff] }
 0x105   : > { %7713 = vmatprep.subr.bf16.mxu0 %v8683_v3  ;;  %7737 = vmatprep.subr.bf16.mxu1 %v8683_v3  ;;  %v10002_v31 = vpack.c.bf16 %v4500_v25, %v4499_v54  ;;  %v10259_v25 = vld [vmem:[%s8822_s24 + $0x290] sm:$0xff] }
 0x107   : > { %6196 = vmatmul.mubr.f32.vlgmr.msra.gmra.mrb[14].mxu0 %v9669_v36  ;;  %6249 = vmatmul.mubr.f32.vlgmr.msra.gmra.mrb[14].mxu1 %v9672_v41 }
 0x108   : > { %7715 = vmatpush3.bf16.msra.mxu0 %v9674_v46  ;;  %7739 = vmatpush3.bf16.msra.mxu1 %v9674_v46 }
 0x109   : > { %7716 = vmatprep.subr.bf16.mxu0 %v8683_v3  ;;  %7740 = vmatprep.subr.bf16.mxu1 %v8683_v3 }
 0x10a   : > { %6198 = vmatprep.mubr.msk.f32.mxu0 %vm8684_vm0, %v8685_v6  ;;  %6251 = vmatprep.mubr.msk.f32.mxu1 %vm8684_vm0, %v8685_v6 }
 0x10b   : > { %6199 = vmatmul.mubr.f32.gmra.mrb[16].mxu0 %v9691_v58  ;;  %6252 = vmatmul.mubr.f32.gmra.mrb[16].mxu1 %v9694_v59 }
 0x10c   : > { %7718 = vmatpush3.bf16.msra.mxu0 %v9688_v57  ;;  %7742 = vmatpush3.bf16.msra.mxu1 %v9688_v57 }
 0x10d   : > { %7719 = vmatprep.subr.bf16.mxu0 %v8683_v3  ;;  %7743 = vmatprep.subr.bf16.mxu1 %v8683_v3 }
 0x10e   : > { %6201 = vmatprep.mubr.msk.f32.mxu0 %vm8684_vm0, %v8685_v6  ;;  %6254 = vmatprep.mubr.msk.f32.mxu1 %vm8684_vm0, %v8685_v6 }
 0x10f   : > { %6202 = vmatmul.mubr.f32.gmra.mrb[18].mxu0 %v9715_v35  ;;  %6255 = vmatmul.mubr.f32.gmra.mrb[18].mxu1 %v9718_v40 }
 0x110   : > { %7721 = vmatpush3.bf16.msra.mxu0 %v9712_v30  ;;  %7745 = vmatpush3.bf16.msra.mxu1 %v9712_v30 }
 0x111   : > { %7722 = vmatprep.subr.bf16.mxu0 %v8683_v3  ;;  %7746 = vmatprep.subr.bf16.mxu1 %v8683_v3 }
 0x112   : > { %6204 = vmatprep.mubr.msk.f32.mxu0 %vm8684_vm0, %v8685_v6  ;;  %6257 = vmatprep.mubr.msk.f32.mxu1 %vm8684_vm0, %v8685_v6 }
 0x113   : > { %6205 = vmatmul.mubr.f32.gmra.mrb[20].mxu0 %v9739_v63  ;;  %6258 = vmatmul.mubr.f32.gmra.mrb[20].mxu1 %v9742_v0 }
 0x114   : > { %7724 = vmatpush3.bf16.msra.mxu0 %v9736_v55  ;;  %7748 = vmatpush3.bf16.msra.mxu1 %v9736_v55 }
 0x115   : > { %7725 = vmatprep.subr.bf16.mxu0 %v8683_v3  ;;  %7749 = vmatprep.subr.bf16.mxu1 %v8683_v3 }
 0x116   : > { %6207 = vmatprep.mubr.msk.f32.mxu0 %vm8684_vm0, %v8685_v6  ;;  %6260 = vmatprep.mubr.msk.f32.mxu1 %vm8684_vm0, %v8685_v6 }
 0x117   : > { %6208 = vmatmul.mubr.f32.gmra.mrb[22].mxu0 %v9763_v7  ;;  %6261 = vmatmul.mubr.f32.gmra.mrb[22].mxu1 %v9766_v8 }
 0x118   : > { %7727 = vmatpush3.bf16.msra.mxu0 %v9760_v4  ;;  %7751 = vmatpush3.bf16.msra.mxu1 %v9760_v4 }
 0x119   : > { %7728 = vmatprep.subr.bf16.mxu0 %v8683_v3  ;;  %7752 = vmatprep.subr.bf16.mxu1 %v8683_v3 }
 0x11a   : > { %6210 = vmatprep.mubr.msk.f32.mxu0 %vm8684_vm0, %v8685_v6  ;;  %6263 = vmatprep.mubr.msk.f32.mxu1 %vm8684_vm0, %v8685_v6 }
 0x11b   : > { %6211 = vmatmul.mubr.f32.gmra.mrb[24].mxu0 %v9787_v28  ;;  %6264 = vmatmul.mubr.f32.gmra.mrb[24].mxu1 %v9790_v32 }
 0x11c   : > { %7730 = vmatpush3.bf16.msra.mxu0 %v9784_v27  ;;  %7754 = vmatpush3.bf16.msra.mxu1 %v9784_v27 }
 0x11d   : > { %7731 = vmatprep.subr.bf16.mxu0 %v8683_v3  ;;  %7755 = vmatprep.subr.bf16.mxu1 %v8683_v3 }
 0x11e   : > { %6213 = vmatprep.mubr.msk.f32.mxu0 %vm8684_vm0, %v8685_v6  ;;  %6266 = vmatprep.mubr.msk.f32.mxu1 %vm8684_vm0, %v8685_v6 }
 0x11f   : > { %6214 = vmatmul.mubr.f32.gmra.mrb[26].mxu0 %v9811_v39  ;;  %6267 = vmatmul.mubr.f32.gmra.mrb[26].mxu1 %v9814_v42 }
 0x120   : > { %7733 = vmatpush3.bf16.msra.mxu0 %v9808_v38  ;;  %7757 = vmatpush3.bf16.msra.mxu1 %v9808_v38 }
 0x121   : > { %7734 = vmatprep.subr.bf16.mxu0 %v8683_v3  ;;  %7758 = vmatprep.subr.bf16.mxu1 %v8683_v3 }
 0x122   : > { %6301 = vmatprep.mubr.msk.f32.mxu0 %vm8684_vm0, %v8685_v6  ;;  %6354 = vmatprep.mubr.msk.f32.mxu1 %vm8684_vm0, %v8685_v6 }
 0x124   : > { %7736 = vmatpush3.bf16.msra.mxu0 %v9832_v48  ;;  %7760 = vmatpush3.bf16.msra.mxu1 %v9832_v48 }
 0x125   : > { %7761 = vmatprep.subr.bf16.mxu0 %v8683_v3  ;;  %7785 = vmatprep.subr.bf16.mxu1 %v8683_v3 }
 0x127   : > { %6302 = vmatmul.mubr.f32.vlgmr.msra.gmra.mrb[0].mxu0 %v9081_v9  ;;  %6355 = vmatmul.mubr.f32.vlgmr.msra.gmra.mrb[0].mxu1 %v9084_v10  ;;  %v4491_v9 = vld [vmem:[%s10918_s1 + $0x280] sm:$0xff]  ;;  %v4492_v10 = vld [vmem:[%s10918_s1 + $0x288] sm:$0xff] }
 0x128   : > { %7763 = vmatpush3.bf16.msra.mxu0 %v9674_v46  ;;  %7787 = vmatpush3.bf16.msra.mxu1 %v9674_v46  ;;  %v10005_v46 = vld [vmem:[%s8822_s24 + $0x250] sm:$0xff] }
 0x129   : > { %7764 = vmatprep.subr.bf16.mxu0 %v8683_v3  ;;  %7788 = vmatprep.subr.bf16.mxu1 %v8683_v3 }
 0x12a   : > { %6304 = vmatprep.mubr.msk.f32.mxu0 %vm8684_vm0, %v8685_v6  ;;  %6357 = vmatprep.mubr.msk.f32.mxu1 %vm8684_vm0, %v8685_v6 }
 0x12b   : > { %6305 = vmatmul.mubr.f32.gmra.mrb[2].mxu0 %v9093_v11  ;;  %6358 = vmatmul.mubr.f32.gmra.mrb[2].mxu1 %v9096_v12  ;;  %v9923_v11 = vld [vmem:[%s8822_s24 + $0x230] sm:$0xff]  ;;  %v9925_v12 = vpack.c.bf16 %v4492_v10, %v4491_v9  ;;  %v10196_v10 = vld [vmem:[%s8822_s24 + $0x278] sm:$0xff] }
 0x12c   : > { %7766 = vmatpush3.bf16.msra.mxu0 %v9688_v57  ;;  %7790 = vmatpush3.bf16.msra.mxu1 %v9688_v57  ;;  %v10023_v57 = vpack.c.bf16 %v4502_v56, %v4501_v51  ;;  %v4527_v51 = vld [vmem:[%s10918_s1 + $0x368] sm:$0xff] }
 0x12d   : > { %7767 = vmatprep.subr.bf16.mxu0 %v8683_v3  ;;  %7791 = vmatprep.subr.bf16.mxu1 %v8683_v3 }
 0x12e   : > { %6307 = vmatprep.mubr.msk.f32.mxu0 %vm8684_vm0, %v8685_v6  ;;  %6360 = vmatprep.mubr.msk.f32.mxu1 %vm8684_vm0, %v8685_v6 }
 0x12f   : > { %6308 = vmatmul.mubr.f32.gmra.mrb[4].mxu0 %v9109_v13  ;;  %6361 = vmatmul.mubr.f32.gmra.mrb[4].mxu1 %v9112_v14  ;;  %v4493_v13 = vld [vmem:[%s10918_s1 + $0x290] sm:$0xff]  ;;  %v4494_v14 = vld [vmem:[%s10918_s1 + $0x298] sm:$0xff] }
 0x130   : > { %7769 = vmatpush3.bf16.msra.mxu0 %v9712_v30  ;;  %7793 = vmatpush3.bf16.msra.mxu1 %v9712_v30  ;;  %v4504_v30 = vld [vmem:[%s10918_s1 + $0x2e8] sm:$0xff] }
 0x131   : > { %7770 = vmatprep.subr.bf16.mxu0 %v8683_v3  ;;  %7794 = vmatprep.subr.bf16.mxu1 %v8683_v3  ;;  %v10044_v45 = vpack.c.bf16 %v4504_v30, %v4503_v62  ;;  %v4528_v62 = vld [vmem:[%s10918_s1 + $0x370] sm:$0xff]  ;;  %v4529_v30 = vld [vmem:[%s10918_s1 + $0x378] sm:$0xff] }
 0x132   : > { %6310 = vmatprep.mubr.msk.f32.mxu0 %vm8684_vm0, %v8685_v6  ;;  %6363 = vmatprep.mubr.msk.f32.mxu1 %vm8684_vm0, %v8685_v6 }
 0x133   : > { %6311 = vmatmul.mubr.f32.gmra.mrb[6].mxu0 %v9125_v15  ;;  %6364 = vmatmul.mubr.f32.gmra.mrb[6].mxu1 %v9128_v16  ;;  %v9939_v15 = vpack.c.bf16 %v4494_v14, %v4493_v13  ;;  %v9942_v16 = vld [vmem:[%s8822_s24 + $0x238] sm:$0xff] }
 0x134   : > { %7772 = vmatpush3.bf16.msra.mxu0 %v9736_v55  ;;  %7796 = vmatpush3.bf16.msra.mxu1 %v9736_v55  ;;  %v4505_v55 = vld [vmem:[%s10918_s1 + $0x2f0] sm:$0xff]  ;;  %v4521_v13 = vld [vmem:[%s10918_s1 + $0x338] sm:$0xff] }
 0x135   : > { %7773 = vmatprep.subr.bf16.mxu0 %v8683_v3  ;;  %7797 = vmatprep.subr.bf16.mxu1 %v8683_v3  ;;  %v10065_v2 = vpack.c.bf16 %v4506_v1, %v4505_v55  ;;  %v10430_v55 = vld [vmem:[%s8822_s24 + $0x2e8] sm:$0xff]  ;;  %v4550_v1 = vld [vmem:[%s10918_s1 + $0x3b0] sm:$0xff] }
 0x136   : > { %6313 = vmatprep.mubr.msk.f32.mxu0 %vm8684_vm0, %v8685_v6  ;;  %6366 = vmatprep.mubr.msk.f32.mxu1 %vm8684_vm0, %v8685_v6 }
 0x137   : > { %6314 = vmatmul.mubr.f32.gmra.mrb[8].mxu0 %v9141_v17  ;;  %6367 = vmatmul.mubr.f32.gmra.mrb[8].mxu1 %v9144_v18  ;;  %v4495_v17 = vld [vmem:[%s10918_s1 + $0x2a0] sm:$0xff]  ;;  %v4496_v18 = vld [vmem:[%s10918_s1 + $0x2a8] sm:$0xff] }
 0x138   : > { %7775 = vmatpush3.bf16.msra.mxu0 %v9760_v4  ;;  %7799 = vmatpush3.bf16.msra.mxu1 %v9760_v4  ;;  %v8654_v4 = vld [vmem:[%s8822_s24 + $0x150] sm:$0xff] }
 0x139   : > { %7776 = vmatprep.subr.bf16.mxu0 %v8683_v3  ;;  %7800 = vmatprep.subr.bf16.mxu1 %v8683_v3 }
 0x13a   : > { %6316 = vmatprep.mubr.msk.f32.mxu0 %vm8684_vm0, %v8685_v6  ;;  %6369 = vmatprep.mubr.msk.f32.mxu1 %vm8684_vm0, %v8685_v6 }
 0x13b   : > { %6317 = vmatmul.mubr.f32.gmra.mrb[10].mxu0 %v9157_v19  ;;  %6370 = vmatmul.mubr.f32.gmra.mrb[10].mxu1 %v9160_v20  ;;  %v9960_v19 = vpack.c.bf16 %v4496_v18, %v4495_v17  ;;  %v9963_v20 = vld [vmem:[%s8822_s24 + $0x240] sm:$0xff]  ;;  %v4523_v18 = vld [vmem:[%s10918_s1 + $0x348] sm:$0xff] }
 0x13c   : > { %7778 = vmatpush3.bf16.msra.mxu0 %v9784_v27  ;;  %7802 = vmatpush3.bf16.msra.mxu1 %v9784_v27  ;;  %v4522_v17 = vld [vmem:[%s10918_s1 + $0x340] sm:$0xff] }
 0x13d   : > { %7779 = vmatprep.subr.bf16.mxu0 %v8683_v3  ;;  %7803 = vmatprep.subr.bf16.mxu1 %v8683_v3 }
 0x13e   : > { %6319 = vmatprep.mubr.msk.f32.mxu0 %vm8684_vm0, %v8685_v6  ;;  %6372 = vmatprep.mubr.msk.f32.mxu1 %vm8684_vm0, %v8685_v6 }
 0x13f   : > { %6320 = vmatmul.mubr.f32.gmra.mrb[12].mxu0 %v9173_v21  ;;  %6373 = vmatmul.mubr.f32.gmra.mrb[12].mxu1 %v9176_v22  ;;  %v4497_v21 = vld [vmem:[%s10918_s1 + $0x2b0] sm:$0xff]  ;;  %v4498_v22 = vld [vmem:[%s10918_s1 + $0x2b8] sm:$0xff] }
 0x140   : > { %7781 = vmatpush3.bf16.msra.mxu0 %v9808_v38  ;;  %7805 = vmatpush3.bf16.msra.mxu1 %v9808_v38  ;;  %v9981_v52 = vpack.c.bf16 %v4498_v22, %v4497_v21  ;;  %v10172_v38 = vpack.c.bf16 %v4517_v34, %v4516_v33  ;;  %v10238_v21 = vld [vmem:[%s8822_s24 + $0x288] sm:$0xff]  ;;  %v4524_v22 = vld [vmem:[%s10918_s1 + $0x350] sm:$0xff] }
 0x141   : > { %7782 = vmatprep.subr.bf16.mxu0 %v8683_v3  ;;  %7806 = vmatprep.subr.bf16.mxu1 %v8683_v3  ;;  %v4535_v34 = vld [vmem:[%s8822_s24 + $0x2c8] sm:$0xff] }
 0x142   : > { %6407 = vmatprep.mubr.msk.f32.mxu0 %vm8684_vm0, %v8685_v6  ;;  %6460 = vmatprep.mubr.msk.f32.mxu1 %vm8684_vm0, %v8685_v6 }
 0x144   : > { %7784 = vmatpush3.bf16.msra.mxu0 %v9832_v48  ;;  %7808 = vmatpush3.bf16.msra.mxu1 %v9832_v48  ;;  %v4519_v48 = vld [vmem:[%s10918_s1 + $0x328] sm:$0xff] }
 0x145   : > { %7809 = vmatprep.subr.bf16.mxu0 %v8683_v3  ;;  %7833 = vmatprep.subr.bf16.mxu1 %v8683_v3  ;;  %v10193_v9 = vpack.c.bf16 %v4519_v48, %v4518_v47  ;;  %v4556_v47 = vld [vmem:[%s10918_s1 + $0x3e0] sm:$0xff]  ;;  %v4557_v48 = vld [vmem:[%s10918_s1 + $0x3e8] sm:$0xff] }
 0x147   : > { %6408 = vmatmul.mubr.f32.vlgmr.msra.gmra.mrb[14].mxu0 %v9672_v41  ;;  %6461 = vmatmul.mubr.f32.vlgmr.msra.gmra.mrb[14].mxu1 %v9923_v11 }
 0x148   : > { %7811 = vmatpush3.bf16.msra.mxu0 %v9925_v12  ;;  %7835 = vmatpush3.bf16.msra.mxu1 %v9925_v12 }
 0x149   : > { %7812 = vmatprep.subr.bf16.mxu0 %v8683_v3  ;;  %7836 = vmatprep.subr.bf16.mxu1 %v8683_v3 }
 0x14a   : > { %6410 = vmatprep.mubr.msk.f32.mxu0 %vm8684_vm0, %v8685_v6  ;;  %6463 = vmatprep.mubr.msk.f32.mxu1 %vm8684_vm0, %v8685_v6 }
 0x14b   : > { %6411 = vmatmul.mubr.f32.gmra.mrb[16].mxu0 %v9694_v59  ;;  %6464 = vmatmul.mubr.f32.gmra.mrb[16].mxu1 %v9942_v16 }
 0x14c   : > { %7814 = vmatpush3.bf16.msra.mxu0 %v9939_v15  ;;  %7838 = vmatpush3.bf16.msra.mxu1 %v9939_v15 }
 0x14d   : > { %7815 = vmatprep.subr.bf16.mxu0 %v8683_v3  ;;  %7839 = vmatprep.subr.bf16.mxu1 %v8683_v3 }
 0x14e   : > { %6413 = vmatprep.mubr.msk.f32.mxu0 %vm8684_vm0, %v8685_v6  ;;  %6466 = vmatprep.mubr.msk.f32.mxu1 %vm8684_vm0, %v8685_v6 }
 0x14f   : > { %6414 = vmatmul.mubr.f32.gmra.mrb[18].mxu0 %v9718_v40  ;;  %6467 = vmatmul.mubr.f32.gmra.mrb[18].mxu1 %v9963_v20 }
 0x150   : > { %7817 = vmatpush3.bf16.msra.mxu0 %v9960_v19  ;;  %7841 = vmatpush3.bf16.msra.mxu1 %v9960_v19 }
 0x151   : > { %7818 = vmatprep.subr.bf16.mxu0 %v8683_v3  ;;  %7842 = vmatprep.subr.bf16.mxu1 %v8683_v3 }
 0x152   : > { %6416 = vmatprep.mubr.msk.f32.mxu0 %vm8684_vm0, %v8685_v6  ;;  %6469 = vmatprep.mubr.msk.f32.mxu1 %vm8684_vm0, %v8685_v6 }
 0x153   : > { %6417 = vmatmul.mubr.f32.gmra.mrb[20].mxu0 %v9742_v0  ;;  %6470 = vmatmul.mubr.f32.gmra.mrb[20].mxu1 %v9984_v53 }
 0x154   : > { %7820 = vmatpush3.bf16.msra.mxu0 %v9981_v52  ;;  %7844 = vmatpush3.bf16.msra.mxu1 %v9981_v52 }
 0x155   : > { %7821 = vmatprep.subr.bf16.mxu0 %v8683_v3  ;;  %7845 = vmatprep.subr.bf16.mxu1 %v8683_v3 }
 0x156   : > { %6419 = vmatprep.mubr.msk.f32.mxu0 %vm8684_vm0, %v8685_v6  ;;  %6472 = vmatprep.mubr.msk.f32.mxu1 %vm8684_vm0, %v8685_v6 }
 0x157   : > { %6420 = vmatmul.mubr.f32.gmra.mrb[22].mxu0 %v9766_v8  ;;  %6473 = vmatmul.mubr.f32.gmra.mrb[22].mxu1 %v10005_v46 }
 0x158   : > { %7823 = vmatpush3.bf16.msra.mxu0 %v10002_v31  ;;  %7847 = vmatpush3.bf16.msra.mxu1 %v10002_v31 }
 0x159   : > { %7824 = vmatprep.subr.bf16.mxu0 %v8683_v3  ;;  %7848 = vmatprep.subr.bf16.mxu1 %v8683_v3 }
 0x15a   : > { %6422 = vmatprep.mubr.msk.f32.mxu0 %vm8684_vm0, %v8685_v6  ;;  %6475 = vmatprep.mubr.msk.f32.mxu1 %vm8684_vm0, %v8685_v6 }
 0x15b   : > { %6423 = vmatmul.mubr.f32.gmra.mrb[24].mxu0 %v9790_v32  ;;  %6476 = vmatmul.mubr.f32.gmra.mrb[24].mxu1 %v10026_v61 }
 0x15c   : > { %7826 = vmatpush3.bf16.msra.mxu0 %v10023_v57  ;;  %7850 = vmatpush3.bf16.msra.mxu1 %v10023_v57 }
 0x15d   : > { %7827 = vmatprep.subr.bf16.mxu0 %v8683_v3  ;;  %7851 = vmatprep.subr.bf16.mxu1 %v8683_v3 }
 0x15e   : > { %6425 = vmatprep.mubr.msk.f32.mxu0 %vm8684_vm0, %v8685_v6  ;;  %6478 = vmatprep.mubr.msk.f32.mxu1 %vm8684_vm0, %v8685_v6 }
 0x15f   : > { %6426 = vmatmul.mubr.f32.gmra.mrb[26].mxu0 %v9814_v42  ;;  %6479 = vmatmul.mubr.f32.gmra.mrb[26].mxu1 %v10047_v50 }
 0x160   : > { %7829 = vmatpush3.bf16.msra.mxu0 %v10044_v45  ;;  %7853 = vmatpush3.bf16.msra.mxu1 %v10044_v45 }
 0x161   : > { %7830 = vmatprep.subr.bf16.mxu0 %v8683_v3  ;;  %7854 = vmatprep.subr.bf16.mxu1 %v8683_v3 }
 0x162   : > { %6513 = vmatprep.mubr.msk.f32.mxu0 %vm8684_vm0, %v8685_v6  ;;  %6566 = vmatprep.mubr.msk.f32.mxu1 %vm8684_vm0, %v8685_v6 }
 0x164   : > { %7832 = vmatpush3.bf16.msra.mxu0 %v10065_v2  ;;  %7856 = vmatpush3.bf16.msra.mxu1 %v10065_v2 }
 0x165   : > { %7857 = vmatprep.subr.bf16.mxu0 %v8683_v3  ;;  %7881 = vmatprep.subr.bf16.mxu1 %v8683_v3 }
 0x167   : > { %6514 = vmatmul.mubr.f32.vlgmr.msra.gmra.mrb[0].mxu0 %v8654_v4  ;;  %6567 = vmatmul.mubr.f32.vlgmr.msra.gmra.mrb[0].mxu1 %v9436_v60  ;;  %v8656_v60 = vld [vmem:[%s8822_s24 + $0x160] sm:$0xff] }
 0x168   : > { %7859 = vmatpush3.bf16.msra.mxu0 %v9925_v12  ;;  %7883 = vmatpush3.bf16.msra.mxu1 %v9925_v12  ;;  %v4520_v12 = vld [vmem:[%s10918_s1 + $0x330] sm:$0xff] }
 0x169   : > { %7860 = vmatprep.subr.bf16.mxu0 %v8683_v3  ;;  %7884 = vmatprep.subr.bf16.mxu1 %v8683_v3  ;;  %v10214_v14 = vpack.c.bf16 %v4521_v13, %v4520_v12  ;;  %v4536_v12 = vld [vmem:[%s8822_s24 + $0x2d0] sm:$0x1]  ;;  %v10514_v13 = vld [vmem:[%s8822_s24 + $0x308] sm:$0x1] }
 0x16a   : > { %6516 = vmatprep.mubr.msk.f32.mxu0 %vm8684_vm0, %v8685_v6  ;;  %6569 = vmatprep.mubr.msk.f32.mxu1 %vm8684_vm0, %v8685_v6 }
 0x16b   : > { %6517 = vmatmul.mubr.f32.gmra.mrb[2].mxu0 %v8655_v23  ;;  %6570 = vmatmul.mubr.f32.gmra.mrb[2].mxu1 %v9455_v5  ;;  %v8657_v5 = vld [vmem:[%s8822_s24 + $0x168] sm:$0xff]  ;;  %v4533_v23 = vld [vmem:[%s8822_s24 + $0x2b8] sm:$0xff] }
 0x16c   : > { %7862 = vmatpush3.bf16.msra.mxu0 %v9939_v15  ;;  %7886 = vmatpush3.bf16.msra.mxu1 %v9939_v15  ;;  %v10217_v15 = vld [vmem:[%s8822_s24 + $0x280] sm:$0xff] }
 0x16d   : > { %7863 = vmatprep.subr.bf16.mxu0 %v8683_v3  ;;  %7887 = vmatprep.subr.bf16.mxu1 %v8683_v3 }
 0x16e   : > { %6519 = vmatprep.mubr.msk.f32.mxu0 %vm8684_vm0, %v8685_v6  ;;  %6572 = vmatprep.mubr.msk.f32.mxu1 %vm8684_vm0, %v8685_v6 }
 0x16f   : > { %6520 = vmatmul.mubr.f32.gmra.mrb[4].mxu0 %v8656_v60  ;;  %6573 = vmatmul.mubr.f32.gmra.mrb[4].mxu1 %v9476_v24  ;;  %v8658_v24 = vld [vmem:[%s8822_s24 + $0x170] sm:$0xff] }
 0x170   : > { %7865 = vmatpush3.bf16.msra.mxu0 %v9960_v19  ;;  %7889 = vmatpush3.bf16.msra.mxu1 %v9960_v19  ;;  %v10235_v19 = vpack.c.bf16 %v4523_v18, %v4522_v17  ;;  %v10451_v60 = vld [vmem:[%s8822_s24 + $0x2f0] sm:$0xff]  ;;  %v4559_v17 = vld [vmem:[%s10918_s1 + $0x3f8] sm:$0xff] }
 0x171   : > { %7866 = vmatprep.subr.bf16.mxu0 %v8683_v3  ;;  %7890 = vmatprep.subr.bf16.mxu1 %v8683_v3 }
 0x172   : > { %6522 = vmatprep.mubr.msk.f32.mxu0 %vm8684_vm0, %v8685_v6  ;;  %6575 = vmatprep.mubr.msk.f32.mxu1 %vm8684_vm0, %v8685_v6 }
 0x173   : > { %6523 = vmatmul.mubr.f32.gmra.mrb[6].mxu0 %v8657_v5  ;;  %6576 = vmatmul.mubr.f32.gmra.mrb[6].mxu1 %v9497_v29  ;;  %v8659_v29 = vld [vmem:[%s8822_s24 + $0x178] sm:$0xff]  ;;  %v4552_v5 = vld [vmem:[%s10918_s1 + $0x3c0] sm:$0xff] }
 0x174   : > { %7868 = vmatpush3.bf16.msra.mxu0 %v9981_v52  ;;  %7892 = vmatpush3.bf16.msra.mxu1 %v9981_v52  ;;  %v4525_v52 = vld [vmem:[%s10918_s1 + $0x358] sm:$0xff] }
 0x175   : > { %7869 = vmatprep.subr.bf16.mxu0 %v8683_v3  ;;  %7893 = vmatprep.subr.bf16.mxu1 %v8683_v3  ;;  %v10256_v54 = vpack.c.bf16 %v4525_v52, %v4524_v22  ;;  %v8662_v22 = vld [vmem:[%s8822_s24 + $0x200] sm:$0xff]  ;;  %v4568_v52 = vld [vmem:[%s10918_s1 + $0x408] sm:$0xff] }
 0x176   : > { %6525 = vmatprep.mubr.msk.f32.mxu0 %vm8684_vm0, %v8685_v6  ;;  %6578 = vmatprep.mubr.msk.f32.mxu1 %vm8684_vm0, %v8685_v6 }
 0x177   : > { %6526 = vmatmul.mubr.f32.gmra.mrb[8].mxu0 %v8658_v24  ;;  %6579 = vmatmul.mubr.f32.gmra.mrb[8].mxu1 %v9518_v37  ;;  %v8660_v37 = vld [vmem:[%s8822_s24 + $0x180] sm:$0x1]  ;;  %v4553_v24 = vld [vmem:[%s10918_s1 + $0x3c8] sm:$0xff] }
 0x178   : > { %7871 = vmatpush3.bf16.msra.mxu0 %v10002_v31  ;;  %7895 = vmatpush3.bf16.msra.mxu1 %v10002_v31  ;;  %v4526_v31 = vld [vmem:[%s10918_s1 + $0x360] sm:$0xff] }
 0x179   : > { %7872 = vmatprep.subr.bf16.mxu0 %v8683_v3  ;;  %7896 = vmatprep.subr.bf16.mxu1 %v8683_v3  ;;  %v10277_v56 = vpack.c.bf16 %v4527_v51, %v4526_v31  ;;  %v4569_v31 = vld [vmem:[%s10918_s1 + $0x410] sm:$0xff]  ;;  %v4570_v51 = vld [vmem:[%s10918_s1 + $0x418] sm:$0xff] }
 0x17a   : > { %6528 = vmatprep.mubr.msk.f32.mxu0 %vm8684_vm0, %v8685_v6  ;;  %6581 = vmatprep.mubr.msk.f32.mxu1 %vm8684_vm0, %v8685_v6 }
 0x17b   : > { %6529 = vmatmul.mubr.f32.gmra.mrb[10].mxu0 %v8659_v29  ;;  %6582 = vmatmul.mubr.f32.gmra.mrb[10].mxu1 %v9539_v43  ;;  %v4514_v43 = vld [vmem:[%s10918_s1 + $0x300] sm:$0xff]  ;;  %v10468_v29 = vpack.c.bf16 %v4553_v24, %v4552_v5  ;;  %v8668_v24 = vld [vmem:[%s8822_s24 + $0x230] sm:$0xff] }
 0x17c   : > { %7874 = vmatpush3.bf16.msra.mxu0 %v10023_v57  ;;  %7898 = vmatpush3.bf16.msra.mxu1 %v10023_v57  ;;  %v10158_v27 = vpack.c.bf16 %v4515_v26, %v4514_v43  ;;  %v10280_v57 = vld [vmem:[%s8822_s24 + $0x298] sm:$0x1]  ;;  %v4554_v26 = vld [vmem:[%s10918_s1 + $0x3d0] sm:$0xff] }
 0x17d   : > { %7875 = vmatprep.subr.bf16.mxu0 %v8683_v3  ;;  %7899 = vmatprep.subr.bf16.mxu1 %v8683_v3  ;;  %v10472_v43 = vld [vmem:[%s8822_s24 + $0x2f8] sm:$0xff] }
 0x17e   : > { %6531 = vmatprep.mubr.msk.f32.mxu0 %vm8684_vm0, %v8685_v6  ;;  %6584 = vmatprep.mubr.msk.f32.mxu1 %vm8684_vm0, %v8685_v6 }
 0x17f   : > { %6532 = vmatmul.mubr.f32.gmra.mrb[12].mxu0 %v8660_v37  ;;  %6585 = vmatmul.mubr.f32.gmra.mrb[12].mxu1 %v9560_v49  ;;  %v10156_v49 = vld [vmem:[%s8822_s24 + $0x268] sm:$0xff]  ;;  %v4534_v37 = vld [vmem:[%s8822_s24 + $0x2c0] sm:$0xff] }
 0x180   : > { %7877 = vmatpush3.bf16.msra.mxu0 %v10044_v45  ;;  %7901 = vmatpush3.bf16.msra.mxu1 %v10044_v45  ;;  %v10298_v45 = vpack.c.bf16 %v4529_v30, %v4528_v62  ;;  %v10641_v62 = vld [vmem:[%s8822_s24 + $0x318] sm:$0xff]  ;;  %v4571_v30 = vld [vmem:[%s10918_s1 + $0x420] sm:$0xff] }
 0x181   : > { %7878 = vmatprep.subr.bf16.mxu0 %v8683_v3  ;;  %7902 = vmatprep.subr.bf16.mxu1 %v8683_v3 }
 0x182   : > { %6619 = vmatprep.mubr.msk.f32.mxu0 %vm8684_vm0, %v8685_v6  ;;  %6672 = vmatprep.mubr.msk.f32.mxu1 %vm8684_vm0, %v8685_v6 }
 0x184   : > { %7880 = vmatpush3.bf16.msra.mxu0 %v10065_v2  ;;  %7904 = vmatpush3.bf16.msra.mxu1 %v10065_v2  ;;  %v4551_v2 = vld [vmem:[%s10918_s1 + $0x3b8] sm:$0xff] }
 0x185   : > { %7905 = vmatprep.subr.bf16.mxu0 %v8683_v3  ;;  %7929 = vmatprep.subr.bf16.mxu1 %v8683_v3  ;;  %v10447_v4 = vpack.c.bf16 %v4551_v2, %v4550_v1  ;;  %v4580_v1 = vld [vmem:[%s10918_s1 + $0x468] sm:$0xff] }
 0x187   : > { %6620 = vmatmul.mubr.f32.vlgmr.msra.gmra.mrb[14].mxu0 %v9923_v11  ;;  %6673 = vmatmul.mubr.f32.vlgmr.msra.gmra.mrb[14].mxu1 %v10156_v49 }
 0x188   : > { %7907 = vmatpush3.bf16.msra.mxu0 %v10158_v27  ;;  %7931 = vmatpush3.bf16.msra.mxu1 %v10158_v27 }
 0x189   : > { %7908 = vmatprep.subr.bf16.mxu0 %v8683_v3  ;;  %7932 = vmatprep.subr.bf16.mxu1 %v8683_v3 }
 0x18a   : > { %6622 = vmatprep.mubr.msk.f32.mxu0 %vm8684_vm0, %v8685_v6  ;;  %6675 = vmatprep.mubr.msk.f32.mxu1 %vm8684_vm0, %v8685_v6 }
 0x18b   : > { %6623 = vmatmul.mubr.f32.gmra.mrb[16].mxu0 %v9942_v16  ;;  %6676 = vmatmul.mubr.f32.gmra.mrb[16].mxu1 %v10175_v44 }
 0x18c   : > { %7910 = vmatpush3.bf16.msra.mxu0 %v10172_v38  ;;  %7934 = vmatpush3.bf16.msra.mxu1 %v10172_v38 }
 0x18d   : > { %7911 = vmatprep.subr.bf16.mxu0 %v8683_v3  ;;  %7935 = vmatprep.subr.bf16.mxu1 %v8683_v3 }
 0x18e   : > { %6625 = vmatprep.mubr.msk.f32.mxu0 %vm8684_vm0, %v8685_v6  ;;  %6678 = vmatprep.mubr.msk.f32.mxu1 %vm8684_vm0, %v8685_v6 }
 0x18f   : > { %6626 = vmatmul.mubr.f32.gmra.mrb[18].mxu0 %v9963_v20  ;;  %6679 = vmatmul.mubr.f32.gmra.mrb[18].mxu1 %v10196_v10 }
 0x190   : > { %7913 = vmatpush3.bf16.msra.mxu0 %v10193_v9  ;;  %7937 = vmatpush3.bf16.msra.mxu1 %v10193_v9 }
 0x191   : > { %7914 = vmatprep.subr.bf16.mxu0 %v8683_v3  ;;  %7938 = vmatprep.subr.bf16.mxu1 %v8683_v3 }
 0x192   : > { %6628 = vmatprep.mubr.msk.f32.mxu0 %vm8684_vm0, %v8685_v6  ;;  %6681 = vmatprep.mubr.msk.f32.mxu1 %vm8684_vm0, %v8685_v6 }
 0x193   : > { %6629 = vmatmul.mubr.f32.gmra.mrb[20].mxu0 %v9984_v53  ;;  %6682 = vmatmul.mubr.f32.gmra.mrb[20].mxu1 %v10217_v15 }
 0x194   : > { %7916 = vmatpush3.bf16.msra.mxu0 %v10214_v14  ;;  %7940 = vmatpush3.bf16.msra.mxu1 %v10214_v14 }
 0x195   : > { %7917 = vmatprep.subr.bf16.mxu0 %v8683_v3  ;;  %7941 = vmatprep.subr.bf16.mxu1 %v8683_v3 }
 0x196   : > { %6631 = vmatprep.mubr.msk.f32.mxu0 %vm8684_vm0, %v8685_v6  ;;  %6684 = vmatprep.mubr.msk.f32.mxu1 %vm8684_vm0, %v8685_v6 }
 0x197   : > { %6632 = vmatmul.mubr.f32.gmra.mrb[22].mxu0 %v10005_v46  ;;  %6685 = vmatmul.mubr.f32.gmra.mrb[22].mxu1 %v10238_v21 }
 0x198   : > { %7919 = vmatpush3.bf16.msra.mxu0 %v10235_v19  ;;  %7943 = vmatpush3.bf16.msra.mxu1 %v10235_v19 }
 0x199   : > { %7920 = vmatprep.subr.bf16.mxu0 %v8683_v3  ;;  %7944 = vmatprep.subr.bf16.mxu1 %v8683_v3 }
 0x19a   : > { %6634 = vmatprep.mubr.msk.f32.mxu0 %vm8684_vm0, %v8685_v6  ;;  %6687 = vmatprep.mubr.msk.f32.mxu1 %vm8684_vm0, %v8685_v6 }
 0x19b   : > { %6635 = vmatmul.mubr.f32.gmra.mrb[24].mxu0 %v10026_v61  ;;  %6688 = vmatmul.mubr.f32.gmra.mrb[24].mxu1 %v10259_v25 }
 0x19c   : > { %7922 = vmatpush3.bf16.msra.mxu0 %v10256_v54  ;;  %7946 = vmatpush3.bf16.msra.mxu1 %v10256_v54 }
 0x19d   : > { %7923 = vmatprep.subr.bf16.mxu0 %v8683_v3  ;;  %7947 = vmatprep.subr.bf16.mxu1 %v8683_v3 }
 0x19e   : > { %6637 = vmatprep.mubr.msk.f32.mxu0 %vm8684_vm0, %v8685_v6  ;;  %6690 = vmatprep.mubr.msk.f32.mxu1 %vm8684_vm0, %v8685_v6 }
 0x19f   : > { %6638 = vmatmul.mubr.f32.gmra.mrb[26].mxu0 %v10047_v50  ;;  %6691 = vmatmul.mubr.f32.gmra.mrb[26].mxu1 %v10280_v57 }
 0x1a0   : > { %7925 = vmatpush3.bf16.msra.mxu0 %v10277_v56  ;;  %7949 = vmatpush3.bf16.msra.mxu1 %v10277_v56 }
 0x1a1   : > { %7926 = vmatprep.subr.bf16.mxu0 %v8683_v3  ;;  %7950 = vmatprep.subr.bf16.mxu1 %v8683_v3 }
 0x1a2   : > { %6725 = vmatprep.mubr.msk.f32.mxu0 %vm8684_vm0, %v8685_v6  ;;  %6778 = vmatprep.mubr.msk.f32.mxu1 %vm8684_vm0, %v8685_v6 }
 0x1a4   : > { %7928 = vmatpush3.bf16.msra.mxu0 %v10298_v45  ;;  %7952 = vmatpush3.bf16.msra.mxu1 %v10298_v45 }
 0x1a5   : > { %7953 = vmatprep.subr.bf16.mxu0 %v8683_v3  ;;  %7977 = vmatprep.subr.bf16.mxu1 %v8683_v3 }
 0x1a7   : > { %6726 = vmatmul.mubr.f32.vlgmr.msra.gmra.mrb[0].mxu0 %v9669_v36  ;;  %6779 = vmatmul.mubr.f32.vlgmr.msra.gmra.mrb[0].mxu1 %v9672_v41  ;;  %v4544_v36 = vld [vmem:[%s10918_s1 + $0x380] sm:$0xff]  ;;  %v4545_v41 = vld [vmem:[%s10918_s1 + $0x388] sm:$0xff] }
 0x1a8   : > { %7955 = vmatpush3.bf16.msra.mxu0 %v10158_v27  ;;  %7979 = vmatpush3.bf16.msra.mxu1 %v10158_v27  ;;  %v4555_v27 = vld [vmem:[%s10918_s1 + $0x3d8] sm:$0xff] }
 0x1a9   : > { %7956 = vmatprep.subr.bf16.mxu0 %v8683_v3  ;;  %7980 = vmatprep.subr.bf16.mxu1 %v8683_v3  ;;  %v10489_v33 = vpack.c.bf16 %v4555_v27, %v4554_v26  ;;  %v4588_v26 = vld [vmem:[%s8822_s24 + $0x370] sm:$0xff]  ;;  %v4589_v27 = vld [vmem:[%s8822_s24 + $0x378] sm:$0x1] }
 0x1aa   : > { %6728 = vmatprep.mubr.msk.f32.mxu0 %vm8684_vm0, %v8685_v6  ;;  %6781 = vmatprep.mubr.msk.f32.mxu1 %vm8684_vm0, %v8685_v6 }
 0x1ab   : > { %6729 = vmatmul.mubr.f32.gmra.mrb[2].mxu0 %v9691_v58  ;;  %6782 = vmatmul.mubr.f32.gmra.mrb[2].mxu1 %v9694_v59  ;;  %v4530_v58 = vld [vmem:[%s8822_s24 + $0x2a0] sm:$0xff]  ;;  %v10390_v59 = vld [vmem:[%s8822_s24 + $0x2d8] sm:$0xff] }
 0x1ac   : > { %7958 = vmatpush3.bf16.msra.mxu0 %v10172_v38  ;;  %7982 = vmatpush3.bf16.msra.mxu1 %v10172_v38  ;;  %v10493_v38 = vld [vmem:[%s8822_s24 + $0x300] sm:$0xff] }
 0x1ad   : > { %7959 = vmatprep.subr.bf16.mxu0 %v8683_v3  ;;  %7983 = vmatprep.subr.bf16.mxu1 %v8683_v3 }
 0x1ae   : > { %6731 = vmatprep.mubr.msk.f32.mxu0 %vm8684_vm0, %v8685_v6  ;;  %6784 = vmatprep.mubr.msk.f32.mxu1 %vm8684_vm0, %v8685_v6 }
 0x1af   : > { %6732 = vmatmul.mubr.f32.gmra.mrb[4].mxu0 %v9715_v35  ;;  %6785 = vmatmul.mubr.f32.gmra.mrb[4].mxu1 %v9718_v40  ;;  %v10392_v35 = vpack.c.bf16 %v4545_v41, %v4544_v36  ;;  %v4546_v40 = vld [vmem:[%s10918_s1 + $0x390] sm:$0xff]  ;;  %v10662_v41 = vld [vmem:[%s8822_s24 + $0x320] sm:$0xff] }
 0x1b0   : > { %7961 = vmatpush3.bf16.msra.mxu0 %v10193_v9  ;;  %7985 = vmatpush3.bf16.msra.mxu1 %v10193_v9  ;;  %v10510_v9 = vpack.c.bf16 %v4557_v48, %v4556_v47 }
 0x1b1   : > { %7962 = vmatprep.subr.bf16.mxu0 %v8683_v3  ;;  %7986 = vmatprep.subr.bf16.mxu1 %v8683_v3 }
 0x1b2   : > { %6734 = vmatprep.mubr.msk.f32.mxu0 %vm8684_vm0, %v8685_v6  ;;  %6787 = vmatprep.mubr.msk.f32.mxu1 %vm8684_vm0, %v8685_v6 }
 0x1b3   : > { %6735 = vmatmul.mubr.f32.gmra.mrb[6].mxu0 %v9739_v63  ;;  %6788 = vmatmul.mubr.f32.gmra.mrb[6].mxu1 %v9742_v0  ;;  %v4547_v63 = vld [vmem:[%s10918_s1 + $0x398] sm:$0xff] }
 0x1b4   : > { %7964 = vmatpush3.bf16.msra.mxu0 %v10214_v14  ;;  %7988 = vmatpush3.bf16.msra.mxu1 %v10214_v14  ;;  %v10405_v0 = vpack.c.bf16 %v4547_v63, %v4546_v40  ;;  %v4558_v14 = vld [vmem:[%s10918_s1 + $0x3f0] sm:$0xff]  ;;  %v10683_v40 = vld [vmem:[%s8822_s24 + $0x328] sm:$0xff]  ;;  %v4575_v63 = vld [vmem:[%s10918_s1 + $0x440] sm:$0xff] }
 0x1b5   : > { %7965 = vmatprep.subr.bf16.mxu0 %v8683_v3  ;;  %7989 = vmatprep.subr.bf16.mxu1 %v8683_v3  ;;  %v10531_v18 = vpack.c.bf16 %v4559_v17, %v4558_v14 }
 0x1b6   : > { %6737 = vmatprep.mubr.msk.f32.mxu0 %vm8684_vm0, %v8685_v6  ;;  %6790 = vmatprep.mubr.msk.f32.mxu1 %vm8684_vm0, %v8685_v6 }
 0x1b7   : > { %6738 = vmatmul.mubr.f32.gmra.mrb[8].mxu0 %v9763_v7  ;;  %6791 = vmatmul.mubr.f32.gmra.mrb[8].mxu1 %v9766_v8  ;;  %v4531_v7 = vld [vmem:[%s8822_s24 + $0x2a8] sm:$0xff]  ;;  %v10409_v8 = vld [vmem:[%s8822_s24 + $0x2e0] sm:$0xff] }
 0x1b8   : > { %7967 = vmatpush3.bf16.msra.mxu0 %v10235_v19  ;;  %7991 = vmatpush3.bf16.msra.mxu1 %v10235_v19  ;;  %v8661_v19 = vld [vmem:[%s8822_s24 + $0x1f8] sm:$0xff] }
 0x1b9   : > { %7968 = vmatprep.subr.bf16.mxu0 %v8683_v3  ;;  %7992 = vmatprep.subr.bf16.mxu1 %v8683_v3 }
 0x1ba   : > { %6740 = vmatprep.mubr.msk.f32.mxu0 %vm8684_vm0, %v8685_v6  ;;  %6793 = vmatprep.mubr.msk.f32.mxu1 %vm8684_vm0, %v8685_v6 }
 0x1bb   : > { %6741 = vmatmul.mubr.f32.gmra.mrb[10].mxu0 %v9787_v28  ;;  %6794 = vmatmul.mubr.f32.gmra.mrb[10].mxu1 %v9790_v32  ;;  %v4548_v28 = vld [vmem:[%s10918_s1 + $0x3a0] sm:$0xff]  ;;  %v4549_v32 = vld [vmem:[%s10918_s1 + $0x3a8] sm:$0xff] }
 0x1bc   : > { %7970 = vmatpush3.bf16.msra.mxu0 %v10256_v54  ;;  %7994 = vmatpush3.bf16.msra.mxu1 %v10256_v54 }
 0x1bd   : > { %7971 = vmatprep.subr.bf16.mxu0 %v8683_v3  ;;  %7995 = vmatprep.subr.bf16.mxu1 %v8683_v3 }
 0x1be   : > { %6743 = vmatprep.mubr.msk.f32.mxu0 %vm8684_vm0, %v8685_v6  ;;  %6796 = vmatprep.mubr.msk.f32.mxu1 %vm8684_vm0, %v8685_v6 }
 0x1bf   : > { %6744 = vmatmul.mubr.f32.gmra.mrb[12].mxu0 %v9811_v39  ;;  %6797 = vmatmul.mubr.f32.gmra.mrb[12].mxu1 %v9814_v42  ;;  %v10426_v39 = vpack.c.bf16 %v4549_v32, %v4548_v28  ;;  %v4532_v42 = vld [vmem:[%s8822_s24 + $0x2b0] sm:$0xff]  ;;  %v4578_v32 = vld [vmem:[%s10918_s1 + $0x458] sm:$0xff] }
 0x1c0   : > { %7973 = vmatpush3.bf16.msra.mxu0 %v10277_v56  ;;  %7997 = vmatpush3.bf16.msra.mxu1 %v10277_v56  ;;  %v10638_v56 = vpack.c.bf16 %v4570_v51, %v4569_v31  ;;  %v4577_v28 = vld [vmem:[%s10918_s1 + $0x450] sm:$0xff] }
 0x1c1   : > { %7974 = vmatprep.subr.bf16.mxu0 %v8683_v3  ;;  %7998 = vmatprep.subr.bf16.mxu1 %v8683_v3 }
 0x1c2   : > { %6831 = vmatprep.mubr.msk.f32.mxu0 %vm8684_vm0, %v8685_v6  ;;  %6884 = vmatprep.mubr.msk.f32.mxu1 %vm8684_vm0, %v8685_v6 }
 0x1c4   : > { %7976 = vmatpush3.bf16.msra.mxu0 %v10298_v45  ;;  %8000 = vmatpush3.bf16.msra.mxu1 %v10298_v45  ;;  %v4572_v45 = vld [vmem:[%s10918_s1 + $0x428] sm:$0xff] }
 0x1c5   : > { %8001 = vmatprep.subr.bf16.mxu0 %v8683_v3  ;;  %8025 = vmatprep.subr.bf16.mxu1 %v8683_v3  ;;  %v10659_v36 = vpack.c.bf16 %v4572_v45, %v4571_v30 }
 0x1c7   : > { %6832 = vmatmul.mubr.f32.vlgmr.msra.gmra.mrb[14].mxu0 %v4530_v58  ;;  %6885 = vmatmul.mubr.f32.vlgmr.msra.gmra.mrb[14].mxu1 %v10390_v59  ;;  %v4573_v58 = vld [vmem:[%s10918_s1 + $0x430] sm:$0xff] }
 0x1c8   : > { %8003 = vmatpush3.bf16.msra.mxu0 %v10392_v35  ;;  %8027 = vmatpush3.bf16.msra.mxu1 %v10392_v35 }
 0x1c9   : > { %8004 = vmatprep.subr.bf16.mxu0 %v8683_v3  ;;  %8028 = vmatprep.subr.bf16.mxu1 %v8683_v3 }
 0x1ca   : > { %6834 = vmatprep.mubr.msk.f32.mxu0 %vm8684_vm0, %v8685_v6  ;;  %6887 = vmatprep.mubr.msk.f32.mxu1 %vm8684_vm0, %v8685_v6 }
 0x1cb   : > { %6835 = vmatmul.mubr.f32.gmra.mrb[16].mxu0 %v4531_v7  ;;  %6888 = vmatmul.mubr.f32.gmra.mrb[16].mxu1 %v10409_v8 }
 0x1cc   : > { %8006 = vmatpush3.bf16.msra.mxu0 %v10405_v0  ;;  %8030 = vmatpush3.bf16.msra.mxu1 %v10405_v0 }
 0x1cd   : > { %8007 = vmatprep.subr.bf16.mxu0 %v8683_v3  ;;  %8031 = vmatprep.subr.bf16.mxu1 %v8683_v3 }
 0x1ce   : > { %6837 = vmatprep.mubr.msk.f32.mxu0 %vm8684_vm0, %v8685_v6  ;;  %6890 = vmatprep.mubr.msk.f32.mxu1 %vm8684_vm0, %v8685_v6 }
 0x1cf   : > { %6838 = vmatmul.mubr.f32.gmra.mrb[18].mxu0 %v4532_v42  ;;  %6891 = vmatmul.mubr.f32.gmra.mrb[18].mxu1 %v10430_v55  ;;  %v10725_v42 = vld [vmem:[%s8822_s24 + $0x338] sm:$0xff] }
 0x1d0   : > { %8009 = vmatpush3.bf16.msra.mxu0 %v10426_v39  ;;  %8033 = vmatpush3.bf16.msra.mxu1 %v10426_v39 }
 0x1d1   : > { %8010 = vmatprep.subr.bf16.mxu0 %v8683_v3  ;;  %8034 = vmatprep.subr.bf16.mxu1 %v8683_v3 }
 0x1d2   : > { %6840 = vmatprep.mubr.msk.f32.mxu0 %vm8684_vm0, %v8685_v6  ;;  %6893 = vmatprep.mubr.msk.f32.mxu1 %vm8684_vm0, %v8685_v6 }
 0x1d3   : > { %6841 = vmatmul.mubr.f32.gmra.mrb[20].mxu0 %v4533_v23  ;;  %6894 = vmatmul.mubr.f32.gmra.mrb[20].mxu1 %v10451_v60  ;;  %v4581_v23 = vld [vmem:[%s10918_s1 + $0x470] sm:$0xff] }
 0x1d4   : > { %8012 = vmatpush3.bf16.msra.mxu0 %v10447_v4  ;;  %8036 = vmatpush3.bf16.msra.mxu1 %v10447_v4 }
 0x1d5   : > { %8013 = vmatprep.subr.bf16.mxu0 %v8683_v3  ;;  %8037 = vmatprep.subr.bf16.mxu1 %v8683_v3 }
 0x1d6   : > { %6843 = vmatprep.mubr.msk.f32.mxu0 %vm8684_vm0, %v8685_v6  ;;  %6896 = vmatprep.mubr.msk.f32.mxu1 %vm8684_vm0, %v8685_v6 }
 0x1d7   : > { %6844 = vmatmul.mubr.f32.gmra.mrb[22].mxu0 %v4534_v37  ;;  %6897 = vmatmul.mubr.f32.gmra.mrb[22].mxu1 %v10472_v43  ;;  %v4586_v37 = vld [vmem:[%s8822_s24 + $0x360] sm:$0xff] }
 0x1d8   : > { %8015 = vmatpush3.bf16.msra.mxu0 %v10468_v29  ;;  %8039 = vmatpush3.bf16.msra.mxu1 %v10468_v29 }
 0x1d9   : > { %8016 = vmatprep.subr.bf16.mxu0 %v8683_v3  ;;  %8040 = vmatprep.subr.bf16.mxu1 %v8683_v3 }
 0x1da   : > { %6846 = vmatprep.mubr.msk.f32.mxu0 %vm8684_vm0, %v8685_v6  ;;  %6899 = vmatprep.mubr.msk.f32.mxu1 %vm8684_vm0, %v8685_v6 }
 0x1db   : > { %6847 = vmatmul.mubr.f32.gmra.mrb[24].mxu0 %v4535_v34  ;;  %6900 = vmatmul.mubr.f32.gmra.mrb[24].mxu1 %v10493_v38 }
 0x1dc   : > { %8018 = vmatpush3.bf16.msra.mxu0 %v10489_v33  ;;  %8042 = vmatpush3.bf16.msra.mxu1 %v10489_v33 }
 0x1dd   : > { %8019 = vmatprep.subr.bf16.mxu0 %v8683_v3  ;;  %8043 = vmatprep.subr.bf16.mxu1 %v8683_v3 }
 0x1de   : > { %6849 = vmatprep.mubr.msk.f32.mxu0 %vm8684_vm0, %v8685_v6  ;;  %6902 = vmatprep.mubr.msk.f32.mxu1 %vm8684_vm0, %v8685_v6 }
 0x1df   : > { %6850 = vmatmul.mubr.f32.gmra.mrb[26].mxu0 %v4536_v12  ;;  %6903 = vmatmul.mubr.f32.gmra.mrb[26].mxu1 %v10514_v13 }
 0x1e0   : > { %8021 = vmatpush3.bf16.msra.mxu0 %v10510_v9  ;;  %8045 = vmatpush3.bf16.msra.mxu1 %v10510_v9 }
 0x1e1   : > { %8022 = vmatprep.subr.bf16.mxu0 %v8683_v3  ;;  %8046 = vmatprep.subr.bf16.mxu1 %v8683_v3 }
 0x1e2   : > { %6937 = vmatprep.mubr.msk.f32.mxu0 %vm8684_vm0, %v8685_v6  ;;  %6990 = vmatprep.mubr.msk.f32.mxu1 %vm8684_vm0, %v8685_v6 }
 0x1e4   : > { %8024 = vmatpush3.bf16.msra.mxu0 %v10531_v18  ;;  %8048 = vmatpush3.bf16.msra.mxu1 %v10531_v18 }
 0x1e5   : > { %8049 = vmatprep.subr.bf16.mxu0 %v8683_v3  ;;  %8073 = vmatprep.subr.bf16.mxu1 %v8683_v3 }
 0x1e7   : > { %6938 = vmatmul.mubr.f32.vlgmr.msra.gmra.mrb[0].mxu0 %v8661_v19  ;;  %6991 = vmatmul.mubr.f32.vlgmr.msra.gmra.mrb[0].mxu1 %v9923_v11  ;;  %v8663_v11 = vld [vmem:[%s8822_s24 + $0x208] sm:$0xff] }
 0x1e8   : > { %8051 = vmatpush3.bf16.msra.mxu0 %v10392_v35  ;;  %8075 = vmatpush3.bf16.msra.mxu1 %v10392_v35 }
 0x1e9   : > { %8052 = vmatprep.subr.bf16.mxu0 %v8683_v3  ;;  %8076 = vmatprep.subr.bf16.mxu1 %v8683_v3 }
 0x1ea   : > { %6940 = vmatprep.mubr.msk.f32.mxu0 %vm8684_vm0, %v8685_v6  ;;  %6993 = vmatprep.mubr.msk.f32.mxu1 %vm8684_vm0, %v8685_v6 }
 0x1eb   : > { %6941 = vmatmul.mubr.f32.gmra.mrb[2].mxu0 %v8662_v22  ;;  %6994 = vmatmul.mubr.f32.gmra.mrb[2].mxu1 %v9942_v16  ;;  %v8664_v16 = vld [vmem:[%s8822_s24 + $0x210] sm:$0xff] }
 0x1ec   : > { %8054 = vmatpush3.bf16.msra.mxu0 %v10405_v0  ;;  %8078 = vmatpush3.bf16.msra.mxu1 %v10405_v0  ;;  %v4576_v0 = vld [vmem:[%s10918_s1 + $0x448] sm:$0xff] }
 0x1ed   : > { %8055 = vmatprep.subr.bf16.mxu0 %v8683_v3  ;;  %8079 = vmatprep.subr.bf16.mxu1 %v8683_v3  ;;  %v10701_v7 = vpack.c.bf16 %v4576_v0, %v4575_v63 }
 0x1ee   : > { %6943 = vmatprep.mubr.msk.f32.mxu0 %vm8684_vm0, %v8685_v6  ;;  %6996 = vmatprep.mubr.msk.f32.mxu1 %vm8684_vm0, %v8685_v6 }
 0x1ef   : > { %6944 = vmatmul.mubr.f32.gmra.mrb[4].mxu0 %v8663_v11  ;;  %6997 = vmatmul.mubr.f32.gmra.mrb[4].mxu1 %v9963_v20  ;;  %v8665_v20 = vld [vmem:[%s8822_s24 + $0x218] sm:$0xff] }
 0x1f0   : > { %8057 = vmatpush3.bf16.msra.mxu0 %v10426_v39  ;;  %8081 = vmatpush3.bf16.msra.mxu1 %v10426_v39  ;;  %v10722_v39 = vpack.c.bf16 %v4578_v32, %v4577_v28  ;;  %v4590_v32 = vld [vmem:[%s10919_s2] ss:$0 sm:$0xff] }
 0x1f1   : > { %8058 = vmatprep.subr.bf16.mxu0 %v8683_v3  ;;  %8082 = vmatprep.subr.bf16.mxu1 %v8683_v3 }
 0x1f2   : > { %6946 = vmatprep.mubr.msk.f32.mxu0 %vm8684_vm0, %v8685_v6  ;;  %6999 = vmatprep.mubr.msk.f32.mxu1 %vm8684_vm0, %v8685_v6 }
 0x1f3   : > { %6947 = vmatmul.mubr.f32.gmra.mrb[6].mxu0 %v8664_v16  ;;  %7000 = vmatmul.mubr.f32.gmra.mrb[6].mxu1 %v9984_v53  ;;  %v8666_v53 = vld [vmem:[%s8822_s24 + $0x220] sm:$0xff] }
 0x1f4   : > { %8060 = vmatpush3.bf16.msra.mxu0 %v10447_v4  ;;  %8084 = vmatpush3.bf16.msra.mxu1 %v10447_v4  ;;  %v10746_v4 = vld [vmem:[%s8822_s24 + $0x340] sm:$0x1] }
 0x1f5   : > { %8061 = vmatprep.subr.bf16.mxu0 %v8683_v3  ;;  %8085 = vmatprep.subr.bf16.mxu1 %v8683_v3 }
 0x1f6   : > { %6949 = vmatprep.mubr.msk.f32.mxu0 %vm8684_vm0, %v8685_v6  ;;  %7002 = vmatprep.mubr.msk.f32.mxu1 %vm8684_vm0, %v8685_v6 }
 0x1f7   : > { %6950 = vmatmul.mubr.f32.gmra.mrb[8].mxu0 %v8665_v20  ;;  %7003 = vmatmul.mubr.f32.gmra.mrb[8].mxu1 %v10005_v46  ;;  %v8667_v46 = vld [vmem:[%s8822_s24 + $0x228] sm:$0x1] }
 0x1f8   : > { %8063 = vmatpush3.bf16.msra.mxu0 %v10468_v29  ;;  %8087 = vmatpush3.bf16.msra.mxu1 %v10468_v29  ;;  %v8669_v29 = vld [vmem:[%s8822_s24 + $0x238] sm:$0xff] }
 0x1f9   : > { %8064 = vmatprep.subr.bf16.mxu0 %v8683_v3  ;;  %8088 = vmatprep.subr.bf16.mxu1 %v8683_v3 }
 0x1fa   : > { %6952 = vmatprep.mubr.msk.f32.mxu0 %vm8684_vm0, %v8685_v6  ;;  %7005 = vmatprep.mubr.msk.f32.mxu1 %vm8684_vm0, %v8685_v6 }
 0x1fb   : > { %6953 = vmatmul.mubr.f32.gmra.mrb[10].mxu0 %v8666_v53  ;;  %7006 = vmatmul.mubr.f32.gmra.mrb[10].mxu1 %v10026_v61  ;;  %v4567_v61 = vld [vmem:[%s10918_s1 + $0x400] sm:$0xff] }
 0x1fc   : > { %8066 = vmatpush3.bf16.msra.mxu0 %v10489_v33  ;;  %8090 = vmatpush3.bf16.msra.mxu1 %v10489_v33  ;;  %v10624_v54 = vpack.c.bf16 %v4568_v52, %v4567_v61 }
 0x1fd   : > { %8067 = vmatprep.subr.bf16.mxu0 %v8683_v3  ;;  %8091 = vmatprep.subr.bf16.mxu1 %v8683_v3 }
 0x1fe   : > { %6955 = vmatprep.mubr.msk.f32.mxu0 %vm8684_vm0, %v8685_v6  ;;  %7008 = vmatprep.mubr.msk.f32.mxu1 %vm8684_vm0, %v8685_v6 }
 0x1ff   : > { %6956 = vmatmul.mubr.f32.gmra.mrb[12].mxu0 %v8667_v46  ;;  %7009 = vmatmul.mubr.f32.gmra.mrb[12].mxu1 %v10047_v50  ;;  %v10622_v50 = vld [vmem:[%s8822_s24 + $0x310] sm:$0xff] }
 0x200   : > { %8069 = vmatpush3.bf16.msra.mxu0 %v10510_v9  ;;  %8093 = vmatpush3.bf16.msra.mxu1 %v10510_v9 }
 0x201   : > { %8070 = vmatprep.subr.bf16.mxu0 %v8683_v3  ;;  %8094 = vmatprep.subr.bf16.mxu1 %v8683_v3 }
 0x202   : > { %7043 = vmatprep.mubr.msk.f32.mxu0 %vm8684_vm0, %v8685_v6  ;;  %7096 = vmatprep.mubr.msk.f32.mxu1 %vm8684_vm0, %v8685_v6 }
 0x204   : > { %8072 = vmatpush3.bf16.msra.mxu0 %v10531_v18  ;;  %8096 = vmatpush3.bf16.msra.mxu1 %v10531_v18 }
 0x205   : > { %8097 = vmatprep.subr.bf16.mxu0 %v8683_v3  ;;  %8121 = vmatprep.subr.bf16.mxu1 %v8683_v3 }
 0x207   : > { %7044 = vmatmul.mubr.f32.vlgmr.msra.gmra.mrb[14].mxu0 %v10390_v59  ;;  %7097 = vmatmul.mubr.f32.vlgmr.msra.gmra.mrb[14].mxu1 %v10622_v50  ;;  %v4574_v59 = vld [vmem:[%s10918_s1 + $0x438] sm:$0xff] }
 0x208   : > { %8099 = vmatpush3.bf16.msra.mxu0 %v10624_v54  ;;  %8123 = vmatpush3.bf16.msra.mxu1 %v10624_v54  ;;  %v10680_v35 = vpack.c.bf16 %v4574_v59, %v4573_v58 }
 0x209   : > { %8100 = vmatprep.subr.bf16.mxu0 %v8683_v3  ;;  %8124 = vmatprep.subr.bf16.mxu1 %v8683_v3 }
 0x20a   : > { %7046 = vmatprep.mubr.msk.f32.mxu0 %vm8684_vm0, %v8685_v6  ;;  %7099 = vmatprep.mubr.msk.f32.mxu1 %vm8684_vm0, %v8685_v6 }
 0x20b   : > { %7047 = vmatmul.mubr.f32.gmra.mrb[16].mxu0 %v10409_v8  ;;  %7100 = vmatmul.mubr.f32.gmra.mrb[16].mxu1 %v10641_v62  ;;  %v10704_v8 = vld [vmem:[%s8822_s24 + $0x330] sm:$0xff] }
 0x20c   : > { %8102 = vmatpush3.bf16.msra.mxu0 %v10638_v56  ;;  %8126 = vmatpush3.bf16.msra.mxu1 %v10638_v56 }
 0x20d   : > { %8103 = vmatprep.subr.bf16.mxu0 %v8683_v3  ;;  %8127 = vmatprep.subr.bf16.mxu1 %v8683_v3 }
 0x20e   : > { %7049 = vmatprep.mubr.msk.f32.mxu0 %vm8684_vm0, %v8685_v6  ;;  %7102 = vmatprep.mubr.msk.f32.mxu1 %vm8684_vm0, %v8685_v6 }
 0x20f   : > { %7050 = vmatmul.mubr.f32.gmra.mrb[18].mxu0 %v10430_v55  ;;  %7103 = vmatmul.mubr.f32.gmra.mrb[18].mxu1 %v10662_v41  ;;  %v4579_v55 = vld [vmem:[%s10918_s1 + $0x460] sm:$0xff] }
 0x210   : > { %8105 = vmatpush3.bf16.msra.mxu0 %v10659_v36  ;;  %8129 = vmatpush3.bf16.msra.mxu1 %v10659_v36  ;;  %v10743_v2 = vpack.c.bf16 %v4580_v1, %v4579_v55 }
 0x211   : > { %8106 = vmatprep.subr.bf16.mxu0 %v8683_v3  ;;  %8130 = vmatprep.subr.bf16.mxu1 %v8683_v3 }
 0x212   : > { %7052 = vmatprep.mubr.msk.f32.mxu0 %vm8684_vm0, %v8685_v6  ;;  %7105 = vmatprep.mubr.msk.f32.mxu1 %vm8684_vm0, %v8685_v6 }
 0x213   : > { %7053 = vmatmul.mubr.f32.gmra.mrb[20].mxu0 %v10451_v60  ;;  %7106 = vmatmul.mubr.f32.gmra.mrb[20].mxu1 %v10683_v40  ;;  %v4582_v60 = vld [vmem:[%s10918_s1 + $0x478] sm:$0xff] }
 0x214   : > { %8108 = vmatpush3.bf16.msra.mxu0 %v10680_v35  ;;  %8132 = vmatpush3.bf16.msra.mxu1 %v10680_v35  ;;  %v10764_v5 = vpack.c.bf16 %v4582_v60, %v4581_v23 }
 0x215   : > { %8109 = vmatprep.subr.bf16.mxu0 %v8683_v3  ;;  %8133 = vmatprep.subr.bf16.mxu1 %v8683_v3 }
 0x216   : > { %7055 = vmatprep.mubr.msk.f32.mxu0 %vm8684_vm0, %v8685_v6  ;;  %7108 = vmatprep.mubr.msk.f32.mxu1 %vm8684_vm0, %v8685_v6 }
 0x217   : > { %7056 = vmatmul.mubr.f32.gmra.mrb[22].mxu0 %v10472_v43  ;;  %7109 = vmatmul.mubr.f32.gmra.mrb[22].mxu1 %v10704_v8  ;;  %v4587_v43 = vld [vmem:[%s8822_s24 + $0x368] sm:$0xff] }
 0x218   : > { %8111 = vmatpush3.bf16.msra.mxu0 %v10701_v7  ;;  %8135 = vmatpush3.bf16.msra.mxu1 %v10701_v7 }
 0x219   : > { %8112 = vmatprep.subr.bf16.mxu0 %v8683_v3  ;;  %8136 = vmatprep.subr.bf16.mxu1 %v8683_v3 }
 0x21a   : > { %7058 = vmatprep.mubr.msk.f32.mxu0 %vm8684_vm0, %v8685_v6  ;;  %7111 = vmatprep.mubr.msk.f32.mxu1 %vm8684_vm0, %v8685_v6 }
 0x21b   : > { %7059 = vmatmul.mubr.f32.gmra.mrb[24].mxu0 %v10493_v38  ;;  %7112 = vmatmul.mubr.f32.gmra.mrb[24].mxu1 %v10725_v42 }
 0x21c   : > { %8114 = vmatpush3.bf16.msra.mxu0 %v10722_v39  ;;  %8138 = vmatpush3.bf16.msra.mxu1 %v10722_v39 }
 0x21d   : > { %8115 = vmatprep.subr.bf16.mxu0 %v8683_v3  ;;  %8139 = vmatprep.subr.bf16.mxu1 %v8683_v3 }
 0x21e   : > { %7061 = vmatprep.mubr.msk.f32.mxu0 %vm8684_vm0, %v8685_v6  ;;  %7114 = vmatprep.mubr.msk.f32.mxu1 %vm8684_vm0, %v8685_v6 }
 0x21f   : > { %7062 = vmatmul.mubr.f32.gmra.mrb[26].mxu0 %v10514_v13  ;;  %7115 = vmatmul.mubr.f32.gmra.mrb[26].mxu1 %v10746_v4 }
 0x220   : > { %8117 = vmatpush3.bf16.msra.mxu0 %v10743_v2  ;;  %8141 = vmatpush3.bf16.msra.mxu1 %v10743_v2 }
 0x221   : > { %8118 = vmatprep.subr.bf16.mxu0 %v8683_v3  ;;  %8142 = vmatprep.subr.bf16.mxu1 %v8683_v3 }
 0x222   : > { %7149 = vmatprep.mubr.msk.f32.mxu0 %vm8684_vm0, %v8685_v6  ;;  %7202 = vmatprep.mubr.msk.f32.mxu1 %vm8684_vm0, %v8685_v6 }
 0x224   : > { %8120 = vmatpush3.bf16.msra.mxu0 %v10764_v5  ;;  %8144 = vmatpush3.bf16.msra.mxu1 %v10764_v5 }
 0x225   : > { %8145 = vmatprep.subr.bf16.mxu0 %v8683_v3  ;;  %8169 = vmatprep.subr.bf16.mxu1 %v8683_v3 }
 0x227   : > { %7150 = vmatmul.mubr.f32.vlgmr.msra.gmra.mrb[0].mxu0 %v8668_v24  ;;  %7203 = vmatmul.mubr.f32.vlgmr.msra.gmra.mrb[0].mxu1 %v10156_v49  ;;  %v8670_v49 = vld [vmem:[%s8822_s24 + $0x240] sm:$0xff] }
 0x228   : > { %8147 = vmatpush3.bf16.msra.mxu0 %v10624_v54  ;;  %8171 = vmatpush3.bf16.msra.mxu1 %v10624_v54 }
 0x229   : > { %7152 = vmatprep.mubr.msk.f32.mxu0 %vm8684_vm0, %v8685_v6  ;;  %7205 = vmatprep.mubr.msk.f32.mxu1 %vm8684_vm0, %v8685_v6 }
 0x22a   : > { %8148 = vmatprep.subr.bf16.mxu0 %v8683_v3  ;;  %8172 = vmatprep.subr.bf16.mxu1 %v8683_v3 }
 0x22b   : > { %7153 = vmatmul.mubr.f32.gmra.mrb[2].mxu0 %v8669_v29  ;;  %7206 = vmatmul.mubr.f32.gmra.mrb[2].mxu1 %v10175_v44  ;;  %v8671_v44 = vld [vmem:[%s8822_s24 + $0x248] sm:$0xff] }
 0x22c   : > { %8150 = vmatpush3.bf16.msra.mxu0 %v10638_v56  ;;  %8174 = vmatpush3.bf16.msra.mxu1 %v10638_v56 }
 0x22d   : > { %7155 = vmatprep.mubr.msk.f32.mxu0 %vm8684_vm0, %v8685_v6  ;;  %7208 = vmatprep.mubr.msk.f32.mxu1 %vm8684_vm0, %v8685_v6 }
 0x22e   : > { %8151 = vmatprep.subr.bf16.mxu0 %v8683_v3  ;;  %8175 = vmatprep.subr.bf16.mxu1 %v8683_v3 }
 0x22f   : > { %7156 = vmatmul.mubr.f32.gmra.mrb[4].mxu0 %v8670_v49  ;;  %7209 = vmatmul.mubr.f32.gmra.mrb[4].mxu1 %v10196_v10  ;;  %v8672_v10 = vld [vmem:[%s8822_s24 + $0x250] sm:$0xff] }
 0x230   : > { %8153 = vmatpush3.bf16.msra.mxu0 %v10659_v36  ;;  %8177 = vmatpush3.bf16.msra.mxu1 %v10659_v36 }
 0x231   : > { %7158 = vmatprep.mubr.msk.f32.mxu0 %vm8684_vm0, %v8685_v6  ;;  %7211 = vmatprep.mubr.msk.f32.mxu1 %vm8684_vm0, %v8685_v6 }
 0x232   : > { %8154 = vmatprep.subr.bf16.mxu0 %v8683_v3  ;;  %8178 = vmatprep.subr.bf16.mxu1 %v8683_v3 }
 0x233   : > { %7159 = vmatmul.mubr.f32.gmra.mrb[6].mxu0 %v8671_v44  ;;  %7212 = vmatmul.mubr.f32.gmra.mrb[6].mxu1 %v10217_v15  ;;  %v8673_v15 = vld [vmem:[%s8822_s24 + $0x258] sm:$0xff] }
 0x234   : > { %8156 = vmatpush3.bf16.msra.mxu0 %v10680_v35  ;;  %8180 = vmatpush3.bf16.msra.mxu1 %v10680_v35 }
 0x235   : > { %7161 = vmatprep.mubr.msk.f32.mxu0 %vm8684_vm0, %v8685_v6  ;;  %7214 = vmatprep.mubr.msk.f32.mxu1 %vm8684_vm0, %v8685_v6 }
 0x236   : > { %8157 = vmatprep.subr.bf16.mxu0 %v8683_v3  ;;  %8181 = vmatprep.subr.bf16.mxu1 %v8683_v3 }
 0x237   : > { %7162 = vmatmul.mubr.f32.gmra.mrb[8].mxu0 %v8672_v10  ;;  %7215 = vmatmul.mubr.f32.gmra.mrb[8].mxu1 %v10238_v21  ;;  %v8674_v21 = vld [vmem:[%s8822_s24 + $0x260] sm:$0x1] }
 0x238   : > { %8159 = vmatpush3.bf16.msra.mxu0 %v10701_v7  ;;  %8183 = vmatpush3.bf16.msra.mxu1 %v10701_v7 }
 0x239   : > { %7164 = vmatprep.mubr.msk.f32.mxu0 %vm8684_vm0, %v8685_v6  ;;  %7217 = vmatprep.mubr.msk.f32.mxu1 %vm8684_vm0, %v8685_v6 }
 0x23a   : > { %8160 = vmatprep.subr.bf16.mxu0 %v8683_v3  ;;  %8184 = vmatprep.subr.bf16.mxu1 %v8683_v3 }
 0x23b   : > { %7165 = vmatmul.mubr.f32.gmra.mrb[10].mxu0 %v8673_v15  ;;  %7218 = vmatmul.mubr.f32.gmra.mrb[10].mxu1 %v10259_v25  ;;  %v4583_v25 = vld [vmem:[%s8822_s24 + $0x348] sm:$0xff] }
 0x23c   : > { %8162 = vmatpush3.bf16.msra.mxu0 %v10722_v39  ;;  %8186 = vmatpush3.bf16.msra.mxu1 %v10722_v39 }
 0x23d   : > { %7167 = vmatprep.mubr.msk.f32.mxu0 %vm8684_vm0, %v8685_v6  ;;  %7220 = vmatprep.mubr.msk.f32.mxu1 %vm8684_vm0, %v8685_v6 }
 0x23e   : > { %8163 = vmatprep.subr.bf16.mxu0 %v8683_v3  ;;  %8187 = vmatprep.subr.bf16.mxu1 %v8683_v3 }
 0x23f   : > { %7168 = vmatmul.mubr.f32.gmra.mrb[12].mxu0 %v8674_v21  ;;  %7221 = vmatmul.mubr.f32.gmra.mrb[12].mxu1 %v10280_v57  ;;  %v4585_v57 = vld [vmem:[%s8822_s24 + $0x358] sm:$0xff] }
 0x240   : > { %8165 = vmatpush3.bf16.msra.mxu0 %v10743_v2  ;;  %8189 = vmatpush3.bf16.msra.mxu1 %v10743_v2 }
 0x241   : > { %8166 = vmatprep.subr.bf16.mxu0 %v8683_v3  ;;  %8190 = vmatprep.subr.bf16.mxu1 %v8683_v3  ;;  %v4584_v3 = vld [vmem:[%s8822_s24 + $0x350] sm:$0xff]  ;;  %s8642_s24 = smul.u32 56, %s10922_s13 }
 0x242   : > { %7255 = vmatprep.mubr.msk.f32.mxu0 %vm8684_vm0, %v8685_v6  ;;  %7308 = vmatprep.mubr.msk.f32.mxu1 %vm8684_vm0, %v8685_v6 }
 0x243   : > { %s10902_s20 = scalar_lea.vmem %s10920_s3, %s8642_s24 }
 0x244   : > { %8168 = vmatpush3.bf16.msra.mxu0 %v10764_v5  ;;  %8192 = vmatpush3.bf16.msra.mxu1 %v10764_v5 }
 0x247   : > { %7256 = vmatmul.mubr.f32.vlgmr.msra.gmra.mrb[14].mxu0 %v10622_v50  ;;  %7309 = vmatmul.mubr.f32.vlgmr.msra.gmra.mrb[14].mxu1 %v4583_v25 }
 0x248   : > { %7258 = vmatprep.mubr.msk.f32.mxu0 %vm8684_vm0, %v8685_v6  ;;  %7311 = vmatprep.mubr.msk.f32.mxu1 %vm8684_vm0, %v8685_v6 }
 0x24b   : > { %7259 = vmatmul.mubr.f32.gmra.mrb[16].mxu0 %v10641_v62  ;;  %7312 = vmatmul.mubr.f32.gmra.mrb[16].mxu1 %v4584_v3 }
 0x24c   : > { %7261 = vmatprep.mubr.msk.f32.mxu0 %vm8684_vm0, %v8685_v6  ;;  %7314 = vmatprep.mubr.msk.f32.mxu1 %vm8684_vm0, %v8685_v6 }
 0x24f   : > { %7262 = vmatmul.mubr.f32.gmra.mrb[18].mxu0 %v10662_v41  ;;  %7315 = vmatmul.mubr.f32.gmra.mrb[18].mxu1 %v4585_v57 }
 0x250   : > { %7264 = vmatprep.mubr.msk.f32.mxu0 %vm8684_vm0, %v8685_v6  ;;  %7317 = vmatprep.mubr.msk.f32.mxu1 %vm8684_vm0, %v8685_v6 }
 0x253   : > { %7265 = vmatmul.mubr.f32.gmra.mrb[20].mxu0 %v10683_v40  ;;  %7318 = vmatmul.mubr.f32.gmra.mrb[20].mxu1 %v4586_v37 }
 0x254   : > { %7267 = vmatprep.mubr.msk.f32.mxu0 %vm8684_vm0, %v8685_v6  ;;  %7320 = vmatprep.mubr.msk.f32.mxu1 %vm8684_vm0, %v8685_v6 }
 0x257   : > { %7268 = vmatmul.mubr.f32.gmra.mrb[22].mxu0 %v10704_v8  ;;  %7321 = vmatmul.mubr.f32.gmra.mrb[22].mxu1 %v4587_v43 }
 0x258   : > { %7270 = vmatprep.mubr.msk.f32.mxu0 %vm8684_vm0, %v8685_v6  ;;  %7323 = vmatprep.mubr.msk.f32.mxu1 %vm8684_vm0, %v8685_v6 }
 0x25b   : > { %7271 = vmatmul.mubr.f32.gmra.mrb[24].mxu0 %v10725_v42  ;;  %7324 = vmatmul.mubr.f32.gmra.mrb[24].mxu1 %v4588_v26 }
 0x25c   : > { %7273 = vmatprep.mubr.msk.f32.mxu0 %vm8684_vm0, %v8685_v6  ;;  %7326 = vmatprep.mubr.msk.f32.mxu1 %vm8684_vm0, %v8685_v6 }
 0x25f   : > { %7274 = vmatmul.mubr.f32.gmra.mrb[26].mxu0 %v10746_v4  ;;  %7327 = vmatmul.mubr.f32.gmra.mrb[26].mxu1 %v4589_v27 }
 0x2fa   : > { %v3877_v33 = vpop.f32.mrb[0].mxu0  ;;  %v3984_v34 = vpop.f32.mrb[0].mxu1 }
 0x2fb   : > { %v4247_v38 = vmax.f32 %v3877_v33, %v3984_v34  ;;  %v7151_v47 = vpop.f32.mrb[1].mxu0  ;;  %v7204_v48 = vpop.f32.mrb[1].mxu1 }
 0x2fe   : > { %v3882_v9 = vpop.f32.mrb[2].mxu0  ;;  %v3989_v12 = vpop.f32.mrb[2].mxu1 }
 0x2ff   : > { %v4248_v13 = vmax.f32 %v3882_v9, %v3989_v12  ;;  %v7154_v14 = vpop.f32.mrb[3].mxu0  ;;  %v7207_v17 = vpop.f32.mrb[3].mxu1 }
 0x302   : > { %v3887_v18 = vpop.f32.mrb[4].mxu0  ;;  %v3994_v19 = vpop.f32.mrb[4].mxu1 }
 0x303   : > { %v4249_v22 = vmax.f32 %v3887_v18, %v3994_v19  ;;  %v7157_v11 = vpop.f32.mrb[5].mxu0  ;;  %v7210_v16 = vpop.f32.mrb[5].mxu1 }
 0x306   : > { %v3892_v6 = vpop.f32.mrb[6].mxu0  ;;  %v3999_v20 = vpop.f32.mrb[6].mxu1 }
 0x307   : > { %v4250_v53 = vmax.f32 %v3892_v6, %v3999_v20  ;;  %v7160_v46 = vpop.f32.mrb[7].mxu0  ;;  %v7213_v61 = vpop.f32.mrb[7].mxu1 }
 0x30a   : > { %v3897_v52 = vpop.f32.mrb[8].mxu0  ;;  %v4004_v50 = vpop.f32.mrb[8].mxu1 }
 0x30b   : > { %v4251_v54 = vmax.f32 %v3897_v52, %v4004_v50  ;;  %v7163_v31 = vpop.f32.mrb[9].mxu0  ;;  %v7216_v51 = vpop.f32.mrb[9].mxu1 }
 0x30e   : > { %v10886_v56 = vpop.f32.mrb[10].mxu0  ;;  %v4009_v62 = vpop.f32.mrb[10].mxu1 }
 0x30f   : > { %v4252_v30 = vmax.f32 %v10886_v56, %v4009_v62  ;;  %v7166_v45 = vpop.f32.mrb[11].mxu0  ;;  %v7219_v36 = vpop.f32.mrb[11].mxu1 }
 0x312   : > { %v10889_v41 = vpop.f32.mrb[12].mxu0  ;;  %v10891_v58 = vpop.f32.mrb[12].mxu1 }
 0x313   : > { %v4253_v59 = vmax.f32 %v10889_v41, %v10891_v58  ;;  %v7169_v35 = vpop.f32.mrb[13].mxu0  ;;  %v7222_v40 = vpop.f32.mrb[13].mxu1 }
 0x31a   : > { %v4091_v63 = vpop.f32.mrb[14].mxu0  ;;  %v4206_v0 = vpop.f32.mrb[14].mxu1 }
 0x31b   : > { %v4254_v7 = vmax.f32 %v4091_v63, %v4206_v0  ;;  %v7257_v8 = vpop.f32.mrb[15].mxu0  ;;  %v7310_v28 = vpop.f32.mrb[15].mxu1 }
 0x31d   : > { %v4261_v39 = vmax.f32 %v4247_v38, %v4254_v7 }
 0x31e   : > { %v4096_v42 = vpop.f32.mrb[16].mxu0  ;;  %v4211_v55 = vpop.f32.mrb[16].mxu1 }
 0x31f   : > { %v4274_v1 = vadd.f32 %v4590_v32, %v4261_v39  ;;  %v4255_v2 = vmax.f32 %v4096_v42, %v4211_v55  ;;  %v7260_v4 = vpop.f32.mrb[17].mxu0  ;;  %v7313_v23 = vpop.f32.mrb[17].mxu1 }
 0x321   : > { %v4281_v60 = vmax.f32 %v4274_v1, 0.0  ;;  %v4262_v5 = vmax.f32 %v4248_v13, %v4255_v2 }
 0x322   : > { %v4101_v24 = vpop.f32.mrb[18].mxu0  ;;  %v4216_v29 = vpop.f32.mrb[18].mxu1 }
 0x323   : > { %4288 = vst [vmem:[%s10902_s20] sm:$0xff] %v4281_v60  ;;  %v4275_v49 = vadd.f32 %v4590_v32, %v4262_v5  ;;  %v4256_v44 = vmax.f32 %v4101_v24, %v4216_v29  ;;  %v7263_v10 = vpop.f32.mrb[19].mxu0  ;;  %v7316_v15 = vpop.f32.mrb[19].mxu1 }
 0x325   : > { %v4282_v21 = vmax.f32 %v4275_v49, 0.0  ;;  %v4263_v25 = vmax.f32 %v4249_v22, %v4256_v44 }
 0x326   : > { %v4106_v3 = vpop.f32.mrb[20].mxu0  ;;  %v4221_v57 = vpop.f32.mrb[20].mxu1 }
 0x327   : > { %4289 = vst [vmem:[%s10902_s20 + $0x8] sm:$0xff] %v4282_v21  ;;  %v4276_v37 = vadd.f32 %v4590_v32, %v4263_v25  ;;  %v4257_v43 = vmax.f32 %v4106_v3, %v4221_v57  ;;  %v7266_v26 = vpop.f32.mrb[21].mxu0  ;;  %v7319_v27 = vpop.f32.mrb[21].mxu1 }
 0x329   : > { %v4283_v33 = vmax.f32 %v4276_v37, 0.0  ;;  %v4264_v34 = vmax.f32 %v4250_v53, %v4257_v43 }
 0x32a   : > { %v4111_v38 = vpop.f32.mrb[22].mxu0  ;;  %v4226_v47 = vpop.f32.mrb[22].mxu1 }
 0x32b   : > { %4290 = vst [vmem:[%s10902_s20 + $0x10] sm:$0xff] %v4283_v33  ;;  %v4277_v48 = vadd.f32 %v4590_v32, %v4264_v34  ;;  %v4258_v9 = vmax.f32 %v4111_v38, %v4226_v47  ;;  %v7269_v12 = vpop.f32.mrb[23].mxu0  ;;  %v7322_v13 = vpop.f32.mrb[23].mxu1 }
 0x32d   : > { %v4284_v14 = vmax.f32 %v4277_v48, 0.0  ;;  %v4265_v17 = vmax.f32 %v4251_v54, %v4258_v9 }
 0x32e   : > { %v4116_v18 = vpop.f32.mrb[24].mxu0  ;;  %v4231_v19 = vpop.f32.mrb[24].mxu1 }
 0x32f   : > { %4291 = vst [vmem:[%s10902_s20 + $0x18] sm:$0xff] %v4284_v14  ;;  %v4278_v22 = vadd.f32 %v4590_v32, %v4265_v17  ;;  %v4259_v11 = vmax.f32 %v4116_v18, %v4231_v19  ;;  %v7272_v16 = vpop.f32.mrb[25].mxu0  ;;  %v7325_v6 = vpop.f32.mrb[25].mxu1 }
 0x331   : > { %v4285_v20 = vmax.f32 %v4278_v22, 0.0  ;;  %v4266_v53 = vmax.f32 %v4252_v30, %v4259_v11 }
 0x332   : > { %v4121_v46 = vpop.f32.mrb[26].mxu0  ;;  %v4236_v61 = vpop.f32.mrb[26].mxu1 }
 0x333   : > { %4292 = vst [vmem:[%s10902_s20 + $0x20] sm:$0xff] %v4285_v20  ;;  %v4279_v52 = vadd.f32 %v4590_v32, %v4266_v53  ;;  %v4260_v50 = vmax.f32 %v4121_v46, %v4236_v61  ;;  %v7275_v31 = vpop.f32.mrb[27].mxu0  ;;  %v7328_v51 = vpop.f32.mrb[27].mxu1 }
 0x335   : > { %v4286_v56 = vmax.f32 %v4279_v52, 0.0  ;;  %v4267_v54 = vmax.f32 %v4253_v59, %v4260_v50 }
 0x337   : > { %4293 = vst [vmem:[%s10902_s20 + $0x28] sm:$0xff] %v4286_v56  ;;  %v4280_v62 = vadd.f32 %v4590_v32, %v4267_v54 }
 0x339   : > { %v4287_v45 = vmax.f32 %v4280_v62, 0.0 }
 0x33b   : > { %4294 = vst [vmem:[%s10902_s20 + $0x30] sm:$0x1] %v4287_v45 }
 0x33c PF: > { %s13_s12 = sadd.s32 1, %s8681_s12  }
 0x33d   : > { %p10_p4 = scmp.ge.s32.totalorder %s13_s12, 4  }
 0x33f   :  { %12 = sbr.rel (!%p10_p4) target bundleno = 1 (0x1), region = 85 }

// kernel: cnn_forward.5
= control target key start
LH: loop header
LB: loop body
LE: loop exit
PB: predicated region body
PF: predicated region fallthrough
CT: control target
= control target key end

     0   :  { %v4761_v43 = vmov 1983009808   ;;  %v842_v45 = vlaneseq  ;;  %s7417_s0 = inlined_call_operand.vmem [shape: f32[2,6272], index: 0, kind: input, shape index: {}]   ;;  %s7418_s1 = inlined_call_operand.vmem [shape: f32[6272,128], index: 1, kind: input, shape index: {}]   ;;  %s7419_s2 = inlined_call_operand.vmem [shape: f32[1,128], index: 2, kind: input, shape index: {}]   ;;  %s7420_s3 = inlined_call_operand.vmem [shape: f32[128,128], index: 3, kind: input, shape index: {}]   ;;  %s7421_s4 = inlined_call_operand.vmem [shape: f32[1,128], index: 4, kind: input, shape index: {}]   ;;  %s7422_s5 = inlined_call_operand.hbm [shape: f32[2,128], index: 5, kind: output, shape index: {}]  }
   0x1   :  { %v50_v0 = vld [vmem:[%s7418_s1 + $0x80] sm:$0xff]  ;;  %v51_v1 = vld [vmem:[%s7418_s1 + $0x88] sm:$0xff]  ;;  %v52_v11 = vld [vmem:[%s7418_s1 + $0x90] sm:$0xff]  ;;  %v840_v44 = vunpack.c.l.s4 %v4761_v43 }
   0x2   :  { %v34_v2 = vld [vmem:[%s7418_s1] sm:$0xff]  ;;  %v3904_v3 = vpack.c.bf16 %v51_v1, %v50_v0  ;;  %v35_v4 = vld [vmem:[%s7418_s1 + $0x8] sm:$0xff]  ;;  %v53_v13 = vld [vmem:[%s7418_s1 + $0x98] sm:$0xff]  ;;  %v843_v60 = vshrl.u32 %v842_v45, 7 }
   0x3   :  { %v82_v5 = vld [vmem:[%s7418_s1 + $0x180] sm:$0xff]  ;;  %v83_v6 = vld [vmem:[%s7418_s1 + $0x188] sm:$0xff]  ;;  %v3906_v7 = vpack.c.bf16 %v35_v4, %v34_v2  ;;  %v36_v14 = vld [vmem:[%s7418_s1 + $0x10] sm:$0xff]  ;;  %v3908_v16 = vpack.c.bf16 %v53_v13, %v52_v11  ;;  %v841_v59 = vunpack.c.0.s8 %v840_v44 }
   0x4   :  { %v3936_v8 = vpack.c.bf16 %v83_v6, %v82_v5  ;;  %v66_v9 = vld [vmem:[%s7418_s1 + $0x100] sm:$0xff]  ;;  %v67_v10 = vld [vmem:[%s7418_s1 + $0x108] sm:$0xff]  ;;  %3905 = vmatprep.subr.bf16.mxu0 %v3904_v3  ;;  %v37_v15 = vld [vmem:[%s7418_s1 + $0x18] sm:$0xff] }
   0x5   :  { %v3938_v12 = vpack.c.bf16 %v67_v10, %v66_v9  ;;  %3907 = vmatpush3.bf16.msra.mxu0 %v3906_v7  ;;  %v3910_v17 = vpack.c.bf16 %v37_v15, %v36_v14  ;;  %v84_v18 = vld [vmem:[%s7418_s1 + $0x190] sm:$0xff]  ;;  %v85_v19 = vld [vmem:[%s7418_s1 + $0x198] sm:$0xff]  ;;  %v54_v23 = vld [vmem:[%s7418_s1 + $0xa0] sm:$0xff]  ;;  %v4940_v10 = vsub.s32 %v841_v59, %v843_v60 }
   0x6   :  { %3937 = vmatprep.subr.bf16.mxu1 %v3936_v8  ;;  %v68_v20 = vld [vmem:[%s7418_s1 + $0x110] sm:$0xff]  ;;  %v3940_v21 = vpack.c.bf16 %v85_v19, %v84_v18  ;;  %v69_v22 = vld [vmem:[%s7418_s1 + $0x118] sm:$0xff]  ;;  %v55_v24 = vld [vmem:[%s7418_s1 + $0xa8] sm:$0xff]  ;;  %3909 = vmatprep.subr.bf16.mxu0 %v3908_v16 }
   0x7   :  { %3939 = vmatpush3.bf16.msra.mxu1 %v3938_v12  ;;  %v3942_v25 = vpack.c.bf16 %v69_v22, %v68_v20  ;;  %v3912_v26 = vpack.c.bf16 %v55_v24, %v54_v23  ;;  %v38_v27 = vld [vmem:[%s7418_s1 + $0x20] sm:$0xff]  ;;  %v39_v28 = vld [vmem:[%s7418_s1 + $0x28] sm:$0xff]  ;;  %v56_v35 = vld [vmem:[%s7418_s1 + $0xb0] sm:$0xff] }
   0x8   :  { %v86_v29 = vld [vmem:[%s7418_s1 + $0x1a0] sm:$0xff]  ;;  %3941 = vmatprep.subr.bf16.mxu1 %v3940_v21  ;;  %v87_v30 = vld [vmem:[%s7418_s1 + $0x1a8] sm:$0xff]  ;;  %v3914_v33 = vpack.c.bf16 %v39_v28, %v38_v27  ;;  %v57_v36 = vld [vmem:[%s7418_s1 + $0xb8] sm:$0xff] }
   0x9   :  { %v70_v31 = vld [vmem:[%s7418_s1 + $0x120] sm:$0xff]  ;;  %v71_v32 = vld [vmem:[%s7418_s1 + $0x128] sm:$0xff]  ;;  %3911 = vmatpush3.bf16.msra.mxu0 %v3910_v17  ;;  %v3944_v34 = vpack.c.bf16 %v87_v30, %v86_v29  ;;  %v40_v37 = vld [vmem:[%s7418_s1 + $0x30] sm:$0xff]  ;;  %v3916_v39 = vpack.c.bf16 %v57_v36, %v56_v35 }
   0xa   :  { %3913 = vmatprep.subr.bf16.mxu0 %v3912_v26  ;;  %v3946_v38 = vpack.c.bf16 %v71_v32, %v70_v31  ;;  %v41_v40 = vld [vmem:[%s7418_s1 + $0x38] sm:$0xff]  ;;  %v88_v41 = vld [vmem:[%s7418_s1 + $0x1b0] sm:$0xff]  ;;  %v58_v49 = vld [vmem:[%s7418_s1 + $0xc0] sm:$0xff] }
   0xb   :  { %3943 = vmatpush3.bf16.msra.mxu1 %v3942_v25  ;;  %v89_v42 = vld [vmem:[%s7418_s1 + $0x1b8] sm:$0xff]  ;;  %v72_v47 = vld [vmem:[%s7418_s1 + $0x130] sm:$0xff]  ;;  %v59_v50 = vld [vmem:[%s7418_s1 + $0xc8] sm:$0xff]  ;;  %v3918_v51 = vpack.c.bf16 %v41_v40, %v40_v37 }
   0xc   :  { %3945 = vmatprep.subr.bf16.mxu1 %v3944_v34  ;;  %v3948_v46 = vpack.c.bf16 %v89_v42, %v88_v41  ;;  %v73_v48 = vld [vmem:[%s7418_s1 + $0x138] sm:$0xff]  ;;  %v90_v52 = vld [vmem:[%s7418_s1 + $0x1c0] sm:$0xff]  ;;  %v91_v53 = vld [vmem:[%s7418_s1 + $0x1c8] sm:$0xff]  ;;  %v3920_v55 = vpack.c.bf16 %v59_v50, %v58_v49 }
   0xd   :  { %3915 = vmatpush3.bf16.msra.mxu0 %v3914_v33  ;;  %v3950_v54 = vpack.c.bf16 %v73_v48, %v72_v47  ;;  %v42_v56 = vld [vmem:[%s7418_s1 + $0x40] sm:$0xff]  ;;  %v43_v57 = vld [vmem:[%s7418_s1 + $0x48] sm:$0xff]  ;;  %v3952_v61 = vpack.c.bf16 %v91_v53, %v90_v52  ;;  %v60_v63 = vld [vmem:[%s7418_s1 + $0xd0] sm:$0xff] }
   0xe   :  { %3917 = vmatprep.subr.bf16.mxu0 %v3916_v39  ;;  %v74_v58 = vld [vmem:[%s7418_s1 + $0x140] sm:$0xff]  ;;  %v75_v62 = vld [vmem:[%s7418_s1 + $0x148] sm:$0xff]  ;;  %v61_v0 = vld [vmem:[%s7418_s1 + $0xd8] sm:$0xff]  ;;  %v3922_v3 = vpack.c.bf16 %v43_v57, %v42_v56 }
   0xf   :  { %3947 = vmatpush3.bf16.msra.mxu1 %v3946_v38  ;;  %v92_v1 = vld [vmem:[%s7418_s1 + $0x1d0] sm:$0xff]  ;;  %v93_v2 = vld [vmem:[%s7418_s1 + $0x1d8] sm:$0xff]  ;;  %v3954_v5 = vpack.c.bf16 %v75_v62, %v74_v58  ;;  %v3924_v6 = vpack.c.bf16 %v61_v0, %v60_v63  ;;  %v62_v12 = vld [vmem:[%s7418_s1 + $0xe0] sm:$0xff] }
  0x10   :  { %3949 = vmatprep.subr.bf16.mxu1 %v3948_v46  ;;  %v44_v4 = vld [vmem:[%s7418_s1 + $0x50] sm:$0xff]  ;;  %v45_v7 = vld [vmem:[%s7418_s1 + $0x58] sm:$0xff]  ;;  %v3956_v11 = vpack.c.bf16 %v93_v2, %v92_v1  ;;  %v63_v13 = vld [vmem:[%s7418_s1 + $0xe8] sm:$0xff] }
  0x11   :  { %3919 = vmatpush3.bf16.msra.mxu0 %v3918_v51  ;;  %v76_v8 = vld [vmem:[%s7418_s1 + $0x150] sm:$0xff]  ;;  %v77_v9 = vld [vmem:[%s7418_s1 + $0x158] sm:$0xff]  ;;  %v94_v14 = vld [vmem:[%s7418_s1 + $0x1e0] sm:$0xff]  ;;  %v3926_v16 = vpack.c.bf16 %v45_v7, %v44_v4  ;;  %v3928_v19 = vpack.c.bf16 %v63_v13, %v62_v12 }
  0x12   :  { %3921 = vmatprep.subr.bf16.mxu0 %v3920_v55  ;;  %v95_v15 = vld [vmem:[%s7418_s1 + $0x1e8] sm:$0xff]  ;;  %v3958_v17 = vpack.c.bf16 %v77_v9, %v76_v8  ;;  %v21_v18 = vld [vmem:[%s7417_s0] sm:$0xff]  ;;  %v64_v27 = vld [vmem:[%s7418_s1 + $0xf0] sm:$0xff] }
  0x13   :  { %3951 = vmatpush3.bf16.msra.mxu1 %v3950_v54  ;;  %v46_v20 = vld [vmem:[%s7418_s1 + $0x60] sm:$0xff]  ;;  %v47_v21 = vld [vmem:[%s7418_s1 + $0x68] sm:$0xff]  ;;  %v845_v23 = vrot.slane %v21_v18, %v4940_v10  ;;  %v838_v24 = vcombine.high %v21_v18, %v21_v18  ;;  %v3960_v25 = vpack.c.bf16 %v95_v15, %v94_v14  ;;  %v65_v28 = vld [vmem:[%s7418_s1 + $0xf8] sm:$0xff] }
  0x14   :  { %3953 = vmatprep.subr.bf16.mxu1 %v3952_v61  ;;  %v78_v22 = vld [vmem:[%s7418_s1 + $0x160] sm:$0xff]  ;;  %v79_v26 = vld [vmem:[%s7418_s1 + $0x168] sm:$0xff]  ;;  %v96_v29 = vld [vmem:[%s7418_s1 + $0x1f0] sm:$0xff]  ;;  %v3930_v33 = vpack.c.bf16 %v47_v21, %v46_v20  ;;  %v3932_v35 = vpack.c.bf16 %v65_v28, %v64_v27 }
  0x15   :  { %3923 = vmatpush3.bf16.msra.mxu0 %v3922_v3  ;;  %v97_v30 = vld [vmem:[%s7418_s1 + $0x1f8] sm:$0xff]  ;;  %v853_v31 = vcombine.high %v845_v23, %v845_v23  ;;  %v852_v32 = vrot.slane %v838_v24, %v4940_v10  ;;  %v3962_v34 = vpack.c.bf16 %v79_v26, %v78_v22  ;;  %v48_v36 = vld [vmem:[%s7418_s1 + $0x70] sm:$0xff]  ;;  %v114_v42 = vld [vmem:[%s7418_s1 + $0x280] sm:$0xff] }
  0x16   :  { %3925 = vmatprep.subr.bf16.mxu0 %v3924_v6  ;;  %v49_v37 = vld [vmem:[%s7418_s1 + $0x78] sm:$0xff]  ;;  %v80_v38 = vld [vmem:[%s7418_s1 + $0x170] sm:$0xff]  ;;  %v3964_v40 = vpack.c.bf16 %v97_v30, %v96_v29  ;;  %v115_v43 = vld [vmem:[%s7418_s1 + $0x288] sm:$0xff] }
  0x17   :  { %3955 = vmatpush3.bf16.msra.mxu1 %v3954_v5  ;;  %v854_v39 = vcombine.high %v852_v32, %v852_v32  ;;  %1162 = vmatprep.mubr.f32.mxu0 %v853_v31  ;;  %v81_v41 = vld [vmem:[%s7418_s1 + $0x178] sm:$0xff]  ;;  %v146_v44 = vld [vmem:[%s7418_s1 + $0x380] sm:$0xff]  ;;  %v147_v45 = vld [vmem:[%s7418_s1 + $0x388] sm:$0xff]  ;;  %v3934_v46 = vpack.c.bf16 %v49_v37, %v48_v36  ;;  %v3968_v48 = vpack.c.bf16 %v115_v43, %v114_v42 }
  0x18   :  { %3957 = vmatprep.subr.bf16.mxu1 %v3956_v11  ;;  %v3966_v47 = vpack.c.bf16 %v81_v41, %v80_v38  ;;  %v98_v49 = vld [vmem:[%s7418_s1 + $0x200] sm:$0xff]  ;;  %v99_v50 = vld [vmem:[%s7418_s1 + $0x208] sm:$0xff]  ;;  %v4000_v52 = vpack.c.bf16 %v147_v45, %v146_v44  ;;  %v116_v54 = vld [vmem:[%s7418_s1 + $0x290] sm:$0xff] }
  0x19   :  { %3927 = vmatpush3.bf16.msra.mxu0 %v3926_v16  ;;  %1232 = vmatprep.mubr.f32.mxu1 %v854_v39  ;;  %v130_v51 = vld [vmem:[%s7418_s1 + $0x300] sm:$0xff]  ;;  %v131_v53 = vld [vmem:[%s7418_s1 + $0x308] sm:$0xff]  ;;  %v117_v55 = vld [vmem:[%s7418_s1 + $0x298] sm:$0xff]  ;;  %v3970_v58 = vpack.c.bf16 %v99_v50, %v98_v49 }
  0x1a   :  { %3929 = vmatprep.subr.bf16.mxu0 %v3928_v19  ;;  %v148_v56 = vld [vmem:[%s7418_s1 + $0x390] sm:$0xff]  ;;  %v149_v57 = vld [vmem:[%s7418_s1 + $0x398] sm:$0xff]  ;;  %v4002_v59 = vpack.c.bf16 %v131_v53, %v130_v51  ;;  %v3972_v60 = vpack.c.bf16 %v117_v55, %v116_v54  ;;  %v118_v2 = vld [vmem:[%s7418_s1 + $0x2a0] sm:$0xff] }
  0x1b   :  { %3959 = vmatpush3.bf16.msra.mxu1 %v3958_v17  ;;  %v100_v61 = vld [vmem:[%s7418_s1 + $0x210] sm:$0xff]  ;;  %v101_v62 = vld [vmem:[%s7418_s1 + $0x218] sm:$0xff]  ;;  %v4004_v0 = vpack.c.bf16 %v149_v57, %v148_v56  ;;  %v119_v3 = vld [vmem:[%s7418_s1 + $0x2a8] sm:$0xff] }
  0x1c   :  { %3961 = vmatprep.subr.bf16.mxu1 %v3960_v25  ;;  %v132_v63 = vld [vmem:[%s7418_s1 + $0x310] sm:$0xff]  ;;  %v133_v1 = vld [vmem:[%s7418_s1 + $0x318] sm:$0xff]  ;;  %v150_v4 = vld [vmem:[%s7418_s1 + $0x3a0] sm:$0xff]  ;;  %v3974_v6 = vpack.c.bf16 %v101_v62, %v100_v61  ;;  %v3976_v8 = vpack.c.bf16 %v119_v3, %v118_v2 }
  0x1d   :  { %3931 = vmatpush3.bf16.msra.mxu0 %v3930_v33  ;;  %v151_v5 = vld [vmem:[%s7418_s1 + $0x3a8] sm:$0xff]  ;;  %v4006_v7 = vpack.c.bf16 %v133_v1, %v132_v63  ;;  %v102_v9 = vld [vmem:[%s7418_s1 + $0x220] sm:$0xff]  ;;  %v120_v15 = vld [vmem:[%s7418_s1 + $0x2b0] sm:$0xff] }
  0x1e   :  { %3933 = vmatprep.subr.bf16.mxu0 %v3932_v35  ;;  %v103_v11 = vld [vmem:[%s7418_s1 + $0x228] sm:$0xff]  ;;  %v134_v12 = vld [vmem:[%s7418_s1 + $0x320] sm:$0xff]  ;;  %v4008_v13 = vpack.c.bf16 %v151_v5, %v150_v4  ;;  %v121_v16 = vld [vmem:[%s7418_s1 + $0x2b8] sm:$0xff] }
  0x1f   :  { %3963 = vmatpush3.bf16.msra.mxu1 %v3962_v34  ;;  %v135_v14 = vld [vmem:[%s7418_s1 + $0x328] sm:$0xff]  ;;  %v152_v17 = vld [vmem:[%s7418_s1 + $0x3b0] sm:$0xff]  ;;  %v153_v18 = vld [vmem:[%s7418_s1 + $0x3b8] sm:$0xff]  ;;  %v3978_v19 = vpack.c.bf16 %v103_v11, %v102_v9  ;;  %v3980_v22 = vpack.c.bf16 %v121_v16, %v120_v15 }
  0x20   :  { %3965 = vmatprep.subr.bf16.mxu1 %v3964_v40  ;;  %v104_v20 = vld [vmem:[%s7418_s1 + $0x230] sm:$0xff]  ;;  %v4010_v21 = vpack.c.bf16 %v135_v14, %v134_v12  ;;  %v137_v25 = vld [vmem:[%s7418_s1 + $0x338] sm:$0xff]  ;;  %v4012_v26 = vpack.c.bf16 %v153_v18, %v152_v17  ;;  %v122_v27 = vld [vmem:[%s7418_s1 + $0x2c0] sm:$0xff] }
  0x21   :  { %3935 = vmatpush3.bf16.msra.mxu0 %v3934_v46  ;;  %v136_v24 = vld [vmem:[%s7418_s1 + $0x330] sm:$0xff]  ;;  %v123_v28 = vld [vmem:[%s7418_s1 + $0x2c8] sm:$0xff]  ;;  %v154_v30 = vld [vmem:[%s7418_s1 + $0x3c0] sm:$0xff] }
  0x22   :  { %3969 = vmatprep.subr.bf16.mxu0 %v3968_v48  ;;  %v22_v29 = vld [vmem:[%s7417_s0 + $0x8] sm:$0xff]  ;;  %v4014_v35 = vpack.c.bf16 %v137_v25, %v136_v24  ;;  %v3984_v36 = vpack.c.bf16 %v123_v28, %v122_v27  ;;  %v106_v37 = vld [vmem:[%s7418_s1 + $0x240] sm:$0xff]  ;;  %v124_v44 = vld [vmem:[%s7418_s1 + $0x2d0] sm:$0xff] }
  0x23   :  { %3967 = vmatpush3.bf16.msra.mxu1 %v3966_v47  ;;  %v155_v31 = vld [vmem:[%s7418_s1 + $0x3c8] sm:$0xff]  ;;  %v855_v33 = vcombine.high %v22_v29, %v22_v29  ;;  %v138_v39 = vld [vmem:[%s7418_s1 + $0x340] sm:$0xff]  ;;  %v125_v45 = vld [vmem:[%s7418_s1 + $0x2d8] sm:$0xff] }
  0x24   :  { %4001 = vmatprep.subr.bf16.mxu1 %v4000_v52  ;;  %1163 = vmatmul.mubr.f32.vlgmr.msra.gmra.mrb[0].mxu0 %v845_v23  ;;  %v105_v23 = vld [vmem:[%s7418_s1 + $0x238] sm:$0xff]  ;;  %v107_v38 = vld [vmem:[%s7418_s1 + $0x248] sm:$0xff]  ;;  %v4016_v42 = vpack.c.bf16 %v155_v31, %v154_v30  ;;  %v156_v46 = vld [vmem:[%s7418_s1 + $0x3d0] sm:$0xff]  ;;  %v3988_v51 = vpack.c.bf16 %v125_v45, %v124_v44 }
  0x25   :  { %3971 = vmatpush3.bf16.msra.mxu0 %v3970_v58  ;;  %v3982_v34 = vpack.c.bf16 %v105_v23, %v104_v20  ;;  %v5121_v41 = vrot.slane %v855_v33, %v4940_v10  ;;  %v139_v43 = vld [vmem:[%s7418_s1 + $0x348] sm:$0xff]  ;;  %v157_v47 = vld [vmem:[%s7418_s1 + $0x3d8] sm:$0xff]  ;;  %v3986_v49 = vpack.c.bf16 %v107_v38, %v106_v37  ;;  %v108_v52 = vld [vmem:[%s7418_s1 + $0x250] sm:$0xff] }
  0x26   :  { %1233 = vmatmul.mubr.f32.vlgmr.msra.gmra.mrb[0].mxu1 %v852_v32  ;;  %3973 = vmatprep.subr.bf16.mxu0 %v3972_v60  ;;  %v5107_v32 = vrot.slane %v22_v29, %v4940_v10  ;;  %v4018_v50 = vpack.c.bf16 %v139_v43, %v138_v39  ;;  %v109_v53 = vld [vmem:[%s7418_s1 + $0x258] sm:$0xff]  ;;  %v140_v54 = vld [vmem:[%s7418_s1 + $0x350] sm:$0xff]  ;;  %v4020_v55 = vpack.c.bf16 %v157_v47, %v156_v46  ;;  %v126_v57 = vld [vmem:[%s7418_s1 + $0x2e0] sm:$0xff] }
  0x27   :  { %4003 = vmatpush3.bf16.msra.mxu1 %v4002_v59  ;;  %v871_v48 = vcombine.high %v5121_v41, %v5121_v41  ;;  %v141_v56 = vld [vmem:[%s7418_s1 + $0x358] sm:$0xff]  ;;  %v127_v58 = vld [vmem:[%s7418_s1 + $0x2e8] sm:$0xff]  ;;  %v158_v59 = vld [vmem:[%s7418_s1 + $0x3e0] sm:$0xff]  ;;  %v3990_v61 = vpack.c.bf16 %v109_v53, %v108_v52 }
  0x28   :  { %4005 = vmatprep.subr.bf16.mxu1 %v4004_v0  ;;  %v870_v40 = vcombine.high %v5107_v32, %v5107_v32  ;;  %v159_v60 = vld [vmem:[%s7418_s1 + $0x3e8] sm:$0xff]  ;;  %v4022_v62 = vpack.c.bf16 %v141_v56, %v140_v54  ;;  %v3992_v63 = vpack.c.bf16 %v127_v58, %v126_v57  ;;  %v110_v0 = vld [vmem:[%s7418_s1 + $0x260] sm:$0xff]  ;;  %v128_v5 = vld [vmem:[%s7418_s1 + $0x2f0] sm:$0xff] }
  0x29   :  { %3975 = vmatpush3.bf16.msra.mxu0 %v3974_v6  ;;  %1372 = vmatprep.mubr.f32.mxu1 %v871_v48  ;;  %v111_v1 = vld [vmem:[%s7418_s1 + $0x268] sm:$0xff]  ;;  %v142_v2 = vld [vmem:[%s7418_s1 + $0x360] sm:$0xff]  ;;  %v4024_v3 = vpack.c.bf16 %v159_v60, %v158_v59  ;;  %v129_v6 = vld [vmem:[%s7418_s1 + $0x2f8] sm:$0xff] }
  0x2a   :  { %3977 = vmatprep.subr.bf16.mxu0 %v3976_v8  ;;  %1302 = vmatprep.mubr.f32.mxu0 %v870_v40  ;;  %v143_v4 = vld [vmem:[%s7418_s1 + $0x368] sm:$0xff]  ;;  %v161_v8 = vld [vmem:[%s7418_s1 + $0x3f8] sm:$0xff]  ;;  %v3994_v9 = vpack.c.bf16 %v111_v1, %v110_v0  ;;  %v3996_v12 = vpack.c.bf16 %v129_v6, %v128_v5  ;;  %v144_v15 = vld [vmem:[%s7418_s1 + $0x370] sm:$0xff] }
  0x2b   :  { %4007 = vmatpush3.bf16.msra.mxu1 %v4006_v7  ;;  %v160_v7 = vld [vmem:[%s7418_s1 + $0x3f0] sm:$0xff]  ;;  %v4026_v11 = vpack.c.bf16 %v143_v4, %v142_v2  ;;  %v113_v14 = vld [vmem:[%s7418_s1 + $0x278] sm:$0xff]  ;;  %v178_v18 = vld [vmem:[%s7418_s1 + $0x480] sm:$0xff] }
  0x2c   :  { %4009 = vmatprep.subr.bf16.mxu1 %v4008_v13  ;;  %v112_v13 = vld [vmem:[%s7418_s1 + $0x270] sm:$0xff]  ;;  %v4028_v16 = vpack.c.bf16 %v161_v8, %v160_v7  ;;  %v145_v17 = vld [vmem:[%s7418_s1 + $0x378] sm:$0xff]  ;;  %v210_v20 = vld [vmem:[%s7418_s1 + $0x580] sm:$0xff] }
  0x2d   :  { %3979 = vmatpush3.bf16.msra.mxu0 %v3978_v19  ;;  %v179_v19 = vld [vmem:[%s7418_s1 + $0x488] sm:$0xff]  ;;  %v162_v23 = vld [vmem:[%s7418_s1 + $0x400] sm:$0xff]  ;;  %v4030_v24 = vpack.c.bf16 %v145_v17, %v144_v15  ;;  %v180_v30 = vld [vmem:[%s7418_s1 + $0x490] sm:$0xff] }
  0x2e   :  { %3981 = vmatprep.subr.bf16.mxu0 %v3980_v22  ;;  %v3998_v22 = vpack.c.bf16 %v113_v14, %v112_v13  ;;  %v4032_v25 = vpack.c.bf16 %v179_v19, %v178_v18  ;;  %v194_v27 = vld [vmem:[%s7418_s1 + $0x500] sm:$0xff]  ;;  %v195_v28 = vld [vmem:[%s7418_s1 + $0x508] sm:$0xff]  ;;  %v181_v31 = vld [vmem:[%s7418_s1 + $0x498] sm:$0xff] }
  0x2f   :  { %4011 = vmatpush3.bf16.msra.mxu1 %v4010_v21  ;;  %v211_v21 = vld [vmem:[%s7418_s1 + $0x588] sm:$0xff]  ;;  %v212_v33 = vld [vmem:[%s7418_s1 + $0x590] sm:$0xff]  ;;  %v4036_v38 = vpack.c.bf16 %v181_v31, %v180_v30  ;;  %v165_v40 = vld [vmem:[%s7418_s1 + $0x418] sm:$0xff] }
  0x30   :  { %4013 = vmatprep.subr.bf16.mxu1 %v4012_v26  ;;  %v163_v26 = vld [vmem:[%s7418_s1 + $0x408] sm:$0xff]  ;;  %v4064_v29 = vpack.c.bf16 %v211_v21, %v210_v20  ;;  %v23_v37 = vld [vmem:[%s7417_s0 + $0x10] sm:$0xff]  ;;  %v197_v46 = vld [vmem:[%s7418_s1 + $0x518] sm:$0xff] }
  0x31   :  { %3983 = vmatpush3.bf16.msra.mxu0 %v3982_v34  ;;  %v213_v34 = vld [vmem:[%s7418_s1 + $0x598] sm:$0xff]  ;;  %v164_v39 = vld [vmem:[%s7418_s1 + $0x410] sm:$0xff]  ;;  %v5249_v43 = vrot.slane %v23_v37, %v4940_v10  ;;  %v872_v44 = vcombine.high %v23_v37, %v23_v37  ;;  %v182_v47 = vld [vmem:[%s7418_s1 + $0x4a0] sm:$0xff] }
  0x32   :  { %3985 = vmatprep.subr.bf16.mxu0 %v3984_v36  ;;  %v4066_v36 = vpack.c.bf16 %v195_v28, %v194_v27  ;;  %v4068_v45 = vpack.c.bf16 %v213_v34, %v212_v33  ;;  %v183_v48 = vld [vmem:[%s7418_s1 + $0x4a8] sm:$0xff]  ;;  %v4038_v53 = vpack.c.bf16 %v165_v40, %v164_v39  ;;  %v198_v57 = vld [vmem:[%s7418_s1 + $0x520] sm:$0xff]  ;;  %v184_v60 = vld [vmem:[%s7418_s1 + $0x4b0] sm:$0xff] }
  0x33   :  { %4015 = vmatpush3.bf16.msra.mxu1 %v4014_v35  ;;  %v4034_v35 = vpack.c.bf16 %v163_v26, %v162_v23  ;;  %v5270_v52 = vrot.slane %v872_v44, %v4940_v10  ;;  %v4040_v54 = vpack.c.bf16 %v183_v48, %v182_v47  ;;  %v167_v56 = vld [vmem:[%s7418_s1 + $0x428] sm:$0xff]  ;;  %v169_v4 = vld [vmem:[%s7418_s1 + $0x438] sm:$0xff]  ;;  %v200_v5 = vld [vmem:[%s7418_s1 + $0x530] sm:$0xff] }
  0x34   :  { %4017 = vmatprep.subr.bf16.mxu1 %v4016_v42  ;;  %v196_v42 = vld [vmem:[%s7418_s1 + $0x510] sm:$0xff]  ;;  %v199_v59 = vld [vmem:[%s7418_s1 + $0x528] sm:$0xff]  ;;  %v201_v7 = vld [vmem:[%s7418_s1 + $0x538] sm:$0xff] }
  0x35   :  { %3987 = vmatpush3.bf16.msra.mxu0 %v3986_v49  ;;  %v214_v49 = vld [vmem:[%s7418_s1 + $0x5a0] sm:$0xff]  ;;  %v4074_v1 = vpack.c.bf16 %v199_v59, %v198_v57  ;;  %v4078_v14 = vpack.c.bf16 %v201_v7, %v200_v5  ;;  %v171_v17 = vld [vmem:[%s7418_s1 + $0x448] sm:$0xff]  ;;  %v188_v21 = vld [vmem:[%s7418_s1 + $0x4d0] sm:$0xff] }
  0x36   :  { %3989 = vmatprep.subr.bf16.mxu0 %v3988_v51  ;;  %v887_v51 = vcombine.high %v5249_v43, %v5249_v43  ;;  %v186_v8 = vld [vmem:[%s7418_s1 + $0x4c0] sm:$0xff]  ;;  %v203_v20 = vld [vmem:[%s7418_s1 + $0x548] sm:$0xff]  ;;  %v220_v23 = vld [vmem:[%s7418_s1 + $0x5d0] sm:$0xff] }
  0x37   :  { %4019 = vmatpush3.bf16.msra.mxu1 %v4018_v50  ;;  %v215_v50 = vld [vmem:[%s7418_s1 + $0x5a8] sm:$0xff]  ;;  %v202_v18 = vld [vmem:[%s7418_s1 + $0x540] sm:$0xff]  ;;  %v172_v28 = vld [vmem:[%s7418_s1 + $0x450] sm:$0xff] }
  0x38   :  { %4021 = vmatprep.subr.bf16.mxu1 %v4020_v55  ;;  %v166_v55 = vld [vmem:[%s7418_s1 + $0x420] sm:$0xff]  ;;  %v4072_v58 = vpack.c.bf16 %v215_v50, %v214_v49  ;;  %v4082_v26 = vpack.c.bf16 %v203_v20, %v202_v18  ;;  %v204_v30 = vld [vmem:[%s7418_s1 + $0x550] sm:$0xff]  ;;  %v205_v33 = vld [vmem:[%s7418_s1 + $0x558] sm:$0xff] }
  0x39   :  { %3991 = vmatpush3.bf16.msra.mxu0 %v3990_v61  ;;  %v185_v61 = vld [vmem:[%s7418_s1 + $0x4b8] sm:$0xff]  ;;  %v4042_v0 = vpack.c.bf16 %v167_v56, %v166_v55  ;;  %v190_v34 = vld [vmem:[%s7418_s1 + $0x4e0] sm:$0xff]  ;;  %v223_v37 = vld [vmem:[%s7418_s1 + $0x5e8] sm:$0xff]  ;;  %v4086_v39 = vpack.c.bf16 %v205_v33, %v204_v30 }
  0x3a   :  { %3993 = vmatprep.subr.bf16.mxu0 %v3992_v63  ;;  %v217_v63 = vld [vmem:[%s7418_s1 + $0x5b8] sm:$0xff]  ;;  %v4044_v2 = vpack.c.bf16 %v185_v61, %v184_v60  ;;  %v175_v44 = vld [vmem:[%s7418_s1 + $0x468] sm:$0xff]  ;;  %v192_v48 = vld [vmem:[%s7418_s1 + $0x4f0] sm:$0xff] }
  0x3b   :  { %4023 = vmatpush3.bf16.msra.mxu1 %v4022_v62  ;;  %v216_v62 = vld [vmem:[%s7418_s1 + $0x5b0] sm:$0xff]  ;;  %v207_v47 = vld [vmem:[%s7418_s1 + $0x568] sm:$0xff]  ;;  %v193_v49 = vld [vmem:[%s7418_s1 + $0x4f8] sm:$0xff] }
  0x3c   :  { %4025 = vmatprep.subr.bf16.mxu1 %v4024_v3  ;;  %v168_v3 = vld [vmem:[%s7418_s1 + $0x430] sm:$0xff]  ;;  %v4076_v6 = vpack.c.bf16 %v217_v63, %v216_v62  ;;  %v4060_v55 = vpack.c.bf16 %v193_v49, %v192_v48  ;;  %v177_v57 = vld [vmem:[%s7418_s1 + $0x478] sm:$0xff]  ;;  %v242_v60 = vld [vmem:[%s7418_s1 + $0x680] sm:$0xff] }
  0x3d   :  { %3995 = vmatpush3.bf16.msra.mxu0 %v3994_v9  ;;  %v187_v9 = vld [vmem:[%s7418_s1 + $0x4c8] sm:$0xff]  ;;  %v4046_v13 = vpack.c.bf16 %v169_v4, %v168_v3  ;;  %v224_v50 = vld [vmem:[%s7418_s1 + $0x5f0] sm:$0xff]  ;;  %v209_v59 = vld [vmem:[%s7418_s1 + $0x578] sm:$0xff] }
  0x3e   :  { %3997 = vmatprep.subr.bf16.mxu0 %v3996_v12  ;;  %v219_v12 = vld [vmem:[%s7418_s1 + $0x5c8] sm:$0xff]  ;;  %v4048_v15 = vpack.c.bf16 %v187_v9, %v186_v8  ;;  %v176_v56 = vld [vmem:[%s7418_s1 + $0x470] sm:$0xff]  ;;  %v274_v62 = vld [vmem:[%s7418_s1 + $0x780] sm:$0xff] }
  0x3f   :  { %4027 = vmatpush3.bf16.msra.mxu1 %v4026_v11  ;;  %v218_v11 = vld [vmem:[%s7418_s1 + $0x5c0] sm:$0xff]  ;;  %v243_v61 = vld [vmem:[%s7418_s1 + $0x688] sm:$0xff]  ;;  %v244_v9 = vld [vmem:[%s7418_s1 + $0x690] sm:$0xff] }
  0x40   :  { %4029 = vmatprep.subr.bf16.mxu1 %v4028_v16  ;;  %v170_v16 = vld [vmem:[%s7418_s1 + $0x440] sm:$0xff]  ;;  %v4080_v19 = vpack.c.bf16 %v219_v12, %v218_v11  ;;  %v275_v63 = vld [vmem:[%s7418_s1 + $0x788] sm:$0xff]  ;;  %v4096_v3 = vpack.c.bf16 %v243_v61, %v242_v60  ;;  %v245_v11 = vld [vmem:[%s7418_s1 + $0x698] sm:$0xff] }
  0x41   :  { %3999 = vmatpush3.bf16.msra.mxu0 %v3998_v22  ;;  %v189_v22 = vld [vmem:[%s7418_s1 + $0x4d8] sm:$0xff]  ;;  %v226_v4 = vld [vmem:[%s7418_s1 + $0x600] sm:$0xff]  ;;  %v227_v5 = vld [vmem:[%s7418_s1 + $0x608] sm:$0xff]  ;;  %v4128_v7 = vpack.c.bf16 %v275_v63, %v274_v62  ;;  %v4100_v18 = vpack.c.bf16 %v245_v11, %v244_v9 }
  0x42   :  { %4033 = vmatprep.subr.bf16.mxu0 %v4032_v25  ;;  %v4050_v25 = vpack.c.bf16 %v171_v17, %v170_v16  ;;  %v4052_v27 = vpack.c.bf16 %v189_v22, %v188_v21  ;;  %v259_v8 = vld [vmem:[%s7418_s1 + $0x708] sm:$0xff]  ;;  %v4098_v16 = vpack.c.bf16 %v227_v5, %v226_v4  ;;  %v229_v20 = vld [vmem:[%s7418_s1 + $0x618] sm:$0xff]  ;;  %v260_v21 = vld [vmem:[%s7418_s1 + $0x710] sm:$0xff] }
  0x43   :  { %4031 = vmatpush3.bf16.msra.mxu1 %v4030_v24  ;;  %v221_v24 = vld [vmem:[%s7418_s1 + $0x5d8] sm:$0xff]  ;;  %v264_v48 = vld [vmem:[%s7418_s1 + $0x730] sm:$0xff]  ;;  %v267_v61 = vld [vmem:[%s7418_s1 + $0x748] sm:$0xff] }
  0x44   :  { %4065 = vmatprep.subr.bf16.mxu1 %v4064_v29  ;;  %1303 = vmatmul.mubr.f32.vlgmr.msra.gmra.mrb[2].mxu0 %v5107_v32  ;;  %v4070_v32 = vpack.c.bf16 %v197_v46, %v196_v42  ;;  %v173_v29 = vld [vmem:[%s7418_s1 + $0x458] sm:$0xff]  ;;  %v4084_v31 = vpack.c.bf16 %v221_v24, %v220_v23  ;;  %v174_v42 = vld [vmem:[%s7418_s1 + $0x460] sm:$0xff]  ;;  %v252_v62 = vld [vmem:[%s7418_s1 + $0x6d0] sm:$0xff] }
  0x45   :  { %4035 = vmatpush3.bf16.msra.mxu0 %v4034_v35  ;;  %1442 = vmatprep.mubr.f32.mxu0 %v887_v51  ;;  %v191_v35 = vld [vmem:[%s7418_s1 + $0x4e8] sm:$0xff]  ;;  %v225_v51 = vld [vmem:[%s7418_s1 + $0x5f8] sm:$0xff]  ;;  %v246_v24 = vld [vmem:[%s7418_s1 + $0x6a0] sm:$0xff] }
  0x46   :  { %1373 = vmatmul.mubr.f32.vlgmr.msra.gmra.mrb[2].mxu1 %v5121_v41  ;;  %4037 = vmatprep.subr.bf16.mxu0 %v4036_v38  ;;  %v888_v41 = vcombine.high %v5270_v52, %v5270_v52  ;;  %v4054_v38 = vpack.c.bf16 %v173_v29, %v172_v28  ;;  %v4056_v40 = vpack.c.bf16 %v191_v35, %v190_v34  ;;  %v261_v23 = vld [vmem:[%s7418_s1 + $0x718] sm:$0xff]  ;;  %v279_v28 = vld [vmem:[%s7418_s1 + $0x7a8] sm:$0xff]  ;;  %v262_v35 = vld [vmem:[%s7418_s1 + $0x720] sm:$0xff] }
  0x47   :  { %4067 = vmatpush3.bf16.msra.mxu1 %v4066_v36  ;;  %v222_v36 = vld [vmem:[%s7418_s1 + $0x5e0] sm:$0xff]  ;;  %v231_v34 = vld [vmem:[%s7418_s1 + $0x628] sm:$0xff]  ;;  %v253_v63 = vld [vmem:[%s7418_s1 + $0x6d8] sm:$0xff] }
  0x48   :  { %4069 = vmatprep.subr.bf16.mxu1 %v4068_v45  ;;  %1512 = vmatprep.mubr.f32.mxu1 %v888_v41  ;;  %v206_v45 = vld [vmem:[%s7418_s1 + $0x560] sm:$0xff]  ;;  %v4088_v46 = vpack.c.bf16 %v223_v37, %v222_v36  ;;  %v208_v41 = vld [vmem:[%s7418_s1 + $0x570] sm:$0xff]  ;;  %v4116_v4 = vpack.c.bf16 %v253_v63, %v252_v62  ;;  %v269_v9 = vld [vmem:[%s7418_s1 + $0x758] sm:$0xff] }
  0x49   :  { %4039 = vmatpush3.bf16.msra.mxu0 %v4038_v53  ;;  %v4058_v53 = vpack.c.bf16 %v175_v44, %v174_v42  ;;  %v248_v37 = vld [vmem:[%s7418_s1 + $0x6b0] sm:$0xff]  ;;  %v254_v11 = vld [vmem:[%s7418_s1 + $0x6e0] sm:$0xff] }
  0x4a   :  { %4041 = vmatprep.subr.bf16.mxu0 %v4040_v54  ;;  %v4090_v54 = vpack.c.bf16 %v207_v47, %v206_v45  ;;  %v233_v47 = vld [vmem:[%s7418_s1 + $0x638] sm:$0xff]  ;;  %v236_v5 = vld [vmem:[%s7418_s1 + $0x650] sm:$0xff] }
  0x4b   :  { %4071 = vmatpush3.bf16.msra.mxu1 %v4070_v32  ;;  %v24_v32 = vld [vmem:[%s7417_s0 + $0x18] sm:$0xff]  ;;  %v324_v62 = vld [vmem:[%s7418_s1 + $0x910] sm:$0xff] }
  0x4c   :  { %4073 = vmatprep.subr.bf16.mxu1 %v4072_v58  ;;  %v4092_v58 = vpack.c.bf16 %v225_v51, %v224_v50  ;;  %v5441_v12 = vrot.slane %v24_v32, %v4940_v10  ;;  %v265_v50 = vld [vmem:[%s7418_s1 + $0x738] sm:$0xff]  ;;  %v250_v51 = vld [vmem:[%s7418_s1 + $0x6c0] sm:$0xff] }
  0x4d   :  { %4043 = vmatpush3.bf16.msra.mxu0 %v4042_v0  ;;  %v889_v0 = vcombine.high %v24_v32, %v24_v32  ;;  %v282_v32 = vld [vmem:[%s7418_s1 + $0x7c0] sm:$0xff] }
  0x4e   :  { %4045 = vmatprep.subr.bf16.mxu0 %v4044_v2  ;;  %v4094_v2 = vpack.c.bf16 %v209_v59, %v208_v41  ;;  %v234_v41 = vld [vmem:[%s7418_s1 + $0x640] sm:$0xff] }
  0x4f   :  { %4075 = vmatpush3.bf16.msra.mxu1 %v4074_v1  ;;  %v4062_v1 = vpack.c.bf16 %v177_v57, %v176_v56  ;;  %v4142_v56 = vpack.c.bf16 %v265_v50, %v264_v48  ;;  %v266_v59 = vld [vmem:[%s7418_s1 + $0x740] sm:$0xff]  ;;  %v291_v48 = vld [vmem:[%s7418_s1 + $0x808] sm:$0xff] }
  0x50   :  { %4077 = vmatprep.subr.bf16.mxu1 %v4076_v6  ;;  %v258_v6 = vld [vmem:[%s7418_s1 + $0x700] sm:$0xff] }
  0x51   :  { %4047 = vmatpush3.bf16.msra.mxu0 %v4046_v13  ;;  %v276_v13 = vld [vmem:[%s7418_s1 + $0x790] sm:$0xff]  ;;  %v4130_v17 = vpack.c.bf16 %v259_v8, %v258_v6  ;;  %v237_v6 = vld [vmem:[%s7418_s1 + $0x658] sm:$0xff] }
  0x52   :  { %4049 = vmatprep.subr.bf16.mxu0 %v4048_v15  ;;  %v5450_v15 = vrot.slane %v889_v0, %v4940_v10  ;;  %v284_v0 = vld [vmem:[%s7418_s1 + $0x7d0] sm:$0xff] }
  0x53   :  { %4079 = vmatpush3.bf16.msra.mxu1 %v4078_v14  ;;  %v277_v14 = vld [vmem:[%s7418_s1 + $0x798] sm:$0xff] }
  0x54   :  { %4081 = vmatprep.subr.bf16.mxu1 %v4080_v19  ;;  %v228_v19 = vld [vmem:[%s7418_s1 + $0x610] sm:$0xff]  ;;  %v4132_v22 = vpack.c.bf16 %v277_v14, %v276_v13  ;;  %v905_v29 = vcombine.high %v5450_v15, %v5450_v15  ;;  %v255_v13 = vld [vmem:[%s7418_s1 + $0x6e8] sm:$0xff]  ;;  %v286_v14 = vld [vmem:[%s7418_s1 + $0x7e0] sm:$0xff] }
  0x55   :  { %4051 = vmatpush3.bf16.msra.mxu0 %v4050_v25  ;;  %v247_v25 = vld [vmem:[%s7418_s1 + $0x6a8] sm:$0xff]  ;;  %v4102_v30 = vpack.c.bf16 %v229_v20, %v228_v19  ;;  %v4120_v19 = vpack.c.bf16 %v255_v13, %v254_v11  ;;  %v238_v20 = vld [vmem:[%s7418_s1 + $0x660] sm:$0xff] }
  0x56   :  { %4053 = vmatprep.subr.bf16.mxu0 %v4052_v27  ;;  %v278_v27 = vld [vmem:[%s7418_s1 + $0x7a0] sm:$0xff]  ;;  %v4104_v33 = vpack.c.bf16 %v247_v25, %v246_v24  ;;  %v271_v24 = vld [vmem:[%s7418_s1 + $0x768] sm:$0xff]  ;;  %v256_v25 = vld [vmem:[%s7418_s1 + $0x6f0] sm:$0xff] }
  0x57   :  { %4083 = vmatpush3.bf16.msra.mxu1 %v4082_v26  ;;  %v904_v26 = vcombine.high %v5441_v12, %v5441_v12  ;;  %v4136_v36 = vpack.c.bf16 %v279_v28, %v278_v27  ;;  %v288_v27 = vld [vmem:[%s7418_s1 + $0x7f0] sm:$0xff]  ;;  %v289_v28 = vld [vmem:[%s7418_s1 + $0x7f8] sm:$0xff]  ;;  %v295_v11 = vld [vmem:[%s7418_s1 + $0x828] sm:$0xff] }
  0x58   :  { %4085 = vmatprep.subr.bf16.mxu1 %v4084_v31  ;;  %v4134_v31 = vpack.c.bf16 %v261_v23, %v260_v21  ;;  %v239_v21 = vld [vmem:[%s7418_s1 + $0x668] sm:$0xff]  ;;  %v326_v13 = vld [vmem:[%s7418_s1 + $0x920] sm:$0xff] }
  0x59   :  { %4055 = vmatpush3.bf16.msra.mxu0 %v4054_v38  ;;  %v249_v38 = vld [vmem:[%s7418_s1 + $0x6b8] sm:$0xff] }
  0x5a   :  { %4057 = vmatprep.subr.bf16.mxu0 %v4056_v40  ;;  %v281_v40 = vld [vmem:[%s7418_s1 + $0x7b8] sm:$0xff]  ;;  %v4108_v45 = vpack.c.bf16 %v249_v38, %v248_v37  ;;  %v306_v37 = vld [vmem:[%s7418_s1 + $0x880] sm:$0xff]  ;;  %v307_v38 = vld [vmem:[%s7418_s1 + $0x888] sm:$0xff] }
  0x5b   :  { %4087 = vmatpush3.bf16.msra.mxu1 %v4086_v39  ;;  %v280_v39 = vld [vmem:[%s7418_s1 + $0x7b0] sm:$0xff] }
  0x5c   :  { %4089 = vmatprep.subr.bf16.mxu1 %v4088_v46  ;;  %v232_v46 = vld [vmem:[%s7418_s1 + $0x630] sm:$0xff]  ;;  %v4140_v49 = vpack.c.bf16 %v281_v40, %v280_v39  ;;  %v338_v39 = vld [vmem:[%s7418_s1 + $0x980] sm:$0xff]  ;;  %v339_v40 = vld [vmem:[%s7418_s1 + $0x988] sm:$0xff] }
  0x5d   :  { %4059 = vmatpush3.bf16.msra.mxu0 %v4058_v53  ;;  %v251_v53 = vld [vmem:[%s7418_s1 + $0x6c8] sm:$0xff]  ;;  %v4192_v50 = vpack.c.bf16 %v339_v40, %v338_v39  ;;  %v316_v39 = vld [vmem:[%s7418_s1 + $0x8d0] sm:$0xff]  ;;  %v317_v40 = vld [vmem:[%s7418_s1 + $0x8d8] sm:$0xff] }
  0x5e   :  { %4061 = vmatprep.subr.bf16.mxu0 %v4060_v55  ;;  %v4110_v55 = vpack.c.bf16 %v233_v47, %v232_v46  ;;  %v4112_v57 = vpack.c.bf16 %v251_v53, %v250_v51  ;;  %v4160_v46 = vpack.c.bf16 %v307_v38, %v306_v37  ;;  %v290_v47 = vld [vmem:[%s7418_s1 + $0x800] sm:$0xff]  ;;  %v323_v51 = vld [vmem:[%s7418_s1 + $0x908] sm:$0xff]  ;;  %v308_v53 = vld [vmem:[%s7418_s1 + $0x890] sm:$0xff] }
  0x5f   :  { %4091 = vmatpush3.bf16.msra.mxu1 %v4090_v54  ;;  %v283_v54 = vld [vmem:[%s7418_s1 + $0x7c8] sm:$0xff] }
  0x60   :  { %4093 = vmatprep.subr.bf16.mxu1 %v4092_v58  ;;  %v235_v58 = vld [vmem:[%s7418_s1 + $0x648] sm:$0xff]  ;;  %v4144_v60 = vpack.c.bf16 %v283_v54, %v282_v32  ;;  %v309_v32 = vld [vmem:[%s7418_s1 + $0x898] sm:$0xff] }
  0x61   :  { %4063 = vmatpush3.bf16.msra.mxu0 %v4062_v1  ;;  %v285_v1 = vld [vmem:[%s7418_s1 + $0x7d8] sm:$0xff]  ;;  %v331_v38 = vld [vmem:[%s7418_s1 + $0x948] sm:$0xff] }
  0x62   :  { %4097 = vmatprep.subr.bf16.mxu0 %v4096_v3  ;;  %v4146_v3 = vpack.c.bf16 %v267_v61, %v266_v59  ;;  %v4148_v8 = vpack.c.bf16 %v285_v1, %v284_v0  ;;  %v4164_v59 = vpack.c.bf16 %v309_v32, %v308_v53  ;;  %v293_v61 = vld [vmem:[%s7418_s1 + $0x818] sm:$0xff]  ;;  %v310_v1 = vld [vmem:[%s7418_s1 + $0x8a0] sm:$0xff] }
  0x63   :  { %4095 = vmatpush3.bf16.msra.mxu1 %v4094_v2  ;;  %v4114_v2 = vpack.c.bf16 %v235_v58, %v234_v41  ;;  %v4162_v41 = vpack.c.bf16 %v291_v48, %v290_v47  ;;  %v325_v0 = vld [vmem:[%s7418_s1 + $0x918] sm:$0xff]  ;;  %v4180_v47 = vpack.c.bf16 %v317_v40, %v316_v39  ;;  %v300_v48 = vld [vmem:[%s7418_s1 + $0x850] sm:$0xff]  ;;  %v318_v32 = vld [vmem:[%s7418_s1 + $0x8e0] sm:$0xff] }
  0x64   :  { %4129 = vmatprep.subr.bf16.mxu1 %v4128_v7  ;;  %1443 = vmatmul.mubr.f32.vlgmr.msra.gmra.mrb[4].mxu0 %v5249_v43  ;;  %v230_v43 = vld [vmem:[%s7418_s1 + $0x620] sm:$0xff]  ;;  %v268_v7 = vld [vmem:[%s7418_s1 + $0x750] sm:$0xff]  ;;  %v333_v53 = vld [vmem:[%s7418_s1 + $0x958] sm:$0xff] }
  0x65   :  { %4099 = vmatpush3.bf16.msra.mxu0 %v4098_v16  ;;  %1582 = vmatprep.mubr.f32.mxu0 %v904_v26  ;;  %v4106_v42 = vpack.c.bf16 %v231_v34, %v230_v43  ;;  %v287_v16 = vld [vmem:[%s7418_s1 + $0x7e8] sm:$0xff]  ;;  %v257_v26 = vld [vmem:[%s7418_s1 + $0x6f8] sm:$0xff]  ;;  %v240_v43 = vld [vmem:[%s7418_s1 + $0x670] sm:$0xff] }
  0x66   :  { %1513 = vmatmul.mubr.f32.vlgmr.msra.gmra.mrb[4].mxu1 %v5270_v52  ;;  %4101 = vmatprep.subr.bf16.mxu0 %v4100_v18  ;;  %v263_v52 = vld [vmem:[%s7418_s1 + $0x728] sm:$0xff]  ;;  %v4150_v18 = vpack.c.bf16 %v269_v9, %v268_v7  ;;  %v4152_v23 = vpack.c.bf16 %v287_v16, %v286_v14  ;;  %v241_v34 = vld [vmem:[%s7418_s1 + $0x678] sm:$0xff]  ;;  %v312_v16 = vld [vmem:[%s7418_s1 + $0x8b0] sm:$0xff] }
  0x67   :  { %4131 = vmatpush3.bf16.msra.mxu1 %v4130_v17  ;;  %1652 = vmatprep.mubr.f32.mxu1 %v905_v29  ;;  %v4138_v44 = vpack.c.bf16 %v263_v52, %v262_v35  ;;  %v4118_v17 = vpack.c.bf16 %v237_v6, %v236_v5  ;;  %v4122_v29 = vpack.c.bf16 %v239_v21, %v238_v20  ;;  %v272_v35 = vld [vmem:[%s7418_s1 + $0x770] sm:$0xff]  ;;  %v273_v52 = vld [vmem:[%s7418_s1 + $0x778] sm:$0xff]  ;;  %v343_v5 = vld [vmem:[%s7418_s1 + $0x9a8] sm:$0xff] }
  0x68   :  { %4133 = vmatprep.subr.bf16.mxu1 %v4132_v22  ;;  %v270_v22 = vld [vmem:[%s7418_s1 + $0x760] sm:$0xff]  ;;  %v388_v39 = vld [vmem:[%s7418_s1 + $0xb10] sm:$0xff] }
  0x69   :  { %4103 = vmatpush3.bf16.msra.mxu0 %v4102_v30  ;;  %v25_v30 = vld [vmem:[%s7417_s0 + $0x20] sm:$0xff] }
  0x6a   :  { %4105 = vmatprep.subr.bf16.mxu0 %v4104_v33  ;;  %v4124_v33 = vpack.c.bf16 %v257_v26, %v256_v25  ;;  %v5648_v54 = vrot.slane %v25_v30, %v4940_v10  ;;  %v328_v25 = vld [vmem:[%s7418_s1 + $0x930] sm:$0xff] }
  0x6b   :  { %4135 = vmatpush3.bf16.msra.mxu1 %v4134_v31  ;;  %v4154_v31 = vpack.c.bf16 %v271_v24, %v270_v22  ;;  %v297_v24 = vld [vmem:[%s7418_s1 + $0x838] sm:$0xff] }
  0x6c   :  { %4137 = vmatprep.subr.bf16.mxu1 %v4136_v36  ;;  %v4156_v36 = vpack.c.bf16 %v289_v28, %v288_v27  ;;  %v329_v27 = vld [vmem:[%s7418_s1 + $0x938] sm:$0xff]  ;;  %v314_v28 = vld [vmem:[%s7418_s1 + $0x8c0] sm:$0xff] }
  0x6d   :  { %4107 = vmatpush3.bf16.msra.mxu0 %v4106_v42  ;;  %v906_v42 = vcombine.high %v25_v30, %v25_v30  ;;  %v346_v30 = vld [vmem:[%s7418_s1 + $0x9c0] sm:$0xff] }
  0x6e   :  { %4109 = vmatprep.subr.bf16.mxu0 %v4108_v45  ;;  %v4158_v45 = vpack.c.bf16 %v273_v52, %v272_v35  ;;  %v298_v35 = vld [vmem:[%s7418_s1 + $0x840] sm:$0xff] }
  0x6f   :  { %4139 = vmatpush3.bf16.msra.mxu1 %v4138_v44  ;;  %v4126_v44 = vpack.c.bf16 %v241_v34, %v240_v43  ;;  %v4206_v43 = vpack.c.bf16 %v329_v27, %v328_v25  ;;  %v330_v52 = vld [vmem:[%s7418_s1 + $0x940] sm:$0xff]  ;;  %v355_v25 = vld [vmem:[%s7418_s1 + $0xa08] sm:$0xff] }
  0x70   :  { %4141 = vmatprep.subr.bf16.mxu1 %v4140_v49  ;;  %v322_v49 = vld [vmem:[%s7418_s1 + $0x900] sm:$0xff] }
  0x71   :  { %4111 = vmatpush3.bf16.msra.mxu0 %v4110_v55  ;;  %v340_v55 = vld [vmem:[%s7418_s1 + $0x990] sm:$0xff]  ;;  %v4194_v58 = vpack.c.bf16 %v323_v51, %v322_v49  ;;  %v301_v49 = vld [vmem:[%s7418_s1 + $0x858] sm:$0xff] }
  0x72   :  { %4113 = vmatprep.subr.bf16.mxu0 %v4112_v57  ;;  %v5657_v57 = vrot.slane %v906_v42, %v4940_v10  ;;  %v348_v42 = vld [vmem:[%s7418_s1 + $0x9d0] sm:$0xff] }
  0x73   :  { %4143 = vmatpush3.bf16.msra.mxu1 %v4142_v56  ;;  %v341_v56 = vld [vmem:[%s7418_s1 + $0x998] sm:$0xff] }
  0x74   :  { %4145 = vmatprep.subr.bf16.mxu1 %v4144_v60  ;;  %v292_v60 = vld [vmem:[%s7418_s1 + $0x810] sm:$0xff]  ;;  %v4196_v63 = vpack.c.bf16 %v341_v56, %v340_v55  ;;  %v922_v6 = vcombine.high %v5657_v57, %v5657_v57  ;;  %v319_v55 = vld [vmem:[%s7418_s1 + $0x8e8] sm:$0xff]  ;;  %v350_v56 = vld [vmem:[%s7418_s1 + $0x9e0] sm:$0xff] }
  0x75   :  { %4115 = vmatpush3.bf16.msra.mxu0 %v4114_v2  ;;  %v311_v2 = vld [vmem:[%s7418_s1 + $0x8a8] sm:$0xff]  ;;  %v4166_v7 = vpack.c.bf16 %v293_v61, %v292_v60  ;;  %v4184_v60 = vpack.c.bf16 %v319_v55, %v318_v32  ;;  %v302_v61 = vld [vmem:[%s7418_s1 + $0x860] sm:$0xff] }
  0x76   :  { %4117 = vmatprep.subr.bf16.mxu0 %v4116_v4  ;;  %v342_v4 = vld [vmem:[%s7418_s1 + $0x9a0] sm:$0xff]  ;;  %v4168_v9 = vpack.c.bf16 %v311_v2, %v310_v1  ;;  %v335_v1 = vld [vmem:[%s7418_s1 + $0x968] sm:$0xff]  ;;  %v320_v2 = vld [vmem:[%s7418_s1 + $0x8f0] sm:$0xff] }
  0x77   :  { %4147 = vmatpush3.bf16.msra.mxu1 %v4146_v3  ;;  %v921_v3 = vcombine.high %v5648_v54, %v5648_v54  ;;  %v4200_v14 = vpack.c.bf16 %v343_v5, %v342_v4  ;;  %v352_v4 = vld [vmem:[%s7418_s1 + $0x9f0] sm:$0xff]  ;;  %v353_v5 = vld [vmem:[%s7418_s1 + $0x9f8] sm:$0xff]  ;;  %v359_v32 = vld [vmem:[%s7418_s1 + $0xa28] sm:$0xff] }
  0x78   :  { %4149 = vmatprep.subr.bf16.mxu1 %v4148_v8  ;;  %v4198_v8 = vpack.c.bf16 %v325_v0, %v324_v62  ;;  %v303_v62 = vld [vmem:[%s7418_s1 + $0x868] sm:$0xff]  ;;  %v390_v55 = vld [vmem:[%s7418_s1 + $0xb20] sm:$0xff] }
  0x79   :  { %4119 = vmatpush3.bf16.msra.mxu0 %v4118_v17  ;;  %v313_v17 = vld [vmem:[%s7418_s1 + $0x8b8] sm:$0xff] }
  0x7a   :  { %4121 = vmatprep.subr.bf16.mxu0 %v4120_v19  ;;  %v345_v19 = vld [vmem:[%s7418_s1 + $0x9b8] sm:$0xff]  ;;  %v4172_v22 = vpack.c.bf16 %v313_v17, %v312_v16  ;;  %v370_v16 = vld [vmem:[%s7418_s1 + $0xa80] sm:$0xff]  ;;  %v371_v17 = vld [vmem:[%s7418_s1 + $0xa88] sm:$0xff] }
  0x7b   :  { %4151 = vmatpush3.bf16.msra.mxu1 %v4150_v18  ;;  %v344_v18 = vld [vmem:[%s7418_s1 + $0x9b0] sm:$0xff] }
  0x7c   :  { %4153 = vmatprep.subr.bf16.mxu1 %v4152_v23  ;;  %v296_v23 = vld [vmem:[%s7418_s1 + $0x830] sm:$0xff]  ;;  %v4204_v26 = vpack.c.bf16 %v345_v19, %v344_v18  ;;  %v402_v18 = vld [vmem:[%s7418_s1 + $0xb80] sm:$0xff]  ;;  %v403_v19 = vld [vmem:[%s7418_s1 + $0xb88] sm:$0xff] }
  0x7d   :  { %4123 = vmatpush3.bf16.msra.mxu0 %v4122_v29  ;;  %v315_v29 = vld [vmem:[%s7418_s1 + $0x8c8] sm:$0xff]  ;;  %v4256_v27 = vpack.c.bf16 %v403_v19, %v402_v18  ;;  %v380_v18 = vld [vmem:[%s7418_s1 + $0xad0] sm:$0xff]  ;;  %v381_v19 = vld [vmem:[%s7418_s1 + $0xad8] sm:$0xff] }
  0x7e   :  { %4125 = vmatprep.subr.bf16.mxu0 %v4124_v33  ;;  %v4174_v33 = vpack.c.bf16 %v297_v24, %v296_v23  ;;  %v4176_v34 = vpack.c.bf16 %v315_v29, %v314_v28  ;;  %v4224_v23 = vpack.c.bf16 %v371_v17, %v370_v16  ;;  %v354_v24 = vld [vmem:[%s7418_s1 + $0xa00] sm:$0xff]  ;;  %v387_v28 = vld [vmem:[%s7418_s1 + $0xb08] sm:$0xff]  ;;  %v372_v29 = vld [vmem:[%s7418_s1 + $0xa90] sm:$0xff] }
  0x7f   :  { %4155 = vmatpush3.bf16.msra.mxu1 %v4154_v31  ;;  %v347_v31 = vld [vmem:[%s7418_s1 + $0x9c8] sm:$0xff] }
  0x80   :  { %4157 = vmatprep.subr.bf16.mxu1 %v4156_v36  ;;  %v299_v36 = vld [vmem:[%s7418_s1 + $0x848] sm:$0xff]  ;;  %v4208_v37 = vpack.c.bf16 %v347_v31, %v346_v30  ;;  %v373_v30 = vld [vmem:[%s7418_s1 + $0xa98] sm:$0xff] }
  0x81   :  { %4127 = vmatpush3.bf16.msra.mxu0 %v4126_v44  ;;  %v349_v44 = vld [vmem:[%s7418_s1 + $0x9d8] sm:$0xff]  ;;  %v395_v17 = vld [vmem:[%s7418_s1 + $0xb48] sm:$0xff] }
  0x82   :  { %4161 = vmatprep.subr.bf16.mxu0 %v4160_v46  ;;  %v4210_v46 = vpack.c.bf16 %v331_v38, %v330_v52  ;;  %v4212_v51 = vpack.c.bf16 %v349_v44, %v348_v42  ;;  %v4228_v52 = vpack.c.bf16 %v373_v30, %v372_v29  ;;  %v357_v38 = vld [vmem:[%s7418_s1 + $0xa18] sm:$0xff]  ;;  %v374_v44 = vld [vmem:[%s7418_s1 + $0xaa0] sm:$0xff] }
  0x83   :  { %4159 = vmatpush3.bf16.msra.mxu1 %v4158_v45  ;;  %v4178_v45 = vpack.c.bf16 %v299_v36, %v298_v35  ;;  %v4226_v35 = vpack.c.bf16 %v355_v25, %v354_v24  ;;  %v389_v42 = vld [vmem:[%s7418_s1 + $0xb18] sm:$0xff]  ;;  %v4244_v24 = vpack.c.bf16 %v381_v19, %v380_v18  ;;  %v364_v25 = vld [vmem:[%s7418_s1 + $0xa50] sm:$0xff]  ;;  %v382_v30 = vld [vmem:[%s7418_s1 + $0xae0] sm:$0xff] }
  0x84   :  { %4193 = vmatprep.subr.bf16.mxu1 %v4192_v50  ;;  %1583 = vmatmul.mubr.f32.vlgmr.msra.gmra.mrb[6].mxu0 %v5441_v12  ;;  %v294_v12 = vld [vmem:[%s7418_s1 + $0x820] sm:$0xff]  ;;  %v332_v50 = vld [vmem:[%s7418_s1 + $0x950] sm:$0xff]  ;;  %v397_v29 = vld [vmem:[%s7418_s1 + $0xb58] sm:$0xff] }
  0x85   :  { %4163 = vmatpush3.bf16.msra.mxu0 %v4162_v41  ;;  %1722 = vmatprep.mubr.f32.mxu0 %v921_v3  ;;  %v4170_v20 = vpack.c.bf16 %v295_v11, %v294_v12  ;;  %v351_v41 = vld [vmem:[%s7418_s1 + $0x9e8] sm:$0xff]  ;;  %v321_v3 = vld [vmem:[%s7418_s1 + $0x8f8] sm:$0xff]  ;;  %v304_v12 = vld [vmem:[%s7418_s1 + $0x870] sm:$0xff] }
  0x86   :  { %1653 = vmatmul.mubr.f32.vlgmr.msra.gmra.mrb[6].mxu1 %v5450_v15  ;;  %4165 = vmatprep.subr.bf16.mxu0 %v4164_v59  ;;  %v327_v15 = vld [vmem:[%s7418_s1 + $0x928] sm:$0xff]  ;;  %v4214_v59 = vpack.c.bf16 %v333_v53, %v332_v50  ;;  %v4216_v0 = vpack.c.bf16 %v351_v41, %v350_v56  ;;  %v305_v11 = vld [vmem:[%s7418_s1 + $0x878] sm:$0xff]  ;;  %v376_v41 = vld [vmem:[%s7418_s1 + $0xab0] sm:$0xff] }
  0x87   :  { %4195 = vmatpush3.bf16.msra.mxu1 %v4194_v58  ;;  %1792 = vmatprep.mubr.f32.mxu1 %v922_v6  ;;  %v4202_v21 = vpack.c.bf16 %v327_v15, %v326_v13  ;;  %v4182_v58 = vpack.c.bf16 %v301_v49, %v300_v48  ;;  %v4186_v6 = vpack.c.bf16 %v303_v62, %v302_v61  ;;  %v336_v13 = vld [vmem:[%s7418_s1 + $0x970] sm:$0xff]  ;;  %v337_v15 = vld [vmem:[%s7418_s1 + $0x978] sm:$0xff]  ;;  %v407_v48 = vld [vmem:[%s7418_s1 + $0xba8] sm:$0xff] }
  0x88   :  { %4197 = vmatprep.subr.bf16.mxu1 %v4196_v63  ;;  %v334_v63 = vld [vmem:[%s7418_s1 + $0x960] sm:$0xff]  ;;  %v452_v18 = vld [vmem:[%s7418_s1 + $0xd10] sm:$0xff] }
  0x89   :  { %4167 = vmatpush3.bf16.msra.mxu0 %v4166_v7  ;;  %v26_v7 = vld [vmem:[%s7417_s0 + $0x28] sm:$0xff] }
  0x8a   :  { %4169 = vmatprep.subr.bf16.mxu0 %v4168_v9  ;;  %v4188_v9 = vpack.c.bf16 %v321_v3, %v320_v2  ;;  %v5855_v31 = vrot.slane %v26_v7, %v4940_v10  ;;  %v392_v2 = vld [vmem:[%s7418_s1 + $0xb30] sm:$0xff] }
  0x8b   :  { %4199 = vmatpush3.bf16.msra.mxu1 %v4198_v8  ;;  %v4218_v8 = vpack.c.bf16 %v335_v1, %v334_v63  ;;  %v361_v1 = vld [vmem:[%s7418_s1 + $0xa38] sm:$0xff] }
  0x8c   :  { %4201 = vmatprep.subr.bf16.mxu1 %v4200_v14  ;;  %v4220_v14 = vpack.c.bf16 %v353_v5, %v352_v4  ;;  %v393_v4 = vld [vmem:[%s7418_s1 + $0xb38] sm:$0xff]  ;;  %v378_v5 = vld [vmem:[%s7418_s1 + $0xac0] sm:$0xff] }
  0x8d   :  { %4171 = vmatpush3.bf16.msra.mxu0 %v4170_v20  ;;  %v923_v20 = vcombine.high %v26_v7, %v26_v7  ;;  %v410_v7 = vld [vmem:[%s7418_s1 + $0xbc0] sm:$0xff] }
  0x8e   :  { %4173 = vmatprep.subr.bf16.mxu0 %v4172_v22  ;;  %v4222_v22 = vpack.c.bf16 %v337_v15, %v336_v13  ;;  %v362_v13 = vld [vmem:[%s7418_s1 + $0xa40] sm:$0xff] }
  0x8f   :  { %4203 = vmatpush3.bf16.msra.mxu1 %v4202_v21  ;;  %v4190_v21 = vpack.c.bf16 %v305_v11, %v304_v12  ;;  %v4270_v12 = vpack.c.bf16 %v393_v4, %v392_v2  ;;  %v394_v15 = vld [vmem:[%s7418_s1 + $0xb40] sm:$0xff]  ;;  %v419_v2 = vld [vmem:[%s7418_s1 + $0xc08] sm:$0xff] }
  0x90   :  { %4205 = vmatprep.subr.bf16.mxu1 %v4204_v26  ;;  %v386_v26 = vld [vmem:[%s7418_s1 + $0xb00] sm:$0xff] }
  0x91   :  { %4175 = vmatpush3.bf16.msra.mxu0 %v4174_v33  ;;  %v404_v33 = vld [vmem:[%s7418_s1 + $0xb90] sm:$0xff]  ;;  %v4258_v36 = vpack.c.bf16 %v387_v28, %v386_v26  ;;  %v365_v26 = vld [vmem:[%s7418_s1 + $0xa58] sm:$0xff] }
  0x92   :  { %4177 = vmatprep.subr.bf16.mxu0 %v4176_v34  ;;  %v5864_v34 = vrot.slane %v923_v20, %v4940_v10  ;;  %v412_v20 = vld [vmem:[%s7418_s1 + $0xbd0] sm:$0xff] }
  0x93   :  { %4207 = vmatpush3.bf16.msra.mxu1 %v4206_v43  ;;  %v405_v43 = vld [vmem:[%s7418_s1 + $0xb98] sm:$0xff] }
  0x94   :  { %4209 = vmatprep.subr.bf16.mxu1 %v4208_v37  ;;  %v356_v37 = vld [vmem:[%s7418_s1 + $0xa10] sm:$0xff]  ;;  %v4260_v40 = vpack.c.bf16 %v405_v43, %v404_v33  ;;  %v939_v49 = vcombine.high %v5864_v34, %v5864_v34  ;;  %v383_v33 = vld [vmem:[%s7418_s1 + $0xae8] sm:$0xff]  ;;  %v414_v43 = vld [vmem:[%s7418_s1 + $0xbe0] sm:$0xff] }
  0x95   :  { %4179 = vmatpush3.bf16.msra.mxu0 %v4178_v45  ;;  %v375_v45 = vld [vmem:[%s7418_s1 + $0xaa8] sm:$0xff]  ;;  %v4230_v50 = vpack.c.bf16 %v357_v38, %v356_v37  ;;  %v4248_v37 = vpack.c.bf16 %v383_v33, %v382_v30  ;;  %v366_v38 = vld [vmem:[%s7418_s1 + $0xa60] sm:$0xff] }
  0x96   :  { %4181 = vmatprep.subr.bf16.mxu0 %v4180_v47  ;;  %v406_v47 = vld [vmem:[%s7418_s1 + $0xba0] sm:$0xff]  ;;  %v4232_v53 = vpack.c.bf16 %v375_v45, %v374_v44  ;;  %v399_v44 = vld [vmem:[%s7418_s1 + $0xb68] sm:$0xff]  ;;  %v384_v45 = vld [vmem:[%s7418_s1 + $0xaf0] sm:$0xff] }
  0x97   :  { %4211 = vmatpush3.bf16.msra.mxu1 %v4210_v46  ;;  %v938_v46 = vcombine.high %v5855_v31, %v5855_v31  ;;  %v4264_v56 = vpack.c.bf16 %v407_v48, %v406_v47  ;;  %v416_v47 = vld [vmem:[%s7418_s1 + $0xbf0] sm:$0xff]  ;;  %v417_v48 = vld [vmem:[%s7418_s1 + $0xbf8] sm:$0xff]  ;;  %v423_v30 = vld [vmem:[%s7418_s1 + $0xc28] sm:$0xff] }
  0x98   :  { %4213 = vmatprep.subr.bf16.mxu1 %v4212_v51  ;;  %v4262_v51 = vpack.c.bf16 %v389_v42, %v388_v39  ;;  %v367_v39 = vld [vmem:[%s7418_s1 + $0xa68] sm:$0xff]  ;;  %v454_v33 = vld [vmem:[%s7418_s1 + $0xd20] sm:$0xff] }
  0x99   :  { %4183 = vmatpush3.bf16.msra.mxu0 %v4182_v58  ;;  %v377_v58 = vld [vmem:[%s7418_s1 + $0xab8] sm:$0xff] }
  0x9a   :  { %4185 = vmatprep.subr.bf16.mxu0 %v4184_v60  ;;  %v409_v60 = vld [vmem:[%s7418_s1 + $0xbb8] sm:$0xff]  ;;  %v4236_v63 = vpack.c.bf16 %v377_v58, %v376_v41  ;;  %v434_v41 = vld [vmem:[%s7418_s1 + $0xc80] sm:$0xff]  ;;  %v435_v58 = vld [vmem:[%s7418_s1 + $0xc88] sm:$0xff] }
  0x9b   :  { %4215 = vmatpush3.bf16.msra.mxu1 %v4214_v59  ;;  %v408_v59 = vld [vmem:[%s7418_s1 + $0xbb0] sm:$0xff] }
  0x9c   :  { %4217 = vmatprep.subr.bf16.mxu1 %v4216_v0  ;;  %v360_v0 = vld [vmem:[%s7418_s1 + $0xa30] sm:$0xff]  ;;  %v4268_v3 = vpack.c.bf16 %v409_v60, %v408_v59  ;;  %v466_v59 = vld [vmem:[%s7418_s1 + $0xd80] sm:$0xff]  ;;  %v467_v60 = vld [vmem:[%s7418_s1 + $0xd88] sm:$0xff] }
  0x9d   :  { %4187 = vmatpush3.bf16.msra.mxu0 %v4186_v6  ;;  %v379_v6 = vld [vmem:[%s7418_s1 + $0xac8] sm:$0xff]  ;;  %v4320_v4 = vpack.c.bf16 %v467_v60, %v466_v59  ;;  %v444_v59 = vld [vmem:[%s7418_s1 + $0xcd0] sm:$0xff]  ;;  %v445_v60 = vld [vmem:[%s7418_s1 + $0xcd8] sm:$0xff] }
  0x9e   :  { %4189 = vmatprep.subr.bf16.mxu0 %v4188_v9  ;;  %v4238_v9 = vpack.c.bf16 %v361_v1, %v360_v0  ;;  %v4240_v11 = vpack.c.bf16 %v379_v6, %v378_v5  ;;  %v4288_v0 = vpack.c.bf16 %v435_v58, %v434_v41  ;;  %v418_v1 = vld [vmem:[%s7418_s1 + $0xc00] sm:$0xff]  ;;  %v451_v5 = vld [vmem:[%s7418_s1 + $0xd08] sm:$0xff]  ;;  %v436_v6 = vld [vmem:[%s7418_s1 + $0xc90] sm:$0xff] }
  0x9f   :  { %4219 = vmatpush3.bf16.msra.mxu1 %v4218_v8  ;;  %v411_v8 = vld [vmem:[%s7418_s1 + $0xbc8] sm:$0xff] }
  0xa0   :  { %4221 = vmatprep.subr.bf16.mxu1 %v4220_v14  ;;  %v363_v14 = vld [vmem:[%s7418_s1 + $0xa48] sm:$0xff]  ;;  %v4272_v16 = vpack.c.bf16 %v411_v8, %v410_v7  ;;  %v437_v7 = vld [vmem:[%s7418_s1 + $0xc98] sm:$0xff] }
  0xa1   :  { %4191 = vmatpush3.bf16.msra.mxu0 %v4190_v21  ;;  %v413_v21 = vld [vmem:[%s7418_s1 + $0xbd8] sm:$0xff]  ;;  %v459_v58 = vld [vmem:[%s7418_s1 + $0xd48] sm:$0xff] }
  0xa2   :  { %4225 = vmatprep.subr.bf16.mxu0 %v4224_v23  ;;  %v4274_v23 = vpack.c.bf16 %v395_v17, %v394_v15  ;;  %v4276_v28 = vpack.c.bf16 %v413_v21, %v412_v20  ;;  %v4292_v15 = vpack.c.bf16 %v437_v7, %v436_v6  ;;  %v421_v17 = vld [vmem:[%s7418_s1 + $0xc18] sm:$0xff]  ;;  %v438_v21 = vld [vmem:[%s7418_s1 + $0xca0] sm:$0xff] }
  0xa3   :  { %4223 = vmatpush3.bf16.msra.mxu1 %v4222_v22  ;;  %v4242_v22 = vpack.c.bf16 %v363_v14, %v362_v13  ;;  %v4290_v13 = vpack.c.bf16 %v419_v2, %v418_v1  ;;  %v453_v20 = vld [vmem:[%s7418_s1 + $0xd18] sm:$0xff]  ;;  %v4308_v1 = vpack.c.bf16 %v445_v60, %v444_v59  ;;  %v428_v2 = vld [vmem:[%s7418_s1 + $0xc50] sm:$0xff]  ;;  %v446_v7 = vld [vmem:[%s7418_s1 + $0xce0] sm:$0xff] }
  0xa4   :  { %4257 = vmatprep.subr.bf16.mxu1 %v4256_v27  ;;  %1723 = vmatmul.mubr.f32.vlgmr.msra.gmra.mrb[8].mxu0 %v5648_v54  ;;  %v358_v54 = vld [vmem:[%s7418_s1 + $0xa20] sm:$0xff]  ;;  %v396_v27 = vld [vmem:[%s7418_s1 + $0xb50] sm:$0xff]  ;;  %v461_v6 = vld [vmem:[%s7418_s1 + $0xd58] sm:$0xff] }
  0xa5   :  { %4227 = vmatpush3.bf16.msra.mxu0 %v4226_v35  ;;  %1862 = vmatprep.mubr.f32.mxu0 %v938_v46  ;;  %v4234_v61 = vpack.c.bf16 %v359_v32, %v358_v54  ;;  %v415_v35 = vld [vmem:[%s7418_s1 + $0xbe8] sm:$0xff]  ;;  %v385_v46 = vld [vmem:[%s7418_s1 + $0xaf8] sm:$0xff]  ;;  %v368_v54 = vld [vmem:[%s7418_s1 + $0xa70] sm:$0xff] }
  0xa6   :  { %1793 = vmatmul.mubr.f32.vlgmr.msra.gmra.mrb[8].mxu1 %v5657_v57  ;;  %4229 = vmatprep.subr.bf16.mxu0 %v4228_v52  ;;  %v391_v57 = vld [vmem:[%s7418_s1 + $0xb28] sm:$0xff]  ;;  %v4278_v52 = vpack.c.bf16 %v397_v29, %v396_v27  ;;  %v4280_v42 = vpack.c.bf16 %v415_v35, %v414_v43  ;;  %v369_v32 = vld [vmem:[%s7418_s1 + $0xa78] sm:$0xff]  ;;  %v440_v35 = vld [vmem:[%s7418_s1 + $0xcb0] sm:$0xff] }
  0xa7   :  { %4259 = vmatpush3.bf16.msra.mxu1 %v4258_v36  ;;  %1932 = vmatprep.mubr.f32.mxu1 %v939_v49  ;;  %v4266_v62 = vpack.c.bf16 %v391_v57, %v390_v55  ;;  %v4246_v36 = vpack.c.bf16 %v365_v26, %v364_v25  ;;  %v4250_v49 = vpack.c.bf16 %v367_v39, %v366_v38  ;;  %v400_v55 = vld [vmem:[%s7418_s1 + $0xb70] sm:$0xff]  ;;  %v401_v57 = vld [vmem:[%s7418_s1 + $0xb78] sm:$0xff]  ;;  %v471_v25 = vld [vmem:[%s7418_s1 + $0xda8] sm:$0xff] }
  0xa8   :  { %4261 = vmatprep.subr.bf16.mxu1 %v4260_v40  ;;  %v398_v40 = vld [vmem:[%s7418_s1 + $0xb60] sm:$0xff]  ;;  %v516_v59 = vld [vmem:[%s7418_s1 + $0xf10] sm:$0xff] }
  0xa9   :  { %4231 = vmatpush3.bf16.msra.mxu0 %v4230_v50  ;;  %v27_v50 = vld [vmem:[%s7417_s0 + $0x30] sm:$0xff] }
  0xaa   :  { %4233 = vmatprep.subr.bf16.mxu0 %v4232_v53  ;;  %v4252_v53 = vpack.c.bf16 %v385_v46, %v384_v45  ;;  %v6062_v8 = vrot.slane %v27_v50, %v4940_v10  ;;  %v456_v45 = vld [vmem:[%s7418_s1 + $0xd30] sm:$0xff] }
  0xab   :  { %4263 = vmatpush3.bf16.msra.mxu1 %v4262_v51  ;;  %v4282_v51 = vpack.c.bf16 %v399_v44, %v398_v40  ;;  %v425_v44 = vld [vmem:[%s7418_s1 + $0xc38] sm:$0xff] }
  0xac   :  { %4265 = vmatprep.subr.bf16.mxu1 %v4264_v56  ;;  %v4284_v56 = vpack.c.bf16 %v417_v48, %v416_v47  ;;  %v457_v47 = vld [vmem:[%s7418_s1 + $0xd38] sm:$0xff]  ;;  %v442_v48 = vld [vmem:[%s7418_s1 + $0xcc0] sm:$0xff] }
  0xad   :  { %4235 = vmatpush3.bf16.msra.mxu0 %v4234_v61  ;;  %v940_v61 = vcombine.high %v27_v50, %v27_v50  ;;  %v474_v50 = vld [vmem:[%s7418_s1 + $0xdc0] sm:$0xff] }
  0xae   :  { %4237 = vmatprep.subr.bf16.mxu0 %v4236_v63  ;;  %v4286_v63 = vpack.c.bf16 %v401_v57, %v400_v55  ;;  %v426_v55 = vld [vmem:[%s7418_s1 + $0xc40] sm:$0xff] }
  0xaf   :  { %4267 = vmatpush3.bf16.msra.mxu1 %v4266_v62  ;;  %v4254_v62 = vpack.c.bf16 %v369_v32, %v368_v54  ;;  %v4334_v54 = vpack.c.bf16 %v457_v47, %v456_v45  ;;  %v458_v57 = vld [vmem:[%s7418_s1 + $0xd40] sm:$0xff]  ;;  %v483_v45 = vld [vmem:[%s7418_s1 + $0xe08] sm:$0xff] }
  0xb0   :  { %4269 = vmatprep.subr.bf16.mxu1 %v4268_v3  ;;  %v450_v3 = vld [vmem:[%s7418_s1 + $0xd00] sm:$0xff] }
  0xb1   :  { %4239 = vmatpush3.bf16.msra.mxu0 %v4238_v9  ;;  %v468_v9 = vld [vmem:[%s7418_s1 + $0xd90] sm:$0xff]  ;;  %v4322_v14 = vpack.c.bf16 %v451_v5, %v450_v3  ;;  %v429_v3 = vld [vmem:[%s7418_s1 + $0xc58] sm:$0xff] }
  0xb2   :  { %4241 = vmatprep.subr.bf16.mxu0 %v4240_v11  ;;  %v6071_v11 = vrot.slane %v940_v61, %v4940_v10  ;;  %v476_v61 = vld [vmem:[%s7418_s1 + $0xdd0] sm:$0xff] }
  0xb3   :  { %4271 = vmatpush3.bf16.msra.mxu1 %v4270_v12  ;;  %v469_v12 = vld [vmem:[%s7418_s1 + $0xd98] sm:$0xff] }
  0xb4   :  { %4273 = vmatprep.subr.bf16.mxu1 %v4272_v16  ;;  %v420_v16 = vld [vmem:[%s7418_s1 + $0xc10] sm:$0xff]  ;;  %v4324_v19 = vpack.c.bf16 %v469_v12, %v468_v9  ;;  %v956_v26 = vcombine.high %v6071_v11, %v6071_v11  ;;  %v447_v9 = vld [vmem:[%s7418_s1 + $0xce8] sm:$0xff]  ;;  %v478_v12 = vld [vmem:[%s7418_s1 + $0xde0] sm:$0xff] }
  0xb5   :  { %4243 = vmatpush3.bf16.msra.mxu0 %v4242_v22  ;;  %v439_v22 = vld [vmem:[%s7418_s1 + $0xca8] sm:$0xff]  ;;  %v4294_v27 = vpack.c.bf16 %v421_v17, %v420_v16  ;;  %v4312_v16 = vpack.c.bf16 %v447_v9, %v446_v7  ;;  %v430_v17 = vld [vmem:[%s7418_s1 + $0xc60] sm:$0xff] }
  0xb6   :  { %4245 = vmatprep.subr.bf16.mxu0 %v4244_v24  ;;  %v470_v24 = vld [vmem:[%s7418_s1 + $0xda0] sm:$0xff]  ;;  %v4296_v29 = vpack.c.bf16 %v439_v22, %v438_v21  ;;  %v463_v21 = vld [vmem:[%s7418_s1 + $0xd68] sm:$0xff]  ;;  %v448_v22 = vld [vmem:[%s7418_s1 + $0xcf0] sm:$0xff] }
  0xb7   :  { %4275 = vmatpush3.bf16.msra.mxu1 %v4274_v23  ;;  %v955_v23 = vcombine.high %v6062_v8, %v6062_v8  ;;  %v4328_v43 = vpack.c.bf16 %v471_v25, %v470_v24  ;;  %v480_v24 = vld [vmem:[%s7418_s1 + $0xdf0] sm:$0xff]  ;;  %v481_v25 = vld [vmem:[%s7418_s1 + $0xdf8] sm:$0xff]  ;;  %v487_v7 = vld [vmem:[%s7418_s1 + $0xe28] sm:$0xff] }
  0xb8   :  { %4277 = vmatprep.subr.bf16.mxu1 %v4276_v28  ;;  %v4326_v28 = vpack.c.bf16 %v453_v20, %v452_v18  ;;  %v431_v18 = vld [vmem:[%s7418_s1 + $0xc68] sm:$0xff]  ;;  %v518_v9 = vld [vmem:[%s7418_s1 + $0xf20] sm:$0xff] }
  0xb9   :  { %4247 = vmatpush3.bf16.msra.mxu0 %v4246_v36  ;;  %v441_v36 = vld [vmem:[%s7418_s1 + $0xcb8] sm:$0xff] }
  0xba   :  { %4249 = vmatprep.subr.bf16.mxu0 %v4248_v37  ;;  %v473_v37 = vld [vmem:[%s7418_s1 + $0xdb8] sm:$0xff]  ;;  %v4300_v40 = vpack.c.bf16 %v441_v36, %v440_v35  ;;  %v498_v35 = vld [vmem:[%s7418_s1 + $0xe80] sm:$0xff]  ;;  %v499_v36 = vld [vmem:[%s7418_s1 + $0xe88] sm:$0xff] }
  0xbb   :  { %4279 = vmatpush3.bf16.msra.mxu1 %v4278_v52  ;;  %v472_v52 = vld [vmem:[%s7418_s1 + $0xdb0] sm:$0xff] }
  0xbc   :  { %4281 = vmatprep.subr.bf16.mxu1 %v4280_v42  ;;  %v424_v42 = vld [vmem:[%s7418_s1 + $0xc30] sm:$0xff]  ;;  %v4332_v46 = vpack.c.bf16 %v473_v37, %v472_v52  ;;  %v530_v52 = vld [vmem:[%s7418_s1 + $0xf80] sm:$0xff]  ;;  %v531_v37 = vld [vmem:[%s7418_s1 + $0xf88] sm:$0xff] }
  0xbd   :  { %4251 = vmatpush3.bf16.msra.mxu0 %v4250_v49  ;;  %v443_v49 = vld [vmem:[%s7418_s1 + $0xcc8] sm:$0xff]  ;;  %v4384_v47 = vpack.c.bf16 %v531_v37, %v530_v52  ;;  %v508_v52 = vld [vmem:[%s7418_s1 + $0xed0] sm:$0xff]  ;;  %v509_v37 = vld [vmem:[%s7418_s1 + $0xed8] sm:$0xff] }
  0xbe   :  { %4253 = vmatprep.subr.bf16.mxu0 %v4252_v53  ;;  %v4302_v53 = vpack.c.bf16 %v425_v44, %v424_v42  ;;  %v4304_v32 = vpack.c.bf16 %v443_v49, %v442_v48  ;;  %v4352_v42 = vpack.c.bf16 %v499_v36, %v498_v35  ;;  %v482_v44 = vld [vmem:[%s7418_s1 + $0xe00] sm:$0xff]  ;;  %v515_v48 = vld [vmem:[%s7418_s1 + $0xf08] sm:$0xff]  ;;  %v500_v49 = vld [vmem:[%s7418_s1 + $0xe90] sm:$0xff] }
  0xbf   :  { %4283 = vmatpush3.bf16.msra.mxu1 %v4282_v51  ;;  %v475_v51 = vld [vmem:[%s7418_s1 + $0xdc8] sm:$0xff] }
  0xc0   :  { %4285 = vmatprep.subr.bf16.mxu1 %v4284_v56  ;;  %v427_v56 = vld [vmem:[%s7418_s1 + $0xc48] sm:$0xff]  ;;  %v4336_v41 = vpack.c.bf16 %v475_v51, %v474_v50  ;;  %v501_v50 = vld [vmem:[%s7418_s1 + $0xe98] sm:$0xff] }
  0xc1   :  { %4255 = vmatpush3.bf16.msra.mxu0 %v4254_v62  ;;  %v477_v62 = vld [vmem:[%s7418_s1 + $0xdd8] sm:$0xff]  ;;  %v523_v36 = vld [vmem:[%s7418_s1 + $0xf48] sm:$0xff] }
  0xc2   :  { %4289 = vmatprep.subr.bf16.mxu0 %v4288_v0  ;;  %v4338_v0 = vpack.c.bf16 %v459_v58, %v458_v57  ;;  %v4340_v5 = vpack.c.bf16 %v477_v62, %v476_v61  ;;  %v4356_v57 = vpack.c.bf16 %v501_v50, %v500_v49  ;;  %v485_v58 = vld [vmem:[%s7418_s1 + $0xe18] sm:$0xff]  ;;  %v502_v62 = vld [vmem:[%s7418_s1 + $0xea0] sm:$0xff] }
  0xc3   :  { %4287 = vmatpush3.bf16.msra.mxu1 %v4286_v63  ;;  %v4306_v63 = vpack.c.bf16 %v427_v56, %v426_v55  ;;  %v4354_v55 = vpack.c.bf16 %v483_v45, %v482_v44  ;;  %v517_v61 = vld [vmem:[%s7418_s1 + $0xf18] sm:$0xff]  ;;  %v4372_v44 = vpack.c.bf16 %v509_v37, %v508_v52  ;;  %v492_v45 = vld [vmem:[%s7418_s1 + $0xe50] sm:$0xff]  ;;  %v510_v50 = vld [vmem:[%s7418_s1 + $0xee0] sm:$0xff] }
  0xc4   :  { %4321 = vmatprep.subr.bf16.mxu1 %v4320_v4  ;;  %1863 = vmatmul.mubr.f32.vlgmr.msra.gmra.mrb[10].mxu0 %v5855_v31  ;;  %v422_v31 = vld [vmem:[%s7418_s1 + $0xc20] sm:$0xff]  ;;  %v460_v4 = vld [vmem:[%s7418_s1 + $0xd50] sm:$0xff]  ;;  %v525_v49 = vld [vmem:[%s7418_s1 + $0xf58] sm:$0xff] }
  0xc5   :  { %4291 = vmatpush3.bf16.msra.mxu0 %v4290_v13  ;;  %2002 = vmatprep.mubr.f32.mxu0 %v955_v23  ;;  %v4298_v38 = vpack.c.bf16 %v423_v30, %v422_v31  ;;  %v479_v13 = vld [vmem:[%s7418_s1 + $0xde8] sm:$0xff]  ;;  %v449_v23 = vld [vmem:[%s7418_s1 + $0xcf8] sm:$0xff]  ;;  %v432_v31 = vld [vmem:[%s7418_s1 + $0xc70] sm:$0xff] }
  0xc6   :  { %1933 = vmatmul.mubr.f32.vlgmr.msra.gmra.mrb[10].mxu1 %v5864_v34  ;;  %4293 = vmatprep.subr.bf16.mxu0 %v4292_v15  ;;  %v455_v34 = vld [vmem:[%s7418_s1 + $0xd28] sm:$0xff]  ;;  %v4342_v15 = vpack.c.bf16 %v461_v6, %v460_v4  ;;  %v4344_v20 = vpack.c.bf16 %v479_v13, %v478_v12  ;;  %v433_v30 = vld [vmem:[%s7418_s1 + $0xc78] sm:$0xff]  ;;  %v504_v13 = vld [vmem:[%s7418_s1 + $0xeb0] sm:$0xff] }
  0xc7   :  { %4323 = vmatpush3.bf16.msra.mxu1 %v4322_v14  ;;  %2072 = vmatprep.mubr.f32.mxu1 %v956_v26  ;;  %v4330_v39 = vpack.c.bf16 %v455_v34, %v454_v33  ;;  %v4310_v14 = vpack.c.bf16 %v429_v3, %v428_v2  ;;  %v4314_v26 = vpack.c.bf16 %v431_v18, %v430_v17  ;;  %v464_v33 = vld [vmem:[%s7418_s1 + $0xd70] sm:$0xff]  ;;  %v465_v34 = vld [vmem:[%s7418_s1 + $0xd78] sm:$0xff]  ;;  %v535_v2 = vld [vmem:[%s7418_s1 + $0xfa8] sm:$0xff] }
  0xc8   :  { %4325 = vmatprep.subr.bf16.mxu1 %v4324_v19  ;;  %v462_v19 = vld [vmem:[%s7418_s1 + $0xd60] sm:$0xff]  ;;  %v596_v37 = vld [vmem:[%s7418_s1 + $0x1190] sm:$0xff] }
  0xc9   :  { %4295 = vmatpush3.bf16.msra.mxu0 %v4294_v27  ;;  %v28_v27 = vld [vmem:[%s7417_s0 + $0x38] sm:$0xff] }
  0xca   :  { %4297 = vmatprep.subr.bf16.mxu0 %v4296_v29  ;;  %v4316_v29 = vpack.c.bf16 %v449_v23, %v448_v22  ;;  %v6269_v51 = vrot.slane %v28_v27, %v4940_v10  ;;  %v520_v22 = vld [vmem:[%s7418_s1 + $0xf30] sm:$0xff] }
  0xcb   :  { %4327 = vmatpush3.bf16.msra.mxu1 %v4326_v28  ;;  %v4346_v28 = vpack.c.bf16 %v463_v21, %v462_v19  ;;  %v489_v21 = vld [vmem:[%s7418_s1 + $0xe38] sm:$0xff] }
  0xcc   :  { %4329 = vmatprep.subr.bf16.mxu1 %v4328_v43  ;;  %v4348_v43 = vpack.c.bf16 %v481_v25, %v480_v24  ;;  %v521_v24 = vld [vmem:[%s7418_s1 + $0xf38] sm:$0xff]  ;;  %v506_v25 = vld [vmem:[%s7418_s1 + $0xec0] sm:$0xff] }
  0xcd   :  { %4299 = vmatpush3.bf16.msra.mxu0 %v4298_v38  ;;  %v957_v38 = vcombine.high %v28_v27, %v28_v27  ;;  %v538_v27 = vld [vmem:[%s7418_s1 + $0xfc0] sm:$0xff] }
  0xce   :  { %4301 = vmatprep.subr.bf16.mxu0 %v4300_v40  ;;  %v4350_v40 = vpack.c.bf16 %v465_v34, %v464_v33  ;;  %v490_v33 = vld [vmem:[%s7418_s1 + $0xe40] sm:$0xff] }
  0xcf   :  { %4331 = vmatpush3.bf16.msra.mxu1 %v4330_v39  ;;  %v4318_v39 = vpack.c.bf16 %v433_v30, %v432_v31  ;;  %v4398_v31 = vpack.c.bf16 %v521_v24, %v520_v22  ;;  %v522_v34 = vld [vmem:[%s7418_s1 + $0xf40] sm:$0xff]  ;;  %v563_v22 = vld [vmem:[%s7418_s1 + $0x1088] sm:$0xff] }
  0xd0   :  { %4333 = vmatprep.subr.bf16.mxu1 %v4332_v46  ;;  %v514_v46 = vld [vmem:[%s7418_s1 + $0xf00] sm:$0xff]  ;;  %v595_v24 = vld [vmem:[%s7418_s1 + $0x1188] sm:$0xff] }
  0xd1   :  { %4303 = vmatpush3.bf16.msra.mxu0 %v4302_v53  ;;  %v532_v53 = vld [vmem:[%s7418_s1 + $0xf90] sm:$0xff]  ;;  %v4386_v56 = vpack.c.bf16 %v515_v48, %v514_v46  ;;  %v493_v46 = vld [vmem:[%s7418_s1 + $0xe58] sm:$0xff] }
  0xd2   :  { %4305 = vmatprep.subr.bf16.mxu0 %v4304_v32  ;;  %v6278_v32 = vrot.slane %v957_v38, %v4940_v10  ;;  %v540_v38 = vld [vmem:[%s7418_s1 + $0xfd0] sm:$0xff] }
  0xd3   :  { %4335 = vmatpush3.bf16.msra.mxu1 %v4334_v54  ;;  %v533_v54 = vld [vmem:[%s7418_s1 + $0xf98] sm:$0xff] }
  0xd4   :  { %4337 = vmatprep.subr.bf16.mxu1 %v4336_v41  ;;  %v484_v41 = vld [vmem:[%s7418_s1 + $0xe10] sm:$0xff]  ;;  %v4388_v60 = vpack.c.bf16 %v533_v54, %v532_v53  ;;  %v973_v3 = vcombine.high %v6278_v32, %v6278_v32  ;;  %v511_v53 = vld [vmem:[%s7418_s1 + $0xee8] sm:$0xff]  ;;  %v542_v54 = vld [vmem:[%s7418_s1 + $0xfe0] sm:$0xff] }
  0xd5   :  { %4307 = vmatpush3.bf16.msra.mxu0 %v4306_v63  ;;  %v503_v63 = vld [vmem:[%s7418_s1 + $0xea8] sm:$0xff]  ;;  %v4358_v4 = vpack.c.bf16 %v485_v58, %v484_v41  ;;  %v4376_v41 = vpack.c.bf16 %v511_v53, %v510_v50  ;;  %v494_v58 = vld [vmem:[%s7418_s1 + $0xe60] sm:$0xff] }
  0xd6   :  { %4309 = vmatprep.subr.bf16.mxu0 %v4308_v1  ;;  %v534_v1 = vld [vmem:[%s7418_s1 + $0xfa0] sm:$0xff]  ;;  %v4360_v6 = vpack.c.bf16 %v503_v63, %v502_v62  ;;  %v527_v63 = vld [vmem:[%s7418_s1 + $0xf68] sm:$0xff] }
  0xd7   :  { %4339 = vmatpush3.bf16.msra.mxu1 %v4338_v0  ;;  %v972_v0 = vcombine.high %v6269_v51, %v6269_v51  ;;  %v4392_v12 = vpack.c.bf16 %v535_v2, %v534_v1  ;;  %v513_v1 = vld [vmem:[%s7418_s1 + $0xef8] sm:$0xff]  ;;  %v2957_v2 = vld [vmem:[%s7419_s2] ss:$0 sm:$0xff]  ;;  %v567_v53 = vld [vmem:[%s7418_s1 + $0x10a8] sm:$0xff] }
  0xd8   :  { %4341 = vmatprep.subr.bf16.mxu1 %v4340_v5  ;;  %v4390_v5 = vpack.c.bf16 %v517_v61, %v516_v59  ;;  %v495_v59 = vld [vmem:[%s7418_s1 + $0xe68] sm:$0xff]  ;;  %v566_v50 = vld [vmem:[%s7418_s1 + $0x10a0] sm:$0xff] }
  0xd9   :  { %4311 = vmatpush3.bf16.msra.mxu0 %v4310_v14  ;;  %v505_v14 = vld [vmem:[%s7418_s1 + $0xeb8] sm:$0xff] }
  0xda   :  { %4313 = vmatprep.subr.bf16.mxu0 %v4312_v16  ;;  %v537_v16 = vld [vmem:[%s7418_s1 + $0xfb8] sm:$0xff]  ;;  %v4364_v19 = vpack.c.bf16 %v505_v14, %v504_v13 }
  0xdb   :  { %4343 = vmatpush3.bf16.msra.mxu1 %v4342_v15  ;;  %v536_v15 = vld [vmem:[%s7418_s1 + $0xfb0] sm:$0xff] }
  0xdc   :  { %4345 = vmatprep.subr.bf16.mxu1 %v4344_v20  ;;  %v488_v20 = vld [vmem:[%s7418_s1 + $0xe30] sm:$0xff]  ;;  %v4396_v23 = vpack.c.bf16 %v537_v16, %v536_v15  ;;  %v497_v16 = vld [vmem:[%s7418_s1 + $0xe78] sm:$0xff] }
  0xdd   :  { %4315 = vmatpush3.bf16.msra.mxu0 %v4314_v26  ;;  %v507_v26 = vld [vmem:[%s7418_s1 + $0xec8] sm:$0xff]  ;;  %v496_v15 = vld [vmem:[%s7418_s1 + $0xe70] sm:$0xff] }
  0xde   :  { %4317 = vmatprep.subr.bf16.mxu0 %v4316_v29  ;;  %v4366_v29 = vpack.c.bf16 %v489_v21, %v488_v20  ;;  %v4368_v30 = vpack.c.bf16 %v507_v26, %v506_v25  ;;  %v529_v20 = vld [vmem:[%s7418_s1 + $0xf78] sm:$0xff]  ;;  %v562_v21 = vld [vmem:[%s7418_s1 + $0x1080] sm:$0xff] }
  0xdf   :  { %4347 = vmatpush3.bf16.msra.mxu1 %v4346_v28  ;;  %v539_v28 = vld [vmem:[%s7418_s1 + $0xfc8] sm:$0xff] }
  0xe0   :  { %4349 = vmatprep.subr.bf16.mxu1 %v4348_v43  ;;  %v491_v43 = vld [vmem:[%s7418_s1 + $0xe48] sm:$0xff]  ;;  %v4400_v35 = vpack.c.bf16 %v539_v28, %v538_v27  ;;  %v4382_v27 = vpack.c.bf16 %v497_v16, %v496_v15 }
  0xe1   :  { %4319 = vmatpush3.bf16.msra.mxu0 %v4318_v39  ;;  %v541_v39 = vld [vmem:[%s7418_s1 + $0xfd8] sm:$0xff] }
  0xe2   :  { %4353 = vmatprep.subr.bf16.mxu0 %v4352_v42  ;;  %v4402_v42 = vpack.c.bf16 %v523_v36, %v522_v34  ;;  %v4404_v48 = vpack.c.bf16 %v541_v39, %v540_v38  ;;  %v579_v34 = vld [vmem:[%s7418_s1 + $0x1108] sm:$0xff]  ;;  %v565_v36 = vld [vmem:[%s7418_s1 + $0x1098] sm:$0xff] }
  0xe3   :  { %4351 = vmatpush3.bf16.msra.mxu1 %v4350_v40  ;;  %v4370_v40 = vpack.c.bf16 %v491_v43, %v490_v33  ;;  %v578_v33 = vld [vmem:[%s7418_s1 + $0x1100] sm:$0xff]  ;;  %v597_v38 = vld [vmem:[%s7418_s1 + $0x1198] sm:$0xff] }
  0xe4   :  { %4385 = vmatprep.subr.bf16.mxu1 %v4384_v47  ;;  %2003 = vmatmul.mubr.f32.vlgmr.msra.gmra.mrb[12].mxu0 %v6062_v8  ;;  %v486_v8 = vld [vmem:[%s7418_s1 + $0xe20] sm:$0xff]  ;;  %v524_v47 = vld [vmem:[%s7418_s1 + $0xf50] sm:$0xff] }
  0xe5   :  { %4355 = vmatpush3.bf16.msra.mxu0 %v4354_v55  ;;  %2142 = vmatprep.mubr.f32.mxu0 %v972_v0  ;;  %v4362_v17 = vpack.c.bf16 %v487_v7, %v486_v8  ;;  %v543_v55 = vld [vmem:[%s7418_s1 + $0xfe8] sm:$0xff]  ;;  %v512_v0 = vld [vmem:[%s7418_s1 + $0xef0] sm:$0xff] }
  0xe6   :  { %2073 = vmatmul.mubr.f32.vlgmr.msra.gmra.mrb[12].mxu1 %v6071_v11  ;;  %4357 = vmatprep.subr.bf16.mxu0 %v4356_v57  ;;  %v519_v11 = vld [vmem:[%s7418_s1 + $0xf28] sm:$0xff]  ;;  %v4406_v57 = vpack.c.bf16 %v525_v49, %v524_v47  ;;  %v4408_v62 = vpack.c.bf16 %v543_v55, %v542_v54  ;;  %v4380_v14 = vpack.c.bf16 %v513_v1, %v512_v0  ;;  %v580_v47 = vld [vmem:[%s7418_s1 + $0x1110] sm:$0xff]  ;;  %v581_v49 = vld [vmem:[%s7418_s1 + $0x1118] sm:$0xff] }
  0xe7   :  { %4387 = vmatpush3.bf16.msra.mxu1 %v4386_v56  ;;  %2212 = vmatprep.mubr.f32.mxu1 %v973_v3  ;;  %v4394_v18 = vpack.c.bf16 %v519_v11, %v518_v9  ;;  %v4374_v56 = vpack.c.bf16 %v493_v46, %v492_v45  ;;  %v4378_v9 = vpack.c.bf16 %v495_v59, %v494_v58  ;;  %v548_v45 = vld [vmem:[%s7418_s1 + $0x1010] sm:$0xff]  ;;  %v549_v46 = vld [vmem:[%s7418_s1 + $0x1018] sm:$0xff]  ;;  %v598_v55 = vld [vmem:[%s7418_s1 + $0x11a0] sm:$0xff] }
  0xe8   :  { %4389 = vmatprep.subr.bf16.mxu1 %v4388_v60  ;;  %v526_v60 = vld [vmem:[%s7418_s1 + $0xf60] sm:$0xff]  ;;  %v4424_v59 = vpack.c.bf16 %v567_v53, %v566_v50 }
  0xe9   :  { %4359 = vmatpush3.bf16.msra.mxu0 %v4358_v4  ;;  %v4410_v13 = vpack.c.bf16 %v527_v63, %v526_v60  ;;  %v550_v58 = vld [vmem:[%s7418_s1 + $0x1020] sm:$0xff]  ;;  %v551_v60 = vld [vmem:[%s7418_s1 + $0x1028] sm:$0xff] }
  0xea   :  { %4361 = vmatprep.subr.bf16.mxu0 %v4360_v6  ;;  %v545_v6 = vld [vmem:[%s7418_s1 + $0xff8] sm:$0xff] }
  0xeb   :  { %4391 = vmatpush3.bf16.msra.mxu1 %v4390_v5  ;;  %v544_v5 = vld [vmem:[%s7418_s1 + $0xff0] sm:$0xff] }
  0xec   :  { %4393 = vmatprep.subr.bf16.mxu1 %v4392_v12  ;;  %v29_v12 = vld [vmem:[%s7417_s0 + $0x40] sm:$0xff] }
  0xed   :  { %4363 = vmatpush3.bf16.msra.mxu0 %v4362_v17  ;;  %v528_v17 = vld [vmem:[%s7418_s1 + $0xf70] sm:$0xff]  ;;  %v974_v25 = vcombine.high %v29_v12, %v29_v12  ;;  %v6481_v52 = vrot.slane %v29_v12, %v4940_v10 }
  0xee   :  { %4365 = vmatprep.subr.bf16.mxu0 %v4364_v19  ;;  %v4412_v19 = vpack.c.bf16 %v545_v6, %v544_v5  ;;  %v4414_v28 = vpack.c.bf16 %v529_v20, %v528_v17 }
  0xef   :  { %4395 = vmatpush3.bf16.msra.mxu1 %v4394_v18  ;;  %v6490_v39 = vrot.slane %v974_v25, %v4940_v10  ;;  %v989_v54 = vcombine.high %v6481_v52, %v6481_v52 }
  0xf0   :  { %4397 = vmatprep.subr.bf16.mxu1 %v4396_v23  ;;  %v594_v23 = vld [vmem:[%s7418_s1 + $0x1180] sm:$0xff] }
  0xf1   :  { %4367 = vmatpush3.bf16.msra.mxu0 %v4366_v29  ;;  %v4416_v29 = vpack.c.bf16 %v563_v22, %v562_v21  ;;  %v4448_v43 = vpack.c.bf16 %v595_v24, %v594_v23 }
  0xf2   :  { %4369 = vmatprep.subr.bf16.mxu0 %v4368_v30  ;;  %v547_v30 = vld [vmem:[%s7418_s1 + $0x1008] sm:$0xff] }
  0xf3   :  { %4399 = vmatpush3.bf16.msra.mxu1 %v4398_v31  ;;  %v546_v31 = vld [vmem:[%s7418_s1 + $0x1000] sm:$0xff] }
  0xf4   :  { %4401 = vmatprep.subr.bf16.mxu1 %v4400_v35  ;;  %v564_v35 = vld [vmem:[%s7418_s1 + $0x1090] sm:$0xff] }
  0xf5   :  { %4371 = vmatpush3.bf16.msra.mxu0 %v4370_v40  ;;  %v4418_v40 = vpack.c.bf16 %v547_v30, %v546_v31 }
  0xf6   :  { %4373 = vmatprep.subr.bf16.mxu0 %v4372_v44  ;;  %v4420_v44 = vpack.c.bf16 %v565_v36, %v564_v35 }
  0xf7   :  { %4403 = vmatpush3.bf16.msra.mxu1 %v4402_v42  ;;  %v2992_v61 = vpop.f32.mrb[0].mxu0  ;;  %v4450_v42 = vpack.c.bf16 %v579_v34, %v578_v33 }
  0xf8   :  { %4405 = vmatprep.subr.bf16.mxu1 %v4404_v48  ;;  %v2993_v3 = vpop.f32.mrb[1].mxu0  ;;  %v4452_v48 = vpack.c.bf16 %v597_v38, %v596_v37 }
  0xf9   :  { %v3027_v4 = vpop.f32.mrb[0].mxu1  ;;  %v2994_v8 = vadd.f32 %v2993_v3, %v2992_v61  ;;  %4375 = vmatpush3.bf16.msra.mxu0 %v4374_v56  ;;  %v599_v56 = vld [vmem:[%s7418_s1 + $0x11a8] sm:$0xff]  ;;  %v582_v61 = vld [vmem:[%s7418_s1 + $0x1120] sm:$0xff] }
  0xfa   :  { %v3028_v7 = vpop.f32.mrb[1].mxu1  ;;  %4377 = vmatprep.subr.bf16.mxu0 %v4376_v41  ;;  %v4422_v41 = vpack.c.bf16 %v549_v46, %v548_v45 }
  0xfb   :  { %v3029_v11 = vadd.f32 %v3028_v7, %v3027_v4  ;;  %4407 = vmatpush3.bf16.msra.mxu1 %v4406_v57  ;;  %v1165_v18 = vadd.f32 %v2994_v8, %v2957_v2  ;;  %v990_v57 = vcombine.high %v6490_v39, %v6490_v39 }
  0xfc   :  { %4409 = vmatprep.subr.bf16.mxu1 %v4408_v62 }
  0xfd   :  { %v6460_v26 = vadd.f32 %v3029_v11, %v1165_v18  ;;  %4379 = vmatpush3.bf16.msra.mxu0 %v4378_v9 }
  0xfe   :  { %4381 = vmatprep.subr.bf16.mxu0 %v4380_v14 }
  0xff   :  { %4411 = vmatpush3.bf16.msra.mxu1 %v4410_v13 }
 0x100   :  { %4413 = vmatprep.subr.bf16.mxu1 %v4412_v19 }
 0x101   :  { %4383 = vmatpush3.bf16.msra.mxu0 %v4382_v27 }
 0x102   :  { %4417 = vmatprep.subr.bf16.mxu0 %v4416_v29 }
 0x103   :  { %4415 = vmatpush3.bf16.msra.mxu1 %v4414_v28 }
 0x104   :  { %4449 = vmatprep.subr.bf16.mxu1 %v4448_v43  ;;  %2143 = vmatmul.mubr.f32.vlgmr.msra.gmra.mrb[14].mxu0 %v6269_v51  ;;  %v4454_v51 = vpack.c.bf16 %v581_v49, %v580_v47 }
 0x105   :  { %4419 = vmatpush3.bf16.msra.mxu0 %v4418_v40 }
 0x106   :  { %2213 = vmatmul.mubr.f32.vlgmr.msra.gmra.mrb[14].mxu1 %v6278_v32  ;;  %4421 = vmatprep.subr.bf16.mxu0 %v4420_v44 }
 0x107   :  { %4451 = vmatpush3.bf16.msra.mxu1 %v4450_v42 }
 0x108   :  { %10 = vsyncpa [#allocation3], 0  ;;  %4453 = vmatprep.subr.bf16.mxu1 %v4452_v48  ;;  %v4456_v32 = vpack.c.bf16 %v599_v56, %v598_v55  ;;  %v583_v62 = vld [vmem:[%s7418_s1 + $0x1128] sm:$0xff]  ;;  %v568_v63 = vld [vmem:[%s7418_s1 + $0x10b0] sm:$0xff]  ;;  %2282 = vmatprep.mubr.f32.mxu0 %v989_v54  ;;  %v4426_v3 = vpack.c.bf16 %v551_v60, %v550_v58  ;;  %vm4763_vm0 = vmmov 0   ;;  %s4765_s20 = smov [#allocation2]  }
 0x109   :  { %v569_v0 = vld [vmem:[%s7418_s1 + $0x10b8] sm:$0xff]  ;;  %v600_v1 = vld [vmem:[%s7418_s1 + $0x11b0] sm:$0xff]  ;;  %2352 = vmatprep.mubr.f32.mxu1 %v990_v57  ;;  %4423 = vmatpush3.bf16.msra.mxu0 %v4422_v41  ;;  %v4458_v4 = vpack.c.bf16 %v583_v62, %v582_v61  ;;  %v570_v11 = vld [vmem:[%s7418_s1 + $0x10c0] sm:$0xff]  ;;  %s2949_s21 = sshll.u32 %s4765_s20, 4  ;;  %s2950_s21 = int_to_ptr.vmem [resolvable:$true] %s2949_s21 }
 0x10a   :  { %v601_v2 = vld [vmem:[%s7418_s1 + $0x11b8] sm:$0xff]  ;;  %4425 = vmatprep.subr.bf16.mxu0 %v4424_v59  ;;  %v4428_v5 = vpack.c.bf16 %v569_v0, %v568_v63  ;;  %v552_v6 = vld [vmem:[%s7418_s1 + $0x1030] sm:$0xff]  ;;  %v571_v13 = vld [vmem:[%s7418_s1 + $0x10c8] sm:$0xff]  ;;  %s4737_s22 = scalar_lea.vmem %s2950_s21, 32  ;;  %p4742_p1 = scmp.lt.s32.totalorder %s2950_s21, %s2950_s21 }
 0x10b   :  { %4455 = vmatpush3.bf16.msra.mxu1 %v4454_v51  ;;  %v553_v8 = vld [vmem:[%s7418_s1 + $0x1038] sm:$0xff]  ;;  %v584_v7 = vld [vmem:[%s7418_s1 + $0x1130] sm:$0xff]  ;;  %v4460_v9 = vpack.c.bf16 %v601_v2, %v600_v1  ;;  %v602_v14 = vld [vmem:[%s7418_s1 + $0x11c0] sm:$0xff]  ;;  %v4432_v18 = vpack.c.bf16 %v571_v13, %v570_v11  ;;  %p4738_p0 = scmp.ne.s32.totalorder %s2950_s21, %s4737_s22  ;;  %p4743_p2 = scmp.lt.s32.totalorder %s4737_s22, %s4737_s22 }
 0x10c   :  { %4457 = vmatprep.subr.bf16.mxu1 %v4456_v32  ;;  %v585_v12 = vld [vmem:[%s7418_s1 + $0x1138] sm:$0xff]  ;;  %v603_v15 = vld [vmem:[%s7418_s1 + $0x11c8] sm:$0xff]  ;;  %v4430_v16 = vpack.c.bf16 %v553_v8, %v552_v6  ;;  %v554_v19 = vld [vmem:[%s7418_s1 + $0x1040] sm:$0xff] }
 0x10d   :  { %4427 = vmatpush3.bf16.msra.mxu0 %v4426_v3  ;;  %v4462_v17 = vpack.c.bf16 %v585_v12, %v584_v7  ;;  %v555_v20 = vld [vmem:[%s7418_s1 + $0x1048] sm:$0xff]  ;;  %v586_v21 = vld [vmem:[%s7418_s1 + $0x1140] sm:$0xff]  ;;  %v4464_v22 = vpack.c.bf16 %v603_v15, %v602_v14  ;;  %v572_v24 = vld [vmem:[%s7418_s1 + $0x10d0] sm:$0xff]  ;;  %p4744_p3 = por %p4743_p2, %p4742_p1 }
 0x10e   :  { %4429 = vmatprep.subr.bf16.mxu0 %v4428_v5  ;;  %v587_v23 = vld [vmem:[%s7418_s1 + $0x1148] sm:$0xff]  ;;  %v573_v25 = vld [vmem:[%s7418_s1 + $0x10d8] sm:$0xff]  ;;  %v604_v27 = vld [vmem:[%s7418_s1 + $0x11d0] sm:$0xff]  ;;  %v4434_v29 = vpack.c.bf16 %v555_v20, %v554_v19 }
 0x10f   :  { %4459 = vmatpush3.bf16.msra.mxu1 %v4458_v4  ;;  %v605_v28 = vld [vmem:[%s7418_s1 + $0x11d8] sm:$0xff]  ;;  %v4466_v31 = vpack.c.bf16 %v587_v23, %v586_v21  ;;  %v4436_v30 = vpack.c.bf16 %v573_v25, %v572_v24  ;;  %v556_v33 = vld [vmem:[%s7418_s1 + $0x1050] sm:$0xff]  ;;  %v574_v37 = vld [vmem:[%s7418_s1 + $0x10e0] sm:$0xff]  ;;  %p4745_p4 = pnand %p4744_p3, %p4738_p0 }
 0x110   :  { %4461 = vmatprep.subr.bf16.mxu1 %v4460_v9  ;;  %v557_v43 = vld [vmem:[%s7418_s1 + $0x1058] sm:$0xff]  ;;  %v588_v34 = vld [vmem:[%s7418_s1 + $0x1150] sm:$0xff]  ;;  %v4468_v35 = vpack.c.bf16 %v605_v28, %v604_v27  ;;  %v575_v38 = vld [vmem:[%s7418_s1 + $0x10e8] sm:$0xff] }
 0x111   :  { %4431 = vmatpush3.bf16.msra.mxu0 %v4430_v16  ;;  %v589_v36 = vld [vmem:[%s7418_s1 + $0x1158] sm:$0xff]  ;;  %v606_v40 = vld [vmem:[%s7418_s1 + $0x11e0] sm:$0xff]  ;;  %v607_v42 = vld [vmem:[%s7418_s1 + $0x11e8] sm:$0xff]  ;;  %v4438_v44 = vpack.c.bf16 %v557_v43, %v556_v33  ;;  %v4440_v46 = vpack.c.bf16 %v575_v38, %v574_v37 }
 0x112   :  { %4433 = vmatprep.subr.bf16.mxu0 %v4432_v18  ;;  %v4470_v45 = vpack.c.bf16 %v589_v36, %v588_v34  ;;  %v558_v47 = vld [vmem:[%s7418_s1 + $0x1060] sm:$0xff]  ;;  %v559_v48 = vld [vmem:[%s7418_s1 + $0x1068] sm:$0xff]  ;;  %v4472_v53 = vpack.c.bf16 %v607_v42, %v606_v40  ;;  %v576_v55 = vld [vmem:[%s7418_s1 + $0x10f0] sm:$0xff] }
 0x113   :  { %4463 = vmatpush3.bf16.msra.mxu1 %v4462_v17  ;;  %v590_v49 = vld [vmem:[%s7418_s1 + $0x1160] sm:$0xff]  ;;  %v591_v54 = vld [vmem:[%s7418_s1 + $0x1168] sm:$0xff]  ;;  %v577_v56 = vld [vmem:[%s7418_s1 + $0x10f8] sm:$0xff]  ;;  %v4442_v61 = vpack.c.bf16 %v559_v48, %v558_v47 }
 0x114   :  { %4465 = vmatprep.subr.bf16.mxu1 %v4464_v22  ;;  %v608_v58 = vld [vmem:[%s7418_s1 + $0x11f0] sm:$0xff]  ;;  %v609_v51 = vld [vmem:[%s7418_s1 + $0x11f8] sm:$0xff]  ;;  %v30_v32 = vld [vmem:[%s7417_s0 + $0x48] sm:$0xff]  ;;  %v4474_v63 = vpack.c.bf16 %v591_v54, %v590_v49  ;;  %v4444_v0 = vpack.c.bf16 %v577_v56, %v576_v55 }
 0x115   :  { %4435 = vmatpush3.bf16.msra.mxu0 %v4434_v29  ;;  %v560_v1 = vld [vmem:[%s7418_s1 + $0x1070] sm:$0xff]  ;;  %v561_v2 = vld [vmem:[%s7418_s1 + $0x1078] sm:$0xff]  ;;  %v4476_v5 = vpack.c.bf16 %v609_v51, %v608_v58  ;;  %v626_v8 = vld [vmem:[%s7418_s1 + $0x1280] sm:$0xff]  ;;  %v991_v12 = vcombine.high %v30_v32, %v30_v32  ;;  %v6691_v23 = vrot.slane %v30_v32, %v4940_v10 }
 0x116   :  { %4437 = vmatprep.subr.bf16.mxu0 %v4436_v30  ;;  %v592_v3 = vld [vmem:[%s7418_s1 + $0x1170] sm:$0xff]  ;;  %v593_v6 = vld [vmem:[%s7418_s1 + $0x1178] sm:$0xff]  ;;  %v627_v7 = vld [vmem:[%s7418_s1 + $0x1288] sm:$0xff]  ;;  %v4446_v13 = vpack.c.bf16 %v561_v2, %v560_v1 }
 0x117   :  { %4467 = vmatpush3.bf16.msra.mxu1 %v4466_v31  ;;  %v3062_v50 = vpop.f32.mrb[2].mxu0  ;;  %v658_v9 = vld [vmem:[%s7418_s1 + $0x1380] sm:$0xff]  ;;  %v4478_v14 = vpack.c.bf16 %v593_v6, %v592_v3  ;;  %v4480_v15 = vpack.c.bf16 %v627_v7, %v626_v8  ;;  %v611_v17 = vld [vmem:[%s7418_s1 + $0x1208] sm:$0xff]  ;;  %v628_v21 = vld [vmem:[%s7418_s1 + $0x1290] sm:$0xff]  ;;  %v6700_v27 = vrot.slane %v991_v12, %v4940_v10  ;;  %v1006_v38 = vcombine.high %v6691_v23, %v6691_v23 }
 0x118   :  { %4469 = vmatprep.subr.bf16.mxu1 %v4468_v35  ;;  %v3063_v57 = vpop.f32.mrb[3].mxu0  ;;  %v610_v16 = vld [vmem:[%s7418_s1 + $0x1200] sm:$0xff]  ;;  %v643_v20 = vld [vmem:[%s7418_s1 + $0x1308] sm:$0xff]  ;;  %v629_v22 = vld [vmem:[%s7418_s1 + $0x1298] sm:$0xff] }
 0x119   :  { %v3097_v41 = vpop.f32.mrb[2].mxu1  ;;  %v3064_v59 = vadd.f32 %v3063_v57, %v3062_v50  ;;  %4439 = vmatpush3.bf16.msra.mxu0 %v4438_v44  ;;  %v642_v18 = vld [vmem:[%s7418_s1 + $0x1300] sm:$0xff]  ;;  %v660_v24 = vld [vmem:[%s7418_s1 + $0x1390] sm:$0xff]  ;;  %v661_v25 = vld [vmem:[%s7418_s1 + $0x1398] sm:$0xff]  ;;  %v4482_v28 = vpack.c.bf16 %v611_v17, %v610_v16  ;;  %v4484_v31 = vpack.c.bf16 %v629_v22, %v628_v21  ;;  %v1007_v44 = vcombine.high %v6700_v27, %v6700_v27 }
 0x11a   :  { %v3098_v60 = vpop.f32.mrb[3].mxu1  ;;  %4441 = vmatprep.subr.bf16.mxu0 %v4440_v46  ;;  %v4514_v29 = vpack.c.bf16 %v643_v20, %v642_v18  ;;  %v612_v30 = vld [vmem:[%s7418_s1 + $0x1210] sm:$0xff]  ;;  %v613_v33 = vld [vmem:[%s7418_s1 + $0x1218] sm:$0xff]  ;;  %v4516_v34 = vpack.c.bf16 %v661_v25, %v660_v24  ;;  %v630_v36 = vld [vmem:[%s7418_s1 + $0x12a0] sm:$0xff] }
 0x11b   :  { %v3099_v62 = vadd.f32 %v3098_v60, %v3097_v41  ;;  %4471 = vmatpush3.bf16.msra.mxu1 %v4470_v45  ;;  %v1305_v4 = vadd.f32 %v3064_v59, %v6460_v26  ;;  %v659_v26 = vld [vmem:[%s7418_s1 + $0x1388] sm:$0xff]  ;;  %v644_v43 = vld [vmem:[%s7418_s1 + $0x1310] sm:$0xff]  ;;  %v645_v35 = vld [vmem:[%s7418_s1 + $0x1318] sm:$0xff]  ;;  %v4486_v45 = vpack.c.bf16 %v613_v33, %v612_v30 }
 0x11c   :  { %4473 = vmatprep.subr.bf16.mxu1 %v4472_v53  ;;  %v4512_v19 = vpack.c.bf16 %v659_v26, %v658_v9  ;;  %v631_v37 = vld [vmem:[%s7418_s1 + $0x12a8] sm:$0xff]  ;;  %v662_v40 = vld [vmem:[%s7418_s1 + $0x13a0] sm:$0xff]  ;;  %v4518_v46 = vpack.c.bf16 %v645_v35, %v644_v43  ;;  %v632_v53 = vld [vmem:[%s7418_s1 + $0x12b0] sm:$0xff] }
 0x11d   :  { %v6670_v11 = vadd.f32 %v3099_v62, %v1305_v4  ;;  %4443 = vmatpush3.bf16.msra.mxu0 %v4442_v61  ;;  %v663_v42 = vld [vmem:[%s7418_s1 + $0x13a8] sm:$0xff]  ;;  %v4488_v47 = vpack.c.bf16 %v631_v37, %v630_v36  ;;  %v646_v49 = vld [vmem:[%s7418_s1 + $0x1320] sm:$0xff]  ;;  %v633_v54 = vld [vmem:[%s7418_s1 + $0x12b8] sm:$0xff] }
 0x11e   :  { %4445 = vmatprep.subr.bf16.mxu0 %v4444_v0  ;;  %v615_v48 = vld [vmem:[%s7418_s1 + $0x1228] sm:$0xff]  ;;  %v4520_v50 = vpack.c.bf16 %v663_v42, %v662_v40  ;;  %v664_v55 = vld [vmem:[%s7418_s1 + $0x13b0] sm:$0xff]  ;;  %v665_v56 = vld [vmem:[%s7418_s1 + $0x13b8] sm:$0xff]  ;;  %v4492_v58 = vpack.c.bf16 %v633_v54, %v632_v53 }
 0x11f   :  { %4475 = vmatpush3.bf16.msra.mxu1 %v4474_v63  ;;  %v616_v51 = vld [vmem:[%s7418_s1 + $0x1230] sm:$0xff]  ;;  %v617_v59 = vld [vmem:[%s7418_s1 + $0x1238] sm:$0xff]  ;;  %v4524_v61 = vpack.c.bf16 %v665_v56, %v664_v55  ;;  %v634_v62 = vld [vmem:[%s7418_s1 + $0x12c0] sm:$0xff] }
 0x120   :  { %4477 = vmatprep.subr.bf16.mxu1 %v4476_v5  ;;  %v648_v60 = vld [vmem:[%s7418_s1 + $0x1330] sm:$0xff]  ;;  %v649_v32 = vld [vmem:[%s7418_s1 + $0x1338] sm:$0xff]  ;;  %v635_v63 = vld [vmem:[%s7418_s1 + $0x12c8] sm:$0xff]  ;;  %v4494_v2 = vpack.c.bf16 %v617_v59, %v616_v51 }
 0x121   :  { %4447 = vmatpush3.bf16.msra.mxu0 %v4446_v13  ;;  %v666_v0 = vld [vmem:[%s7418_s1 + $0x13c0] sm:$0xff]  ;;  %v667_v1 = vld [vmem:[%s7418_s1 + $0x13c8] sm:$0xff]  ;;  %v4526_v3 = vpack.c.bf16 %v649_v32, %v648_v60  ;;  %v4496_v4 = vpack.c.bf16 %v635_v63, %v634_v62  ;;  %v636_v26 = vld [vmem:[%s7418_s1 + $0x12d0] sm:$0xff] }
 0x122   :  { %4481 = vmatprep.subr.bf16.mxu0 %v4480_v15  ;;  %v618_v5 = vld [vmem:[%s7418_s1 + $0x1240] sm:$0xff]  ;;  %v619_v6 = vld [vmem:[%s7418_s1 + $0x1248] sm:$0xff]  ;;  %v4528_v7 = vpack.c.bf16 %v667_v1, %v666_v0  ;;  %v637_v12 = vld [vmem:[%s7418_s1 + $0x12d8] sm:$0xff] }
 0x123   :  { %4479 = vmatpush3.bf16.msra.mxu1 %v4478_v14  ;;  %v650_v8 = vld [vmem:[%s7418_s1 + $0x1340] sm:$0xff]  ;;  %v651_v9 = vld [vmem:[%s7418_s1 + $0x1348] sm:$0xff]  ;;  %v668_v13 = vld [vmem:[%s7418_s1 + $0x13d0] sm:$0xff]  ;;  %v4498_v15 = vpack.c.bf16 %v619_v6, %v618_v5  ;;  %v4500_v17 = vpack.c.bf16 %v637_v12, %v636_v26 }
 0x124   :  { %4513 = vmatprep.subr.bf16.mxu1 %v4512_v19  ;;  %2283 = vmatmul.mubr.f32.vlgmr.msra.gmra.mrb[16].mxu0 %v6481_v52  ;;  %v614_v52 = vld [vmem:[%s7418_s1 + $0x1220] sm:$0xff]  ;;  %v669_v14 = vld [vmem:[%s7418_s1 + $0x13d8] sm:$0xff]  ;;  %v4530_v16 = vpack.c.bf16 %v651_v9, %v650_v8  ;;  %v620_v18 = vld [vmem:[%s7418_s1 + $0x1250] sm:$0xff] }
 0x125   :  { %4483 = vmatpush3.bf16.msra.mxu0 %v4482_v28  ;;  %2422 = vmatprep.mubr.f32.mxu0 %v1006_v38  ;;  %v4490_v57 = vpack.c.bf16 %v615_v48, %v614_v52  ;;  %v621_v19 = vld [vmem:[%s7418_s1 + $0x1258] sm:$0xff]  ;;  %v652_v20 = vld [vmem:[%s7418_s1 + $0x1350] sm:$0xff]  ;;  %v4532_v21 = vpack.c.bf16 %v669_v14, %v668_v13  ;;  %v638_v24 = vld [vmem:[%s7418_s1 + $0x12e0] sm:$0xff] }
 0x126   :  { %2353 = vmatmul.mubr.f32.vlgmr.msra.gmra.mrb[16].mxu1 %v6490_v39  ;;  %4485 = vmatprep.subr.bf16.mxu0 %v4484_v31  ;;  %v647_v39 = vld [vmem:[%s7418_s1 + $0x1328] sm:$0xff]  ;;  %v653_v22 = vld [vmem:[%s7418_s1 + $0x1358] sm:$0xff]  ;;  %v670_v28 = vld [vmem:[%s7418_s1 + $0x13e0] sm:$0xff]  ;;  %v4502_v31 = vpack.c.bf16 %v621_v19, %v620_v18 }
 0x127   :  { %4515 = vmatpush3.bf16.msra.mxu1 %v4514_v29  ;;  %2492 = vmatprep.mubr.f32.mxu1 %v1007_v44  ;;  %v4522_v41 = vpack.c.bf16 %v647_v39, %v646_v49  ;;  %v639_v25 = vld [vmem:[%s7418_s1 + $0x12e8] sm:$0xff]  ;;  %v4534_v30 = vpack.c.bf16 %v653_v22, %v652_v20  ;;  %v622_v43 = vld [vmem:[%s7418_s1 + $0x1260] sm:$0xff]  ;;  %v640_v40 = vld [vmem:[%s7418_s1 + $0x12f0] sm:$0xff] }
 0x128   :  { %4517 = vmatprep.subr.bf16.mxu1 %v4516_v34  ;;  %v671_v29 = vld [vmem:[%s7418_s1 + $0x13e8] sm:$0xff]  ;;  %v4504_v33 = vpack.c.bf16 %v639_v25, %v638_v24  ;;  %v654_v35 = vld [vmem:[%s7418_s1 + $0x1360] sm:$0xff]  ;;  %v641_v42 = vld [vmem:[%s7418_s1 + $0x12f8] sm:$0xff] }
 0x129   :  { %4487 = vmatpush3.bf16.msra.mxu0 %v4486_v45  ;;  %v623_v34 = vld [vmem:[%s7418_s1 + $0x1268] sm:$0xff]  ;;  %v4536_v37 = vpack.c.bf16 %v671_v29, %v670_v28  ;;  %v4508_v54 = vpack.c.bf16 %v641_v42, %v640_v40  ;;  %v624_v55 = vld [vmem:[%s7418_s1 + $0x1270] sm:$0xff]  ;;  %v625_v56 = vld [vmem:[%s7418_s1 + $0x1278] sm:$0xff] }
 0x12a   :  { %4489 = vmatprep.subr.bf16.mxu0 %v4488_v47  ;;  %v655_v38 = vld [vmem:[%s7418_s1 + $0x1368] sm:$0xff]  ;;  %v673_v47 = vld [vmem:[%s7418_s1 + $0x13f8] sm:$0xff]  ;;  %v4506_v49 = vpack.c.bf16 %v623_v34, %v622_v43  ;;  %v690_v59 = vld [vmem:[%s7418_s1 + $0x1480] sm:$0xff]  ;;  %v4510_v63 = vpack.c.bf16 %v625_v56, %v624_v55 }
 0x12b   :  { %4519 = vmatpush3.bf16.msra.mxu1 %v4518_v46  ;;  %v672_v46 = vld [vmem:[%s7418_s1 + $0x13f0] sm:$0xff]  ;;  %v4538_v53 = vpack.c.bf16 %v655_v38, %v654_v35  ;;  %v657_v51 = vld [vmem:[%s7418_s1 + $0x1378] sm:$0xff]  ;;  %v691_v60 = vld [vmem:[%s7418_s1 + $0x1488] sm:$0xff] }
 0x12c   :  { %4521 = vmatprep.subr.bf16.mxu1 %v4520_v50  ;;  %v31_v50 = vld [vmem:[%s7417_s0 + $0x50] sm:$0xff]  ;;  %v4544_v1 = vpack.c.bf16 %v691_v60, %v690_v59  ;;  %v707_v6 = vld [vmem:[%s7418_s1 + $0x1508] sm:$0xff]  ;;  %v725_v12 = vld [vmem:[%s7418_s1 + $0x1598] sm:$0xff] }
 0x12d   :  { %4491 = vmatpush3.bf16.msra.mxu0 %v4490_v57  ;;  %v656_v57 = vld [vmem:[%s7418_s1 + $0x1370] sm:$0xff]  ;;  %v1008_v32 = vcombine.high %v31_v50, %v31_v50  ;;  %v6901_v9 = vrot.slane %v31_v50, %v4940_v10  ;;  %v677_v18 = vld [vmem:[%s7418_s1 + $0x1418] sm:$0xff]  ;;  %v694_v22 = vld [vmem:[%s7418_s1 + $0x14a0] sm:$0xff] }
 0x12e   :  { %4493 = vmatprep.subr.bf16.mxu0 %v4492_v58  ;;  %v4540_v58 = vpack.c.bf16 %v673_v47, %v672_v46  ;;  %v4542_v0 = vpack.c.bf16 %v657_v51, %v656_v57  ;;  %v692_v8 = vld [vmem:[%s7418_s1 + $0x1490] sm:$0xff]  ;;  %v695_v24 = vld [vmem:[%s7418_s1 + $0x14a8] sm:$0xff]  ;;  %v726_v28 = vld [vmem:[%s7418_s1 + $0x15a0] sm:$0xff] }
 0x12f   :  { %4523 = vmatpush3.bf16.msra.mxu1 %v4522_v41  ;;  %v724_v26 = vld [vmem:[%s7418_s1 + $0x1590] sm:$0xff]  ;;  %v6910_v13 = vrot.slane %v1008_v32, %v4940_v10  ;;  %v1023_v25 = vcombine.high %v6901_v9, %v6901_v9  ;;  %v727_v29 = vld [vmem:[%s7418_s1 + $0x15a8] sm:$0xff]  ;;  %v4552_v43 = vpack.c.bf16 %v695_v24, %v694_v22  ;;  %v710_v35 = vld [vmem:[%s7418_s1 + $0x1520] sm:$0xff] }
 0x130   :  { %4525 = vmatprep.subr.bf16.mxu1 %v4524_v61  ;;  %v722_v61 = vld [vmem:[%s7418_s1 + $0x1580] sm:$0xff]  ;;  %v708_v19 = vld [vmem:[%s7418_s1 + $0x1510] sm:$0xff]  ;;  %v4580_v20 = vpack.c.bf16 %v725_v12, %v724_v26  ;;  %v679_v34 = vld [vmem:[%s7418_s1 + $0x1428] sm:$0xff] }
 0x131   :  { %4495 = vmatpush3.bf16.msra.mxu0 %v4494_v2  ;;  %v674_v2 = vld [vmem:[%s7418_s1 + $0x1400] sm:$0xff]  ;;  %v697_v38 = vld [vmem:[%s7418_s1 + $0x14b8] sm:$0xff]  ;;  %v728_v40 = vld [vmem:[%s7418_s1 + $0x15b0] sm:$0xff] }
 0x132   :  { %4497 = vmatprep.subr.bf16.mxu0 %v4496_v4  ;;  %v706_v4 = vld [vmem:[%s7418_s1 + $0x1500] sm:$0xff]  ;;  %v729_v42 = vld [vmem:[%s7418_s1 + $0x15b8] sm:$0xff]  ;;  %v680_v47 = vld [vmem:[%s7418_s1 + $0x1430] sm:$0xff] }
 0x133   :  { %4527 = vmatpush3.bf16.msra.mxu1 %v4526_v3  ;;  %v675_v3 = vld [vmem:[%s7418_s1 + $0x1408] sm:$0xff]  ;;  %v713_v50 = vld [vmem:[%s7418_s1 + $0x1538] sm:$0xff]  ;;  %v714_v59 = vld [vmem:[%s7418_s1 + $0x1540] sm:$0xff] }
 0x134   :  { %4529 = vmatprep.subr.bf16.mxu1 %v4528_v7  ;;  %v693_v7 = vld [vmem:[%s7418_s1 + $0x1498] sm:$0xff]  ;;  %v4546_v14 = vpack.c.bf16 %v675_v3, %v674_v2  ;;  %v731_v55 = vld [vmem:[%s7418_s1 + $0x15c8] sm:$0xff]  ;;  %v702_v26 = vld [vmem:[%s7418_s1 + $0x14e0] sm:$0xff] }
 0x135   :  { %4499 = vmatpush3.bf16.msra.mxu0 %v4498_v15  ;;  %v4578_v15 = vpack.c.bf16 %v707_v6, %v706_v4  ;;  %v683_v51 = vld [vmem:[%s7418_s1 + $0x1448] sm:$0xff]  ;;  %v701_v32 = vld [vmem:[%s7418_s1 + $0x14d8] sm:$0xff]  ;;  %v684_v4 = vld [vmem:[%s7418_s1 + $0x1450] sm:$0xff] }
 0x136   :  { %4501 = vmatprep.subr.bf16.mxu0 %v4500_v17  ;;  %v676_v17 = vld [vmem:[%s7418_s1 + $0x1410] sm:$0xff]  ;;  %v703_v12 = vld [vmem:[%s7418_s1 + $0x14e8] sm:$0xff] }
 0x137   :  { %4531 = vmatpush3.bf16.msra.mxu1 %v4530_v16  ;;  %v3132_v36 = vpop.f32.mrb[4].mxu0  ;;  %v4548_v16 = vpack.c.bf16 %v693_v7, %v692_v8  ;;  %v716_v6 = vld [vmem:[%s7418_s1 + $0x1550] sm:$0xff]  ;;  %v717_v7 = vld [vmem:[%s7418_s1 + $0x1558] sm:$0xff] }
 0x138   :  { %4533 = vmatprep.subr.bf16.mxu1 %v4532_v21  ;;  %v3133_v44 = vpop.f32.mrb[5].mxu0  ;;  %v709_v21 = vld [vmem:[%s7418_s1 + $0x1518] sm:$0xff] }
 0x139   :  { %v3167_v45 = vpop.f32.mrb[4].mxu1  ;;  %v3134_v52 = vadd.f32 %v3133_v44, %v3132_v36  ;;  %4503 = vmatpush3.bf16.msra.mxu0 %v4502_v31  ;;  %v1024_v31 = vcombine.high %v6910_v13, %v6910_v13  ;;  %v4584_v36 = vpack.c.bf16 %v727_v29, %v726_v28  ;;  %v704_v28 = vld [vmem:[%s7418_s1 + $0x14f0] sm:$0xff]  ;;  %v705_v29 = vld [vmem:[%s7418_s1 + $0x14f8] sm:$0xff] }
 0x13a   :  { %v3168_v48 = vpop.f32.mrb[5].mxu1  ;;  %4505 = vmatprep.subr.bf16.mxu0 %v4504_v33  ;;  %v4582_v33 = vpack.c.bf16 %v709_v21, %v708_v19  ;;  %v686_v19 = vld [vmem:[%s7418_s1 + $0x1460] sm:$0xff] }
 0x13b   :  { %v3169_v39 = vadd.f32 %v3168_v48, %v3167_v45  ;;  %4535 = vmatpush3.bf16.msra.mxu1 %v4534_v30  ;;  %v1445_v41 = vadd.f32 %v3134_v52, %v6670_v11  ;;  %v723_v11 = vld [vmem:[%s7418_s1 + $0x1588] sm:$0xff]  ;;  %v4550_v30 = vpack.c.bf16 %v677_v18, %v676_v17  ;;  %v681_v52 = vld [vmem:[%s7418_s1 + $0x1438] sm:$0xff]  ;;  %v712_v48 = vld [vmem:[%s7418_s1 + $0x1530] sm:$0xff]  ;;  %v4598_v17 = vpack.c.bf16 %v717_v7, %v716_v6 }
 0x13c   :  { %4537 = vmatprep.subr.bf16.mxu1 %v4536_v37  ;;  %v4576_v5 = vpack.c.bf16 %v723_v11, %v722_v61  ;;  %v696_v37 = vld [vmem:[%s7418_s1 + $0x14b0] sm:$0xff]  ;;  %v4558_v56 = vpack.c.bf16 %v681_v52, %v680_v47  ;;  %v4590_v57 = vpack.c.bf16 %v713_v50, %v712_v48  ;;  %v715_v61 = vld [vmem:[%s7418_s1 + $0x1548] sm:$0xff]  ;;  %v4568_v18 = vpack.c.bf16 %v703_v12, %v702_v26  ;;  %v718_v21 = vld [vmem:[%s7418_s1 + $0x1560] sm:$0xff] }
 0x13d   :  { %v6880_v62 = vadd.f32 %v3169_v39, %v1445_v41  ;;  %4507 = vmatpush3.bf16.msra.mxu0 %v4506_v49  ;;  %v4556_v46 = vpack.c.bf16 %v697_v38, %v696_v37  ;;  %v4588_v49 = vpack.c.bf16 %v729_v42, %v728_v40  ;;  %v698_v39 = vld [vmem:[%s7418_s1 + $0x14c0] sm:$0xff]  ;;  %v700_v11 = vld [vmem:[%s7418_s1 + $0x14d0] sm:$0xff]  ;;  %v4594_v2 = vpack.c.bf16 %v715_v61, %v714_v59  ;;  %v689_v42 = vld [vmem:[%s7418_s1 + $0x1478] sm:$0xff] }
 0x13e   :  { %4509 = vmatprep.subr.bf16.mxu0 %v4508_v54  ;;  %v730_v54 = vld [vmem:[%s7418_s1 + $0x15c0] sm:$0xff]  ;;  %v4564_v3 = vpack.c.bf16 %v701_v32, %v700_v11  ;;  %v4572_v38 = vpack.c.bf16 %v705_v29, %v704_v28  ;;  %v688_v40 = vld [vmem:[%s7418_s1 + $0x1470] sm:$0xff]  ;;  %v721_v47 = vld [vmem:[%s7418_s1 + $0x1578] sm:$0xff] }
 0x13f   :  { %4539 = vmatpush3.bf16.msra.mxu1 %v4538_v53  ;;  %v699_v53 = vld [vmem:[%s7418_s1 + $0x14c8] sm:$0xff]  ;;  %v4592_v60 = vpack.c.bf16 %v731_v55, %v730_v54  ;;  %v754_v52 = vld [vmem:[%s7418_s1 + $0x1680] sm:$0xff]  ;;  %v756_v59 = vld [vmem:[%s7418_s1 + $0x1690] sm:$0xff] }
 0x140   :  { %4541 = vmatprep.subr.bf16.mxu1 %v4540_v58  ;;  %v4560_v41 = vpack.c.bf16 %v699_v53, %v698_v39  ;;  %v682_v58 = vld [vmem:[%s7418_s1 + $0x1440] sm:$0xff]  ;;  %v755_v48 = vld [vmem:[%s7418_s1 + $0x1688] sm:$0xff]  ;;  %v4574_v53 = vpack.c.bf16 %v689_v42, %v688_v40  ;;  %v788_v11 = vld [vmem:[%s7418_s1 + $0x1790] sm:$0xff] }
 0x141   :  { %4511 = vmatpush3.bf16.msra.mxu0 %v4510_v63  ;;  %v732_v63 = vld [vmem:[%s7418_s1 + $0x15d0] sm:$0xff]  ;;  %v4608_v55 = vpack.c.bf16 %v755_v48, %v754_v52  ;;  %v789_v32 = vld [vmem:[%s7418_s1 + $0x1798] sm:$0xff]  ;;  %v759_v7 = vld [vmem:[%s7418_s1 + $0x16a8] sm:$0xff] }
 0x142   :  { %4545 = vmatprep.subr.bf16.mxu0 %v4544_v1  ;;  %v4562_v1 = vpack.c.bf16 %v683_v51, %v682_v58  ;;  %v771_v51 = vld [vmem:[%s7418_s1 + $0x1708] sm:$0xff]  ;;  %v773_v6 = vld [vmem:[%s7418_s1 + $0x1718] sm:$0xff]  ;;  %v790_v12 = vld [vmem:[%s7418_s1 + $0x17a0] sm:$0xff] }
 0x143   :  { %4543 = vmatpush3.bf16.msra.mxu1 %v4542_v0  ;;  %v733_v0 = vld [vmem:[%s7418_s1 + $0x15d8] sm:$0xff]  ;;  %v779_v48 = vld [vmem:[%s7418_s1 + $0x1748] sm:$0xff] }
 0x144   :  { %4577 = vmatprep.subr.bf16.mxu1 %v4576_v5  ;;  %2423 = vmatmul.mubr.f32.vlgmr.msra.gmra.mrb[18].mxu0 %v6691_v23  ;;  %v678_v23 = vld [vmem:[%s7418_s1 + $0x1420] sm:$0xff]  ;;  %v685_v5 = vld [vmem:[%s7418_s1 + $0x1458] sm:$0xff]  ;;  %v4596_v8 = vpack.c.bf16 %v733_v0, %v732_v63 }
 0x145   :  { %4547 = vmatpush3.bf16.msra.mxu0 %v4546_v14  ;;  %2562 = vmatprep.mubr.f32.mxu0 %v1023_v25  ;;  %v4554_v44 = vpack.c.bf16 %v679_v34, %v678_v23  ;;  %v734_v14 = vld [vmem:[%s7418_s1 + $0x15e0] sm:$0xff]  ;;  %v719_v25 = vld [vmem:[%s7418_s1 + $0x1568] sm:$0xff]  ;;  %v793_v28 = vld [vmem:[%s7418_s1 + $0x17b8] sm:$0xff] }
 0x146   :  { %2493 = vmatmul.mubr.f32.vlgmr.msra.gmra.mrb[18].mxu1 %v6700_v27  ;;  %4549 = vmatprep.subr.bf16.mxu0 %v4548_v16  ;;  %v711_v27 = vld [vmem:[%s7418_s1 + $0x1528] sm:$0xff]  ;;  %v4566_v16 = vpack.c.bf16 %v685_v5, %v684_v4  ;;  %v4602_v37 = vpack.c.bf16 %v719_v25, %v718_v21  ;;  %v741_v4 = vld [vmem:[%s7418_s1 + $0x1618] sm:$0xff]  ;;  %v772_v5 = vld [vmem:[%s7418_s1 + $0x1710] sm:$0xff] }
 0x147   :  { %4579 = vmatpush3.bf16.msra.mxu1 %v4578_v15  ;;  %2632 = vmatprep.mubr.f32.mxu1 %v1024_v31  ;;  %v4586_v45 = vpack.c.bf16 %v711_v27, %v710_v35  ;;  %v735_v15 = vld [vmem:[%s7418_s1 + $0x15e8] sm:$0xff]  ;;  %v792_v25 = vld [vmem:[%s7418_s1 + $0x17b0] sm:$0xff] }
 0x148   :  { %4581 = vmatprep.subr.bf16.mxu1 %v4580_v20  ;;  %v687_v20 = vld [vmem:[%s7418_s1 + $0x1468] sm:$0xff]  ;;  %v4600_v24 = vpack.c.bf16 %v735_v15, %v734_v14 }
 0x149   :  { %4551 = vmatpush3.bf16.msra.mxu0 %v4550_v30  ;;  %v4570_v35 = vpack.c.bf16 %v687_v20, %v686_v19  ;;  %v791_v14 = vld [vmem:[%s7418_s1 + $0x17a8] sm:$0xff]  ;;  %v774_v20 = vld [vmem:[%s7418_s1 + $0x1720] sm:$0xff] }
 0x14a   :  { %4553 = vmatprep.subr.bf16.mxu0 %v4552_v43  ;;  %v737_v43 = vld [vmem:[%s7418_s1 + $0x15f8] sm:$0xff]  ;;  %v743_v19 = vld [vmem:[%s7418_s1 + $0x1628] sm:$0xff]  ;;  %v4648_v21 = vpack.c.bf16 %v791_v14, %v790_v12 }
 0x14b   :  { %4583 = vmatpush3.bf16.msra.mxu1 %v4582_v33  ;;  %v736_v33 = vld [vmem:[%s7418_s1 + $0x15f0] sm:$0xff]  ;;  %v769_v12 = vld [vmem:[%s7418_s1 + $0x16f8] sm:$0xff] }
 0x14c   :  { %4585 = vmatprep.subr.bf16.mxu1 %v4584_v36  ;;  %v32_v36 = vld [vmem:[%s7417_s0 + $0x58] sm:$0xff] }
 0x14d   :  { %4555 = vmatpush3.bf16.msra.mxu0 %v4554_v44  ;;  %v720_v44 = vld [vmem:[%s7418_s1 + $0x1570] sm:$0xff]  ;;  %v1025_v50 = vcombine.high %v32_v36, %v32_v36  ;;  %v7111_v61 = vrot.slane %v32_v36, %v4940_v10  ;;  %v762_v36 = vld [vmem:[%s7418_s1 + $0x16c0] sm:$0xff] }
 0x14e   :  { %4557 = vmatprep.subr.bf16.mxu0 %v4556_v46  ;;  %v4604_v46 = vpack.c.bf16 %v737_v43, %v736_v33  ;;  %v4606_v54 = vpack.c.bf16 %v721_v47, %v720_v44  ;;  %v744_v33 = vld [vmem:[%s7418_s1 + $0x1630] sm:$0xff]  ;;  %v745_v43 = vld [vmem:[%s7418_s1 + $0x1638] sm:$0xff]  ;;  %v778_v47 = vld [vmem:[%s7418_s1 + $0x1740] sm:$0xff] }
 0x14f   :  { %4587 = vmatpush3.bf16.msra.mxu1 %v4586_v45  ;;  %v7120_v63 = vrot.slane %v1025_v50, %v4940_v10  ;;  %v4644_v10 = vpack.c.bf16 %v789_v32, %v788_v11  ;;  %v1040_v26 = vcombine.high %v7111_v61, %v7111_v61  ;;  %v4622_v40 = vpack.c.bf16 %v745_v43, %v744_v33  ;;  %v796_v50 = vld [vmem:[%s7418_s1 + $0x17d0] sm:$0xff]  ;;  %v767_v11 = vld [vmem:[%s7418_s1 + $0x16e8] sm:$0xff]  ;;  %v798_v32 = vld [vmem:[%s7418_s1 + $0x17e0] sm:$0xff] }
 0x150   :  { %4589 = vmatprep.subr.bf16.mxu1 %v4588_v49  ;;  %v786_v49 = vld [vmem:[%s7418_s1 + $0x1780] sm:$0xff] }
 0x151   :  { %4559 = vmatpush3.bf16.msra.mxu0 %v4558_v56  ;;  %v738_v56 = vld [vmem:[%s7418_s1 + $0x1600] sm:$0xff]  ;;  %v1041_v15 = vcombine.high %v7120_v63, %v7120_v63 }
 0x152   :  { %4561 = vmatprep.subr.bf16.mxu0 %v4560_v41  ;;  %v770_v41 = vld [vmem:[%s7418_s1 + $0x1700] sm:$0xff] }
 0x153   :  { %4591 = vmatpush3.bf16.msra.mxu1 %v4590_v57  ;;  %v739_v57 = vld [vmem:[%s7418_s1 + $0x1608] sm:$0xff] }
 0x154   :  { %4593 = vmatprep.subr.bf16.mxu1 %v4592_v60  ;;  %v757_v60 = vld [vmem:[%s7418_s1 + $0x1698] sm:$0xff]  ;;  %v4610_v0 = vpack.c.bf16 %v739_v57, %v738_v56  ;;  %v748_v57 = vld [vmem:[%s7418_s1 + $0x1650] sm:$0xff] }
 0x155   :  { %4563 = vmatpush3.bf16.msra.mxu0 %v4562_v1  ;;  %v4642_v1 = vpack.c.bf16 %v771_v51, %v770_v41  ;;  %v749_v41 = vld [vmem:[%s7418_s1 + $0x1658] sm:$0xff] }
 0x156   :  { %4565 = vmatprep.subr.bf16.mxu0 %v4564_v3  ;;  %v740_v3 = vld [vmem:[%s7418_s1 + $0x1610] sm:$0xff] }
 0x157   :  { %4595 = vmatpush3.bf16.msra.mxu1 %v4594_v2  ;;  %v3202_v22 = vpop.f32.mrb[6].mxu0  ;;  %v4612_v2 = vpack.c.bf16 %v757_v60, %v756_v59  ;;  %v781_v59 = vld [vmem:[%s7418_s1 + $0x1758] sm:$0xff]  ;;  %v766_v60 = vld [vmem:[%s7418_s1 + $0x16e0] sm:$0xff] }
 0x158   :  { %4597 = vmatprep.subr.bf16.mxu1 %v4596_v8  ;;  %v3203_v31 = vpop.f32.mrb[7].mxu0  ;;  %v758_v8 = vld [vmem:[%s7418_s1 + $0x16a0] sm:$0xff] }
 0x159   :  { %v3237_v30 = vpop.f32.mrb[6].mxu1  ;;  %v3204_v23 = vadd.f32 %v3203_v31, %v3202_v22  ;;  %4567 = vmatpush3.bf16.msra.mxu0 %v4566_v16  ;;  %v4614_v16 = vpack.c.bf16 %v741_v4, %v740_v3  ;;  %v760_v22 = vld [vmem:[%s7418_s1 + $0x16b0] sm:$0xff]  ;;  %v4632_v3 = vpack.c.bf16 %v767_v11, %v766_v60  ;;  %v750_v4 = vld [vmem:[%s7418_s1 + $0x1660] sm:$0xff]  ;;  %v817_v60 = vld [vmem:[%s7418_s1 + $0x1878] sm:$0xff] }
 0x15a   :  { %v3238_v34 = vpop.f32.mrb[7].mxu1  ;;  %4569 = vmatprep.subr.bf16.mxu0 %v4568_v18  ;;  %v4616_v18 = vpack.c.bf16 %v759_v7, %v758_v8  ;;  %v783_v7 = vld [vmem:[%s7418_s1 + $0x1768] sm:$0xff] }
 0x15b   :  { %v3239_v27 = vadd.f32 %v3238_v34, %v3237_v30  ;;  %4599 = vmatpush3.bf16.msra.mxu1 %v4598_v17  ;;  %v1585_v45 = vadd.f32 %v3204_v23, %v6880_v62  ;;  %v787_v62 = vld [vmem:[%s7418_s1 + $0x1788] sm:$0xff]  ;;  %v4646_v17 = vpack.c.bf16 %v773_v6, %v772_v5  ;;  %v776_v23 = vld [vmem:[%s7418_s1 + $0x1730] sm:$0xff]  ;;  %v4652_v34 = vpack.c.bf16 %v793_v28, %v792_v25 }
 0x15c   :  { %4601 = vmatprep.subr.bf16.mxu1 %v4600_v24  ;;  %v4640_v58 = vpack.c.bf16 %v787_v62, %v786_v49  ;;  %v761_v24 = vld [vmem:[%s7418_s1 + $0x16b8] sm:$0xff]  ;;  %v764_v49 = vld [vmem:[%s7418_s1 + $0x16d0] sm:$0xff]  ;;  %v751_v5 = vld [vmem:[%s7418_s1 + $0x1668] sm:$0xff] }
 0x15d   :  { %v7090_v39 = vadd.f32 %v3239_v27, %v1585_v45  ;;  %4571 = vmatpush3.bf16.msra.mxu0 %v4570_v35  ;;  %v4620_v30 = vpack.c.bf16 %v761_v24, %v760_v22  ;;  %v777_v35 = vld [vmem:[%s7418_s1 + $0x1738] sm:$0xff]  ;;  %v763_v27 = vld [vmem:[%s7418_s1 + $0x16c8] sm:$0xff]  ;;  %v746_v45 = vld [vmem:[%s7418_s1 + $0x1640] sm:$0xff] }
 0x15e   :  { %4573 = vmatprep.subr.bf16.mxu0 %v4572_v38  ;;  %v795_v38 = vld [vmem:[%s7418_s1 + $0x17c8] sm:$0xff]  ;;  %v4654_v42 = vpack.c.bf16 %v777_v35, %v776_v23  ;;  %v4624_v44 = vpack.c.bf16 %v763_v27, %v762_v36  ;;  %v765_v62 = vld [vmem:[%s7418_s1 + $0x16d8] sm:$0xff]  ;;  %v752_v22 = vld [vmem:[%s7418_s1 + $0x1670] sm:$0xff]  ;;  %v4762_v35 = vmov 0.0|0.0  }
 0x15f   :  { %4603 = vmatpush3.bf16.msra.mxu1 %v4602_v37  ;;  %v794_v37 = vld [vmem:[%s7418_s1 + $0x17c0] sm:$0xff]  ;;  %v4628_v56 = vpack.c.bf16 %v765_v62, %v764_v49  ;;  %v753_v24 = vld [vmem:[%s7418_s1 + $0x1678] sm:$0xff]  ;;  %v803_v23 = vld [vmem:[%s7418_s1 + $0x1808] sm:$0xff] }
 0x160   :  { %4605 = vmatprep.subr.bf16.mxu1 %v4604_v46  ;;  %v747_v46 = vld [vmem:[%s7418_s1 + $0x1648] sm:$0xff]  ;;  %v4656_v52 = vpack.c.bf16 %v795_v38, %v794_v37  ;;  %v4638_v33 = vpack.c.bf16 %v753_v24, %v752_v22  ;;  %v804_v36 = vld [vmem:[%s7418_s1 + $0x1810] sm:$0xff]  ;;  %v805_v27 = vld [vmem:[%s7418_s1 + $0x1818] sm:$0xff] }
 0x161   :  { %4575 = vmatpush3.bf16.msra.mxu0 %v4574_v53  ;;  %v797_v53 = vld [vmem:[%s7418_s1 + $0x17d8] sm:$0xff]  ;;  %v4676_v37 = vpack.c.bf16 %v805_v27, %v804_v36  ;;  %v806_v38 = vld [vmem:[%s7418_s1 + $0x1820] sm:$0xff] }
 0x162   :  { %4609 = vmatprep.subr.bf16.mxu0 %v4608_v55  ;;  %v4658_v55 = vpack.c.bf16 %v779_v48, %v778_v47  ;;  %v4660_v51 = vpack.c.bf16 %v797_v53, %v796_v50  ;;  %v811_v47 = vld [vmem:[%s7418_s1 + $0x1848] sm:$0xff]  ;;  %v812_v48 = vld [vmem:[%s7418_s1 + $0x1850] sm:$0xff]  ;;  %v813_v49 = vld [vmem:[%s7418_s1 + $0x1858] sm:$0xff] }
 0x163   :  { %4607 = vmatpush3.bf16.msra.mxu1 %v4606_v54  ;;  %v4626_v54 = vpack.c.bf16 %v747_v46, %v746_v45  ;;  %v810_v46 = vld [vmem:[%s7418_s1 + $0x1840] sm:$0xff]  ;;  %v4688_v62 = vpack.c.bf16 %v813_v49, %v812_v48  ;;  %v815_v53 = vld [vmem:[%s7418_s1 + $0x1868] sm:$0xff]  ;;  %v2860_v36 = vld [vmem:[%s7420_s3 + $0x58] sm:$0xff] }
 0x164   :  { %4641 = vmatprep.subr.bf16.mxu1 %v4640_v58  ;;  %2563 = vmatmul.mubr.f32.vlgmr.msra.gmra.mrb[20].mxu0 %v6901_v9  ;;  %v742_v9 = vld [vmem:[%s7418_s1 + $0x1620] sm:$0xff]  ;;  %v780_v58 = vld [vmem:[%s7418_s1 + $0x1750] sm:$0xff] }
 0x165   :  { %4611 = vmatpush3.bf16.msra.mxu0 %v4610_v0  ;;  %2702 = vmatprep.mubr.f32.mxu0 %v1040_v26  ;;  %v4618_v29 = vpack.c.bf16 %v743_v19, %v742_v9  ;;  %v799_v0 = vld [vmem:[%s7418_s1 + $0x17e8] sm:$0xff]  ;;  %v768_v26 = vld [vmem:[%s7418_s1 + $0x16f0] sm:$0xff]  ;;  %v4634_v19 = vpack.c.bf16 %v751_v5, %v750_v4  ;;  %v814_v50 = vld [vmem:[%s7418_s1 + $0x1860] sm:$0xff] }
 0x166   :  { %2633 = vmatmul.mubr.f32.vlgmr.msra.gmra.mrb[20].mxu1 %v6910_v13  ;;  %4613 = vmatprep.subr.bf16.mxu0 %v4612_v2  ;;  %v775_v13 = vld [vmem:[%s7418_s1 + $0x1728] sm:$0xff]  ;;  %v4662_v2 = vpack.c.bf16 %v781_v59, %v780_v58  ;;  %v4664_v8 = vpack.c.bf16 %v799_v0, %v798_v32  ;;  %v4691_v58 = vpack.c.bf16 %v815_v53, %v814_v50  ;;  %v816_v59 = vld [vmem:[%s7418_s1 + $0x1870] sm:$0xff] }
 0x167   :  { %4643 = vmatpush3.bf16.msra.mxu1 %v4642_v1  ;;  %2772 = vmatprep.mubr.f32.mxu1 %v1041_v15  ;;  %v4650_v31 = vpack.c.bf16 %v775_v13, %v774_v20  ;;  %v4630_v1 = vpack.c.bf16 %v749_v41, %v748_v57  ;;  %v4636_v13 = vpack.c.bf16 %v769_v12, %v768_v26 }
 0x168   :  { %4645 = vmatprep.subr.bf16.mxu1 %v4644_v10  ;;  %v782_v10 = vld [vmem:[%s7418_s1 + $0x1760] sm:$0xff]  ;;  %v4694_v0 = vpack.c.bf16 %v817_v60, %v816_v59 }
 0x169   :  { %4615 = vmatpush3.bf16.msra.mxu0 %v4614_v16  ;;  %v800_v16 = vld [vmem:[%s7418_s1 + $0x17f0] sm:$0xff] }
 0x16a   :  { %4617 = vmatprep.subr.bf16.mxu0 %v4616_v18 }
 0x16b   :  { %4647 = vmatpush3.bf16.msra.mxu1 %v4646_v17  ;;  %v801_v17 = vld [vmem:[%s7418_s1 + $0x17f8] sm:$0xff] }
 0x16c   :  { %4649 = vmatprep.subr.bf16.mxu1 %v4648_v21  ;;  %v4666_v21 = vpack.c.bf16 %v783_v7, %v782_v10  ;;  %v4668_v28 = vpack.c.bf16 %v801_v17, %v800_v16 }
 0x16d   :  { %4619 = vmatpush3.bf16.msra.mxu0 %v4618_v29  ;;  %v784_v29 = vld [vmem:[%s7418_s1 + $0x1770] sm:$0xff] }
 0x16e   :  { %4621 = vmatprep.subr.bf16.mxu0 %v4620_v30 }
 0x16f   :  { %4651 = vmatpush3.bf16.msra.mxu1 %v4650_v31  ;;  %v785_v31 = vld [vmem:[%s7418_s1 + $0x1778] sm:$0xff] }
 0x170   :  { %4653 = vmatprep.subr.bf16.mxu1 %v4652_v34  ;;  %v4670_v43 = vpack.c.bf16 %v785_v31, %v784_v29  ;;  %v2855_v31 = vld [vmem:[%s7420_s3 + $0x30] sm:$0xff] }
 0x171   :  { %4623 = vmatpush3.bf16.msra.mxu0 %v4622_v40  ;;  %v807_v40 = vld [vmem:[%s7418_s1 + $0x1828] sm:$0xff] }
 0x172   :  { %4625 = vmatprep.subr.bf16.mxu0 %v4624_v44  ;;  %v809_v44 = vld [vmem:[%s7418_s1 + $0x1838] sm:$0xff] }
 0x173   :  { %4655 = vmatpush3.bf16.msra.mxu1 %v4654_v42  ;;  %v4764_v42 = vmov 0.0  }
 0x174   :  { %4657 = vmatprep.subr.bf16.mxu1 %v4656_v52  ;;  %v4685_v52 = vpack.c.bf16 %v811_v47, %v810_v46 }
 0x175   :  { %4627 = vmatpush3.bf16.msra.mxu0 %v4626_v54 }
 0x176   :  { %4629 = vmatprep.subr.bf16.mxu0 %v4628_v56 }
 0x177   :  { %4659 = vmatpush3.bf16.msra.mxu1 %v4658_v55  ;;  %v3272_v6 = vpop.f32.mrb[8].mxu0 }
 0x178   :  { %4661 = vmatprep.subr.bf16.mxu1 %v4660_v51  ;;  %v3273_v14 = vpop.f32.mrb[9].mxu0 }
 0x179   :  { %v3307_v15 = vpop.f32.mrb[8].mxu1  ;;  %v3274_v18 = vadd.f32 %v3273_v14, %v3272_v6  ;;  %4631 = vmatpush3.bf16.msra.mxu0 %v4630_v1  ;;  %v2958_v1 = vld.sshfl [vmem:[%s7417_s0 + $0x60] sm:$0x3 pattern:$0x76325410] }
 0x17a   :  { %v3308_v9 = vpop.f32.mrb[9].mxu1  ;;  %4633 = vmatprep.subr.bf16.mxu0 %v4632_v3 }
 0x17b   :  { %v3309_v20 = vadd.f32 %v3308_v9, %v3307_v15  ;;  %4663 = vmatpush3.bf16.msra.mxu1 %v4662_v2  ;;  %v1725_v25 = vadd.f32 %v3274_v18, %v7090_v39  ;;  %v802_v39 = vld [vmem:[%s7418_s1 + $0x1800] sm:$0xff]  ;;  %v2850_v9 = vld [vmem:[%s7420_s3 + $0x8] sm:$0xff] }
 0x17c   :  { %4665 = vmatprep.subr.bf16.mxu1 %v4664_v8  ;;  %v4673_v34 = vpack.c.bf16 %v803_v23, %v802_v39  ;;  %v2849_v18 = vld [vmem:[%s7420_s3] sm:$0xff]  ;;  %v2858_v39 = vld [vmem:[%s7420_s3 + $0x48] sm:$0xff] }
 0x17d   :  { %v1795_v30 = vadd.f32 %v3309_v20, %v1725_v25  ;;  %4635 = vmatpush3.bf16.msra.mxu0 %v4634_v19  ;;  %v4697_v20 = vpack.c.bf16 %v2850_v9, %v2849_v18  ;;  %v2853_v25 = vld [vmem:[%s7420_s3 + $0x20] sm:$0xff] }
 0x17e   :  { %4637 = vmatprep.subr.bf16.mxu0 %v4636_v13  ;;  %v2852_v13 = vld [vmem:[%s7420_s3 + $0x18] sm:$0xff] }
 0x17f   :  { %4667 = vmatpush3.bf16.msra.mxu1 %v4666_v21  ;;  %v2851_v21 = vld [vmem:[%s7420_s3 + $0x10] sm:$0xff] }
 0x180   :  { %4669 = vmatprep.subr.bf16.mxu1 %v4668_v28  ;;  %v4700_v24 = vpack.c.bf16 %v2852_v13, %v2851_v21  ;;  %v2854_v28 = vld [vmem:[%s7420_s3 + $0x28] sm:$0xff] }
 0x181   :  { %4639 = vmatpush3.bf16.msra.mxu0 %v4638_v33  ;;  %v4703_v29 = vpack.c.bf16 %v2854_v28, %v2853_v25 }
 0x182   :  { %4672 = vmatprep.subr.bf16.mxu0 %v4762_v35 }
 0x183   :  { %4671 = vmatpush3.bf16.msra.mxu1 %v4670_v43  ;;  %v2857_v43 = vld [vmem:[%s7420_s3 + $0x40] sm:$0xff] }
 0x184   :  { %4696 = vmatprep.subr.bf16.mxu1 %v4762_v35  ;;  %2703 = vmatmul.mubr.f32.vlgmr.msra.gmra.mrb[22].mxu0 %v7111_v61  ;;  %v4679_v61 = vpack.c.bf16 %v807_v40, %v806_v38  ;;  %v4709_v23 = vpack.c.bf16 %v2858_v39, %v2857_v43  ;;  %v2862_v38 = vld [vmem:[%s7420_s3 + $0x68] sm:$0xff] }
 0x185   :  { %4674 = vmatpush3.bf16.msra.mxu0 %v4673_v34  ;;  %3866 = vmatprep.mubr.msk.f32.mxu0 %vm4763_vm0, %v4764_v42  ;;  %v2859_v34 = vld [vmem:[%s7420_s3 + $0x50] sm:$0xff] }
 0x186   :  { %2773 = vmatmul.mubr.f32.vlgmr.msra.gmra.mrb[22].mxu1 %v7120_v63  ;;  %4675 = vmatprep.subr.bf16.mxu0 %v4762_v35  ;;  %v808_v63 = vld [vmem:[%s7418_s1 + $0x1830] sm:$0xff]  ;;  %v4712_v27 = vpack.c.bf16 %v2860_v36, %v2859_v34 }
 0x187   :  { %3901 = vmatprep.mubr.msk.f32.mxu1 %vm4763_vm0, %v4764_v42  ;;  %v4682_v45 = vpack.c.bf16 %v809_v44, %v808_v63  ;;  %4698 = vmatpush3.bf16.msra.mxu1 %v4697_v20  ;;  %v2863_v42 = vld [vmem:[%s7420_s3 + $0x70] sm:$0xff] }
 0x188   :  { %4699 = vmatprep.subr.bf16.mxu1 %v4762_v35 }
 0x189   :  { %4677 = vmatpush3.bf16.msra.mxu0 %v4676_v37  ;;  %v2861_v37 = vld [vmem:[%s7420_s3 + $0x60] sm:$0xff] }
 0x18a   :  { %4678 = vmatprep.subr.bf16.mxu0 %v4762_v35  ;;  %v4715_v40 = vpack.c.bf16 %v2862_v38, %v2861_v37 }
 0x18b   :  { %4701 = vmatpush3.bf16.msra.mxu1 %v4700_v24 }
 0x18c   :  { %4702 = vmatprep.subr.bf16.mxu1 %v4762_v35 }
 0x18d   :  { %4680 = vmatpush3.bf16.msra.mxu0 %v4679_v61  ;;  %v2864_v61 = vld [vmem:[%s7420_s3 + $0x78] sm:$0xff] }
 0x18e   :  { %4681 = vmatprep.subr.bf16.mxu0 %v4762_v35  ;;  %v4718_v44 = vpack.c.bf16 %v2864_v61, %v2863_v42 }
 0x18f   :  { %4704 = vmatpush3.bf16.msra.mxu1 %v4703_v29 }
 0x190   :  { %4705 = vmatprep.subr.bf16.mxu1 %v4762_v35 }
 0x191   :  { %4683 = vmatpush3.bf16.msra.mxu0 %v4682_v45 }
 0x192   :  { %4684 = vmatprep.subr.bf16.mxu0 %v4762_v35 }
 0x195   :  { %4686 = vmatpush3.bf16.msra.mxu0 %v4685_v52 }
 0x196   :  { %4687 = vmatprep.subr.bf16.mxu0 %v4762_v35 }
 0x197   :  { %v3342_v54 = vpop.f32.mrb[10].mxu0 }
 0x198   :  { %v3343_v55 = vpop.f32.mrb[11].mxu0 }
 0x199   :  { %v3377_v56 = vpop.f32.mrb[10].mxu1  ;;  %v3344_v57 = vadd.f32 %v3343_v55, %v3342_v54  ;;  %4689 = vmatpush3.bf16.msra.mxu0 %v4688_v62 }
 0x19a   :  { %v3378_v41 = vpop.f32.mrb[11].mxu1  ;;  %4690 = vmatprep.subr.bf16.mxu0 %v4762_v35 }
 0x19b   :  { %v3379_v51 = vadd.f32 %v3378_v41, %v3377_v56  ;;  %v1865_v11 = vadd.f32 %v3344_v57, %v1795_v30  ;;  %v2856_v30 = vld [vmem:[%s7420_s3 + $0x38] sm:$0xff] }
 0x19c   :  { %v4706_v33 = vpack.c.bf16 %v2856_v30, %v2855_v31 }
 0x19d   :  { %v1935_v32 = vadd.f32 %v3379_v51, %v1865_v11  ;;  %4692 = vmatpush3.bf16.msra.mxu0 %v4691_v58 }
 0x19e   :  { %4693 = vmatprep.subr.bf16.mxu0 %v4762_v35  ;;  %4707 = vmatpush3.bf16.msra.mxu1 %v4706_v33 }
 0x19f   :  { %4708 = vmatprep.subr.bf16.mxu1 %v4762_v35 }
 0x1a1   :  { %4695 = vmatpush3.bf16.msra.mxu0 %v4694_v0 }
 0x1a2   :  { %4710 = vmatpush3.bf16.msra.mxu1 %v4709_v23 }
 0x1a3   :  { %4711 = vmatprep.subr.bf16.mxu1 %v4762_v35 }
 0x1a4   :  { %3867 = vmatmul.mubr.f32.vlgmr.msra.gmra.mrb[24].mxu0 %v2958_v1 }
 0x1a6   :  { %4713 = vmatpush3.bf16.msra.mxu1 %v4712_v27 }
 0x1a7   :  { %4714 = vmatprep.subr.bf16.mxu1 %v4762_v35 }
 0x1aa   :  { %4716 = vmatpush3.bf16.msra.mxu1 %v4715_v40 }
 0x1ab   :  { %4717 = vmatprep.subr.bf16.mxu1 %v4762_v35 }
 0x1ae   :  { %4719 = vmatpush3.bf16.msra.mxu1 %v4718_v44 }
 0x1b7   :  { %v3412_v2 = vpop.f32.mrb[12].mxu0 }
 0x1b8   :  { %v3413_v3 = vpop.f32.mrb[13].mxu0 }
 0x1b9   :  { %v3447_v4 = vpop.f32.mrb[12].mxu1  ;;  %v3414_v5 = vadd.f32 %v3413_v3, %v3412_v2 }
 0x1ba   :  { %v3448_v10 = vpop.f32.mrb[13].mxu1 }
 0x1bb   :  { %v3449_v6 = vadd.f32 %v3448_v10, %v3447_v4  ;;  %v2005_v8 = vadd.f32 %v3414_v5, %v1935_v32 }
 0x1bd   :  { %v2075_v7 = vadd.f32 %v3449_v6, %v2005_v8 }
 0x1d7   :  { %v3482_v26 = vpop.f32.mrb[14].mxu0 }
 0x1d8   :  { %v3483_v12 = vpop.f32.mrb[15].mxu0 }
 0x1d9   :  { %v3517_v14 = vpop.f32.mrb[14].mxu1  ;;  %v3484_v15 = vadd.f32 %v3483_v12, %v3482_v26 }
 0x1da   :  { %v3518_v16 = vpop.f32.mrb[15].mxu1 }
 0x1db   :  { %v3519_v17 = vadd.f32 %v3518_v16, %v3517_v14  ;;  %v2145_v19 = vadd.f32 %v3484_v15, %v2075_v7  ;;  %v2959_v16 = vld [vmem:[%s7421_s4] ss:$0 sm:$0xff] }
 0x1dd   :  { %v2215_v22 = vadd.f32 %v3519_v17, %v2145_v19 }
 0x1f7   :  { %v3552_v63 = vpop.f32.mrb[16].mxu0 }
 0x1f8   :  { %v3553_v45 = vpop.f32.mrb[17].mxu0 }
 0x1f9   :  { %v3587_v46 = vpop.f32.mrb[16].mxu1  ;;  %v3554_v47 = vadd.f32 %v3553_v45, %v3552_v63 }
 0x1fa   :  { %v3588_v52 = vpop.f32.mrb[17].mxu1 }
 0x1fb   :  { %v3589_v48 = vadd.f32 %v3588_v52, %v3587_v46  ;;  %v2285_v49 = vadd.f32 %v3554_v47, %v2215_v22 }
 0x1fd   :  { %v2355_v62 = vadd.f32 %v3589_v48, %v2285_v49 }
 0x217   :  { %v3622_v50 = vpop.f32.mrb[18].mxu0 }
 0x218   :  { %v3623_v35 = vpop.f32.mrb[19].mxu0 }
 0x219   :  { %v3657_v53 = vpop.f32.mrb[18].mxu1  ;;  %v3624_v54 = vadd.f32 %v3623_v35, %v3622_v50 }
 0x21a   :  { %v3658_v55 = vpop.f32.mrb[19].mxu1 }
 0x21b   :  { %v3659_v56 = vadd.f32 %v3658_v55, %v3657_v53  ;;  %v2425_v57 = vadd.f32 %v3624_v54, %v2355_v62 }
 0x21d   :  { %v2495_v41 = vadd.f32 %v3659_v56, %v2425_v57 }
 0x237   :  { %v3692_v58 = vpop.f32.mrb[20].mxu0 }
 0x238   :  { %v3693_v51 = vpop.f32.mrb[21].mxu0 }
 0x239   :  { %v3727_v59 = vpop.f32.mrb[20].mxu1  ;;  %v3694_v60 = vadd.f32 %v3693_v51, %v3692_v58 }
 0x23a   :  { %v3728_v11 = vpop.f32.mrb[21].mxu1 }
 0x23b   :  { %v3729_v32 = vadd.f32 %v3728_v11, %v3727_v59  ;;  %v2565_v0 = vadd.f32 %v3694_v60, %v2495_v41 }
 0x23d   :  { %v2635_v1 = vadd.f32 %v3729_v32, %v2565_v0 }
 0x257   :  { %v3762_v2 = vpop.f32.mrb[22].mxu0 }
 0x258   :  { %v3763_v3 = vpop.f32.mrb[23].mxu0 }
 0x259   :  { %v3797_v4 = vpop.f32.mrb[22].mxu1  ;;  %v3764_v5 = vadd.f32 %v3763_v3, %v3762_v2 }
 0x25a   :  { %v3798_v10 = vpop.f32.mrb[23].mxu1 }
 0x25b   :  { %v3799_v6 = vadd.f32 %v3798_v10, %v3797_v4  ;;  %v2705_v8 = vadd.f32 %v3764_v5, %v2635_v1 }
 0x25d   :  { %v2775_v7 = vadd.f32 %v3799_v6, %v2705_v8 }
 0x277   :  { %v2844_v26 = vpop.f32.mrb[24].mxu0 }
 0x278   :  { %v2845_v12 = vadd.f32 %v2844_v26, %v2775_v7  ;;  %v3868_v14 = vpop.f32.mrb[25].mxu0 }
 0x27a   :  { %v2848_v15 = vmax.f32 %v2845_v12, 0.0 }
 0x27c   :  { %3902 = vmatmul.mubr.f32.vlgmr.msra.gmra.mrb[24].mxu1 %v2848_v15 }
 0x34f   :  { %v2938_v17 = vpop.f32.mrb[24].mxu1 }
 0x350   :  { %v2939_v18 = vadd.f32 %v2959_v16, %v2938_v17  ;;  %v3903_v9 = vpop.f32.mrb[25].mxu1 }
 0x352   :  { %2942 = vst [vmem:[#allocation2] sm:$0x3] %v2939_v18 }
 0x353   :  { %4748 = shalt.err (!%p4745_p4)
}
 0x354   :  { %s4749_s25 = scalar_lea.hbm %s7422_s5, 32 }
 0x355   :  { %p4750_p5 = scmp.ne.s32.totalorder %s7422_s5, %s4749_s25  ;;  %p4753_p6 = scmp.lt.u32.totalorder %s4749_s25, %s7422_s5 }
 0x357   :  { %p4755_p7 = pnand %p4753_p6, %p4750_p5 }
 0x359   :  { %4758 = shalt.err (!%p4755_p7)
}
 0x35a   :  { %2952 = dma.vmem_to_hbm [thread:$0]  %s2950_s21, 32, %s7422_s5, [#allocation3]  }
 0x35b   :  { %4759 = dma.done.wait [#allocation3], 32  }
 0x35c   :  { %4760 = vsyncadd [#allocation3], 4294967264 }
 0x35d   :  { %2956 = vsyncpa [#allocation3], 1 }

</bundles_post_ra>
